<compile_context>
chip_gen: v5e
topology: v5e:2x2
jax: 0.10.0
libtpu: 0.0.40
codegen_flags: <defaults>
</compile_context>

<pallas_src>
import functools

import jax
import jax.numpy as jnp
from jax.experimental import pallas as pl
from jax.experimental.pallas import tpu as pltpu


_TAPS = tuple((dy, dx) for dy in (-1, 0, 1) for dx in (-1, 0, 1))


def _conv3x3_bn_stats_kernel(src_ref, scale_ref, shift_ref, w_ref,
                             y_ref, stats_ref, col_ref, *, fuse_bn_relu):
    """One grid step = one batch image.

    src_ref   : (1, H, W, Cin)   conv input (raw x, or pre-activation y1)
    scale_ref : (1, 1, Cin)      folded BN scale  (gamma * rsqrt(var + eps))
    shift_ref : (1, 1, Cin)      folded BN shift  (beta - mean * scale)
    w_ref     : (9*Cin, Cout)    3x3 conv weights (HWIO reshaped to matmul form)
    y_ref     : (1, H, W, Cout)  raw conv output (pre-BN)
    stats_ref : (1, 2, Cout)     per-image [sum, sum_sq] over H*W (for BN)
    col_ref   : (H, W, 9*Cin)    VMEM im2col scratch
    """
    _, H, W, Cin = src_ref.shape
    Cout = w_ref.shape[1]

    src = src_ref[0]
    if fuse_bn_relu:  # BN of the previous conv + ReLU, fused into this pass.
        src = jnp.maximum(src * scale_ref[...] + shift_ref[...], 0.0)

    # ---- im2col: 9 static-slice copies (boundary taps stay zero = padding=1)
    col_ref[...] = jnp.zeros_like(col_ref)
    for t, (dy, dx) in enumerate(_TAPS):
        oy0, oy1 = max(0, -dy), min(H, H - dy)
        ox0, ox1 = max(0, -dx), min(W, W - dx)
        col_ref[oy0:oy1, ox0:ox1, t * Cin:(t + 1) * Cin] = (
            src[oy0 + dy:oy1 + dy, ox0 + dx:ox1 + dx, :])

    # ---- single K = 9*Cin matmul on the MXU (f32 accumulate) ----------------
    patch = col_ref[...].reshape(H * W, 9 * Cin)
    y = jnp.dot(patch, w_ref[...], preferred_element_type=jnp.float32)

    y_ref[...] = y.reshape(1, H, W, Cout)

    # ---- per-image partial BN statistics (reduced globally in the wrapper) --
    s = jnp.sum(y, axis=0, keepdims=True)
    ss = jnp.sum(y * y, axis=0, keepdims=True)
    stats_ref[...] = jnp.concatenate([s, ss], axis=0)[None]


def _conv3x3_bn_stats(src, scale, shift, w_hwio, *, fuse_bn_relu):
    """Gridded conv pass: tiles over N, returns (raw conv out, partial stats)."""
    N, H, W, Cin = src.shape
    Cout = w_hwio.shape[-1]
    w_mat = w_hwio.reshape(9 * Cin, Cout)
    kernel = functools.partial(_conv3x3_bn_stats_kernel,
                               fuse_bn_relu=fuse_bn_relu)
    return pl.pallas_call(
        kernel,
        grid=(N,),
        out_shape=(jax.ShapeDtypeStruct((N, H, W, Cout), jnp.float32),
                   jax.ShapeDtypeStruct((N, 2, Cout), jnp.float32)),
        in_specs=[pl.BlockSpec((1, H, W, Cin), lambda n: (n, 0, 0, 0)),
                  pl.BlockSpec((1, 1, Cin), lambda n: (0, 0, 0)),
                  pl.BlockSpec((1, 1, Cin), lambda n: (0, 0, 0)),
                  pl.BlockSpec((9 * Cin, Cout), lambda n: (0, 0))],
        out_specs=(pl.BlockSpec((1, H, W, Cout), lambda n: (n, 0, 0, 0)),
                   pl.BlockSpec((1, 2, Cout), lambda n: (n, 0, 0))),
        scratch_shapes=[pltpu.VMEM((H, W, 9 * Cin), jnp.float32)],
        compiler_params=pltpu.CompilerParams(
            dimension_semantics=("parallel",)),
    )(src, scale, shift, w_mat)


def _bn_skip_relu_kernel(y2_ref, x_ref, scale_ref, shift_ref, out_ref):
    """BN2 (folded scale/shift) + identity skip + ReLU for one batch image."""
    h2 = y2_ref[0] * scale_ref[...] + shift_ref[...]
    # TODO(synk): downsample / strided projection path not implemented
    # (module defaults: stride=1, downsample=None, in_features == out_features).
    out_ref[...] = jnp.maximum(x_ref[0] + h2, 0.0)[None]


def _bn_skip_relu(y2, x, scale, shift):
    N, H, W, C = y2.shape
    return pl.pallas_call(
        _bn_skip_relu_kernel,
        grid=(N,),
        out_shape=jax.ShapeDtypeStruct((N, H, W, C), jnp.float32),
        in_specs=[pl.BlockSpec((1, H, W, C), lambda n: (n, 0, 0, 0)),
                  pl.BlockSpec((1, H, W, C), lambda n: (n, 0, 0, 0)),
                  pl.BlockSpec((1, 1, C), lambda n: (0, 0, 0)),
                  pl.BlockSpec((1, 1, C), lambda n: (0, 0, 0))],
        out_specs=pl.BlockSpec((1, H, W, C), lambda n: (n, 0, 0, 0)),
        compiler_params=pltpu.CompilerParams(
            dimension_semantics=("parallel",)),
    )(y2, x, scale, shift)


def _bn_scale_shift(stats, count, gamma, beta, eps):
    """Fold global batch mean/var + BN affine into per-channel scale/shift.

    `stats` is (N, 2, C) of per-image [sum, sum_sq]; this O(C) reduction is
    done in the wrapper so the kernels' batch axis can stay "parallel".
    """
    total = jnp.sum(stats, axis=0)                  # (2, C)
    mean = total[0] / count
    var = jnp.maximum(total[1] / count - mean * mean, 0.0)   # biased variance
    scale = gamma * jax.lax.rsqrt(var + eps)
    shift = beta - mean * scale
    return scale.reshape(1, 1, -1), shift.reshape(1, 1, -1)


def basic_block(x_nchw, w1, w2, g1, b1, g2, b2, eps=1e-5):
    """BasicBlock forward: NCHW in / NCHW out. Heavy compute in Pallas kernels."""
    N, Cin, H, W = x_nchw.shape
    Cout = w1.shape[-1]
    assert Cin == Cout, "identity skip requires in_features == out_features"
    # TODO(synk): stride != 1 and downsample projection paths not implemented.

    x = jnp.transpose(x_nchw, (0, 2, 3, 1)).astype(jnp.float32)   # NHWC
    count = float(N * H * W)
    ones = jnp.ones((1, 1, Cin), jnp.float32)
    zeros = jnp.zeros((1, 1, Cin), jnp.float32)

    # pass 1: conv1 + per-image partial BN1 stats
    y1, st1 = _conv3x3_bn_stats(x, ones, zeros, w1, fuse_bn_relu=False)
    scale1, shift1 = _bn_scale_shift(st1, count, g1, b1, eps)

    # pass 2: BN1 + ReLU (folded into the pass) -> conv2 + partial BN2 stats
    y2, st2 = _conv3x3_bn_stats(y1, scale1, shift1, w2, fuse_bn_relu=True)
    scale2, shift2 = _bn_scale_shift(st2, count, g2, b2, eps)

    # pass 3: BN2 + identity skip + ReLU
    out = _bn_skip_relu(y2, x, scale2, shift2)
    return jnp.transpose(out, (0, 3, 1, 2))


def basic_block_reference(x_nchw, w1, w2, g1, b1, g2, b2, eps=1e-5):
    """Pure-JAX reference (training-mode BN), for correctness checking."""
    x = jnp.transpose(x_nchw, (0, 2, 3, 1)).astype(jnp.float32)
    dn = jax.lax.conv_dimension_numbers(x.shape, w1.shape, ("NHWC", "HWIO", "NHWC"))

    def conv(inp, w):
        return jax.lax.conv_general_dilated(inp, w, (1, 1), "SAME",
                                            dimension_numbers=dn)

    def bn(h, g, b):
        mean = jnp.mean(h, axis=(0, 1, 2))
        var = jnp.mean((h - mean) ** 2, axis=(0, 1, 2))
        return (h - mean) * jax.lax.rsqrt(var + eps) * g + b

    h = jnp.maximum(bn(conv(x, w1), g1, b1), 0.0)
    h = bn(conv(h, w2), g2, b2)
    out = jnp.maximum(x + h, 0.0)
    return jnp.transpose(out, (0, 3, 1, 2))


if __name__ == "__main__":
    # Small but TPU-friendly config: C=32 channels -> im2col K=288 fills the
    # MXU depth; stride=1, downsample=None (module defaults).
    N, C, H, W = 2, 32, 16, 16
    key = jax.random.PRNGKey(0)
    kx, kw1, kw2, kg1, kb1, kg2, kb2 = jax.random.split(key, 7)

    x = jax.random.normal(kx, (N, C, H, W), dtype=jnp.float32)
    # Conv weights stored HWIO (3, 3, Cin, Cout).
    w1 = jax.random.normal(kw1, (3, 3, C, C), dtype=jnp.float32) * 0.1
    w2 = jax.random.normal(kw2, (3, 3, C, C), dtype=jnp.float32) * 0.1
    g1 = 1.0 + 0.1 * jax.random.normal(kg1, (C,), dtype=jnp.float32)
    b1 = 0.1 * jax.random.normal(kb1, (C,), dtype=jnp.float32)
    g2 = 1.0 + 0.1 * jax.random.normal(kg2, (C,), dtype=jnp.float32)
    b2 = 0.1 * jax.random.normal(kb2, (C,), dtype=jnp.float32)

    fwd = jax.jit(basic_block)
    out = jax.block_until_ready(fwd(x, w1, w2, g1, b1, g2, b2))
    ref = jax.block_until_ready(basic_block_reference(x, w1, w2, g1, b1, g2, b2))

    assert out.shape == (N, C, H, W)
    assert jnp.allclose(out, ref, atol=5e-3, rtol=5e-3), "mismatch vs reference"
    print("KERNEL_OK")
</pallas_src>

<mosaic_0001>
module attributes {stable_mosaic.version = 11 : i64} {
  func.func @_conv3x3_bn_stats_kernel(%arg0: i32, %arg1: memref<1x16x16x32xf32, #tpu.memory_space<vmem>>, %arg2: memref<1x1x32xf32, #tpu.memory_space<vmem>>, %arg3: memref<1x1x32xf32, #tpu.memory_space<vmem>>, %arg4: memref<288x32xf32, #tpu.memory_space<vmem>>, %arg5: memref<1x16x16x32xf32, #tpu.memory_space<vmem>>, %arg6: memref<1x2x32xf32, #tpu.memory_space<vmem>>, %arg7: memref<16x16x288xf32, #tpu.memory_space<vmem>>) attributes {dimension_semantics = [#tpu.dimension_semantics<parallel>], iteration_bounds = array<i64: 2>, scalar_prefetch = 0 : i64, scratch_operands = 1 : i64, tpu.core_type = #tpu.core_type<tc>, window_params = [{transform_indices = @transform_0, window_bounds = array<i64: 1, 16, 16, 32>}, {pipeline_mode = #tpu.pipeline_mode<synchronous>, transform_indices = @transform_1, window_bounds = array<i64: 1, 1, 32>}, {pipeline_mode = #tpu.pipeline_mode<synchronous>, transform_indices = @transform_2, window_bounds = array<i64: 1, 1, 32>}, {pipeline_mode = #tpu.pipeline_mode<synchronous>, transform_indices = @transform_3, window_bounds = array<i64: 288, 32>}, {transform_indices = @transform_4, window_bounds = array<i64: 1, 16, 16, 32>}, {transform_indices = @transform_5, window_bounds = array<i64: 1, 2, 32>}]} {
    %c0 = arith.constant 0 : index
    %c0_0 = arith.constant 0 : index
    %c0_1 = arith.constant 0 : index
    %c0_2 = arith.constant 0 : index
    %0 = vector.load %arg1[%c0, %c0_0, %c0_1, %c0_2] : memref<1x16x16x32xf32, #tpu.memory_space<vmem>>, vector<1x16x16x32xf32>
    %1 = vector.shape_cast %0 : vector<1x16x16x32xf32> to vector<16x16x32xf32>
    %c0_3 = arith.constant 0 : index
    %c0_4 = arith.constant 0 : index
    %c0_5 = arith.constant 0 : index
    %2 = vector.load %arg2[%c0_3, %c0_4, %c0_5] : memref<1x1x32xf32, #tpu.memory_space<vmem>>, vector<1x1x32xf32>
    %3 = vector.broadcast %2 : vector<1x1x32xf32> to vector<16x16x32xf32>
    %4 = arith.mulf %1, %3 : vector<16x16x32xf32>
    %c0_6 = arith.constant 0 : index
    %c0_7 = arith.constant 0 : index
    %c0_8 = arith.constant 0 : index
    %5 = vector.load %arg3[%c0_6, %c0_7, %c0_8] : memref<1x1x32xf32, #tpu.memory_space<vmem>>, vector<1x1x32xf32>
    %6 = vector.broadcast %5 : vector<1x1x32xf32> to vector<16x16x32xf32>
    %7 = arith.addf %4, %6 : vector<16x16x32xf32>
    %cst = arith.constant 0.000000e+00 : f32
    %8 = vector.broadcast %cst : f32 to vector<16x16x32xf32>
    %9 = arith.maximumf %7, %8 : vector<16x16x32xf32>
    %cst_9 = arith.constant 0.000000e+00 : f32
    %10 = vector.broadcast %cst_9 : f32 to vector<16x16x288xf32>
    %c0_10 = arith.constant 0 : index
    %c0_11 = arith.constant 0 : index
    %c0_12 = arith.constant 0 : index
    %11 = vector.load %arg7[%c0_10, %c0_11, %c0_12] : memref<16x16x288xf32, #tpu.memory_space<vmem>>, vector<16x16x288xf32>
    tpu.vector_store %arg7[%c0_10, %c0_11, %c0_12], %10 {strides = array<i32>} : memref<16x16x288xf32, #tpu.memory_space<vmem>>, vector<16x16x288xf32>,
    %12 = vector.extract_strided_slice %9 {offsets = [0, 0, 0], sizes = [15, 15, 32], strides = [1, 1, 1]} : vector<16x16x32xf32> to vector<15x15x32xf32>
    %c1 = arith.constant 1 : index
    %c1_13 = arith.constant 1 : index
    %c0_14 = arith.constant 0 : index
    %13 = vector.load %arg7[%c1, %c1_13, %c0_14] : memref<16x16x288xf32, #tpu.memory_space<vmem>>, vector<15x15x32xf32>
    tpu.vector_store %arg7[%c1, %c1_13, %c0_14], %12 {strides = array<i32>} : memref<16x16x288xf32, #tpu.memory_space<vmem>>, vector<15x15x32xf32>,
    %14 = vector.extract_strided_slice %9 {offsets = [0, 0, 0], sizes = [15, 16, 32], strides = [1, 1, 1]} : vector<16x16x32xf32> to vector<15x16x32xf32>
    %c1_15 = arith.constant 1 : index
    %c0_16 = arith.constant 0 : index
    %c32 = arith.constant 32 : index
    %15 = vector.load %arg7[%c1_15, %c0_16, %c32] : memref<16x16x288xf32, #tpu.memory_space<vmem>>, vector<15x16x32xf32>
    tpu.vector_store %arg7[%c1_15, %c0_16, %c32], %14 {strides = array<i32>} : memref<16x16x288xf32, #tpu.memory_space<vmem>>, vector<15x16x32xf32>,
    %16 = vector.extract_strided_slice %9 {offsets = [0, 1, 0], sizes = [15, 15, 32], strides = [1, 1, 1]} : vector<16x16x32xf32> to vector<15x15x32xf32>
    %c1_17 = arith.constant 1 : index
    %c0_18 = arith.constant 0 : index
    %c64 = arith.constant 64 : index
    %17 = vector.load %arg7[%c1_17, %c0_18, %c64] : memref<16x16x288xf32, #tpu.memory_space<vmem>>, vector<15x15x32xf32>
    tpu.vector_store %arg7[%c1_17, %c0_18, %c64], %16 {strides = array<i32>} : memref<16x16x288xf32, #tpu.memory_space<vmem>>, vector<15x15x32xf32>,
    %18 = vector.extract_strided_slice %9 {offsets = [0, 0, 0], sizes = [16, 15, 32], strides = [1, 1, 1]} : vector<16x16x32xf32> to vector<16x15x32xf32>
    %c0_19 = arith.constant 0 : index
    %c1_20 = arith.constant 1 : index
    %c96 = arith.constant 96 : index
    %19 = vector.load %arg7[%c0_19, %c1_20, %c96] : memref<16x16x288xf32, #tpu.memory_space<vmem>>, vector<16x15x32xf32>
    tpu.vector_store %arg7[%c0_19, %c1_20, %c96], %18 {strides = array<i32>} : memref<16x16x288xf32, #tpu.memory_space<vmem>>, vector<16x15x32xf32>,
    %c0_21 = arith.constant 0 : index
    %c0_22 = arith.constant 0 : index
    %c128 = arith.constant 128 : index
    %20 = vector.load %arg7[%c0_21, %c0_22, %c128] : memref<16x16x288xf32, #tpu.memory_space<vmem>>, vector<16x16x32xf32>
    tpu.vector_store %arg7[%c0_21, %c0_22, %c128], %9 {strides = array<i32>} : memref<16x16x288xf32, #tpu.memory_space<vmem>>, vector<16x16x32xf32>,
    %21 = vector.extract_strided_slice %9 {offsets = [0, 1, 0], sizes = [16, 15, 32], strides = [1, 1, 1]} : vector<16x16x32xf32> to vector<16x15x32xf32>
    %c0_23 = arith.constant 0 : index
    %c0_24 = arith.constant 0 : index
    %c160 = arith.constant 160 : index
    %22 = vector.load %arg7[%c0_23, %c0_24, %c160] : memref<16x16x288xf32, #tpu.memory_space<vmem>>, vector<16x15x32xf32>
    tpu.vector_store %arg7[%c0_23, %c0_24, %c160], %21 {strides = array<i32>} : memref<16x16x288xf32, #tpu.memory_space<vmem>>, vector<16x15x32xf32>,
    %23 = vector.extract_strided_slice %9 {offsets = [1, 0, 0], sizes = [15, 15, 32], strides = [1, 1, 1]} : vector<16x16x32xf32> to vector<15x15x32xf32>
    %c0_25 = arith.constant 0 : index
    %c1_26 = arith.constant 1 : index
    %c192 = arith.constant 192 : index
    %24 = vector.load %arg7[%c0_25, %c1_26, %c192] : memref<16x16x288xf32, #tpu.memory_space<vmem>>, vector<15x15x32xf32>
    tpu.vector_store %arg7[%c0_25, %c1_26, %c192], %23 {strides = array<i32>} : memref<16x16x288xf32, #tpu.memory_space<vmem>>, vector<15x15x32xf32>,
    %25 = vector.extract_strided_slice %9 {offsets = [1, 0, 0], sizes = [15, 16, 32], strides = [1, 1, 1]} : vector<16x16x32xf32> to vector<15x16x32xf32>
    %c0_27 = arith.constant 0 : index
    %c0_28 = arith.constant 0 : index
    %c224 = arith.constant 224 : index
    %26 = vector.load %arg7[%c0_27, %c0_28, %c224] : memref<16x16x288xf32, #tpu.memory_space<vmem>>, vector<15x16x32xf32>
    tpu.vector_store %arg7[%c0_27, %c0_28, %c224], %25 {strides = array<i32>} : memref<16x16x288xf32, #tpu.memory_space<vmem>>, vector<15x16x32xf32>,
    %27 = vector.extract_strided_slice %9 {offsets = [1, 1, 0], sizes = [15, 15, 32], strides = [1, 1, 1]} : vector<16x16x32xf32> to vector<15x15x32xf32>
    %c0_29 = arith.constant 0 : index
    %c0_30 = arith.constant 0 : index
    %c256 = arith.constant 256 : index
    %28 = vector.load %arg7[%c0_29, %c0_30, %c256] : memref<16x16x288xf32, #tpu.memory_space<vmem>>, vector<15x15x32xf32>
    tpu.vector_store %arg7[%c0_29, %c0_30, %c256], %27 {strides = array<i32>} : memref<16x16x288xf32, #tpu.memory_space<vmem>>, vector<15x15x32xf32>,
    %c0_31 = arith.constant 0 : index
    %c0_32 = arith.constant 0 : index
    %c0_33 = arith.constant 0 : index
    %29 = vector.load %arg7[%c0_31, %c0_32, %c0_33] : memref<16x16x288xf32, #tpu.memory_space<vmem>>, vector<16x16x288xf32>
    %30 = vector.shape_cast %29 : vector<16x16x288xf32> to vector<256x288xf32>
    %c0_34 = arith.constant 0 : index
    %c0_35 = arith.constant 0 : index
    %31 = vector.load %arg4[%c0_34, %c0_35] : memref<288x32xf32, #tpu.memory_space<vmem>>, vector<288x32xf32>
    %cst_36 = arith.constant dense<0.000000e+00> : vector<256x32xf32>
    %32 = tpu.matmul %30, %31, %cst_36 {dimension_numbers = #tpu.dot_dimension_numbers<[1], [0], [0], [1], [0, 0, 1, 1], [], []>} : vector<256x288xf32>, vector<288x32xf32>, vector<256x32xf32> -> vector<256x32xf32>
    %33 = vector.shape_cast %32 : vector<256x32xf32> to vector<1x16x16x32xf32>
    %c0_37 = arith.constant 0 : index
    %c0_38 = arith.constant 0 : index
    %c0_39 = arith.constant 0 : index
    %c0_40 = arith.constant 0 : index
    %34 = vector.load %arg5[%c0_37, %c0_38, %c0_39, %c0_40] : memref<1x16x16x32xf32, #tpu.memory_space<vmem>>, vector<1x16x16x32xf32>
    tpu.vector_store %arg5[%c0_37, %c0_38, %c0_39, %c0_40], %33 {strides = array<i32>} : memref<1x16x16x32xf32, #tpu.memory_space<vmem>>, vector<1x16x16x32xf32>,
    %cst_41 = arith.constant dense<0.000000e+00> : vector<32xf32>
    %35 = vector.multi_reduction <add>, %32, %cst_41 [0] : vector<256x32xf32> to vector<32xf32>
    %36 = vector.shape_cast %35 : vector<32xf32> to vector<1x32xf32>
    %37 = arith.mulf %32, %32 : vector<256x32xf32>
    %cst_42 = arith.constant dense<0.000000e+00> : vector<32xf32>
    %38 = vector.multi_reduction <add>, %37, %cst_42 [0] : vector<256x32xf32> to vector<32xf32>
    %39 = vector.shape_cast %38 : vector<32xf32> to vector<1x32xf32>
    %40 = tpu.concatenate %36, %39 in 0 : vector<1x32xf32>, vector<1x32xf32> -> vector<2x32xf32>
    %41 = vector.shape_cast %40 : vector<2x32xf32> to vector<1x2x32xf32>
    %c0_43 = arith.constant 0 : index
    %c0_44 = arith.constant 0 : index
    %c0_45 = arith.constant 0 : index
    %42 = vector.load %arg6[%c0_43, %c0_44, %c0_45] : memref<1x2x32xf32, #tpu.memory_space<vmem>>, vector<1x2x32xf32>
    tpu.vector_store %arg6[%c0_43, %c0_44, %c0_45], %41 {strides = array<i32>} : memref<1x2x32xf32, #tpu.memory_space<vmem>>, vector<1x2x32xf32>,
    return
  }
  func.func @transform_0(%arg0: i32) -> (i32, i32, i32, i32) {
    %c0_i32 = arith.constant 0 : i32
    %c0_i32_0 = arith.constant 0 : i32
    %c0_i32_1 = arith.constant 0 : i32
    %c0_i32_2 = arith.constant 0 : i32
    return %arg0, %c0_i32, %c0_i32_0, %c0_i32_1 : i32, i32, i32, i32
  }
  func.func @transform_1(%arg0: i32) -> (i32, i32, i32) {
    %c0_i32 = arith.constant 0 : i32
    %c0_i32_0 = arith.constant 0 : i32
    %c0_i32_1 = arith.constant 0 : i32
    %c0_i32_2 = arith.constant 0 : i32
    return %c0_i32, %c0_i32_0, %c0_i32_1 : i32, i32, i32
  }
  func.func @transform_2(%arg0: i32) -> (i32, i32, i32) {
    %c0_i32 = arith.constant 0 : i32
    %c0_i32_0 = arith.constant 0 : i32
    %c0_i32_1 = arith.constant 0 : i32
    %c0_i32_2 = arith.constant 0 : i32
    return %c0_i32, %c0_i32_0, %c0_i32_1 : i32, i32, i32
  }
  func.func @transform_3(%arg0: i32) -> (i32, i32) {
    %c0_i32 = arith.constant 0 : i32
    %c0_i32_0 = arith.constant 0 : i32
    %c0_i32_1 = arith.constant 0 : i32
    return %c0_i32, %c0_i32_0 : i32, i32
  }
  func.func @transform_4(%arg0: i32) -> (i32, i32, i32, i32) {
    %c0_i32 = arith.constant 0 : i32
    %c0_i32_0 = arith.constant 0 : i32
    %c0_i32_1 = arith.constant 0 : i32
    %c0_i32_2 = arith.constant 0 : i32
    return %arg0, %c0_i32, %c0_i32_0, %c0_i32_1 : i32, i32, i32, i32
  }
  func.func @transform_5(%arg0: i32) -> (i32, i32, i32) {
    %c0_i32 = arith.constant 0 : i32
    %c0_i32_0 = arith.constant 0 : i32
    %c0_i32_1 = arith.constant 0 : i32
    return %arg0, %c0_i32, %c0_i32_0 : i32, i32, i32
  }
}

module attributes {stable_mosaic.version = 11 : i64} {
  func.func @_conv3x3_bn_stats_kernel(%arg0: i32, %arg1: memref<1x16x16x32xf32, #tpu.memory_space<vmem>>, %arg2: memref<1x1x32xf32, #tpu.memory_space<vmem>>, %arg3: memref<1x1x32xf32, #tpu.memory_space<vmem>>, %arg4: memref<288x32xf32, #tpu.memory_space<vmem>>, %arg5: memref<1x16x16x32xf32, #tpu.memory_space<vmem>>, %arg6: memref<1x2x32xf32, #tpu.memory_space<vmem>>, %arg7: memref<16x16x288xf32, #tpu.memory_space<vmem>>) attributes {dimension_semantics = [#tpu.dimension_semantics<parallel>], iteration_bounds = array<i64: 2>, scalar_prefetch = 0 : i64, scratch_operands = 1 : i64, tpu.core_type = #tpu.core_type<tc>, window_params = [{transform_indices = @transform_0, window_bounds = array<i64: 1, 16, 16, 32>}, {pipeline_mode = #tpu.pipeline_mode<synchronous>, transform_indices = @transform_1, window_bounds = array<i64: 1, 1, 32>}, {pipeline_mode = #tpu.pipeline_mode<synchronous>, transform_indices = @transform_2, window_bounds = array<i64: 1, 1, 32>}, {pipeline_mode = #tpu.pipeline_mode<synchronous>, transform_indices = @transform_3, window_bounds = array<i64: 288, 32>}, {transform_indices = @transform_4, window_bounds = array<i64: 1, 16, 16, 32>}, {transform_indices = @transform_5, window_bounds = array<i64: 1, 2, 32>}]} {
    %c0 = arith.constant 0 : index
    %c0_0 = arith.constant 0 : index
    %c0_1 = arith.constant 0 : index
    %c0_2 = arith.constant 0 : index
    %0 = vector.load %arg1[%c0, %c0_0, %c0_1, %c0_2] : memref<1x16x16x32xf32, #tpu.memory_space<vmem>>, vector<1x16x16x32xf32>
    %1 = vector.shape_cast %0 : vector<1x16x16x32xf32> to vector<16x16x32xf32>
    %cst = arith.constant 0.000000e+00 : f32
    %2 = vector.broadcast %cst : f32 to vector<16x16x288xf32>
    %c0_3 = arith.constant 0 : index
    %c0_4 = arith.constant 0 : index
    %c0_5 = arith.constant 0 : index
    %3 = vector.load %arg7[%c0_3, %c0_4, %c0_5] : memref<16x16x288xf32, #tpu.memory_space<vmem>>, vector<16x16x288xf32>
    tpu.vector_store %arg7[%c0_3, %c0_4, %c0_5], %2 {strides = array<i32>} : memref<16x16x288xf32, #tpu.memory_space<vmem>>, vector<16x16x288xf32>,
    %4 = vector.extract_strided_slice %1 {offsets = [0, 0, 0], sizes = [15, 15, 32], strides = [1, 1, 1]} : vector<16x16x32xf32> to vector<15x15x32xf32>
    %c1 = arith.constant 1 : index
    %c1_6 = arith.constant 1 : index
    %c0_7 = arith.constant 0 : index
    %5 = vector.load %arg7[%c1, %c1_6, %c0_7] : memref<16x16x288xf32, #tpu.memory_space<vmem>>, vector<15x15x32xf32>
    tpu.vector_store %arg7[%c1, %c1_6, %c0_7], %4 {strides = array<i32>} : memref<16x16x288xf32, #tpu.memory_space<vmem>>, vector<15x15x32xf32>,
    %6 = vector.extract_strided_slice %1 {offsets = [0, 0, 0], sizes = [15, 16, 32], strides = [1, 1, 1]} : vector<16x16x32xf32> to vector<15x16x32xf32>
    %c1_8 = arith.constant 1 : index
    %c0_9 = arith.constant 0 : index
    %c32 = arith.constant 32 : index
    %7 = vector.load %arg7[%c1_8, %c0_9, %c32] : memref<16x16x288xf32, #tpu.memory_space<vmem>>, vector<15x16x32xf32>
    tpu.vector_store %arg7[%c1_8, %c0_9, %c32], %6 {strides = array<i32>} : memref<16x16x288xf32, #tpu.memory_space<vmem>>, vector<15x16x32xf32>,
    %8 = vector.extract_strided_slice %1 {offsets = [0, 1, 0], sizes = [15, 15, 32], strides = [1, 1, 1]} : vector<16x16x32xf32> to vector<15x15x32xf32>
    %c1_10 = arith.constant 1 : index
    %c0_11 = arith.constant 0 : index
    %c64 = arith.constant 64 : index
    %9 = vector.load %arg7[%c1_10, %c0_11, %c64] : memref<16x16x288xf32, #tpu.memory_space<vmem>>, vector<15x15x32xf32>
    tpu.vector_store %arg7[%c1_10, %c0_11, %c64], %8 {strides = array<i32>} : memref<16x16x288xf32, #tpu.memory_space<vmem>>, vector<15x15x32xf32>,
    %10 = vector.extract_strided_slice %1 {offsets = [0, 0, 0], sizes = [16, 15, 32], strides = [1, 1, 1]} : vector<16x16x32xf32> to vector<16x15x32xf32>
    %c0_12 = arith.constant 0 : index
    %c1_13 = arith.constant 1 : index
    %c96 = arith.constant 96 : index
    %11 = vector.load %arg7[%c0_12, %c1_13, %c96] : memref<16x16x288xf32, #tpu.memory_space<vmem>>, vector<16x15x32xf32>
    tpu.vector_store %arg7[%c0_12, %c1_13, %c96], %10 {strides = array<i32>} : memref<16x16x288xf32, #tpu.memory_space<vmem>>, vector<16x15x32xf32>,
    %c0_14 = arith.constant 0 : index
    %c0_15 = arith.constant 0 : index
    %c128 = arith.constant 128 : index
    %12 = vector.load %arg7[%c0_14, %c0_15, %c128] : memref<16x16x288xf32, #tpu.memory_space<vmem>>, vector<16x16x32xf32>
    tpu.vector_store %arg7[%c0_14, %c0_15, %c128], %1 {strides = array<i32>} : memref<16x16x288xf32, #tpu.memory_space<vmem>>, vector<16x16x32xf32>,
    %13 = vector.extract_strided_slice %1 {offsets = [0, 1, 0], sizes = [16, 15, 32], strides = [1, 1, 1]} : vector<16x16x32xf32> to vector<16x15x32xf32>
    %c0_16 = arith.constant 0 : index
    %c0_17 = arith.constant 0 : index
    %c160 = arith.constant 160 : index
    %14 = vector.load %arg7[%c0_16, %c0_17, %c160] : memref<16x16x288xf32, #tpu.memory_space<vmem>>, vector<16x15x32xf32>
    tpu.vector_store %arg7[%c0_16, %c0_17, %c160], %13 {strides = array<i32>} : memref<16x16x288xf32, #tpu.memory_space<vmem>>, vector<16x15x32xf32>,
    %15 = vector.extract_strided_slice %1 {offsets = [1, 0, 0], sizes = [15, 15, 32], strides = [1, 1, 1]} : vector<16x16x32xf32> to vector<15x15x32xf32>
    %c0_18 = arith.constant 0 : index
    %c1_19 = arith.constant 1 : index
    %c192 = arith.constant 192 : index
    %16 = vector.load %arg7[%c0_18, %c1_19, %c192] : memref<16x16x288xf32, #tpu.memory_space<vmem>>, vector<15x15x32xf32>
    tpu.vector_store %arg7[%c0_18, %c1_19, %c192], %15 {strides = array<i32>} : memref<16x16x288xf32, #tpu.memory_space<vmem>>, vector<15x15x32xf32>,
    %17 = vector.extract_strided_slice %1 {offsets = [1, 0, 0], sizes = [15, 16, 32], strides = [1, 1, 1]} : vector<16x16x32xf32> to vector<15x16x32xf32>
    %c0_20 = arith.constant 0 : index
    %c0_21 = arith.constant 0 : index
    %c224 = arith.constant 224 : index
    %18 = vector.load %arg7[%c0_20, %c0_21, %c224] : memref<16x16x288xf32, #tpu.memory_space<vmem>>, vector<15x16x32xf32>
    tpu.vector_store %arg7[%c0_20, %c0_21, %c224], %17 {strides = array<i32>} : memref<16x16x288xf32, #tpu.memory_space<vmem>>, vector<15x16x32xf32>,
    %19 = vector.extract_strided_slice %1 {offsets = [1, 1, 0], sizes = [15, 15, 32], strides = [1, 1, 1]} : vector<16x16x32xf32> to vector<15x15x32xf32>
    %c0_22 = arith.constant 0 : index
    %c0_23 = arith.constant 0 : index
    %c256 = arith.constant 256 : index
    %20 = vector.load %arg7[%c0_22, %c0_23, %c256] : memref<16x16x288xf32, #tpu.memory_space<vmem>>, vector<15x15x32xf32>
    tpu.vector_store %arg7[%c0_22, %c0_23, %c256], %19 {strides = array<i32>} : memref<16x16x288xf32, #tpu.memory_space<vmem>>, vector<15x15x32xf32>,
    %c0_24 = arith.constant 0 : index
    %c0_25 = arith.constant 0 : index
    %c0_26 = arith.constant 0 : index
    %21 = vector.load %arg7[%c0_24, %c0_25, %c0_26] : memref<16x16x288xf32, #tpu.memory_space<vmem>>, vector<16x16x288xf32>
    %22 = vector.shape_cast %21 : vector<16x16x288xf32> to vector<256x288xf32>
    %c0_27 = arith.constant 0 : index
    %c0_28 = arith.constant 0 : index
    %23 = vector.load %arg4[%c0_27, %c0_28] : memref<288x32xf32, #tpu.memory_space<vmem>>, vector<288x32xf32>
    %cst_29 = arith.constant dense<0.000000e+00> : vector<256x32xf32>
    %24 = tpu.matmul %22, %23, %cst_29 {dimension_numbers = #tpu.dot_dimension_numbers<[1], [0], [0], [1], [0, 0, 1, 1], [], []>} : vector<256x288xf32>, vector<288x32xf32>, vector<256x32xf32> -> vector<256x32xf32>
    %25 = vector.shape_cast %24 : vector<256x32xf32> to vector<1x16x16x32xf32>
    %c0_30 = arith.constant 0 : index
    %c0_31 = arith.constant 0 : index
    %c0_32 = arith.constant 0 : index
    %c0_33 = arith.constant 0 : index
    %26 = vector.load %arg5[%c0_30, %c0_31, %c0_32, %c0_33] : memref<1x16x16x32xf32, #tpu.memory_space<vmem>>, vector<1x16x16x32xf32>
    tpu.vector_store %arg5[%c0_30, %c0_31, %c0_32, %c0_33], %25 {strides = array<i32>} : memref<1x16x16x32xf32, #tpu.memory_space<vmem>>, vector<1x16x16x32xf32>,
    %cst_34 = arith.constant dense<0.000000e+00> : vector<32xf32>
    %27 = vector.multi_reduction <add>, %24, %cst_34 [0] : vector<256x32xf32> to vector<32xf32>
    %28 = vector.shape_cast %27 : vector<32xf32> to vector<1x32xf32>
    %29 = arith.mulf %24, %24 : vector<256x32xf32>
    %cst_35 = arith.constant dense<0.000000e+00> : vector<32xf32>
    %30 = vector.multi_reduction <add>, %29, %cst_35 [0] : vector<256x32xf32> to vector<32xf32>
    %31 = vector.shape_cast %30 : vector<32xf32> to vector<1x32xf32>
    %32 = tpu.concatenate %28, %31 in 0 : vector<1x32xf32>, vector<1x32xf32> -> vector<2x32xf32>
    %33 = vector.shape_cast %32 : vector<2x32xf32> to vector<1x2x32xf32>
    %c0_36 = arith.constant 0 : index
    %c0_37 = arith.constant 0 : index
    %c0_38 = arith.constant 0 : index
    %34 = vector.load %arg6[%c0_36, %c0_37, %c0_38] : memref<1x2x32xf32, #tpu.memory_space<vmem>>, vector<1x2x32xf32>
    tpu.vector_store %arg6[%c0_36, %c0_37, %c0_38], %33 {strides = array<i32>} : memref<1x2x32xf32, #tpu.memory_space<vmem>>, vector<1x2x32xf32>,
    return
  }
  func.func @transform_0(%arg0: i32) -> (i32, i32, i32, i32) {
    %c0_i32 = arith.constant 0 : i32
    %c0_i32_0 = arith.constant 0 : i32
    %c0_i32_1 = arith.constant 0 : i32
    %c0_i32_2 = arith.constant 0 : i32
    return %arg0, %c0_i32, %c0_i32_0, %c0_i32_1 : i32, i32, i32, i32
  }
  func.func @transform_1(%arg0: i32) -> (i32, i32, i32) {
    %c0_i32 = arith.constant 0 : i32
    %c0_i32_0 = arith.constant 0 : i32
    %c0_i32_1 = arith.constant 0 : i32
    %c0_i32_2 = arith.constant 0 : i32
    return %c0_i32, %c0_i32_0, %c0_i32_1 : i32, i32, i32
  }
  func.func @transform_2(%arg0: i32) -> (i32, i32, i32) {
    %c0_i32 = arith.constant 0 : i32
    %c0_i32_0 = arith.constant 0 : i32
    %c0_i32_1 = arith.constant 0 : i32
    %c0_i32_2 = arith.constant 0 : i32
    return %c0_i32, %c0_i32_0, %c0_i32_1 : i32, i32, i32
  }
  func.func @transform_3(%arg0: i32) -> (i32, i32) {
    %c0_i32 = arith.constant 0 : i32
    %c0_i32_0 = arith.constant 0 : i32
    %c0_i32_1 = arith.constant 0 : i32
    return %c0_i32, %c0_i32_0 : i32, i32
  }
  func.func @transform_4(%arg0: i32) -> (i32, i32, i32, i32) {
    %c0_i32 = arith.constant 0 : i32
    %c0_i32_0 = arith.constant 0 : i32
    %c0_i32_1 = arith.constant 0 : i32
    %c0_i32_2 = arith.constant 0 : i32
    return %arg0, %c0_i32, %c0_i32_0, %c0_i32_1 : i32, i32, i32, i32
  }
  func.func @transform_5(%arg0: i32) -> (i32, i32, i32) {
    %c0_i32 = arith.constant 0 : i32
    %c0_i32_0 = arith.constant 0 : i32
    %c0_i32_1 = arith.constant 0 : i32
    return %arg0, %c0_i32, %c0_i32_0 : i32, i32, i32
  }
}

module attributes {stable_mosaic.version = 11 : i64} {
  func.func @_bn_skip_relu_kernel(%arg0: i32, %arg1: memref<1x16x16x32xf32, #tpu.memory_space<vmem>>, %arg2: memref<1x16x16x32xf32, #tpu.memory_space<vmem>>, %arg3: memref<1x1x32xf32, #tpu.memory_space<vmem>>, %arg4: memref<1x1x32xf32, #tpu.memory_space<vmem>>, %arg5: memref<1x16x16x32xf32, #tpu.memory_space<vmem>>) attributes {dimension_semantics = [#tpu.dimension_semantics<parallel>], iteration_bounds = array<i64: 2>, scalar_prefetch = 0 : i64, scratch_operands = 0 : i64, tpu.core_type = #tpu.core_type<tc>, window_params = [{transform_indices = @transform_0, window_bounds = array<i64: 1, 16, 16, 32>}, {transform_indices = @transform_1, window_bounds = array<i64: 1, 16, 16, 32>}, {pipeline_mode = #tpu.pipeline_mode<synchronous>, transform_indices = @transform_2, window_bounds = array<i64: 1, 1, 32>}, {pipeline_mode = #tpu.pipeline_mode<synchronous>, transform_indices = @transform_3, window_bounds = array<i64: 1, 1, 32>}, {transform_indices = @transform_4, window_bounds = array<i64: 1, 16, 16, 32>}]} {
    %c0 = arith.constant 0 : index
    %c0_0 = arith.constant 0 : index
    %c0_1 = arith.constant 0 : index
    %c0_2 = arith.constant 0 : index
    %0 = vector.load %arg1[%c0, %c0_0, %c0_1, %c0_2] : memref<1x16x16x32xf32, #tpu.memory_space<vmem>>, vector<1x16x16x32xf32>
    %1 = vector.shape_cast %0 : vector<1x16x16x32xf32> to vector<16x16x32xf32>
    %c0_3 = arith.constant 0 : index
    %c0_4 = arith.constant 0 : index
    %c0_5 = arith.constant 0 : index
    %2 = vector.load %arg3[%c0_3, %c0_4, %c0_5] : memref<1x1x32xf32, #tpu.memory_space<vmem>>, vector<1x1x32xf32>
    %3 = vector.broadcast %2 : vector<1x1x32xf32> to vector<16x16x32xf32>
    %4 = arith.mulf %1, %3 : vector<16x16x32xf32>
    %c0_6 = arith.constant 0 : index
    %c0_7 = arith.constant 0 : index
    %c0_8 = arith.constant 0 : index
    %5 = vector.load %arg4[%c0_6, %c0_7, %c0_8] : memref<1x1x32xf32, #tpu.memory_space<vmem>>, vector<1x1x32xf32>
    %6 = vector.broadcast %5 : vector<1x1x32xf32> to vector<16x16x32xf32>
    %7 = arith.addf %4, %6 : vector<16x16x32xf32>
    %c0_9 = arith.constant 0 : index
    %c0_10 = arith.constant 0 : index
    %c0_11 = arith.constant 0 : index
    %c0_12 = arith.constant 0 : index
    %8 = vector.load %arg2[%c0_9, %c0_10, %c0_11, %c0_12] : memref<1x16x16x32xf32, #tpu.memory_space<vmem>>, vector<1x16x16x32xf32>
    %9 = vector.shape_cast %8 : vector<1x16x16x32xf32> to vector<16x16x32xf32>
    %10 = arith.addf %9, %7 : vector<16x16x32xf32>
    %cst = arith.constant 0.000000e+00 : f32
    %11 = vector.broadcast %cst : f32 to vector<16x16x32xf32>
    %12 = arith.maximumf %10, %11 : vector<16x16x32xf32>
    %13 = vector.shape_cast %12 : vector<16x16x32xf32> to vector<1x16x16x32xf32>
    %c0_13 = arith.constant 0 : index
    %c0_14 = arith.constant 0 : index
    %c0_15 = arith.constant 0 : index
    %c0_16 = arith.constant 0 : index
    %14 = vector.load %arg5[%c0_13, %c0_14, %c0_15, %c0_16] : memref<1x16x16x32xf32, #tpu.memory_space<vmem>>, vector<1x16x16x32xf32>
    tpu.vector_store %arg5[%c0_13, %c0_14, %c0_15, %c0_16], %13 {strides = array<i32>} : memref<1x16x16x32xf32, #tpu.memory_space<vmem>>, vector<1x16x16x32xf32>,
    return
  }
  func.func @transform_0(%arg0: i32) -> (i32, i32, i32, i32) {
    %c0_i32 = arith.constant 0 : i32
    %c0_i32_0 = arith.constant 0 : i32
    %c0_i32_1 = arith.constant 0 : i32
    %c0_i32_2 = arith.constant 0 : i32
    return %arg0, %c0_i32, %c0_i32_0, %c0_i32_1 : i32, i32, i32, i32
  }
  func.func @transform_1(%arg0: i32) -> (i32, i32, i32, i32) {
    %c0_i32 = arith.constant 0 : i32
    %c0_i32_0 = arith.constant 0 : i32
    %c0_i32_1 = arith.constant 0 : i32
    %c0_i32_2 = arith.constant 0 : i32
    return %arg0, %c0_i32, %c0_i32_0, %c0_i32_1 : i32, i32, i32, i32
  }
  func.func @transform_2(%arg0: i32) -> (i32, i32, i32) {
    %c0_i32 = arith.constant 0 : i32
    %c0_i32_0 = arith.constant 0 : i32
    %c0_i32_1 = arith.constant 0 : i32
    %c0_i32_2 = arith.constant 0 : i32
    return %c0_i32, %c0_i32_0, %c0_i32_1 : i32, i32, i32
  }
  func.func @transform_3(%arg0: i32) -> (i32, i32, i32) {
    %c0_i32 = arith.constant 0 : i32
    %c0_i32_0 = arith.constant 0 : i32
    %c0_i32_1 = arith.constant 0 : i32
    %c0_i32_2 = arith.constant 0 : i32
    return %c0_i32, %c0_i32_0, %c0_i32_1 : i32, i32, i32
  }
  func.func @transform_4(%arg0: i32) -> (i32, i32, i32, i32) {
    %c0_i32 = arith.constant 0 : i32
    %c0_i32_0 = arith.constant 0 : i32
    %c0_i32_1 = arith.constant 0 : i32
    %c0_i32_2 = arith.constant 0 : i32
    return %arg0, %c0_i32, %c0_i32_0, %c0_i32_1 : i32, i32, i32, i32
  }
}

</mosaic_0001>

<bundles_post_ra>
// kernel: basic_block.5
= control target key start
LH: loop header
LB: loop body
LE: loop exit
PB: predicated region body
PF: predicated region fallthrough
CT: control target
= control target key end

     0   :  { %9 = vsyncpa [#allocation3], 0  ;;  %s1115_s0 = inlined_call_operand.vmem [shape: f32[2,16,16,32], index: 0, kind: input, shape index: {}]   ;;  %s1116_s1 = inlined_call_operand.hbm [shape: f32[2,16,16,32], index: 1, kind: input, shape index: {}]   ;;  %s1117_s2 = inlined_call_operand.vmem [shape: f32[1,1,32], index: 2, kind: input, shape index: {}]   ;;  %s1118_s3 = inlined_call_operand.vmem [shape: f32[1,1,32], index: 3, kind: input, shape index: {}]   ;;  %s1119_s4 = inlined_call_operand.hbm [shape: f32[2,16,16,32], index: 4, kind: output, shape index: {}]  }
   0x1   :  { %11 = vsyncpa [#allocation3 + $0x1], 0 }
   0x2   :  { %12 = vsyncpa [#allocation4], 0 }
   0x3   :  { %14 = vsyncpa [#allocation4 + $0x1], 0  ;;  %s770_s15 = smov 0   ;;  %s772_s16 = smov 0  }
   0x4   :  { %s774_s17 = smov 0   ;;  %s776_s18 = smov 0  }
   0x5 LB: > { %s791_s19 = sadd.s32 4294967295, %s739_s18   ;;  %s572_s20 = sadd.s32 4294967294, %s739_s18   ;;  %s739_s18 = sphi %s776_s18, %s1129_s18   ;;  %s735_s17 = sphi %s774_s17, %s1128_s17   ;;  %s731_s16 = sphi %s772_s16, %s1127_s16   ;;  %s727_s15 = sphi %s770_s15, %s1126_s15  }
   0x6   : > { %s795_s21 = sadd.s32 1, %s739_s18   ;;  %s53_s22 = sadd.s32 1, %s735_s17 }
   0x7   : > { %s50_s23 = ssub.s32 %s739_s18, %s795_s21  ;;  %p60_p0 = scmp.ne.s32.totalorder %s735_s17, %s731_s16 }
   0x8   : > { %p51_p1 = scmp.eq.s32.totalorder %s50_s23, 0  ;;  %p61_p2 = scmp.eq.s32.totalorder %s739_s18, 0 }
   0x9   : > { %p66_p3 = scmp.ne.s32.totalorder %s731_s16, %s727_s15  ;;  %p67_p4 = scmp.eq.s32.totalorder %s791_s19, 0 }
   0xa   : > { %s807_s24 = scalar_select %p51_p1, %s735_s17, %s53_s22  }
   0xb   : > { %p809_p5 = por %p61_p2, %p60_p0  ;;  %p813_p6 = por %p67_p4, %p66_p3 }
   0xc   : > { %p132_p7 = scmp.eq.s32.totalorder %s791_s19, 1  ;;  %p138_p8 = scmp.eq.s32.totalorder %s572_s20, 1 }
   0xd   : > { %p603_p10 = scmp.lt.s32.totalorder %s739_s18, 2  ;;  %s172_s29 = sand.u32 1, %s735_s17  }
   0xe   : > { %p820_p11 = por %p132_p7, %p60_p0  ;;  %p824_p12 = por %p138_p8, %p66_p3 }
   0xf   : > { %s588_s30 = sshll.u32 %s739_s18, 8  ;;  %s575_s5 = sshll.u32 %s172_s29, 8 }
  0x10   : > { %s181_s8 = scalar_lea.hbm %s1116_s1, %s588_s30  ;;  %s176_s10 = scalar_lea.vmem [#allocation2], %s575_s5 }
  0x11   : > { %s182_s9 = sshll.u32 %s181_s8, 4  ;;  %s184_s11 = sshll.u32 %s176_s10, 4  ;;  %s183_s9 = int_to_ptr.hbm [resolvable:$true] %s182_s9  ;;  %s185_s11 = int_to_ptr.vmem [resolvable:$true] %s184_s11 }
  0x12   : > { %p835_p13 = pnand %p603_p10, %p809_p5  ;;  %p578_p0 = scmp.ge.s32.totalorder %s739_s18, 1 }
  0x13   : > { %p192_p1 = scmp.lt.s32.totalorder %s739_s18, 3  ;;  %s173_s13 = scalar_lea.sflag [#allocation3], %s172_s29 }
  0x14   : > { %s643_s14 = sshra.s32 %s183_s9, 4  ;;  %p647_p3 = pneg %p835_p13  ;;  %s644_s14 = int_to_ptr.hbm [resolvable:$true] %s643_s14 }
  0x15   : > { %s645_s20 = scalar_lea.hbm %s644_s14, 256  ;;  %s650_s25 = scalar_lea.hbm %s1116_s1, 512 }
  0x16   : > { %p646_p2 = scmp.ne.s32.totalorder %s644_s14, %s645_s20  ;;  %p651_p5 = scmp.lt.s32.totalorder %s644_s14, %s1116_s1 }
  0x17   : > { %p652_p8 = scmp.lt.s32.totalorder %s650_s25, %s645_s20 }
  0x18   : > { %p648_p4 = pnand %p647_p3, %p646_p2 }
  0x19   : > { %p653_p10 = por %p652_p8, %p651_p5 }
  0x1a   : > { %p649_p7 = pneg %p648_p4 }
  0x1c   : > { %p654_p9 = pnand %p653_p10, %p649_p7 }
  0x1e   : > { %657 = shalt.err (!%p654_p9)
}
  0x1f   : > { %s741_s29 = smov 128   ;;  %s742_s6 = smov 8  }
  0x20   : > { %598 = dma.hbm_to_vmem [thread:$0]  (!%p835_p13), %s183_s9, 4096, %s185_s11, %s173_s13, %s741_s29, %s741_s29, %s742_s6  }
  0x21   : > { %p193_p2 = pnand %p578_p0, %p192_p1 }
  0x22   : > { %s856_s7 = sand.u32 (!%p193_p2), 1, %s731_s16  }
  0x23   : > { %196 = sbr.rel (%p193_p2) target bundleno = 91 (0x5b), region = 36  ;;  %s579_s8 = sshll.u32 (!%p193_p2), %s856_s7, 8 }
  0x24   : > { %s199_s10 = scalar_lea.sflag (!%p193_p2), [#allocation3], %s856_s7  ;;  %s862_s14 = scalar_lea.vmem (!%p193_p2), [#allocation2], %s579_s8 }
  0x28   : > { %718 = dma.done.wait (%p813_p6), %s199_s10, 4096  }
  0x29   : > { %720 = vsyncadd (%p813_p6), %s199_s10, 4294963200  ;;  %p233_p9 = scmp.lt.s32.totalorder %s791_s19, 1  ;;  %v879_v1 = vld [vmem:[%s1117_s2] ss:$0 sm:$0xff]  ;;  %v343_v8 = vld [vmem:[%s862_s14 + $0x8] sm:$0xff]  ;;  %vm438_vm0 = vcmask 261120  }
  0x2a   : > { %v884_v2 = vld [vmem:[%s1118_s3] ss:$0 sm:$0xff]  ;;  %v344_v12 = vld [vmem:[%s862_s14 + $0x10] sm:$0xff]  ;;  %v345_v18 = vld [vmem:[%s862_s14 + $0x18] sm:$0xff]  ;;  %s922_s30 = scalar_lea.vmem [#allocation5], %s579_s8  ;;  %s590_s5 = sshll.u32 %s791_s19, 8 }
  0x2b   : > { %s234_s9 = scalar_select %p233_p9, %s791_s19, 1  ;;  %v342_v6 = vld [vmem:[%s862_s14] sm:$0xff]  ;;  %v347_v25 = vld [vmem:[%s862_s14 + $0x28] sm:$0xff]  ;;  %v348_v32 = vld [vmem:[%s862_s14 + $0x30] sm:$0xff] }
  0x2c   : > { %v346_v24 = vld [vmem:[%s862_s14 + $0x20] sm:$0xff]  ;;  %v349_v44 = vld [vmem:[%s862_s14 + $0x38] sm:$0xff]  ;;  %v351_v61 = vld [vmem:[%s862_s14 + $0x48] sm:$0xff]  ;;  %s483_s6 = scalar_lea.hbm %s1119_s4, %s590_s5  ;;  %s484_s8 = sshll.u32 %s922_s30, 4  ;;  %s485_s8 = int_to_ptr.vmem [resolvable:$true] %s484_s8 }
  0x2d   : > { %s589_s11 = sshll.u32 %s234_s9, 8  ;;  %v350_v54 = vld [vmem:[%s862_s14 + $0x40] sm:$0xff]  ;;  %v352_v62 = vld [vmem:[%s862_s14 + $0x50] sm:$0xff]  ;;  %s486_s10 = sshll.u32 %s483_s6, 4  ;;  %s487_s10 = int_to_ptr.hbm [resolvable:$true] %s486_s10 }
  0x2e   : > { %s873_s20 = scalar_lea.vmem %s1115_s0, %s589_s11  ;;  %s687_s9 = sshra.s32 %s487_s10, 4  ;;  %s688_s9 = int_to_ptr.hbm [resolvable:$true] %s687_s9 }
  0x2f   : > { %v238_v0 = vld [vmem:[%s873_s20] sm:$0xff]  ;;  %v239_v4 = vld [vmem:[%s873_s20 + $0x8] sm:$0xff]  ;;  %v240_v5 = vld [vmem:[%s873_s20 + $0x10] sm:$0xff]  ;;  %s689_s11 = scalar_lea.hbm %s688_s9, 256  ;;  %p694_p1 = scmp.lt.s32.totalorder %s688_s9, %s1119_s4 }
  0x30   : > { %v274_v3 = vmul.f32 %v879_v1, %v238_v0  ;;  %v275_v7 = vmul.f32 %v879_v1, %v239_v4  ;;  %v276_v9 = vmul.f32 %v879_v1, %v240_v5  ;;  %v241_v10 = vld [vmem:[%s873_s20 + $0x18] sm:$0xff]  ;;  %v242_v14 = vld [vmem:[%s873_s20 + $0x20] sm:$0xff]  ;;  %v243_v15 = vld [vmem:[%s873_s20 + $0x28] sm:$0xff]  ;;  %p690_p6 = scmp.ne.s32.totalorder %s688_s9, %s689_s11 }
  0x31   : > { %v277_v13 = vmul.f32 %v879_v1, %v241_v10  ;;  %v278_v19 = vmul.f32 %v879_v1, %v242_v14  ;;  %v279_v20 = vmul.f32 %v879_v1, %v243_v15  ;;  %v244_v21 = vld [vmem:[%s873_s20 + $0x30] sm:$0xff]  ;;  %v245_v27 = vld [vmem:[%s873_s20 + $0x38] sm:$0xff]  ;;  %v246_v33 = vld [vmem:[%s873_s20 + $0x40] sm:$0xff] }
  0x32   : > { %v310_v11 = vadd.f32 %v884_v2, %v274_v3  ;;  %v311_v16 = vadd.f32 %v884_v2, %v275_v7  ;;  %v312_v17 = vadd.f32 %v884_v2, %v276_v9  ;;  %v280_v26 = vmul.f32 %v879_v1, %v244_v21  ;;  %v247_v38 = vld [vmem:[%s873_s20 + $0x48] sm:$0xff]  ;;  %v248_v39 = vld [vmem:[%s873_s20 + $0x50] sm:$0xff]  ;;  %v249_v45 = vld [vmem:[%s873_s20 + $0x58] sm:$0xff]  ;;  %p691_p13 = pnand %p690_p6, %p820_p11 }
  0x33   : > { %v313_v23 = vadd.f32 %v884_v2, %v277_v13  ;;  %v314_v30 = vadd.f32 %v884_v2, %v278_v19  ;;  %v315_v31 = vadd.f32 %v884_v2, %v279_v20  ;;  %v281_v37 = vmul.f32 %v879_v1, %v245_v27  ;;  %v250_v50 = vld [vmem:[%s873_s20 + $0x60] sm:$0xff]  ;;  %v251_v51 = vld [vmem:[%s873_s20 + $0x68] sm:$0xff]  ;;  %v252_v57 = vld [vmem:[%s873_s20 + $0x70] sm:$0xff] }
  0x34   : > { %v374_v22 = vadd.f32 %v342_v6, %v310_v11  ;;  %v375_v28 = vadd.f32 %v343_v8, %v311_v16  ;;  %v376_v29 = vadd.f32 %v344_v12, %v312_v17  ;;  %v316_v36 = vadd.f32 %v884_v2, %v280_v26  ;;  %v353_v4 = vld [vmem:[%s862_s14 + $0x58] sm:$0xff]  ;;  %v354_v11 = vld [vmem:[%s862_s14 + $0x60] sm:$0xff]  ;;  %v355_v12 = vld [vmem:[%s862_s14 + $0x68] sm:$0xff]  ;;  %p692_p0 = pneg %p691_p13 }
  0x35   : > { %v377_v35 = vadd.f32 %v345_v18, %v313_v23  ;;  %v378_v42 = vadd.f32 %v346_v24, %v314_v30  ;;  %v379_v43 = vadd.f32 %v347_v25, %v315_v31  ;;  %v317_v48 = vadd.f32 %v884_v2, %v281_v37  ;;  %v253_v7 = vld [vmem:[%s873_s20 + $0x78] sm:$0xff]  ;;  %v356_v18 = vld [vmem:[%s862_s14 + $0x70] sm:$0xff]  ;;  %v254_v19 = vld [vmem:[%s873_s20 + $0x80] sm:$0xff] }
  0x36   : > { %v406_v34 = vmax.f32 %v374_v22, 0.0  ;;  %v407_v40 = vmax.f32 %v375_v28, 0.0  ;;  %v408_v41 = vmax.f32 %v376_v29, 0.0  ;;  %v380_v47 = vadd.f32 %v348_v32, %v316_v36  ;;  %v255_v24 = vld [vmem:[%s873_s20 + $0x88] sm:$0xff]  ;;  %v256_v25 = vld [vmem:[%s873_s20 + $0x90] sm:$0xff]  ;;  %v357_v30 = vld [vmem:[%s862_s14 + $0x78] sm:$0xff] }
  0x37   : > { %v409_v46 = vmax.f32 %v377_v35, 0.0  ;;  %v282_v49 = vmul.f32 %v879_v1, %v246_v33  ;;  %v410_v52 = vmax.f32 %v378_v42, 0.0  ;;  %v411_v53 = vmax.f32 %v379_v43, 0.0  ;;  %v257_v31 = vld [vmem:[%s873_s20 + $0x98] sm:$0xff]  ;;  %v258_v36 = vld [vmem:[%s873_s20 + $0xa0] sm:$0xff]  ;;  %v259_v37 = vld [vmem:[%s873_s20 + $0xa8] sm:$0xff] }
  0x38   : > { %439 = vst.msk [vmem:[%s922_s30] sm:$0xff] %vm438_vm0, %v406_v34  ;;  %v283_v55 = vmul.f32 %v879_v1, %v247_v38  ;;  %v284_v56 = vmul.f32 %v879_v1, %v248_v39  ;;  %v412_v58 = vmax.f32 %v380_v47, 0.0  ;;  %v381_v59 = vadd.f32 %v349_v44, %v317_v48  ;;  %v260_v43 = vld [vmem:[%s873_s20 + $0xb0] sm:$0xff]  ;;  %v359_v47 = vld [vmem:[%s862_s14 + $0x88] sm:$0xff] }
  0x39   : > { %440 = vst.msk [vmem:[%s922_s30 + $0x8] sm:$0xff] %vm438_vm0, %v407_v40  ;;  %v318_v60 = vadd.f32 %v884_v2, %v282_v49  ;;  %v285_v63 = vmul.f32 %v879_v1, %v249_v45  ;;  %v286_v5 = vmul.f32 %v879_v1, %v250_v50  ;;  %v287_v6 = vmul.f32 %v879_v1, %v251_v51  ;;  %v358_v40 = vld [vmem:[%s862_s14 + $0x80] sm:$0xff]  ;;  %v360_v48 = vld [vmem:[%s862_s14 + $0x90] sm:$0xff] }
  0x3a   : > { %441 = vst.msk [vmem:[%s922_s30 + $0x10] sm:$0xff] %vm438_vm0, %v408_v41  ;;  %v319_v0 = vadd.f32 %v884_v2, %v283_v55  ;;  %v320_v3 = vadd.f32 %v884_v2, %v284_v56  ;;  %v413_v8 = vmax.f32 %v381_v59, 0.0  ;;  %v288_v13 = vmul.f32 %v879_v1, %v252_v57  ;;  %v261_v55 = vld [vmem:[%s873_s20 + $0xb8] sm:$0xff]  ;;  %v362_v59 = vld [vmem:[%s862_s14 + $0xa0] sm:$0xff] }
  0x3b   : > { %442 = vst.msk [vmem:[%s922_s30 + $0x18] sm:$0xff] %vm438_vm0, %v409_v46  ;;  %v382_v9 = vadd.f32 %v350_v54, %v318_v60  ;;  %v321_v10 = vadd.f32 %v884_v2, %v285_v63  ;;  %v322_v16 = vadd.f32 %v884_v2, %v286_v5  ;;  %v323_v17 = vadd.f32 %v884_v2, %v287_v6  ;;  %v363_v60 = vld [vmem:[%s862_s14 + $0xa8] sm:$0xff]  ;;  %v262_v5 = vld [vmem:[%s873_s20 + $0xc0] sm:$0xff] }
  0x3c   : > { %443 = vst.msk [vmem:[%s922_s30 + $0x20] sm:$0xff] %vm438_vm0, %v410_v52  ;;  %v383_v14 = vadd.f32 %v351_v61, %v319_v0  ;;  %v384_v15 = vadd.f32 %v352_v62, %v320_v3  ;;  %v324_v22 = vadd.f32 %v884_v2, %v288_v13  ;;  %v289_v23 = vmul.f32 %v879_v1, %v253_v7  ;;  %v361_v52 = vld [vmem:[%s862_s14 + $0x98] sm:$0xff] }
  0x3d   : > { %444 = vst.msk [vmem:[%s922_s30 + $0x28] sm:$0xff] %vm438_vm0, %v411_v53  ;;  %v414_v20 = vmax.f32 %v382_v9, 0.0  ;;  %v385_v21 = vadd.f32 %v353_v4, %v321_v10  ;;  %v386_v28 = vadd.f32 %v354_v11, %v322_v16  ;;  %v387_v29 = vadd.f32 %v355_v12, %v323_v17  ;;  %v364_v4 = vld [vmem:[%s862_s14 + $0xb0] sm:$0xff]  ;;  %v263_v10 = vld [vmem:[%s873_s20 + $0xc8] sm:$0xff]  ;;  %v365_v16 = vld [vmem:[%s862_s14 + $0xb8] sm:$0xff] }
  0x3e   : > { %445 = vst.msk [vmem:[%s922_s30 + $0x30] sm:$0xff] %vm438_vm0, %v412_v58  ;;  %v415_v26 = vmax.f32 %v383_v14, 0.0  ;;  %v416_v27 = vmax.f32 %v384_v15, 0.0  ;;  %v388_v33 = vadd.f32 %v356_v18, %v324_v22  ;;  %v325_v34 = vadd.f32 %v884_v2, %v289_v23  ;;  %v264_v11 = vld [vmem:[%s873_s20 + $0xd0] sm:$0xff]  ;;  %v265_v17 = vld [vmem:[%s873_s20 + $0xd8] sm:$0xff]  ;;  %v266_v22 = vld [vmem:[%s873_s20 + $0xe0] sm:$0xff] }
  0x3f   : > { %446 = vst.msk [vmem:[%s922_s30 + $0x38] sm:$0xff] %vm438_vm0, %v413_v8  ;;  %v417_v32 = vmax.f32 %v385_v21, 0.0  ;;  %v290_v35 = vmul.f32 %v879_v1, %v254_v19  ;;  %v418_v38 = vmax.f32 %v386_v28, 0.0  ;;  %v419_v39 = vmax.f32 %v387_v29, 0.0  ;;  %v267_v23 = vld [vmem:[%s873_s20 + $0xe8] sm:$0xff]  ;;  %v268_v29 = vld [vmem:[%s873_s20 + $0xf0] sm:$0xff] }
  0x40   : > { %447 = vst.msk [vmem:[%s922_s30 + $0x40] sm:$0xff] %vm438_vm0, %v414_v20  ;;  %v291_v41 = vmul.f32 %v879_v1, %v255_v24  ;;  %v292_v42 = vmul.f32 %v879_v1, %v256_v25  ;;  %v420_v44 = vmax.f32 %v388_v33, 0.0  ;;  %v389_v45 = vadd.f32 %v357_v30, %v325_v34  ;;  %v367_v33 = vld [vmem:[%s862_s14 + $0xc8] sm:$0xff]  ;;  %v368_v34 = vld [vmem:[%s862_s14 + $0xd0] sm:$0xff] }
  0x41   : > { %448 = vst.msk [vmem:[%s922_s30 + $0x48] sm:$0xff] %vm438_vm0, %v415_v26  ;;  %v326_v46 = vadd.f32 %v884_v2, %v290_v35  ;;  %v293_v49 = vmul.f32 %v879_v1, %v257_v31  ;;  %v294_v53 = vmul.f32 %v879_v1, %v258_v36  ;;  %v295_v54 = vmul.f32 %v879_v1, %v259_v37  ;;  %v366_v26 = vld [vmem:[%s862_s14 + $0xc0] sm:$0xff] }
  0x42   : > { %449 = vst.msk [vmem:[%s922_s30 + $0x50] sm:$0xff] %vm438_vm0, %v416_v27  ;;  %v327_v50 = vadd.f32 %v884_v2, %v291_v41  ;;  %v328_v51 = vadd.f32 %v884_v2, %v292_v42  ;;  %v421_v56 = vmax.f32 %v389_v45, 0.0  ;;  %v296_v61 = vmul.f32 %v879_v1, %v260_v43  ;;  %v269_v41 = vld [vmem:[%s873_s20 + $0xf8] sm:$0xff]  ;;  %v370_v45 = vld [vmem:[%s862_s14 + $0xe0] sm:$0xff]  ;;  %s693_s20 = scalar_lea.hbm %s1119_s4, 512 }
  0x43   : > { %450 = vst.msk [vmem:[%s922_s30 + $0x58] sm:$0xff] %vm438_vm0, %v417_v32  ;;  %v390_v57 = vadd.f32 %v358_v40, %v326_v46  ;;  %v329_v58 = vadd.f32 %v884_v2, %v293_v49  ;;  %v330_v0 = vadd.f32 %v884_v2, %v294_v53  ;;  %v331_v3 = vadd.f32 %v884_v2, %v295_v54  ;;  %v371_v46 = vld [vmem:[%s862_s14 + $0xe8] sm:$0xff]  ;;  %p695_p3 = scmp.lt.s32.totalorder %s693_s20, %s689_s11 }
  0x44   : > { %451 = vst.msk [vmem:[%s922_s30 + $0x60] sm:$0xff] %vm438_vm0, %v418_v38  ;;  %v391_v62 = vadd.f32 %v359_v47, %v327_v50  ;;  %v392_v63 = vadd.f32 %v360_v48, %v328_v51  ;;  %v332_v8 = vadd.f32 %v884_v2, %v296_v61  ;;  %v297_v9 = vmul.f32 %v879_v1, %v261_v55  ;;  %v369_v38 = vld [vmem:[%s862_s14 + $0xd8] sm:$0xff] }
  0x45   : > { %452 = vst.msk [vmem:[%s922_s30 + $0x68] sm:$0xff] %vm438_vm0, %v419_v39  ;;  %v422_v6 = vmax.f32 %v390_v57, 0.0  ;;  %v393_v7 = vadd.f32 %v361_v52, %v329_v58  ;;  %v394_v14 = vadd.f32 %v362_v59, %v330_v0  ;;  %v395_v15 = vadd.f32 %v363_v60, %v331_v3  ;;  %v372_v52 = vld [vmem:[%s862_s14 + $0xf0] sm:$0xff]  ;;  %v373_v61 = vld [vmem:[%s862_s14 + $0xf8] sm:$0xff]  ;;  %s472_s14 = scalar_lea.sflag [#allocation4], %s856_s7  ;;  %p696_p4 = por %p695_p3, %p694_p1 }
  0x46   : > { %453 = vst.msk [vmem:[%s922_s30 + $0x70] sm:$0xff] %vm438_vm0, %v420_v44  ;;  %v423_v12 = vmax.f32 %v391_v62, 0.0  ;;  %v424_v13 = vmax.f32 %v392_v63, 0.0  ;;  %v396_v19 = vadd.f32 %v364_v4, %v332_v8  ;;  %v333_v20 = vadd.f32 %v884_v2, %v297_v9 }
  0x47   : > { %454 = vst.msk [vmem:[%s922_s30 + $0x78] sm:$0xff] %vm438_vm0, %v421_v56  ;;  %v425_v18 = vmax.f32 %v393_v7, 0.0  ;;  %v298_v21 = vmul.f32 %v879_v1, %v262_v5  ;;  %v426_v24 = vmax.f32 %v394_v14, 0.0  ;;  %v427_v25 = vmax.f32 %v395_v15, 0.0  ;;  %p697_p7 = pnand %p696_p4, %p692_p0 }
  0x48   : > { %455 = vst.msk [vmem:[%s922_s30 + $0x80] sm:$0xff] %vm438_vm0, %v422_v6  ;;  %v299_v27 = vmul.f32 %v879_v1, %v263_v10  ;;  %v300_v28 = vmul.f32 %v879_v1, %v264_v11  ;;  %v428_v30 = vmax.f32 %v396_v19, 0.0  ;;  %v397_v31 = vadd.f32 %v365_v16, %v333_v20 }
  0x49   : > { %456 = vst.msk [vmem:[%s922_s30 + $0x88] sm:$0xff] %vm438_vm0, %v423_v12  ;;  %v334_v32 = vadd.f32 %v884_v2, %v298_v21  ;;  %v301_v35 = vmul.f32 %v879_v1, %v265_v17  ;;  %v302_v39 = vmul.f32 %v879_v1, %v266_v22  ;;  %v303_v40 = vmul.f32 %v879_v1, %v267_v23 }
  0x4a   : > { %457 = vst.msk [vmem:[%s922_s30 + $0x90] sm:$0xff] %vm438_vm0, %v424_v13  ;;  %v335_v36 = vadd.f32 %v884_v2, %v299_v27  ;;  %v336_v37 = vadd.f32 %v884_v2, %v300_v28  ;;  %v429_v42 = vmax.f32 %v397_v31, 0.0  ;;  %v304_v47 = vmul.f32 %v879_v1, %v268_v29 }
  0x4b   : > { %458 = vst.msk [vmem:[%s922_s30 + $0x98] sm:$0xff] %vm438_vm0, %v425_v18  ;;  %v398_v43 = vadd.f32 %v366_v26, %v334_v32  ;;  %v337_v44 = vadd.f32 %v884_v2, %v301_v35  ;;  %v338_v50 = vadd.f32 %v884_v2, %v302_v39  ;;  %v339_v51 = vadd.f32 %v884_v2, %v303_v40 }
  0x4c   : > { %459 = vst.msk [vmem:[%s922_s30 + $0xa0] sm:$0xff] %vm438_vm0, %v426_v24  ;;  %v399_v48 = vadd.f32 %v367_v33, %v335_v36  ;;  %v400_v49 = vadd.f32 %v368_v34, %v336_v37  ;;  %v340_v55 = vadd.f32 %v884_v2, %v304_v47  ;;  %v305_v56 = vmul.f32 %v879_v1, %v269_v41 }
  0x4d   : > { %460 = vst.msk [vmem:[%s922_s30 + $0xa8] sm:$0xff] %vm438_vm0, %v427_v25  ;;  %v430_v53 = vmax.f32 %v398_v43, 0.0  ;;  %v401_v54 = vadd.f32 %v369_v38, %v337_v44  ;;  %v402_v59 = vadd.f32 %v370_v45, %v338_v50  ;;  %v403_v60 = vadd.f32 %v371_v46, %v339_v51 }
  0x4e   : > { %461 = vst.msk [vmem:[%s922_s30 + $0xb0] sm:$0xff] %vm438_vm0, %v428_v30  ;;  %v431_v57 = vmax.f32 %v399_v48, 0.0  ;;  %v432_v58 = vmax.f32 %v400_v49, 0.0  ;;  %v404_v63 = vadd.f32 %v372_v52, %v340_v55  ;;  %v341_v1 = vadd.f32 %v884_v2, %v305_v56 }
  0x4f   : > { %462 = vst.msk [vmem:[%s922_s30 + $0xb8] sm:$0xff] %vm438_vm0, %v429_v42  ;;  %v433_v62 = vmax.f32 %v401_v54, 0.0  ;;  %v434_v0 = vmax.f32 %v402_v59, 0.0  ;;  %v435_v3 = vmax.f32 %v403_v60, 0.0 }
  0x50   : > { %463 = vst.msk [vmem:[%s922_s30 + $0xc0] sm:$0xff] %vm438_vm0, %v430_v53  ;;  %v436_v4 = vmax.f32 %v404_v63, 0.0  ;;  %v405_v5 = vadd.f32 %v373_v61, %v341_v1 }
  0x51   : > { %464 = vst.msk [vmem:[%s922_s30 + $0xc8] sm:$0xff] %vm438_vm0, %v431_v57 }
  0x52   : > { %465 = vst.msk [vmem:[%s922_s30 + $0xd0] sm:$0xff] %vm438_vm0, %v432_v58  ;;  %v437_v6 = vmax.f32 %v405_v5, 0.0 }
  0x53   : > { %466 = vst.msk [vmem:[%s922_s30 + $0xd8] sm:$0xff] %vm438_vm0, %v433_v62 }
  0x54   : > { %467 = vst.msk [vmem:[%s922_s30 + $0xe0] sm:$0xff] %vm438_vm0, %v434_v0 }
  0x55   : > { %468 = vst.msk [vmem:[%s922_s30 + $0xe8] sm:$0xff] %vm438_vm0, %v435_v3 }
  0x56   : > { %469 = vst.msk [vmem:[%s922_s30 + $0xf0] sm:$0xff] %vm438_vm0, %v436_v4 }
  0x57   : > { %470 = vst.msk [vmem:[%s922_s30 + $0xf8] sm:$0xff] %vm438_vm0, %v437_v6 }
  0x58   : > { %700 = shalt.err (!%p697_p7)
}
  0x59   : > { %s743_s7 = smov 128   ;;  %s744_s23 = smov 8  }
  0x5a   : > { %593 = dma.vmem_to_hbm [thread:$0]  (%p820_p11), %s485_s8, 4096, %s487_s10, %s472_s14, %s743_s7, %s743_s7, %s744_s23  }
  0x5b PF: > { %s501_s25 = sand.u32 1, %s727_s15   ;;  %p1125_p5 = scmp.ge.s32.totalorder %s739_s18, 2 }
  0x5c   : > { %s502_s30 = scalar_lea.sflag [#allocation4], %s501_s25 }
  0x5d   : > { %p600_p8 = pnand %p1125_p5, %p824_p12 }
  0x5f   : > { %p601_p10 = pneg %p600_p8 }
  0x61   : > { %722 = dma.done.wait (%p601_p10), %s502_s30, 4096  }
  0x62   : > { %724 = vsyncadd (%p601_p10), %s502_s30, 4294963200  ;;  %p17_p2 = scmp.ge.s32.totalorder %s795_s21, 4   ;;  %s1126_s15 = smov %s731_s16 }
  0x63   : > { %s1127_s16 = smov %s735_s17  ;;  %s1128_s17 = smov %s807_s24 }
  0x64   : > { %s1129_s18 = smov %s795_s21  ;;  %19 = sbr.rel (!%p17_p2) target bundleno = 5 (0x5), region = 84 }
  0x69   :  { %508 = vsyncpa [#allocation3], 1 }
  0x6a   :  { %510 = vsyncpa [#allocation3 + $0x1], 1 }
  0x6b   :  { %511 = vsyncpa [#allocation4], 1 }
  0x6c   :  { %513 = vsyncpa [#allocation4 + $0x1], 1 }

// kernel: basic_block.4
= control target key start
LH: loop header
LB: loop body
LE: loop exit
PB: predicated region body
PF: predicated region fallthrough
CT: control target
= control target key end

     0   :  { %11 = vsyncpa [#allocation4], 0  ;;  %s2576_s18 = smov 0   ;;  %s4355_s0 = inlined_call_operand.vmem [shape: f32[2,16,16,32], index: 0, kind: input, shape index: {}]   ;;  %s4356_s1 = inlined_call_operand.vmem [shape: f32[1,1,32], index: 1, kind: input, shape index: {}]   ;;  %s4357_s2 = inlined_call_operand.vmem [shape: f32[1,1,32], index: 2, kind: input, shape index: {}]   ;;  %s4358_s3 = inlined_call_operand.hbm [shape: f32[288,32], index: 3, kind: input, shape index: {}]   ;;  %s4359_s4 = inlined_call_operand.vmem [shape: f32[2,16,16,32], index: 4, kind: output, shape index: {0}]   ;;  %s4360_s5 = inlined_call_operand.vmem [shape: f32[2,2,32], index: 5, kind: output, shape index: {1}]  }
   0x1 LB: > { %s180_s21 = sshll.u32 %s4358_s3, 4  ;;  %s2384_s22 = sadd.s32 4294967295, %s2537_s18   ;;  %s2537_s18 = sphi %s2576_s18, %s17_s18   ;;  %s181_s21 = int_to_ptr.hbm [resolvable:$true] %s180_s21 }
   0x2   : > { %p2386_p0 = scmp.ge.s32.totalorder %s2537_s18, 1  ;;  %p163_p1 = scmp.lt.s32.totalorder %s2537_s18, 3 }
   0x3   : > { %p2476_p2 = scmp.eq.s32.totalorder %s2384_s22, 0  ;;  %s2539_s23 = smov [#allocation3]  }
   0x4   : > { %p164_p3 = pnand %p2386_p0, %p163_p1  ;;  %s182_s24 = sshll.u32 %s2539_s23, 4  ;;  %s183_s24 = int_to_ptr.vmem [resolvable:$true] %s182_s24 }
   0x5   : > { %s2540_s25 = smov 128   ;;  %s2541_s26 = smov 8  }
   0x6   : > { %p2472_p4 = pneg %p164_p3  ;;  %206 = sbr.rel (%p164_p3) target bundleno = 835 (0x343), region = 36 }
   0x8   : > { %p2473_p5 = pnand %p2476_p2, %p2472_p4 }
   0xa   : > { %2475 = dma.hbm_to_vmem [thread:$0]  (!%p2473_p5), %s181_s21, 4608, %s183_s24, [#allocation4], %s2540_s25, %s2540_s25, %s2541_s26  }
   0xb   : > { %2532 = dma.done.wait (%p2476_p2), [#allocation4], 4608  }
   0xc   : > { %2534 = vsyncadd (%p2476_p2), [#allocation4], 4294962688  ;;  %p239_p6 = scmp.lt.s32.totalorder %s2384_s22, 1  ;;  %v2601_v1 = vld [vmem:[%s4356_s1] ss:$0 sm:$0xff]  ;;  %s2542_s10 = smov 32  }
   0xd   : > { %v2606_v2 = vld [vmem:[%s4357_s2] ss:$0 sm:$0xff]  ;;  %vm391_vm0 = vcmask 261120   ;;  %vm745_vm1 = vcmask 1046528   ;;  %vm1484_vm2 = vcmask 260096   ;;  %s2544_s11 = smov 64  }
   0xe   : > { %s4483_s22 = smov (!%p239_p6, %s2384_s22), 1  ;;  %vm593_vm3 = vcmask 261121   ;;  %vm714_vm4 = vcmask 523520   ;;  %s2545_s12 = smov 96   ;;  %vm516_vm5 = vcmask 1040384   ;;  %vm881_vm6 = vcmask 785920  }
   0xf   : > { %s2430_s27 = sshll.u32 %s4483_s22, 8  ;;  %vm883_vm7 = vcmask 784896   ;;  %vm1180_vm8 = vcmask 522496   ;;  %vm1014_vm9 = vcmask 1048321   ;;  %vm1302_vm10 = vcmask 785921   ;;  %s2395_s21 = sshll.u32 %s4483_s22, 1 }
  0x10   : > { %s2595_s30 = scalar_lea.vmem %s4355_s0, %s2430_s27  ;;  %vm1016_vm11 = vcmask 1048320   ;;  %s3902_s20 = scalar_lea.vmem %s4359_s4, %s2430_s27  ;;  %vm2284_vm12 = vcmask 254976  }
  0x11   : > { %v257_v0 = vld [vmem:[%s2595_s30 + $0x20] sm:$0xff]  ;;  %v255_v3 = vld [vmem:[%s2595_s30 + $0x10] sm:$0xff]  ;;  %v258_v7 = vld [vmem:[%s2595_s30 + $0x28] sm:$0xff]  ;;  %s252_s25 = scalar_lea.vmem %s4360_s5, %s2395_s21 }
  0x12   : > { %v293_v4 = vmul.f32 %v2601_v1, %v257_v0  ;;  %v291_v5 = vmul.f32 %v2601_v1, %v255_v3  ;;  %v253_v6 = vld [vmem:[%s2595_s30] sm:$0xff]  ;;  %v256_v8 = vld [vmem:[%s2595_s30 + $0x18] sm:$0xff]  ;;  %v254_v10 = vld [vmem:[%s2595_s30 + $0x8] sm:$0xff]  ;;  %v294_v13 = vmul.f32 %v2601_v1, %v258_v7 }
  0x13   : > { %v289_v9 = vmul.f32 %v2601_v1, %v253_v6  ;;  %v292_v14 = vmul.f32 %v2601_v1, %v256_v8  ;;  %v290_v16 = vmul.f32 %v2601_v1, %v254_v10  ;;  %v261_v23 = vld [vmem:[%s2595_s30 + $0x40] sm:$0xff]  ;;  %v260_v24 = vld [vmem:[%s2595_s30 + $0x38] sm:$0xff]  ;;  %v259_v25 = vld [vmem:[%s2595_s30 + $0x30] sm:$0xff] }
  0x14   : > { %v329_v11 = vadd.f32 %v2606_v2, %v293_v4  ;;  %v327_v12 = vadd.f32 %v2606_v2, %v291_v5  ;;  %v330_v20 = vadd.f32 %v2606_v2, %v294_v13  ;;  %v297_v28 = vmul.f32 %v2601_v1, %v261_v23  ;;  %v264_v35 = vld [vmem:[%s2595_s30 + $0x58] sm:$0xff]  ;;  %v263_v36 = vld [vmem:[%s2595_s30 + $0x50] sm:$0xff]  ;;  %v262_v37 = vld [vmem:[%s2595_s30 + $0x48] sm:$0xff] }
  0x15   : > { %v325_v15 = vadd.f32 %v2606_v2, %v289_v9  ;;  %v328_v21 = vadd.f32 %v2606_v2, %v292_v14  ;;  %v326_v22 = vadd.f32 %v2606_v2, %v290_v16  ;;  %v296_v29 = vmul.f32 %v2601_v1, %v260_v24  ;;  %v267_v47 = vld [vmem:[%s2595_s30 + $0x70] sm:$0xff]  ;;  %v266_v48 = vld [vmem:[%s2595_s30 + $0x68] sm:$0xff]  ;;  %v265_v49 = vld [vmem:[%s2595_s30 + $0x60] sm:$0xff] }
  0x16   : > { %v2622_v17 = vmax.f32 %v329_v11, 0.0  ;;  %v2624_v18 = vmax.f32 %v327_v12, 0.0  ;;  %v2640_v26 = vmax.f32 %v330_v20, 0.0  ;;  %v295_v31 = vmul.f32 %v2601_v1, %v259_v25  ;;  %v270_v59 = vld [vmem:[%s2595_s30 + $0x88] sm:$0xff]  ;;  %v269_v60 = vld [vmem:[%s2595_s30 + $0x80] sm:$0xff]  ;;  %v268_v61 = vld [vmem:[%s2595_s30 + $0x78] sm:$0xff] }
  0x17   : > { %v2626_v19 = vmax.f32 %v325_v15, 0.0  ;;  %v2642_v27 = vmax.f32 %v328_v21, 0.0  ;;  %v2646_v30 = vmax.f32 %v326_v22, 0.0  ;;  %v333_v32 = vadd.f32 %v2606_v2, %v297_v28  ;;  %v273_v8 = vld [vmem:[%s2595_s30 + $0xa0] sm:$0xff]  ;;  %v272_v10 = vld [vmem:[%s2595_s30 + $0x98] sm:$0xff]  ;;  %v271_v11 = vld [vmem:[%s2595_s30 + $0x90] sm:$0xff] }
  0x18   : > { %632 = vrot.lane.b32.xlu2 %v2622_v17, %s2542_s10  ;;  %628 = vrot.lane.b32.xlu1 %v2624_v18, %s2542_s10  ;;  %v332_v33 = vadd.f32 %v2606_v2, %v296_v29  ;;  %v331_v34 = vadd.f32 %v2606_v2, %v295_v31  ;;  %v300_v40 = vmul.f32 %v2601_v1, %v264_v35  ;;  %v276_v24 = vld [vmem:[%s2595_s30 + $0xb8] sm:$0xff]  ;;  %v275_v25 = vld [vmem:[%s2595_s30 + $0xb0] sm:$0xff]  ;;  %v749_v28 = vrot.slane %v2624_v18, 1 }
  0x19   : > { %624 = vrot.lane.b32.xlu0 %v2626_v19, %s2542_s10  ;;  %v2661_v38 = vmax.f32 %v333_v32, 0.0  ;;  %v299_v41 = vmul.f32 %v2601_v1, %v263_v36  ;;  %v298_v43 = vmul.f32 %v2601_v1, %v262_v37  ;;  %v303_v52 = vmul.f32 %v2601_v1, %v267_v47  ;;  %v274_v29 = vld [vmem:[%s2595_s30 + $0xa8] sm:$0xff] }
  0x1a   : > { %v2663_v39 = vmax.f32 %v332_v33, 0.0  ;;  %v2667_v42 = vmax.f32 %v331_v34, 0.0  ;;  %v336_v44 = vadd.f32 %v2606_v2, %v300_v40  ;;  %v302_v53 = vmul.f32 %v2601_v1, %v266_v48  ;;  %v278_v47 = vld [vmem:[%s2595_s30 + $0xc8] sm:$0xff]  ;;  %v277_v48 = vld [vmem:[%s2595_s30 + $0xc0] sm:$0xff] }
  0x1b   : > { %v335_v45 = vadd.f32 %v2606_v2, %v299_v41  ;;  %v334_v46 = vadd.f32 %v2606_v2, %v298_v43  ;;  %v301_v55 = vmul.f32 %v2601_v1, %v265_v49  ;;  %v339_v56 = vadd.f32 %v2606_v2, %v303_v52 }
  0x1c   : > { %v2682_v50 = vmax.f32 %v336_v44, 0.0  ;;  %v338_v57 = vadd.f32 %v2606_v2, %v302_v53  ;;  %v306_v0 = vmul.f32 %v2601_v1, %v270_v59  ;;  %v305_v3 = vmul.f32 %v2601_v1, %v269_v60 }
  0x1d   : > { %v2684_v51 = vmax.f32 %v335_v45, 0.0  ;;  %v2688_v54 = vmax.f32 %v334_v46, 0.0  ;;  %v337_v58 = vadd.f32 %v2606_v2, %v301_v55  ;;  %v2703_v62 = vmax.f32 %v339_v56, 0.0  ;;  %v279_v46 = vld [vmem:[%s2595_s30 + $0xd0] sm:$0xff] }
  0x1e   : > { %v2705_v63 = vmax.f32 %v338_v57, 0.0  ;;  %v304_v5 = vmul.f32 %v2601_v1, %v268_v61  ;;  %v342_v6 = vadd.f32 %v2606_v2, %v306_v0  ;;  %v341_v7 = vadd.f32 %v2606_v2, %v305_v3  ;;  %v282_v61 = vld [vmem:[%s2595_s30 + $0xe8] sm:$0xff]  ;;  %v281_v0 = vld [vmem:[%s2595_s30 + $0xe0] sm:$0xff]  ;;  %v280_v3 = vld [vmem:[%s2595_s30 + $0xd8] sm:$0xff] }
  0x1f   : > { %v2709_v4 = vmax.f32 %v337_v58, 0.0  ;;  %v309_v12 = vmul.f32 %v2601_v1, %v273_v8  ;;  %v308_v15 = vmul.f32 %v2601_v1, %v272_v10  ;;  %v307_v16 = vmul.f32 %v2601_v1, %v271_v11 }
  0x20   : > { %634 = vrot.lane.b32.xlu2 %v2640_v26, %s2542_s10  ;;  %630 = vrot.lane.b32.xlu1 %v2642_v27, %s2542_s10  ;;  %4407 = vst [vmem:[#allocation6_spill] sm:$0xff] %v2705_v63  ;;  %v340_v9 = vadd.f32 %v2606_v2, %v304_v5  ;;  %v2725_v13 = vmax.f32 %v342_v6, 0.0  ;;  %v2727_v14 = vmax.f32 %v341_v7, 0.0  ;;  %v2543_v31 = vmov 0.0  }
  0x21   : > { %626 = vrot.lane.b32.xlu0 %v2646_v30, %s2542_s10  ;;  %v345_v21 = vadd.f32 %v2606_v2, %v309_v12  ;;  %v344_v22 = vadd.f32 %v2606_v2, %v308_v15  ;;  %v343_v23 = vadd.f32 %v2606_v2, %v307_v16  ;;  %392 = vst.msk [vmem:[#allocation2 + $0x10] sm:$0xff] %vm391_vm0, %v2543_v31  ;;  %v2749_v32 = vrot.slane %v2642_v27, 1 }
  0x22   : > { %4408 = vst [vmem:[#allocation7_spill] sm:$0xff] %v2725_v13  ;;  %v2731_v20 = vmax.f32 %v340_v9, 0.0  ;;  %v312_v35 = vmul.f32 %v2601_v1, %v276_v24  ;;  %v311_v36 = vmul.f32 %v2601_v1, %v275_v25  ;;  %v310_v41 = vmul.f32 %v2601_v1, %v274_v29 }
  0x23   : > { %4409 = vst [vmem:[#allocation8_spill] sm:$0xff] %v2727_v14  ;;  %v2751_v33 = vmax.f32 %v345_v21, 0.0  ;;  %v2755_v34 = vmax.f32 %v344_v22, 0.0  ;;  %v2761_v37 = vsel %vm745_vm1, %v749_v28, %v2749_v32  ;;  %v2765_v40 = vmax.f32 %v343_v23, 0.0 }
  0x24   : > { %4410 = vst [vmem:[#allocation9_spill] sm:$0xff] %v2731_v20  ;;  %v348_v43 = vadd.f32 %v2606_v2, %v312_v35  ;;  %v347_v44 = vadd.f32 %v2606_v2, %v311_v36  ;;  %v346_v45 = vadd.f32 %v2606_v2, %v310_v41  ;;  %v315_v53 = vmul.f32 %v2601_v1, %v279_v46 }
  0x25   : > { %4411 = vst [vmem:[#allocation10_spill] sm:$0xff] %v2751_v33  ;;  %v314_v55 = vmul.f32 %v2601_v1, %v278_v47  ;;  %v313_v57 = vmul.f32 %v2601_v1, %v277_v48  ;;  %v318_v7 = vmul.f32 %v2601_v1, %v282_v61  ;;  %v317_v8 = vmul.f32 %v2601_v1, %v281_v0 }
  0x26   : > { %395 = vst.msk [vmem:[#allocation2 + $0x28] sm:$0xff] %vm391_vm0, %v2543_v31  ;;  %v2788_v49 = vmax.f32 %v348_v43, 0.0  ;;  %v2790_v52 = vmax.f32 %v347_v44, 0.0  ;;  %v2796_v56 = vmax.f32 %v346_v45, 0.0  ;;  %v351_v58 = vadd.f32 %v2606_v2, %v315_v53 }
  0x27   : > { %4412 = vst [vmem:[#allocation11_spill] sm:$0xff] %v2755_v34  ;;  %v350_v59 = vadd.f32 %v2606_v2, %v314_v55  ;;  %v349_v60 = vadd.f32 %v2606_v2, %v313_v57  ;;  %v316_v10 = vmul.f32 %v2601_v1, %v280_v3  ;;  %v354_v11 = vadd.f32 %v2606_v2, %v318_v7 }
  0x28   : > { %640 = vrot.lane.b32.xlu2 %v2661_v38, %s2542_s10  ;;  %638 = vrot.lane.b32.xlu1 %v2663_v39, %s2542_s10  ;;  %1485 = vst.msk [vmem:[#allocation2 + $0x28] sm:$0x7f] %vm1484_vm2, %v2749_v32  ;;  %v2820_v5 = vmax.f32 %v351_v58, 0.0  ;;  %v353_v12 = vadd.f32 %v2606_v2, %v317_v8  ;;  %v746_v22 = vrot.slane %v2626_v19, 1  ;;  %v2894_v24 = vrot.slane %v2640_v26, 1 }
  0x29   : > { %636 = vrot.lane.b32.xlu0 %v2667_v42, %s2542_s10  ;;  %4413 = vst [vmem:[#allocation12_spill] sm:$0xff] %v2765_v40  ;;  %v2822_v6 = vmax.f32 %v350_v59, 0.0  ;;  %v2827_v9 = vmax.f32 %v349_v60, 0.0  ;;  %v352_v1 = vadd.f32 %v2606_v2, %v316_v10  ;;  %v2849_v15 = vmax.f32 %v354_v11, 0.0 }
  0x2a   : > { %1483 = vst.msk [vmem:[#allocation2 + $0x10] sm:$0xff] %vm391_vm0, %v2761_v37  ;;  %v2851_v16 = vmax.f32 %v353_v12, 0.0  ;;  %v2871_v2 = vrot.slane %v2646_v30, 1  ;;  %v752_v25 = vrot.slane %v2622_v17, 1  ;;  %v758_v29 = vrot.slane %v2661_v38, 1 }
  0x2b   : > { %389 = vst [vmem:[#allocation2] sm:$0xff] %v2543_v31  ;;  %v2854_v21 = vmax.f32 %v352_v1, 0.0  ;;  %v2949_v35 = vrot.slane %v2688_v54, 1  ;;  %v2952_v36 = vrot.slane %v2663_v39, 1  ;;  %v755_v41 = vrot.slane %v2667_v42, 1 }
  0x2c   : > { %390 = vst [vmem:[#allocation2 + $0x8] sm:$0xff] %v2543_v31  ;;  %v2881_v23 = vsel %vm745_vm1, %v746_v22, %v2871_v2  ;;  %v2905_v28 = vsel %vm745_vm1, %v752_v25, %v2894_v24  ;;  %v2983_v46 = vrot.slane %v2682_v50, 1  ;;  %v761_v47 = vrot.slane %v2684_v51, 1 }
  0x2d   : > { %393 = vst [vmem:[#allocation2 + $0x18] sm:$0xff] %v2543_v31  ;;  %v2960_v43 = vsel %vm745_vm1, %v758_v29, %v2949_v35  ;;  %v2966_v44 = vsel %vm745_vm1, %v755_v41, %v2952_v36  ;;  %v767_v55 = vrot.slane %v2703_v62, 1  ;;  %v3011_v57 = vrot.slane %v2731_v20, 1 }
  0x2e   : > { %394 = vst [vmem:[#allocation2 + $0x20] sm:$0xff] %v2543_v31  ;;  %v2991_v48 = vsel %vm745_vm1, %v761_v47, %v2983_v46  ;;  %v3014_v58 = vrot.slane %v2705_v63, 1  ;;  %v764_v59 = vrot.slane %v2709_v4, 1  ;;  %v3080_v8 = vrot.slane %v2725_v13, 1 }
  0x2f   : > { %396 = vst [vmem:[#allocation2 + $0x30] sm:$0xff] %v2543_v31  ;;  %v3021_v60 = vsel %vm745_vm1, %v767_v55, %v3011_v57  ;;  %v770_v10 = vrot.slane %v2727_v14, 1  ;;  %v776_v25 = vrot.slane %v2751_v33, 1  ;;  %v3115_v29 = vrot.slane %v2796_v56, 1 }
  0x30   : > { %646 = vrot.lane.b32.xlu2 %v2682_v50, %s2542_s10  ;;  %644 = vrot.lane.b32.xlu1 %v2684_v51, %s2542_s10  ;;  %397 = vst [vmem:[#allocation2 + $0x38] sm:$0xff] %v2543_v31  ;;  %v3025_v61 = vsel %vm745_vm1, %v764_v59, %v3014_v58  ;;  %v3118_v41 = vrot.slane %v2755_v34, 1  ;;  %v773_v47 = vrot.slane %v2765_v40, 1 }
  0x31   : > { %642 = vrot.lane.b32.xlu0 %v2688_v54, %s2542_s10  ;;  %4414 = vst [vmem:[#allocation13_spill] sm:$0xff] %v2788_v49  ;;  %v3091_v11 = vsel %vm745_vm1, %v770_v10, %v3080_v8  ;;  %v3127_v55 = vsel %vm745_vm1, %v776_v25, %v3115_v29 }
  0x32   : > { %4415 = vst [vmem:[#allocation14_spill] sm:$0xff] %v2790_v52  ;;  %v3131_v59 = vsel %vm745_vm1, %v773_v47, %v3118_v41 }
  0x33   : > { %398 = vst.msk [vmem:[#allocation2 + $0x40] sm:$0xff] %vm391_vm0, %v2543_v31 }
  0x34   : > { %4416 = vst [vmem:[#allocation15_spill] sm:$0xff] %v2796_v56 }
  0x35   : > { %399 = vst [vmem:[#allocation2 + $0x48] sm:$0xff] %v2543_v31 }
  0x36   : > { %400 = vst [vmem:[#allocation2 + $0x50] sm:$0xff] %v2543_v31 }
  0x37   : > { %401 = vst.msk [vmem:[#allocation2 + $0x58] sm:$0xff] %vm391_vm0, %v2543_v31 }
  0x38   : > { %652 = vrot.lane.b32.xlu2 %v2703_v62, %s2542_s10  ;;  %650 = vrot.lane.b32.xlu1 %v2705_v63, %s2542_s10  ;;  %402 = vst [vmem:[#allocation2 + $0x60] sm:$0xff] %v2543_v31 }
  0x39   : > { %648 = vrot.lane.b32.xlu0 %v2709_v4, %s2542_s10  ;;  %403 = vst [vmem:[#allocation2 + $0x68] sm:$0xff] %v2543_v31 }
  0x3a   : > { %404 = vst.msk [vmem:[#allocation2 + $0x70] sm:$0xff] %vm391_vm0, %v2543_v31 }
  0x3b   : > { %405 = vst [vmem:[#allocation2 + $0x78] sm:$0xff] %v2543_v31 }
  0x3c   : > { %4417 = vst [vmem:[#allocation16_spill] sm:$0xff] %v2822_v6 }
  0x3d   : > { %406 = vst [vmem:[#allocation2 + $0x80] sm:$0xff] %v2543_v31 }
  0x3e   : > { %4418 = vst [vmem:[#allocation17_spill] sm:$0xff] %v2827_v9 }
  0x3f   : > { %407 = vst.msk [vmem:[#allocation2 + $0x88] sm:$0xff] %vm391_vm0, %v2543_v31 }
  0x40   : > { %658 = vrot.lane.b32.xlu2 %v2725_v13, %s2542_s10  ;;  %656 = vrot.lane.b32.xlu1 %v2727_v14, %s2542_s10  ;;  %408 = vst [vmem:[#allocation2 + $0x90] sm:$0xff] %v2543_v31 }
  0x41   : > { %654 = vrot.lane.b32.xlu0 %v2731_v20, %s2542_s10  ;;  %409 = vst [vmem:[#allocation2 + $0x98] sm:$0xff] %v2543_v31 }
  0x42   : > { %410 = vst.msk [vmem:[#allocation2 + $0xa0] sm:$0xff] %vm391_vm0, %v2543_v31 }
  0x43   : > { %411 = vst [vmem:[#allocation2 + $0xa8] sm:$0xff] %v2543_v31 }
  0x44   : > { %412 = vst [vmem:[#allocation2 + $0xb0] sm:$0xff] %v2543_v31 }
  0x45   : > { %413 = vst.msk [vmem:[#allocation2 + $0xb8] sm:$0xff] %vm391_vm0, %v2543_v31 }
  0x46   : > { %4419 = vst [vmem:[#allocation18_spill] sm:$0xff] %v2849_v15 }
  0x47   : > { %414 = vst [vmem:[#allocation2 + $0xc0] sm:$0xff] %v2543_v31 }
  0x48   : > { %664 = vrot.lane.b32.xlu2 %v2751_v33, %s2542_s10  ;;  %662 = vrot.lane.b32.xlu1 %v2755_v34, %s2542_s10  ;;  %4420 = vst [vmem:[#allocation19_spill] sm:$0xff] %v2854_v21 }
  0x49   : > { %660 = vrot.lane.b32.xlu0 %v2765_v40, %s2542_s10  ;;  %415 = vst [vmem:[#allocation2 + $0xc8] sm:$0xff] %v2543_v31 }
  0x4a   : > { %416 = vst.msk [vmem:[#allocation2 + $0xd0] sm:$0xff] %vm391_vm0, %v2543_v31 }
  0x4b   : > { %417 = vst [vmem:[#allocation2 + $0xd8] sm:$0xff] %v2543_v31 }
  0x4c   : > { %418 = vst [vmem:[#allocation2 + $0xe0] sm:$0xff] %v2543_v31 }
  0x4d   : > { %419 = vst.msk [vmem:[#allocation2 + $0xe8] sm:$0xff] %vm391_vm0, %v2543_v31 }
  0x4e   : > { %420 = vst [vmem:[#allocation2 + $0xf0] sm:$0xff] %v2543_v31 }
  0x4f   : > { %421 = vst [vmem:[#allocation2 + $0xf8] sm:$0xff] %v2543_v31 }
  0x50   : > { %670 = vrot.lane.b32.xlu2 %v2788_v49, %s2542_s10  ;;  %668 = vrot.lane.b32.xlu1 %v2790_v52, %s2542_s10  ;;  %422 = vst.msk [vmem:[#allocation2 + $0x100] sm:$0xff] %vm391_vm0, %v2543_v31 }
  0x51   : > { %666 = vrot.lane.b32.xlu0 %v2796_v56, %s2542_s10  ;;  %423 = vst [vmem:[#allocation2 + $0x108] sm:$0xff] %v2543_v31 }
  0x52   : > { %424 = vst [vmem:[#allocation2 + $0x110] sm:$0xff] %v2543_v31 }
  0x53   : > { %425 = vst.msk [vmem:[#allocation2 + $0x118] sm:$0xff] %vm391_vm0, %v2543_v31 }
  0x54   : > { %426 = vst [vmem:[#allocation2 + $0x120] sm:$0xff] %v2543_v31 }
  0x55   : > { %427 = vst [vmem:[#allocation2 + $0x128] sm:$0xff] %v2543_v31 }
  0x56   : > { %428 = vst.msk [vmem:[#allocation2 + $0x130] sm:$0xff] %vm391_vm0, %v2543_v31 }
  0x57   : > { %429 = vst [vmem:[#allocation2 + $0x138] sm:$0xff] %v2543_v31 }
  0x58   : > { %676 = vrot.lane.b32.xlu2 %v2820_v5, %s2542_s10  ;;  %674 = vrot.lane.b32.xlu1 %v2822_v6, %s2542_s10  ;;  %430 = vst [vmem:[#allocation2 + $0x140] sm:$0xff] %v2543_v31 }
  0x59   : > { %672 = vrot.lane.b32.xlu0 %v2827_v9, %s2542_s10  ;;  %431 = vst.msk [vmem:[#allocation2 + $0x148] sm:$0xff] %vm391_vm0, %v2543_v31 }
  0x5a   : > { %432 = vst [vmem:[#allocation2 + $0x150] sm:$0xff] %v2543_v31 }
  0x5b   : > { %433 = vst [vmem:[#allocation2 + $0x158] sm:$0xff] %v2543_v31 }
  0x5c   : > { %434 = vst.msk [vmem:[#allocation2 + $0x160] sm:$0xff] %vm391_vm0, %v2543_v31 }
  0x5d   : > { %435 = vst [vmem:[#allocation2 + $0x168] sm:$0xff] %v2543_v31 }
  0x5e   : > { %436 = vst [vmem:[#allocation2 + $0x170] sm:$0xff] %v2543_v31 }
  0x5f   : > { %437 = vst.msk [vmem:[#allocation2 + $0x178] sm:$0xff] %vm391_vm0, %v2543_v31 }
  0x60   : > { %682 = vrot.lane.b32.xlu2 %v2849_v15, %s2542_s10  ;;  %680 = vrot.lane.b32.xlu1 %v2851_v16, %s2542_s10  ;;  %438 = vst [vmem:[#allocation2 + $0x180] sm:$0xff] %v2543_v31 }
  0x61   : > { %678 = vrot.lane.b32.xlu0 %v2854_v21, %s2542_s10  ;;  %439 = vst [vmem:[#allocation2 + $0x188] sm:$0xff] %v2543_v31 }
  0x62   : > { %440 = vst.msk [vmem:[#allocation2 + $0x190] sm:$0xff] %vm391_vm0, %v2543_v31 }
  0x63   : > { %441 = vst [vmem:[#allocation2 + $0x198] sm:$0xff] %v2543_v31 }
  0x64   : > { %442 = vst [vmem:[#allocation2 + $0x1a0] sm:$0xff] %v2543_v31 }
  0x65   : > { %443 = vst.msk [vmem:[#allocation2 + $0x1a8] sm:$0xff] %vm391_vm0, %v2543_v31 }
  0x66   : > { %444 = vst [vmem:[#allocation2 + $0x1b0] sm:$0xff] %v2543_v31 }
  0x67   : > { %445 = vst [vmem:[#allocation2 + $0x1b8] sm:$0xff] %v2543_v31 }
  0x68   : > { %795 = vrot.lane.b32.xlu2 %v2761_v37, %s2544_s11  ;;  %793 = vrot.lane.b32.xlu1 %v2871_v2, %s2544_s11  ;;  %446 = vst.msk [vmem:[#allocation2 + $0x1c0] sm:$0xff] %vm391_vm0, %v2543_v31 }
  0x69   : > { %791 = vrot.lane.b32.xlu0 %v2881_v23, %s2544_s11  ;;  %447 = vst [vmem:[#allocation2 + $0x1c8] sm:$0xff] %v2543_v31 }
  0x6a   : > { %448 = vst [vmem:[#allocation2 + $0x1d0] sm:$0xff] %v2543_v31 }
  0x6b   : > { %449 = vst.msk [vmem:[#allocation2 + $0x1d8] sm:$0xff] %vm391_vm0, %v2543_v31 }
  0x6c   : > { %450 = vst [vmem:[#allocation2 + $0x1e0] sm:$0xff] %v2543_v31 }
  0x6d   : > { %451 = vst [vmem:[#allocation2 + $0x1e8] sm:$0xff] %v2543_v31 }
  0x6e   : > { %452 = vst.msk [vmem:[#allocation2 + $0x1f0] sm:$0xff] %vm391_vm0, %v2543_v31 }
  0x6f   : > { %453 = vst [vmem:[#allocation2 + $0x1f8] sm:$0xff] %v2543_v31 }
  0x70   : > { %801 = vrot.lane.b32.xlu2 %v2894_v24, %s2544_s11  ;;  %799 = vrot.lane.b32.xlu1 %v2905_v28, %s2544_s11  ;;  %454 = vst [vmem:[#allocation2 + $0x200] sm:$0xff] %v2543_v31 }
  0x71   : > { %797 = vrot.lane.b32.xlu0 %v2749_v32, %s2544_s11  ;;  %455 = vst.msk [vmem:[#allocation2 + $0x208] sm:$0xff] %vm391_vm0, %v2543_v31 }
  0x72   : > { %456 = vst [vmem:[#allocation2 + $0x210] sm:$0xff] %v2543_v31  ;;  %v2975_v45 = vpop.permute.xlu2 %632 }
  0x73   : > { %457 = vst [vmem:[#allocation2 + $0x218] sm:$0xff] %v2543_v31 }
  0x74   : > { %4421 = vst [vmem:[#allocation20_spill] sm:$0xff] %v2949_v35 }
  0x75   : > { %458 = vst.msk [vmem:[#allocation2 + $0x220] sm:$0xff] %vm391_vm0, %v2543_v31 }
  0x76   : > { %459 = vst [vmem:[#allocation2 + $0x228] sm:$0xff] %v2543_v31 }
  0x77   : > { %460 = vst [vmem:[#allocation2 + $0x230] sm:$0xff] %v2543_v31 }
  0x78   : > { %805 = vrot.lane.b32.xlu1 %v2952_v36, %s2544_s11  ;;  %807 = vrot.lane.b32.xlu2 %v2960_v43, %s2544_s11  ;;  %461 = vst.msk [vmem:[#allocation2 + $0x238] sm:$0xff] %vm391_vm0, %v2543_v31 }
  0x79   : > { %803 = vrot.lane.b32.xlu0 %v2966_v44, %s2544_s11  ;;  %462 = vst [vmem:[#allocation2 + $0x240] sm:$0xff] %v2543_v31 }
  0x7a   : > { %463 = vst [vmem:[#allocation2 + $0x248] sm:$0xff] %v2543_v31  ;;  %v3004_v53 = vpop.permute.xlu2 %634 }
  0x7b   : > { %464 = vst.msk [vmem:[#allocation2 + $0x250] sm:$0xff] %vm391_vm0, %v2543_v31 }
  0x7c   : > { %465 = vst [vmem:[#allocation2 + $0x258] sm:$0xff] %v2543_v31 }
  0x7d   : > { %4422 = vst [vmem:[#allocation21_spill] sm:$0xff] %v2983_v46 }
  0x7e   : > { %466 = vst [vmem:[#allocation2 + $0x260] sm:$0xff] %v2543_v31 }
  0x7f   : > { %467 = vst.msk [vmem:[#allocation2 + $0x268] sm:$0xff] %vm391_vm0, %v2543_v31 }
  0x80   : > { %468 = vst [vmem:[#allocation2 + $0x270] sm:$0xff] %v2543_v31  ;;  %813 = vrot.lane.b32.xlu2 %v2983_v46, %s2544_s11  ;;  %811 = vrot.lane.b32.xlu1 %v2991_v48, %s2544_s11 }
  0x81   : > { %469 = vst [vmem:[#allocation2 + $0x278] sm:$0xff] %v2543_v31  ;;  %809 = vrot.lane.b32.xlu0 %v2949_v35, %s2544_s11 }
  0x82   : > { %470 = vst.msk [vmem:[#allocation2 + $0x280] sm:$0xff] %vm391_vm0, %v2543_v31  ;;  %v3041_v0 = vpop.permute.xlu2 %640 }
  0x83   : > { %471 = vst [vmem:[#allocation2 + $0x288] sm:$0xff] %v2543_v31 }
  0x84   : > { %472 = vst [vmem:[#allocation2 + $0x290] sm:$0xff] %v2543_v31 }
  0x85   : > { %473 = vst.msk [vmem:[#allocation2 + $0x298] sm:$0xff] %vm391_vm0, %v2543_v31 }
  0x86   : > { %4423 = vst [vmem:[#allocation22_spill] sm:$0xff] %v3011_v57 }
  0x87   : > { %474 = vst [vmem:[#allocation2 + $0x2a0] sm:$0xff] %v2543_v31 }
  0x88   : > { %475 = vst [vmem:[#allocation2 + $0x2a8] sm:$0xff] %v2543_v31  ;;  %819 = vrot.lane.b32.xlu2 %v3021_v60, %s2544_s11  ;;  %817 = vrot.lane.b32.xlu1 %v3014_v58, %s2544_s11 }
  0x89   : > { %4424 = vst [vmem:[#allocation23_spill] sm:$0xff] %v3021_v60  ;;  %815 = vrot.lane.b32.xlu0 %v3025_v61, %s2544_s11 }
  0x8a   : > { %476 = vst.msk [vmem:[#allocation2 + $0x2b0] sm:$0xff] %vm391_vm0, %v2543_v31  ;;  %v3065_v3 = vpop.permute.xlu1 %628 }
  0x8b   : > { %477 = vst [vmem:[#allocation2 + $0x2b8] sm:$0xff] %v2543_v31  ;;  %v3071_v7 = vpop.permute.xlu0 %624 }
  0x8c   : > { %478 = vst [vmem:[#allocation2 + $0x2c0] sm:$0xff] %v2543_v31 }
  0x8d   : > { %479 = vst.msk [vmem:[#allocation2 + $0x2c8] sm:$0xff] %vm391_vm0, %v2543_v31 }
  0x8e   : > { %480 = vst [vmem:[#allocation2 + $0x2d0] sm:$0xff] %v2543_v31 }
  0x8f   : > { %481 = vst [vmem:[#allocation2 + $0x2d8] sm:$0xff] %v2543_v31 }
  0x90   : > { %482 = vst.msk [vmem:[#allocation2 + $0x2e0] sm:$0xff] %vm391_vm0, %v2543_v31  ;;  %825 = vrot.lane.b32.xlu2 %v3080_v8, %s2544_s11  ;;  %823 = vrot.lane.b32.xlu1 %v3091_v11, %s2544_s11 }
  0x91   : > { %483 = vst [vmem:[#allocation2 + $0x2e8] sm:$0xff] %v2543_v31  ;;  %821 = vrot.lane.b32.xlu0 %v3011_v57, %s2544_s11 }
  0x92   : > { %484 = vst [vmem:[#allocation2 + $0x2f0] sm:$0xff] %v2543_v31  ;;  %v3103_v1 = vpop.permute.xlu1 %630 }
  0x93   : > { %485 = vst.msk [vmem:[#allocation2 + $0x2f8] sm:$0xff] %vm391_vm0, %v2543_v31  ;;  %v3063_v31 = vpop.permute.xlu2 %646  ;;  %v3107_v22 = vpop.permute.xlu0 %626 }
  0x94   : > { %1048 = vst.msk [vmem:[#allocation2 + $0x8] sm:$0xff] %vm391_vm0, %v2626_v19 }
  0x95   : > { %1049 = vst.msk [vmem:[#allocation2 + $0x20] sm:$0xff] %vm391_vm0, %v2646_v30 }
  0x96   : > { %1050 = vst.msk [vmem:[#allocation2 + $0x38] sm:$0xff] %vm391_vm0, %v2624_v18 }
  0x97   : > { %1051 = vst.msk [vmem:[#allocation2 + $0x50] sm:$0xff] %vm391_vm0, %v2642_v27 }
  0x98   : > { %1052 = vst.msk [vmem:[#allocation2 + $0x68] sm:$0xff] %vm391_vm0, %v2622_v17  ;;  %831 = vrot.lane.b32.xlu2 %v3127_v55, %s2544_s11  ;;  %829 = vrot.lane.b32.xlu1 %v3118_v41, %s2544_s11 }
  0x99   : > { %1053 = vst.msk [vmem:[#allocation2 + $0x80] sm:$0xff] %vm391_vm0, %v2640_v26  ;;  %827 = vrot.lane.b32.xlu0 %v3131_v59, %s2544_s11 }
  0x9a   : > { %4425 = vst [vmem:[#allocation24_spill] sm:$0xff] %v3063_v31  ;;  %v3147_v25 = vpop.permute.xlu1 %638 }
  0x9b   : > { %1054 = vst.msk [vmem:[#allocation2 + $0x98] sm:$0xff] %vm391_vm0, %v2667_v42  ;;  %v3101_v12 = vpop.permute.xlu2 %652  ;;  %v3151_v47 = vpop.permute.xlu0 %636 }
  0x9c   : > { %1055 = vst.msk [vmem:[#allocation2 + $0xb0] sm:$0xff] %vm391_vm0, %v2663_v39 }
  0x9d   : > { %1056 = vst.msk [vmem:[#allocation2 + $0xc8] sm:$0xff] %vm391_vm0, %v2661_v38 }
  0x9e   : > { %1057 = vst.msk [vmem:[#allocation2 + $0xe0] sm:$0xff] %vm391_vm0, %v2688_v54 }
  0x9f   : > { %1058 = vst.msk [vmem:[#allocation2 + $0xf8] sm:$0xff] %vm391_vm0, %v2684_v51 }
  0xa0   : > { %4426 = vst [vmem:[#allocation25_spill] sm:$0xff] %v3080_v8  ;;  %1083 = vrot.lane.b32.xlu1 %v2881_v23, %s2542_s10  ;;  %v3193_v23 = vrot.slane %v2661_v38, 7 }
  0xa1   : > { %1059 = vst.msk [vmem:[#allocation2 + $0x110] sm:$0xff] %vm391_vm0, %v2682_v50  ;;  %833 = vrot.lane.b32.xlu0 %v3115_v29, %s2544_s11 }
  0xa2   : > { %1060 = vst.msk [vmem:[#allocation2 + $0x128] sm:$0xff] %vm391_vm0, %v2709_v4  ;;  %v3178_v31 = vpop.permute.xlu1 %644 }
  0xa3   : > { %4427 = vst [vmem:[#allocation26_spill] sm:$0xff] %v3091_v11  ;;  %v3145_v10 = vpop.permute.xlu2 %658 }
  0xa4   : > { %1061 = vst.msk [vmem:[#allocation2 + $0x140] sm:$0xff] %vm391_vm0, %v2705_v63  ;;  %v517_v63 = vrot.slane %v2626_v19, 7 }
  0xa5   : > { %1062 = vst.msk [vmem:[#allocation2 + $0x158] sm:$0xff] %vm391_vm0, %v2703_v62 }
  0xa6   : > { %1063 = vst.msk [vmem:[#allocation2 + $0x170] sm:$0xff] %vm391_vm0, %v2731_v20 }
  0xa7   : > { %1064 = vst.msk [vmem:[#allocation2 + $0x188] sm:$0xff] %vm391_vm0, %v2727_v14 }
  0xa8   : > { %1065 = vst.msk [vmem:[#allocation2 + $0x1a0] sm:$0xff] %vm391_vm0, %v2725_v13  ;;  %v520_v13 = vrot.slane %v2624_v18, 7  ;;  %1333 = vrot.lane.b32.xlu1 %v2624_v18, %s2545_s12  ;;  %v521_v18 = vrot.slane %v2642_v27, 7 }
  0xa9   : > { %1066 = vst.msk [vmem:[#allocation2 + $0x1b8] sm:$0xff] %vm391_vm0, %v2765_v40  ;;  %918 = vrot.lane.b32.xlu0 %v517_v63, %s2545_s12 }
  0xaa   : > { %4428 = vst [vmem:[#allocation27_spill] sm:$0xff] %v3115_v29  ;;  %1212 = vrot.lane.b32.xlu2 %v520_v13, %s2544_s11  ;;  %v3207_v19 = vpop.permute.xlu1 %650 }
  0xab   : > { %4429 = vst [vmem:[#allocation28_spill] sm:$0xff] %v3118_v41  ;;  %v3176_v20 = vpop.permute.xlu2 %664 }
  0xac   : > { %1067 = vst.msk [vmem:[#allocation2 + $0x1d0] sm:$0xff] %vm391_vm0, %v2755_v34 }
  0xad   : > { %1068 = vst.msk [vmem:[#allocation2 + $0x1e8] sm:$0xff] %vm391_vm0, %v2751_v33 }
  0xae   : > { %4430 = vst [vmem:[#allocation29_spill] sm:$0xff] %v3127_v55 }
  0xaf   : > { %4431 = vst [vmem:[#allocation30_spill] sm:$0xff] %v3131_v59 }
  0xb0   : > { %1069 = vst.msk [vmem:[#allocation2 + $0x200] sm:$0xff] %vm391_vm0, %v2796_v56 }
  0xb1   : > { %1070 = vst.msk [vmem:[#allocation2 + $0x218] sm:$0xff] %vm391_vm0, %v2790_v52 }
  0xb2   : > { %1071 = vst.msk [vmem:[#allocation2 + $0x230] sm:$0xff] %vm391_vm0, %v2788_v49  ;;  %1085 = vrot.lane.b32.xlu2 %v2871_v2, %s2542_s10  ;;  %v518_v2 = vrot.slane %v2646_v30, 7  ;;  %v522_v30 = vsel %vm516_vm5, %v520_v13, %v521_v18  ;;  %v3258_v18 = vrot.slane %v2751_v33, 7  ;;  %v551_v33 = vrot.slane %v2788_v49, 7 }
  0xb3   : > { %4432 = vst [vmem:[#allocation31_spill] sm:$0xff] %v3145_v10  ;;  %v3163_v10 = vrot.slane %v2622_v17, 7  ;;  %1214 = vrot.lane.b32.xlu0 %v522_v30, %s2544_s11 }
  0xb4   : > { %1072 = vst.msk [vmem:[#allocation2 + $0x248] sm:$0xff] %vm391_vm0, %v2827_v9 }
  0xb5   : > { %1073 = vst.msk [vmem:[#allocation2 + $0x260] sm:$0xff] %vm391_vm0, %v2822_v6 }
  0xb6   : > { %1074 = vst.msk [vmem:[#allocation2 + $0x278] sm:$0xff] %vm391_vm0, %v2820_v5 }
  0xb7   : > { %1075 = vst.msk [vmem:[#allocation2 + $0x290] sm:$0xff] %vm391_vm0, %v2854_v21 }
  0xb8   : > { %1076 = vst.msk [vmem:[#allocation2 + $0x2a8] sm:$0xff] %vm391_vm0, %v2851_v16 }
  0xb9   : > { %1077 = vst.msk [vmem:[#allocation2 + $0x2c0] sm:$0xff] %vm391_vm0, %v2849_v15  ;;  %v3182_v15 = vpop.permute.xlu0 %642 }
  0xba   : > { %1487 = vst.msk [vmem:[#allocation2 + $0x58] sm:$0x7f] %vm1484_vm2, %v2894_v24  ;;  %1335 = vrot.lane.b32.xlu2 %v2642_v27, %s2545_s12 }
  0xbb   : > { %1486 = vst.msk [vmem:[#allocation2 + $0x40] sm:$0xff] %vm391_vm0, %v2905_v28  ;;  %1087 = vrot.lane.b32.xlu0 %v2761_v37, %s2542_s10  ;;  %v3275_v37 = vrot.slane %v2790_v52, 7 }
  0xbc   : > { %598 = vst.msk [vmem:[#allocation2 + $0x90] sm:$0xfe] %vm593_vm3, %v3163_v10 }
  0xbd   : > { %719 = vst.msk [vmem:[#allocation2 + $0x90] sm:$0xff] %vm714_vm4, %v2975_v45  ;;  %v671_v45 = vpop.permute.xlu2 %670 }
  0xbe   : > { %1490 = vst.msk [vmem:[#allocation2 + $0xa0] sm:$0xff] %vm391_vm0, %v2960_v43 }
  0xbf   : > { %1491 = vst.msk [vmem:[#allocation2 + $0xb8] sm:$0x7f] %vm1484_vm2, %v2949_v35 }
  0xc0   : > { %1489 = vst.msk [vmem:[#allocation2 + $0x88] sm:$0x7f] %vm1484_vm2, %v2952_v36 }
  0xc1   : > { %1488 = vst.msk [vmem:[#allocation2 + $0x70] sm:$0xff] %vm391_vm0, %v2966_v44  ;;  %v649_v35 = vpop.permute.xlu0 %648 }
  0xc2   : > { %1493 = vst.msk [vmem:[#allocation2 + $0xe8] sm:$0x7f] %vm1484_vm2, %v2983_v46  ;;  %v519_v46 = vsel %vm516_vm5, %v517_v63, %v518_v2  ;;  %922 = vrot.lane.b32.xlu2 %v520_v13, %s2545_s12 }
  0xc3   : > { %1492 = vst.msk [vmem:[#allocation2 + $0xd0] sm:$0xff] %vm391_vm0, %v2991_v48  ;;  %920 = vrot.lane.b32.xlu1 %v519_v46, %s2545_s12  ;;  %1337 = vrot.lane.b32.xlu0 %v2622_v17, %s2545_s12  ;;  %v3316_v17 = vrot.slane %v2820_v5, 7 }
  0xc4   : > { %602 = vst.msk [vmem:[#allocation2 + $0xf0] sm:$0xfe] %vm593_vm3, %v3193_v23 }
  0xc5   : > { %723 = vst.msk [vmem:[#allocation2 + $0xf0] sm:$0xff] %vm714_vm4, %v3041_v0  ;;  %v3230_v0 = vrot.slane %v2703_v62, 7  ;;  %v677_v2 = vpop.permute.xlu2 %676 }
  0xc6   : > { %1496 = vst.msk [vmem:[#allocation2 + $0x130] sm:$0xff] %vm391_vm0, %v3021_v60 }
  0xc7   : > { %1497 = vst.msk [vmem:[#allocation2 + $0x148] sm:$0x7f] %vm1484_vm2, %v3011_v57  ;;  %v657_v57 = vpop.permute.xlu1 %656 }
  0xc8   : > { %1495 = vst.msk [vmem:[#allocation2 + $0x118] sm:$0x7f] %vm1484_vm2, %v3014_v58 }
  0xc9   : > { %1494 = vst.msk [vmem:[#allocation2 + $0x100] sm:$0xff] %vm391_vm0, %v3025_v61  ;;  %v3237_v27 = vpop.permute.xlu0 %654 }
  0xca   : > { %596 = vst.msk [vmem:[#allocation2 + $0x60] sm:$0xfe] %vm593_vm3, %v520_v13  ;;  %v3269_v13 = vrot.slane %v2684_v51, 7 }
  0xcb   : > { %717 = vst.msk [vmem:[#allocation2 + $0x60] sm:$0xff] %vm714_vm4, %v3065_v3  ;;  %v3248_v3 = vrot.slane %v2667_v42, 7  ;;  %1216 = vrot.lane.b32.xlu1 %v3163_v10, %s2544_s11  ;;  %924 = vrot.lane.b32.xlu0 %v522_v30, %s2545_s12 }
  0xcc   : > { %1499 = vst.msk [vmem:[#allocation2 + $0x178] sm:$0x7f] %vm1484_vm2, %v3080_v8 }
  0xcd   : > { %1498 = vst.msk [vmem:[#allocation2 + $0x160] sm:$0xff] %vm391_vm0, %v3091_v11  ;;  %v4446_v11 = vld [vmem:[#allocation7_spill] sm:$0xff] }
  0xce   : > { %608 = vst.msk [vmem:[#allocation2 + $0x180] sm:$0xfe] %vm593_vm3, %v3230_v0 }
  0xcf   : > { %729 = vst.msk [vmem:[#allocation2 + $0x180] sm:$0xff] %vm714_vm4, %v3101_v12  ;;  %v3264_v12 = vpop.permute.xlu2 %682 }
  0xd0   : > { %1502 = vst.msk [vmem:[#allocation2 + $0x1c0] sm:$0xff] %vm391_vm0, %v3127_v55 }
  0xd1   : > { %1503 = vst.msk [vmem:[#allocation2 + $0x1d8] sm:$0x7f] %vm1484_vm2, %v3115_v29  ;;  %v663_v29 = vpop.permute.xlu1 %662  ;;  %v661_v55 = vpop.permute.xlu0 %660 }
  0xd2   : > { %1501 = vst.msk [vmem:[#allocation2 + $0x1a8] sm:$0x7f] %vm1484_vm2, %v3118_v41  ;;  %v524_v41 = vrot.slane %v2640_v26, 7 }
  0xd3   : > { %4433 = vst [vmem:[#allocation32_spill] sm:$0xff] %v3258_v18  ;;  %1089 = vrot.lane.b32.xlu1 %v2749_v32, %s2542_s10  ;;  %v3328_v32 = vrot.slane %v2727_v14, 7  ;;  %1220 = vrot.lane.b32.xlu0 %v3248_v3, %s2544_s11 }
  0xd4   : > { %1500 = vst.msk [vmem:[#allocation2 + $0x190] sm:$0xff] %vm391_vm0, %v3131_v59  ;;  %v3286_v59 = vsel %vm516_vm5, %v3163_v10, %v524_v41 }
  0xd5   : > { %600 = vst.msk [vmem:[#allocation2 + $0xc0] sm:$0xfe] %vm593_vm3, %v3248_v3  ;;  %1218 = vrot.lane.b32.xlu2 %v3286_v59, %s2544_s11 }
  0xd6   : > { %721 = vst.msk [vmem:[#allocation2 + $0xc0] sm:$0xff] %vm714_vm4, %v3151_v47  ;;  %v3292_v47 = vsel %vm516_vm5, %v3275_v37, %v551_v33 }
  0xd7   : > { %4434 = vst [vmem:[#allocation33_spill] sm:$0xff] %v3275_v37  ;;  %v796_v33 = vpop.permute.xlu2 %795 }
  0xd8   : > { %614 = vst.msk [vmem:[#allocation2 + $0x210] sm:$0xfe] %vm593_vm3, %v3258_v18 }
  0xd9   : > { %735 = vst.msk [vmem:[#allocation2 + $0x210] sm:$0xff] %vm714_vm4, %v3176_v20  ;;  %v3304_v20 = vrot.slane %v2709_v4, 7  ;;  %v667_v41 = vpop.permute.xlu0 %666 }
  0xda   : > { %604 = vst.msk [vmem:[#allocation2 + $0x120] sm:$0xfe] %vm593_vm3, %v3269_v13 }
  0xdb   : > { %725 = vst.msk [vmem:[#allocation2 + $0x120] sm:$0xff] %vm714_vm4, %v3178_v31  ;;  %v669_v31 = vpop.permute.xlu1 %668  ;;  %1339 = vrot.lane.b32.xlu1 %v2640_v26, %s2545_s12  ;;  %v3335_v26 = vrot.slane %v2765_v40, 7 }
  0xdc   : > { %4435 = vst [vmem:[#allocation34_spill] sm:$0xff] %v3292_v47 }
  0xdd   : > { %594 = vst.msk [vmem:[#allocation2 + $0x30] sm:$0xfe] %vm593_vm3, %v517_v63  ;;  %1091 = vrot.lane.b32.xlu2 %v2905_v28, %s2542_s10  ;;  %v545_v63 = vrot.slane %v2755_v34, 7 }
  0xde   : > { %715 = vst.msk [vmem:[#allocation2 + $0x30] sm:$0xff] %vm714_vm4, %v3071_v7 }
  0xdf   : > { %617 = vst.msk [vmem:[#allocation2 + $0x258] sm:$0xff] %vm391_vm0, %v3292_v47  ;;  %v802_v7 = vpop.permute.xlu2 %801 }
  0xe0   : > { %738 = vst.msk [vmem:[#allocation2 + $0x258] sm:$0xff] %vm714_vm4, %v671_v45  ;;  %v779_v45 = vrot.slane %v2790_v52, 1 }
  0xe1   : > { %616 = vst.msk [vmem:[#allocation2 + $0x240] sm:$0xfe] %vm593_vm3, %v3275_v37  ;;  %v673_v28 = vpop.permute.xlu0 %672  ;;  %v3527_v37 = vld [vmem:[#allocation3 + $0xb8] sm:$0xff] }
  0xe2   : > { %606 = vst.msk [vmem:[#allocation2 + $0x150] sm:$0xfe] %vm593_vm3, %v3304_v20 }
  0xe3   : > { %727 = vst.msk [vmem:[#allocation2 + $0x150] sm:$0xff] %vm714_vm4, %v649_v35  ;;  %v3330_v35 = vpop.permute.xlu1 %674  ;;  %926 = vrot.lane.b32.xlu1 %v3163_v10, %s2545_s12  ;;  %v3376_v10 = vrot.slane %v2827_v9, 7 }
  0xe4   : > { %597 = vst.msk [vmem:[#allocation2 + $0x78] sm:$0xff] %vm391_vm0, %v522_v30  ;;  %v3361_v30 = vrot.slane %v2788_v49, 1 }
  0xe5   : > { %718 = vst.msk [vmem:[#allocation2 + $0x78] sm:$0xff] %vm714_vm4, %v3103_v1  ;;  %1341 = vrot.lane.b32.xlu2 %v2667_v42, %s2545_s12  ;;  %v548_v1 = vrot.slane %v2796_v56, 7  ;;  %v3529_v56 = vld [vmem:[#allocation3 + $0x108] sm:$0xff] }
  0xe6   : > { %595 = vst.msk [vmem:[#allocation2 + $0x48] sm:$0xff] %vm391_vm0, %v519_v46  ;;  %v3342_v46 = vsel %vm516_vm5, %v3335_v26, %v545_v63 }
  0xe7   : > { %716 = vst.msk [vmem:[#allocation2 + $0x48] sm:$0xff] %vm714_vm4, %v3107_v22  ;;  %v808_v22 = vpop.permute.xlu2 %807 }
  0xe8   : > { %4436 = vst [vmem:[#allocation35_spill] sm:$0xff] %v3335_v26 }
  0xe9   : > { %620 = vst.msk [vmem:[#allocation2 + $0x2a0] sm:$0xfe] %vm593_vm3, %v3316_v17  ;;  %v3364_v42 = vpop.permute.xlu0 %678 }
  0xea   : > { %741 = vst.msk [vmem:[#allocation2 + $0x2a0] sm:$0xff] %vm714_vm4, %v677_v2 }
  0xeb   : > { %4437 = vst [vmem:[#allocation36_spill] sm:$0xff] %v3342_v46  ;;  %966 = vrot.lane.b32.xlu1 %v3376_v10, %s2545_s12 }
  0xec   : > { %610 = vst.msk [vmem:[#allocation2 + $0x1b0] sm:$0xfe] %vm593_vm3, %v3328_v32 }
  0xed   : > { %731 = vst.msk [vmem:[#allocation2 + $0x1b0] sm:$0xff] %vm714_vm4, %v657_v57  ;;  %v681_v57 = vpop.permute.xlu1 %680  ;;  %1093 = vrot.lane.b32.xlu2 %v2894_v24, %s2542_s10 }
  0xee   : > { %613 = vst.msk [vmem:[#allocation2 + $0x1f8] sm:$0xff] %vm391_vm0, %v3342_v46  ;;  %v3559_v46 = vld [vmem:[#allocation3 + $0xa8] sm:$0xff] }
  0xef   : > { %734 = vst.msk [vmem:[#allocation2 + $0x1f8] sm:$0xff] %vm714_vm4, %v663_v29  ;;  %v3372_v29 = vsel %vm516_vm5, %v3258_v18, %v548_v1  ;;  %v3396_v2 = vpop.permute.xlu2 %813  ;;  %v1625_v1 = vld [vmem:[#allocation3 + $0x78] sm:$0xff] }
  0xf0   : > { %612 = vst.msk [vmem:[#allocation2 + $0x1e0] sm:$0xfe] %vm593_vm3, %v3335_v26  ;;  %1742 = vmatpush.msra.mxu0 %v1625_v1  ;;  %2432 = vmatpush.msra.mxu3 %v1625_v1  ;;  %v557_v1 = vrot.slane %v2854_v21, 7  ;;  %v542_v26 = vrot.slane %v4446_v11, 7  ;;  %v1613_v11 = vld [vmem:[#allocation3 + $0x18] sm:$0xff] }
  0xf1   : > { %4438 = vst [vmem:[#allocation37_spill] sm:$0xff] %v3361_v30  ;;  %v792_v24 = vpop.permute.xlu0 %791 }
  0xf2   : > { %733 = vst.msk [vmem:[#allocation2 + $0x1e0] sm:$0xff] %vm714_vm4, %v661_v55  ;;  %v3380_v55 = vsel %vm745_vm1, %v779_v45, %v3361_v30 }
  0xf3   : > { %599 = vst.msk [vmem:[#allocation2 + $0xa8] sm:$0xff] %vm391_vm0, %v3286_v59  ;;  %835 = vrot.lane.b32.xlu0 %v3380_v55, %s2544_s11  ;;  %928 = vrot.lane.b32.xlu1 %v3286_v59, %s2545_s12  ;;  %v3425_v59 = vld [vmem:[#allocation3 + $0xf8] sm:$0xff] }
  0xf4   : > { %720 = vst.msk [vmem:[#allocation2 + $0xa8] sm:$0xff] %vm714_vm4, %v3004_v53  ;;  %v3391_v53 = vrot.slane %v2851_v16, 7  ;;  %1855 = vmatpush.msra.mxu1 %v3425_v59 }
  0xf5   : > { %4439 = vst [vmem:[#allocation38_spill] sm:$0xff] %v3372_v29  ;;  %1343 = vrot.lane.b32.xlu2 %v2663_v39, %s2545_s12 }
  0xf6   : > { %737 = vst.msk [vmem:[#allocation2 + $0x240] sm:$0xff] %vm714_vm4, %v669_v31  ;;  %v794_v31 = vpop.permute.xlu1 %793 }
  0xf7   : > { %4440 = vst [vmem:[#allocation39_spill] sm:$0xff] %v3376_v10  ;;  %v820_v63 = vpop.permute.xlu2 %819 }
  0xf8   : > { %4441 = vst [vmem:[#allocation40_spill] sm:$0xff] %v3380_v55 }
  0xf9   : > { %885 = vst.msk [vmem:[#allocation2 + $0x60] sm:$0xff] %vm881_vm6, %v796_v33  ;;  %v527_v33 = vrot.slane %v2663_v39, 7  ;;  %v798_v39 = vpop.permute.xlu0 %797 }
  0xfa   : > { %615 = vst.msk [vmem:[#allocation2 + $0x228] sm:$0xff] %vm391_vm0, %v3372_v29  ;;  %v4445_v29 = vld [vmem:[#allocation9_spill] sm:$0xff] }
  0xfb   : > { %736 = vst.msk [vmem:[#allocation2 + $0x228] sm:$0xff] %vm714_vm4, %v667_v41  ;;  %v3412_v41 = vsel %vm516_vm5, %v3248_v3, %v527_v33  ;;  %v3448_v33 = vrot.slane %v2822_v6, 1  ;;  %v539_v18 = vrot.slane %v4445_v29, 7 }
  0xfc   : > { %888 = vst.msk [vmem:[#allocation2 + $0xa8] sm:$0x7f] %vm883_vm7, %v802_v7  ;;  %1222 = vrot.lane.b32.xlu0 %v3412_v41, %s2544_s11 }
  0xfd   : > { %618 = vst.msk [vmem:[#allocation2 + $0x270] sm:$0xfe] %vm593_vm3, %v3376_v10  ;;  %1095 = vrot.lane.b32.xlu2 %v2966_v44, %s2542_s10 }
  0xfe   : > { %739 = vst.msk [vmem:[#allocation2 + $0x270] sm:$0xff] %vm714_vm4, %v673_v28  ;;  %v800_v7 = vpop.permute.xlu1 %799  ;;  %v554_v28 = vrot.slane %v2822_v6, 7 }
  0xff   : > { %622 = vst.msk [vmem:[#allocation2 + $0x2d0] sm:$0xfe] %vm593_vm3, %v3391_v53  ;;  %v3459_v44 = vpop.permute.xlu2 %825 }
 0x100   : > { %743 = vst.msk [vmem:[#allocation2 + $0x2d0] sm:$0xff] %vm714_vm4, %v681_v57  ;;  %v1624_v57 = vld [vmem:[#allocation3 + $0x70] sm:$0xff]  ;;  %v3435_v45 = vsel %vm516_vm5, %v3376_v10, %v554_v28  ;;  %v3455_v28 = vld [vmem:[#allocation3 + $0xe0] sm:$0xff]  ;;  %v3474_v10 = vld [vmem:[#allocation3 + $0xd8] sm:$0xff] }
 0x101   : > { %891 = vst.msk [vmem:[#allocation2 + $0xf0] sm:$0xff] %vm881_vm6, %v808_v22  ;;  %v3430_v22 = vld [vmem:[#allocation3 + $0xf0] sm:$0xff]  ;;  %1743 = vmatpush.msra.mxu0 %v1624_v57  ;;  %968 = vrot.lane.b32.xlu1 %v3435_v45, %s2545_s12  ;;  %v804_v6 = vpop.permute.xlu0 %803 }
 0x102   : > { %1504 = vst.msk [vmem:[#allocation2 + $0x1f0] sm:$0xff] %vm391_vm0, %v3380_v55  ;;  %1856 = vmatpush.msra.mxu1 %v3430_v22  ;;  %2433 = vmatpush.msra.mxu3 %v1624_v57  ;;  %v1620_v57 = vld [vmem:[#allocation3 + $0x50] sm:$0xff] }
 0x103   : > { %1505 = vst.msk [vmem:[#allocation2 + $0x208] sm:$0x7f] %vm1484_vm2, %v3361_v30 }
 0x104   : > { %884 = vst.msk [vmem:[#allocation2 + $0x48] sm:$0x7f] %vm883_vm7, %v794_v31  ;;  %v1623_v31 = vld [vmem:[#allocation3 + $0x68] sm:$0xff]  ;;  %837 = vrot.lane.b32.xlu0 %v3361_v30, %s2544_s11 }
 0x105   : > { %882 = vst.msk [vmem:[#allocation2 + $0x30] sm:$0xff] %vm881_vm6, %v792_v24  ;;  %v3439_v24 = vld [vmem:[#allocation3 + $0xe8] sm:$0xff]  ;;  %1744 = vmatpush.msra.mxu0 %v1623_v31  ;;  %2434 = vmatpush.msra.mxu3 %v1623_v31 }
 0x106   : > { %601 = vst.msk [vmem:[#allocation2 + $0xd8] sm:$0xff] %vm391_vm0, %v3412_v41  ;;  %1857 = vmatpush.msra.mxu1 %v3439_v24  ;;  %v1619_v31 = vld [vmem:[#allocation3 + $0x48] sm:$0xff]  ;;  %1345 = vrot.lane.b32.xlu2 %v2661_v38, %s2545_s12  ;;  %v4443_v38 = vld [vmem:[#allocation6_spill] sm:$0xff] }
 0x107   : > { %722 = vst.msk [vmem:[#allocation2 + $0xd8] sm:$0xff] %vm714_vm4, %v3147_v25  ;;  %v782_v25 = vrot.slane %v2827_v9, 1  ;;  %v3506_v9 = vld [vmem:[#allocation3 + $0x110] sm:$0xff]  ;;  %v536_v55 = vrot.slane %v4443_v38, 7  ;;  %v832_v49 = vpop.permute.xlu2 %831 }
 0x108   : > { %897 = vst.msk [vmem:[#allocation2 + $0x180] sm:$0xff] %vm881_vm6, %v820_v63  ;;  %v530_v63 = vrot.slane %v2688_v54, 7  ;;  %1858 = vmatpush.msra.mxu1 %v3455_v28 }
 0x109   : > { %4442 = vst [vmem:[#allocation41_spill] sm:$0xff] %v3435_v45  ;;  %v3467_v30 = vsel %vm745_vm1, %v782_v25, %v3448_v33  ;;  %v3485_v25 = vld [vmem:[#allocation3 + $0xd0] sm:$0xff]  ;;  %930 = vrot.lane.b32.xlu1 %v3248_v3, %s2545_s12  ;;  %v810_v52 = vpop.permute.xlu0 %809 }
 0x10a   : > { %887 = vst.msk [vmem:[#allocation2 + $0x90] sm:$0xff] %vm881_vm6, %v800_v7  ;;  %v1622_v7 = vld [vmem:[#allocation3 + $0x60] sm:$0xff]  ;;  %1859 = vmatpush.msra.mxu1 %v3474_v10 }
 0x10b   : > { %886 = vst.msk [vmem:[#allocation2 + $0x78] sm:$0x7f] %vm883_vm7, %v798_v39  ;;  %v806_v39 = vpop.permute.xlu1 %805  ;;  %1745 = vmatpush.msra.mxu0 %v1622_v7  ;;  %2435 = vmatpush.msra.mxu3 %v1622_v7  ;;  %v1618_v7 = vld [vmem:[#allocation3 + $0x40] sm:$0xff] }
 0x10c   : > { %619 = vst.msk [vmem:[#allocation2 + $0x288] sm:$0xff] %vm391_vm0, %v3435_v45  ;;  %v1621_v45 = vld [vmem:[#allocation3 + $0x58] sm:$0xff]  ;;  %1224 = vrot.lane.b32.xlu0 %v3193_v23, %s2544_s11  ;;  %1860 = vmatpush.msra.mxu1 %v3485_v25 }
 0x10d   : > { %740 = vst.msk [vmem:[#allocation2 + $0x288] sm:$0xff] %vm714_vm4, %v3330_v35  ;;  %v3471_v35 = vsel %vm516_vm5, %v3193_v23, %v530_v63  ;;  %1746 = vmatpush.msra.mxu0 %v1621_v45  ;;  %v3487_v63 = vld [vmem:[#allocation3 + $0x118] sm:$0xff]  ;;  %2436 = vmatpush.msra.mxu3 %v1621_v45  ;;  %v1616_v45 = vld [vmem:[#allocation3 + $0x30] sm:$0xff] }
 0x10e   : > { %890 = vst.msk [vmem:[#allocation2 + $0xd8] sm:$0x7f] %vm883_vm7, %v806_v39  ;;  %1980 = vmatpush.msra.mxu2 %v3487_v63  ;;  %v533_v39 = vrot.slane %v2682_v50, 7  ;;  %1097 = vrot.lane.b32.xlu2 %v2952_v36, %s2542_s10  ;;  %v1516_v36 = vld [vmem:[#allocation2 + $0x10] sm:$0xff] }
 0x10f   : > { %889 = vst.msk [vmem:[#allocation2 + $0xc0] sm:$0xff] %vm881_vm6, %v804_v6  ;;  %v3482_v6 = vsel %vm516_vm5, %v3316_v17, %v557_v1  ;;  %1747 = vmatpush.msra.mxu0 %v1620_v57  ;;  %v3499_v1 = vld [vmem:[#allocation3 + $0xc8] sm:$0xff]  ;;  %2437 = vmatpush.msra.mxu3 %v1620_v57  ;;  %v785_v57 = vrot.slane %v2820_v5, 1  ;;  %v3556_v34 = vpop.permute.xlu2 %1212 }
 0x110   : > { %1506 = vst.msk [vmem:[#allocation2 + $0x220] sm:$0xff] %vm391_vm0, %v3467_v30  ;;  %1981 = vmatpush.msra.mxu2 %v3506_v9  ;;  %1861 = vmatpush.msra.mxu1 %v3499_v1  ;;  %v3518_v47 = vsel %vm516_vm5, %v3269_v13, %v533_v39  ;;  %v4444_v39 = vld [vmem:[#allocation24_spill] sm:$0xff] }
 0x111   : > { %1507 = vst.msk [vmem:[#allocation2 + $0x238] sm:$0x7f] %vm1484_vm2, %v3448_v33  ;;  %1748 = vmatpush.msra.mxu0 %v1619_v31  ;;  %970 = vrot.lane.b32.xlu1 %v3316_v17, %s2545_s12  ;;  %v816_v14 = vpop.permute.xlu0 %815 }
 0x112   : > { %603 = vst.msk [vmem:[#allocation2 + $0x108] sm:$0xff] %vm391_vm0, %v3471_v35  ;;  %1982 = vmatpush.msra.mxu2 %v3529_v56  ;;  %2438 = vmatpush.msra.mxu3 %v1619_v31  ;;  %v3588_v31 = vld [vmem:[#allocation3 + $0x98] sm:$0xff] }
 0x113   : > { %724 = vst.msk [vmem:[#allocation2 + $0x108] sm:$0xff] %vm714_vm4, %v3182_v15  ;;  %v812_v3 = vpop.permute.xlu1 %811  ;;  %v3511_v15 = vld [vmem:[#allocation3 + $0xc0] sm:$0xff]  ;;  %1749 = vmatpush.msra.mxu0 %v1618_v7 }
 0x114   : > { %621 = vst.msk [vmem:[#allocation2 + $0x2b8] sm:$0xff] %vm391_vm0, %v3482_v6  ;;  %1862 = vmatpush.msra.mxu1 %v3511_v15  ;;  %839 = vrot.lane.b32.xlu0 %v3467_v30, %s2544_s11 }
 0x115   : > { %742 = vst.msk [vmem:[#allocation2 + $0x2b8] sm:$0xff] %vm714_vm4, %v3364_v42  ;;  %v3525_v42 = vsel %vm516_vm5, %v3304_v20, %v536_v55  ;;  %v3542_v55 = vld [vmem:[#allocation3 + $0x100] sm:$0xff]  ;;  %2439 = vmatpush.msra.mxu3 %v1618_v7  ;;  %v4448_v7 = vld [vmem:[#allocation31_spill] sm:$0xff] }
 0x116   : > { %903 = vst.msk [vmem:[#allocation2 + $0x210] sm:$0xff] %vm881_vm6, %v832_v49  ;;  %v1617_v49 = vld [vmem:[#allocation3 + $0x38] sm:$0xff]  ;;  %1863 = vmatpush.msra.mxu1 %v3527_v37  ;;  %1983 = vmatpush.msra.mxu2 %v3542_v55 }
 0x117   : > { %893 = vst.msk [vmem:[#allocation2 + $0x120] sm:$0xff] %vm881_vm6, %v812_v3  ;;  %1750 = vmatpush.msra.mxu0 %v1617_v49  ;;  %v3546_v3 = vrot.slane %v2854_v21, 1  ;;  %2396 = vmatmul.msk.f32.vlgmr.msra.gmra.mxu2 %vm391_vm0, %v1516_v36  ;;  %v3577_v21 = vsel %vm516_vm5, %v3230_v0, %v539_v18  ;;  %v1519_v18 = vld [vmem:[#allocation2 + $0x28] sm:$0xff]  ;;  %v1610_v36 = vld [vmem:[#allocation3] sm:$0xff] }
 0x118   : > { %892 = vst.msk [vmem:[#allocation2 + $0x108] sm:$0x7f] %vm883_vm7, %v810_v52  ;;  %v3534_v52 = vld [vmem:[#allocation3 + $0xb0] sm:$0xff]  ;;  %2440 = vmatpush.msra.mxu3 %v1617_v49  ;;  %1347 = vrot.lane.b32.xlu2 %v2688_v54, %s2545_s12  ;;  %v3608_v49 = vld [vmem:[#allocation3 + $0x88] sm:$0xff] }
 0x119   : > { %605 = vst.msk [vmem:[#allocation2 + $0x138] sm:$0xff] %vm391_vm0, %v3518_v47  ;;  %1751 = vmatpush.msra.mxu0 %v1616_v45  ;;  %1864 = vmatpush.msra.mxu1 %v3534_v52  ;;  %v3563_v40 = vsel %vm745_vm1, %v785_v57, %v3546_v3  ;;  %v3573_v57 = vld [vmem:[#allocation3 + $0xa0] sm:$0xff] }
 0x11a   : > { %726 = vst.msk [vmem:[#allocation2 + $0x138] sm:$0xff] %vm714_vm4, %v4444_v39  ;;  %v1615_v39 = vld [vmem:[#allocation3 + $0x28] sm:$0xff]  ;;  %932 = vrot.lane.b32.xlu1 %v3412_v41, %s2545_s12  ;;  %2441 = vmatpush.msra.mxu3 %v1616_v45  ;;  %v3616_v45 = vld [vmem:[#allocation3 + $0x80] sm:$0xff] }
 0x11b   : > { %607 = vst.msk [vmem:[#allocation2 + $0x168] sm:$0xff] %vm391_vm0, %v3525_v42  ;;  %v818_v8 = vpop.permute.xlu1 %817  ;;  %1752 = vmatpush.msra.mxu0 %v1615_v39  ;;  %1865 = vmatpush.msra.mxu1 %v3559_v46  ;;  %v1611_v41 = vld [vmem:[#allocation3 + $0x8] sm:$0xff] }
 0x11c   : > { %894 = vst.msk [vmem:[#allocation2 + $0x138] sm:$0x7f] %vm883_vm7, %v3396_v2  ;;  %v1614_v2 = vld [vmem:[#allocation3 + $0x20] sm:$0xff]  ;;  %1226 = vrot.lane.b32.xlu0 %v3471_v35, %s2544_s11  ;;  %2442 = vmatpush.msra.mxu3 %v1615_v39 }
 0x11d   : > { %1509 = vst.msk [vmem:[#allocation2 + $0x268] sm:$0x7f] %vm1484_vm2, %v3546_v3  ;;  %1753 = vmatpush.msra.mxu0 %v1614_v2  ;;  %1866 = vmatpush.msra.mxu1 %v3573_v57 }
 0x11e   : > { %1508 = vst.msk [vmem:[#allocation2 + $0x250] sm:$0xff] %vm391_vm0, %v3563_v40  ;;  %2443 = vmatpush.msra.mxu3 %v1614_v2 }
 0x11f   : > { %895 = vst.msk [vmem:[#allocation2 + $0x150] sm:$0xff] %vm881_vm6, %v816_v14  ;;  %v3585_v14 = vsel %vm516_vm5, %v3328_v32, %v542_v26  ;;  %1754 = vmatpush.msra.mxu0 %v1613_v11  ;;  %v1086_v26 = vpop.permute.xlu2 %1085  ;;  %1867 = vmatpush.msra.mxu1 %v3588_v31 }
 0x120   : > { %728 = vst.msk [vmem:[#allocation2 + $0x168] sm:$0xff] %vm714_vm4, %v3207_v19  ;;  %v3600_v19 = vld [vmem:[#allocation3 + $0x90] sm:$0xff]  ;;  %2397 = vmatmul.msk.f32.gmra.mxu2 %vm391_vm0, %v1519_v18  ;;  %1099 = vrot.lane.b32.xlu2 %v2960_v43, %s2542_s10  ;;  %v1525_v43 = vld [vmem:[#allocation2 + $0x58] sm:$0xff] }
 0x121   : > { %896 = vst.msk [vmem:[#allocation2 + $0x168] sm:$0x7f] %vm883_vm7, %v818_v8  ;;  %v1612_v8 = vld [vmem:[#allocation3 + $0x10] sm:$0xff]  ;;  %1868 = vmatpush.msra.mxu1 %v3600_v19  ;;  %2444 = vmatpush.msra.mxu3 %v1613_v11 }
 0x122   : > { %4447 = vst [vmem:[#allocation6_spill] sm:$0xff] %v3585_v14  ;;  %1755 = vmatpush.msra.mxu0 %v1612_v8  ;;  %972 = vrot.lane.b32.xlu1 %v3482_v6, %s2545_s12 }
 0x123   : > { %609 = vst.msk [vmem:[#allocation2 + $0x198] sm:$0xff] %vm391_vm0, %v3577_v21  ;;  %v824_v54 = vpop.permute.xlu1 %823  ;;  %1869 = vmatpush.msra.mxu1 %v3608_v49  ;;  %2445 = vmatpush.msra.mxu3 %v1612_v8 }
 0x124   : > { %730 = vst.msk [vmem:[#allocation2 + $0x198] sm:$0xff] %vm714_vm4, %v3237_v27  ;;  %v822_v27 = vpop.permute.xlu0 %821  ;;  %1756 = vmatpush.msra.mxu0 %v1611_v41  ;;  %841 = vrot.lane.b32.xlu0 %v3448_v33, %s2544_s11 }
 0x125   : > { %611 = vst.msk [vmem:[#allocation2 + $0x1c8] sm:$0xff] %vm391_vm0, %v3585_v14  ;;  %v4449_v14 = vld [vmem:[#allocation18_spill] sm:$0xff]  ;;  %1870 = vmatpush.msra.mxu1 %v3616_v45  ;;  %2446 = vmatpush.msra.mxu3 %v1611_v41 }
 0x126   : > { %732 = vst.msk [vmem:[#allocation2 + $0x1c8] sm:$0xff] %vm714_vm4, %v4448_v7  ;;  %v560_v60 = vrot.slane %v4449_v14, 7  ;;  %1757 = vmatpush.msra.mxu0 %v1610_v36 }
 0x127   : > { %1181 = vst.msk [vmem:[#allocation2 + $0x20] sm:$0x7f] %vm1180_vm8, %v1086_v26  ;;  %2447 = vmatpush.msra.mxu3 %v1610_v36 }
 0x128   : > { %899 = vst.msk [vmem:[#allocation2 + $0x1b0] sm:$0xff] %vm881_vm6, %v824_v54  ;;  %v3620_v26 = vsel %vm516_vm5, %v3391_v53, %v560_v60  ;;  %v1522_v60 = vld [vmem:[#allocation2 + $0x40] sm:$0xff]  ;;  %1349 = vrot.lane.b32.xlu2 %v2684_v51, %s2545_s12  ;;  %v4450_v51 = vld [vmem:[#allocation20_spill] sm:$0xff] }
 0x129   : > { %898 = vst.msk [vmem:[#allocation2 + $0x198] sm:$0x7f] %vm883_vm7, %v822_v27  ;;  %2398 = vmatmul.msk.f32.gmra.mxu2 %vm391_vm0, %v1522_v60  ;;  %2448 = vmatpush.msrb.mxu3 %v3425_v59  ;;  %v3661_v59 = vrot.slane %v4449_v14, 1  ;;  %v2495_v54 = vld [vmem:[%s4356_s1] ss:$0 sm:$0xff] }
 0x12a   : > { %900 = vst.msk [vmem:[#allocation2 + $0x1c8] sm:$0x7f] %vm883_vm7, %v3459_v44  ;;  %v3635_v44 = vpop.permute.xlu2 %1335  ;;  %934 = vrot.lane.b32.xlu1 %v3193_v23, %s2545_s12  ;;  %v788_v23 = vrot.slane %v2851_v16, 1  ;;  %v2496_v27 = vld [vmem:[%s4357_s2] ss:$0 sm:$0xff] }
 0x12b   : > { %623 = vst.msk [vmem:[#allocation2 + $0x2e8] sm:$0xff] %vm391_vm0, %v3620_v26  ;;  %v830_v39 = vpop.permute.xlu1 %829  ;;  %2449 = vmatpush.msrb.mxu3 %v3430_v22  ;;  %v283_v22 = vld [vmem:[%s2595_s30 + $0xf0] sm:$0xff] }
 0x12c   : > { %744 = vst.msk [vmem:[#allocation2 + $0x2e8] sm:$0xff] %vm714_vm4, %v3264_v12  ;;  %v828_v2 = vpop.permute.xlu0 %827  ;;  %1228 = vrot.lane.b32.xlu0 %v3269_v13, %s2544_s11  ;;  %v319_v41 = vmul.f32 %v2495_v54, %v283_v22 }
 0x12d   : > { %902 = vst.msk [vmem:[#allocation2 + $0x1f8] sm:$0x7f] %vm883_vm7, %v830_v39  ;;  %2450 = vmatpush.msrb.mxu3 %v3439_v24 }
 0x12e   : > { %901 = vst.msk [vmem:[#allocation2 + $0x1e0] sm:$0xff] %vm881_vm6, %v828_v2  ;;  %v355_v36 = vadd.f32 %v2496_v27, %v319_v41 }
 0x12f   : > { %2451 = vmatpush.msrb.mxu3 %v3455_v28  ;;  %1511 = vst.msk [vmem:[#allocation2 + $0x298] sm:$0x7f] %vm1484_vm2, %v3661_v59  ;;  %v3680_v28 = vsel %vm745_vm1, %v788_v23, %v3661_v59 }
 0x130   : > { %1101 = vrot.lane.b32.xlu2 %v4450_v51, %s2542_s10  ;;  %1510 = vst.msk [vmem:[#allocation2 + $0x280] sm:$0xff] %vm391_vm0, %v3680_v28  ;;  %v3688_v60 = vmax.f32 %v355_v36, 0.0 }
 0x131   : > { %2399 = vmatmul.msk.f32.gmra.mxu2 %vm391_vm0, %v1525_v43  ;;  %2452 = vmatpush.msrb.mxu3 %v3474_v10  ;;  %v1531_v10 = vld [vmem:[#allocation2 + $0x88] sm:$0xff] }
 0x132   : > { %v923_v11 = vpop.permute.xlu2 %922  ;;  %974 = vrot.lane.b32.xlu1 %v3391_v53, %s2545_s12  ;;  %1078 = vst.msk [vmem:[#allocation2 + $0x2d8] sm:$0xff] %vm391_vm0, %v3688_v60 }
 0x133   : > { %v1084_v12 = vpop.permute.xlu1 %1083  ;;  %1018 = vst.msk [vmem:[#allocation2 + $0x30] sm:$0xfe] %vm1014_vm9, %v923_v11  ;;  %2453 = vmatpush.msrb.mxu3 %v3485_v25 }
 0x134   : > { %v834_v8 = vpop.permute.xlu0 %833  ;;  %1179 = vst.msk [vmem:[#allocation2 + $0x8] sm:$0xff] %vm714_vm4, %v1084_v12  ;;  %843 = vrot.lane.b32.xlu0 %v3563_v40, %s2544_s11 }
 0x135   : > { %1303 = vst.msk [vmem:[#allocation2 + $0x8] sm:$0xfe] %vm1302_vm10, %v3556_v34  ;;  %v1528_v34 = vld [vmem:[#allocation2 + $0x70] sm:$0xff]  ;;  %2454 = vmatpush.msrb.mxu3 %v3499_v1 }
 0x136   : > { %904 = vst.msk [vmem:[#allocation2 + $0x228] sm:$0x7f] %vm883_vm7, %v834_v8  ;;  %v1540_v8 = vld [vmem:[#allocation2 + $0xd0] sm:$0xff] }
 0x137   : > { %2455 = vmatpush.msrb.mxu3 %v3511_v15 }
 0x138   : > { %1351 = vrot.lane.b32.xlu2 %v2682_v50, %s2545_s12 }
 0x139   : > { %2400 = vmatmul.msk.f32.gmra.mxu2 %vm391_vm0, %v1528_v34  ;;  %2456 = vmatpush.msrb.mxu3 %v3527_v37  ;;  %v1534_v37 = vld [vmem:[#allocation2 + $0xa0] sm:$0xff] }
 0x13a   : > { %v3667_v24 = vpop.permute.xlu2 %1218  ;;  %936 = vrot.lane.b32.xlu1 %v3471_v35, %s2545_s12  ;;  %v284_v35 = vld [vmem:[%s2595_s30 + $0xf8] sm:$0xff] }
 0x13b   : > { %v1334_v18 = vpop.permute.xlu1 %1333  ;;  %2457 = vmatpush.msrb.mxu3 %v3534_v52  ;;  %v320_v52 = vmul.f32 %v2495_v54, %v284_v35 }
 0x13c   : > { %1423 = vst.msk [vmem:[#allocation2 + $0x8] sm:$0xff] %vm1016_vm11, %v1334_v18  ;;  %v919_v7 = vpop.permute.xlu0 %918  ;;  %1230 = vrot.lane.b32.xlu0 %v3518_v47, %s2544_s11 }
 0x13d   : > { %1015 = vst.msk [vmem:[#allocation2] sm:$0xfe] %vm1014_vm9, %v919_v7  ;;  %2458 = vmatpush.msrb.mxu3 %v3559_v46  ;;  %v1543_v7 = vld [vmem:[#allocation2 + $0xe8] sm:$0xff] }
 0x13f   : > { %2459 = vmatpush.msrb.mxu3 %v3573_v57 }
 0x140   : > { %1103 = vrot.lane.b32.xlu2 %v2991_v48, %s2542_s10  ;;  %v356_v48 = vadd.f32 %v2496_v27, %v320_v52 }
 0x141   : > { %2401 = vmatmul.msk.f32.gmra.mxu2 %vm391_vm0, %v1531_v10  ;;  %2460 = vmatpush.msrb.mxu3 %v3588_v31  ;;  %v1537_v31 = vld [vmem:[#allocation2 + $0xb8] sm:$0xff] }
 0x142   : > { %v1092_v25 = vpop.permute.xlu2 %1091  ;;  %976 = vrot.lane.b32.xlu1 %v3620_v26, %s2545_s12  ;;  %v3722_v57 = vmax.f32 %v356_v48, 0.0 }
 0x143   : > { %v921_v39 = vpop.permute.xlu1 %920  ;;  %v1515_v2 = vld [vmem:[#allocation2 + $0x8] sm:$0xff]  ;;  %1184 = vst.msk [vmem:[#allocation2 + $0x68] sm:$0xff] %vm714_vm4, %v1092_v25  ;;  %2461 = vmatpush.msrb.mxu3 %v3600_v19  ;;  %v1546_v25 = vld [vmem:[#allocation2 + $0x100] sm:$0xff] }
 0x144   : > { %v1215_v1 = vpop.permute.xlu0 %1214  ;;  %v1514_v50 = vld [vmem:[#allocation2] sm:$0xff]  ;;  %1871 = vmatmul.f32.vlgmr.msra.gmra.mxu1 %v1515_v2  ;;  %1017 = vst.msk [vmem:[#allocation2 + $0x18] sm:$0xff] %vm1016_vm11, %v921_v39  ;;  %845 = vrot.lane.b32.xlu0 %v3546_v3, %s2544_s11 }
 0x145   : > { %1304 = vst.msk [vmem:[#allocation2 + $0x20] sm:$0xff] %vm881_vm6, %v1215_v1  ;;  %1758 = vmatmul.f32.vlgmr.msra.gmra.mxu0 %v1514_v50  ;;  %2462 = vmatpush.msrb.mxu3 %v3608_v49 }
 0x146   : > { %1424 = vst.msk [vmem:[#allocation2 + $0x20] sm:$0xff] %vm1016_vm11, %v3635_v44 }
 0x147   : > { %1079 = vst.msk [vmem:[#allocation2 + $0x2f0] sm:$0xff] %vm391_vm0, %v3722_v57  ;;  %2463 = vmatpush.msrb.mxu3 %v3616_v45  ;;  %v4451_v45 = vld [vmem:[#allocation21_spill] sm:$0xff] }
 0x148   : > { %1353 = vrot.lane.b32.xlu2 %v2709_v4, %s2545_s12  ;;  %v3737_v4 = vrot.slane %v3688_v60, 7 }
 0x149   : > { %2402 = vmatmul.msk.f32.gmra.mxu2 %vm391_vm0, %v1534_v37  ;;  %v1549_v37 = vld [vmem:[#allocation2 + $0x118] sm:$0xff] }
 0x14a   : > { %v1342_v15 = vpop.permute.xlu2 %1341  ;;  %938 = vrot.lane.b32.xlu1 %v3269_v13, %s2545_s12  ;;  %v1520_v13 = vld [vmem:[#allocation2 + $0x30] sm:$0xff] }
 0x14b   : > { %v1217_v44 = vpop.permute.xlu1 %1216  ;;  %v1517_v11 = vld [vmem:[#allocation2 + $0x18] sm:$0xff] }
 0x14c   : > { %v1088_v43 = vpop.permute.xlu0 %1087  ;;  %1232 = vrot.lane.b32.xlu0 %v3304_v20, %s2544_s11 }
 0x14d   : > { %1182 = vst.msk [vmem:[#allocation2 + $0x38] sm:$0xff] %vm714_vm4, %v1088_v43  ;;  %v1518_v46 = vld [vmem:[#allocation2 + $0x20] sm:$0xff]  ;;  %1761 = vmatmul.f32.gmra.mxu0 %v1517_v11 }
 0x14e   : > { %1305 = vst.msk [vmem:[#allocation2 + $0x38] sm:$0xfe] %vm1302_vm10, %v1217_v44  ;;  %1874 = vmatmul.f32.gmra.mxu1 %v1518_v46  ;;  %v1552_v44 = vld [vmem:[#allocation2 + $0x130] sm:$0xff] }
 0x150   : > { %1105 = vrot.lane.b32.xlu2 %v4451_v45, %s2542_s10 }
 0x151   : > { %2403 = vmatmul.msk.f32.gmra.mxu2 %vm391_vm0, %v1537_v31 }
 0x152   : > { %v1094_v19 = vpop.permute.xlu2 %1093  ;;  %978 = vrot.lane.b32.xlu1 %v3737_v4, %s2545_s12 }
 0x153   : > { %v1090_v12 = vpop.permute.xlu1 %1089  ;;  %1185 = vst.msk [vmem:[#allocation2 + $0x80] sm:$0x7f] %vm1180_vm8, %v1094_v19  ;;  %v1561_v19 = vld [vmem:[#allocation2 + $0x178] sm:$0xff] }
 0x154   : > { %v1338_v49 = vpop.permute.xlu0 %1337  ;;  %1183 = vst.msk [vmem:[#allocation2 + $0x50] sm:$0x7f] %vm1180_vm8, %v1090_v12  ;;  %847 = vrot.lane.b32.xlu0 %v3680_v28, %s2544_s11 }
 0x155   : > { %1425 = vst.msk [vmem:[#allocation2 + $0x38] sm:$0xff] %vm1016_vm11, %v1338_v49  ;;  %1764 = vmatmul.f32.gmra.mxu0 %v1520_v13  ;;  %v4454_v13 = vld [vmem:[#allocation8_spill] sm:$0xff] }
 0x156   : > { %1306 = vst.msk [vmem:[#allocation2 + $0x50] sm:$0xff] %vm881_vm6, %v3667_v24  ;;  %v916_v24 = vrot.slane %v3722_v57, 7 }
 0x158   : > { %1355 = vrot.lane.b32.xlu2 %v4443_v38, %s2545_s12 }
 0x159   : > { %2404 = vmatmul.msk.f32.gmra.mxu2 %vm391_vm0, %v1540_v8 }
 0x15a   : > { %v1344_v51 = vpop.permute.xlu2 %1343  ;;  %940 = vrot.lane.b32.xlu1 %v3518_v47, %s2545_s12  ;;  %v3764_v47 = vsel %vm516_vm5, %v3737_v4, %v916_v24  ;;  %v4455_v24 = vld [vmem:[#allocation22_spill] sm:$0xff] }
 0x15b   : > { %v1340_v23 = vpop.permute.xlu1 %1339 }
 0x15c   : > { %v925_v34 = vpop.permute.xlu0 %924  ;;  %1426 = vst.msk [vmem:[#allocation2 + $0x50] sm:$0xff] %vm1016_vm11, %v1340_v23  ;;  %v1521_v22 = vld [vmem:[#allocation2 + $0x38] sm:$0xff]  ;;  %1234 = vrot.lane.b32.xlu0 %v3525_v42, %s2544_s11 }
 0x15d   : > { %1019 = vst.msk [vmem:[#allocation2 + $0x48] sm:$0xff] %vm1016_vm11, %v925_v34  ;;  %1877 = vmatmul.f32.gmra.mxu1 %v1521_v22 }
 0x160   : > { %1107 = vrot.lane.b32.xlu2 %v3025_v61, %s2542_s10 }
 0x161   : > { %2405 = vmatmul.msk.f32.gmra.mxu2 %vm391_vm0, %v1543_v7 }
 0x162   : > { %v1096_v18 = vpop.permute.xlu2 %1095  ;;  %980 = vrot.lane.b32.xlu1 %v3764_v47, %s2545_s12 }
 0x163   : > { %v927_v54 = vpop.permute.xlu1 %926  ;;  %v1524_v41 = vld [vmem:[#allocation2 + $0x50] sm:$0xff]  ;;  %1186 = vst.msk [vmem:[#allocation2 + $0x98] sm:$0xff] %vm714_vm4, %v1096_v18 }
 0x164   : > { %v1221_v27 = vpop.permute.xlu0 %1220  ;;  %v1523_v36 = vld [vmem:[#allocation2 + $0x48] sm:$0xff]  ;;  %1020 = vst.msk [vmem:[#allocation2 + $0x60] sm:$0xfe] %vm1014_vm9, %v927_v54  ;;  %849 = vrot.lane.b32.xlu0 %v3661_v59, %s2544_s11 }
 0x165   : > { %1307 = vst.msk [vmem:[#allocation2 + $0x68] sm:$0xfe] %vm1302_vm10, %v1221_v27  ;;  %1767 = vmatmul.f32.gmra.mxu0 %v1523_v36  ;;  %1880 = vmatmul.f32.gmra.mxu1 %v1524_v41  ;;  %v1567_v54 = vld [vmem:[#allocation2 + $0x1a8] sm:$0xff] }
 0x166   : > { %1427 = vst.msk [vmem:[#allocation2 + $0x68] sm:$0xff] %vm1016_vm11, %v1342_v15 }
 0x168   : > { %1357 = vrot.lane.b32.xlu2 %v2703_v62, %s2545_s12 }
 0x169   : > { %2406 = vmatmul.msk.f32.gmra.mxu2 %vm391_vm0, %v1546_v25 }
 0x16a   : > { %v1346_v38 = vpop.permute.xlu2 %1345  ;;  %942 = vrot.lane.b32.xlu1 %v3304_v20, %s2545_s12 }
 0x16b   : > { %v967_v10 = vpop.permute.xlu1 %966  ;;  %v1526_v1 = vld [vmem:[#allocation2 + $0x60] sm:$0xff] }
 0x16c   : > { %v836_v39 = vpop.permute.xlu0 %835  ;;  %1236 = vrot.lane.b32.xlu0 %v3230_v0, %s2544_s11 }
 0x16d   : > { %905 = vst.msk [vmem:[#allocation2 + $0x240] sm:$0xff] %vm881_vm6, %v836_v39  ;;  %v1527_v2 = vld [vmem:[#allocation2 + $0x68] sm:$0xff]  ;;  %1770 = vmatmul.f32.gmra.mxu0 %v1526_v1 }
 0x16e   : > { %1040 = vst.msk [vmem:[#allocation2 + $0x240] sm:$0xfe] %vm1014_vm9, %v967_v10  ;;  %1883 = vmatmul.f32.gmra.mxu1 %v1527_v2  ;;  %v1570_v10 = vld [vmem:[#allocation2 + $0x1c0] sm:$0xff] }
 0x170   : > { %1381 = vrot.lane.b32.xlu2 %v2820_v5, %s2545_s12 }
 0x171   : > { %2407 = vmatmul.msk.f32.gmra.mxu2 %vm391_vm0, %v1549_v37  ;;  %v1573_v37 = vld [vmem:[#allocation2 + $0x1d8] sm:$0xff] }
 0x172   : > { %v1098_v61 = vpop.permute.xlu2 %1097  ;;  %1260 = vrot.lane.b32.xlu1 %v3316_v17, %s2544_s11  ;;  %v1555_v17 = vld [vmem:[#allocation2 + $0x148] sm:$0xff] }
 0x173   : > { %v929_v50 = vpop.permute.xlu1 %928  ;;  %1187 = vst.msk [vmem:[#allocation2 + $0xb0] sm:$0x7f] %vm1180_vm8, %v1098_v61 }
 0x174   : > { %v1223_v35 = vpop.permute.xlu0 %1222  ;;  %1021 = vst.msk [vmem:[#allocation2 + $0x78] sm:$0xff] %vm1016_vm11, %v929_v50  ;;  %1131 = vrot.lane.b32.xlu0 %v3467_v30, %s2542_s10 }
 0x175   : > { %1308 = vst.msk [vmem:[#allocation2 + $0x80] sm:$0xff] %vm881_vm6, %v1223_v35  ;;  %v1586_v15 = vld [vmem:[#allocation2 + $0x240] sm:$0xff] }
 0x176   : > { %1428 = vst.msk [vmem:[#allocation2 + $0x80] sm:$0xff] %vm1016_vm11, %v1344_v51  ;;  %1830 = vmatmul.f32.vlgmr.msra.gmra.mxu3 %v1586_v15  ;;  %v1564_v51 = vld [vmem:[#allocation2 + $0x190] sm:$0xff] }
 0x177   : > { %2464 = vmatpush.msra.mxu3 %v3487_v63 }
 0x178   : > { %944 = vrot.lane.b32.xlu2 %v3525_v42, %s2545_s12 }
 0x179   : > { %2465 = vmatpush.msra.mxu3 %v3506_v9  ;;  %2408 = vmatmul.msk.f32.gmra.mxu2 %vm391_vm0, %v1552_v44 }
 0x17a   : > { %v1348_v62 = vpop.permute.xlu2 %1347  ;;  %1238 = vrot.lane.b32.xlu1 %v3577_v21, %s2544_s11 }
 0x17b   : > { %v969_v20 = vpop.permute.xlu1 %968  ;;  %2466 = vmatpush.msra.mxu3 %v3529_v56  ;;  %v1529_v5 = vld [vmem:[#allocation2 + $0x78] sm:$0xff] }
 0x17c   : > { %v838_v52 = vpop.permute.xlu0 %837  ;;  %1773 = vmatmul.f32.gmra.mxu0 %v1529_v5  ;;  %1109 = vrot.lane.b32.xlu0 %v3014_v58, %s2542_s10  ;;  %v4460_v5 = vld [vmem:[#allocation12_spill] sm:$0xff] }
 0x17d   : > { %906 = vst.msk [vmem:[#allocation2 + $0x258] sm:$0x7f] %vm883_vm7, %v838_v52  ;;  %v1530_v63 = vld [vmem:[#allocation2 + $0x80] sm:$0xff]  ;;  %2467 = vmatpush.msra.mxu3 %v3542_v55 }
 0x17e   : > { %1041 = vst.msk [vmem:[#allocation2 + $0x258] sm:$0xff] %vm1016_vm11, %v969_v20  ;;  %1886 = vmatmul.f32.gmra.mxu1 %v1530_v63  ;;  %v1558_v55 = vld [vmem:[#allocation2 + $0x160] sm:$0xff] }
 0x180   : > { %1262 = vrot.lane.b32.xlu2 %v3482_v6, %s2544_s11 }
 0x181   : > { %2409 = vmatmul.msk.f32.gmra.mxu2 %vm391_vm0, %v1555_v17 }
 0x182   : > { %v1100_v56 = vpop.permute.xlu2 %1099  ;;  %1133 = vrot.lane.b32.xlu1 %v3448_v33, %s2542_s10  ;;  %v4452_v33 = vld [vmem:[#allocation23_spill] sm:$0xff] }
 0x183   : > { %v931_v9 = vpop.permute.xlu1 %930  ;;  %1188 = vst.msk [vmem:[#allocation2 + $0xc8] sm:$0xff] %vm714_vm4, %v1100_v56 }
 0x184   : > { %v1225_v30 = vpop.permute.xlu0 %1224  ;;  %1022 = vst.msk [vmem:[#allocation2 + $0x90] sm:$0xfe] %vm1014_vm9, %v931_v9  ;;  %1359 = vrot.lane.b32.xlu0 %v4445_v29, %s2545_s12  ;;  %v4453_v29 = vld [vmem:[#allocation19_spill] sm:$0xff] }
 0x185   : > { %1309 = vst.msk [vmem:[#allocation2 + $0x98] sm:$0xfe] %vm1302_vm10, %v1225_v30  ;;  %v1589_v43 = vld [vmem:[#allocation2 + $0x258] sm:$0xff] }
 0x186   : > { %1429 = vst.msk [vmem:[#allocation2 + $0x98] sm:$0xff] %vm1016_vm11, %v1346_v38  ;;  %1833 = vmatmul.f32.gmra.mxu3 %v1589_v43  ;;  %v1579_v43 = vld [vmem:[#allocation2 + $0x208] sm:$0xff] }
 0x188   : > { %1240 = vrot.lane.b32.xlu2 %v3328_v32, %s2544_s11 }
 0x189   : > { %2410 = vmatmul.msk.f32.gmra.mxu2 %vm391_vm0, %v1558_v55  ;;  %v4461_v55 = vld [vmem:[#allocation36_spill] sm:$0xff] }
 0x18a   : > { %v1350_v58 = vpop.permute.xlu2 %1349  ;;  %1111 = vrot.lane.b32.xlu1 %v4452_v33, %s2542_s10 }
 0x18b   : > { %v971_v42 = vpop.permute.xlu1 %970  ;;  %v1532_v11 = vld [vmem:[#allocation2 + $0x90] sm:$0xff] }
 0x18c   : > { %v840_v46 = vpop.permute.xlu0 %839  ;;  %1776 = vmatmul.f32.gmra.mxu0 %v1532_v11  ;;  %1383 = vrot.lane.b32.xlu0 %v4453_v29, %s2545_s12  ;;  %v3922_v11 = vrot.slane %v3722_v57, 1 }
 0x18d   : > { %907 = vst.msk [vmem:[#allocation2 + $0x270] sm:$0xff] %vm881_vm6, %v840_v46  ;;  %v1533_v48 = vld [vmem:[#allocation2 + $0x98] sm:$0xff] }
 0x18e   : > { %1042 = vst.msk [vmem:[#allocation2 + $0x270] sm:$0xfe] %vm1014_vm9, %v971_v42  ;;  %1889 = vmatmul.f32.gmra.mxu1 %v1533_v48  ;;  %v4462_v46 = vld [vmem:[#allocation25_spill] sm:$0xff]  ;;  %v1080_v48 = vrot.slane %v3688_v60, 1 }
 0x18f   : > { %1513 = vst.msk [vmem:[#allocation2 + $0x2c8] sm:$0x7f] %vm1484_vm2, %v3922_v11 }
 0x190   : > { %1135 = vrot.lane.b32.xlu2 %v3563_v40, %s2542_s10 }
 0x191   : > { %2411 = vmatmul.msk.f32.gmra.mxu2 %vm391_vm0, %v1561_v19 }
 0x192   : > { %v1102_v6 = vpop.permute.xlu2 %1101  ;;  %1361 = vrot.lane.b32.xlu1 %v4454_v13, %s2545_s12 }
 0x193   : > { %v933_v31 = vpop.permute.xlu1 %932  ;;  %1189 = vst.msk [vmem:[#allocation2 + $0xe0] sm:$0x7f] %vm1180_vm8, %v1102_v6  ;;  %v1582_v6 = vld [vmem:[#allocation2 + $0x220] sm:$0xff] }
 0x194   : > { %v1227_v12 = vpop.permute.xlu0 %1226  ;;  %1023 = vst.msk [vmem:[#allocation2 + $0xa8] sm:$0xff] %vm1016_vm11, %v933_v31  ;;  %946 = vrot.lane.b32.xlu0 %v3230_v0, %s2545_s12 }
 0x195   : > { %1310 = vst.msk [vmem:[#allocation2 + $0xb0] sm:$0xff] %vm881_vm6, %v1227_v12  ;;  %v1592_v49 = vld [vmem:[#allocation2 + $0x270] sm:$0xff] }
 0x196   : > { %1430 = vst.msk [vmem:[#allocation2 + $0xb0] sm:$0xff] %vm1016_vm11, %v1348_v62  ;;  %1836 = vmatmul.f32.gmra.mxu3 %v1592_v49  ;;  %v1576_v62 = vld [vmem:[#allocation2 + $0x1f0] sm:$0xff] }
 0x198   : > { %1113 = vrot.lane.b32.xlu2 %v4455_v24, %s2542_s10  ;;  %v4463_v24 = vld [vmem:[#allocation11_spill] sm:$0xff] }
 0x199   : > { %2412 = vmatmul.msk.f32.gmra.mxu2 %vm391_vm0, %v1564_v51 }
 0x19a   : > { %v1352_v45 = vpop.permute.xlu2 %1351  ;;  %v3841_v40 = vpop.f32.mrf.mxu2  ;;  %1385 = vrot.lane.b32.xlu1 %v2851_v16, %s2545_s12  ;;  %v4456_v16 = vld [vmem:[#allocation7_spill] sm:$0xff] }
 0x19b   : > { %v973_v8 = vpop.permute.xlu1 %972  ;;  %v1535_v22 = vld [vmem:[#allocation2 + $0xa8] sm:$0xff] }
 0x19c   : > { %v842_v23 = vpop.permute.xlu0 %841  ;;  %1779 = vmatmul.f32.gmra.mxu0 %v1535_v22  ;;  %1264 = vrot.lane.b32.xlu0 %v3391_v53, %s2544_s11  ;;  %v4457_v53 = vld [vmem:[#allocation6_spill] sm:$0xff] }
 0x19d   : > { %908 = vst.msk [vmem:[#allocation2 + $0x288] sm:$0x7f] %vm883_vm7, %v842_v23  ;;  %v1536_v34 = vld [vmem:[#allocation2 + $0xb0] sm:$0xff] }
 0x19e   : > { %1043 = vst.msk [vmem:[#allocation2 + $0x288] sm:$0xff] %vm1016_vm11, %v973_v8  ;;  %1892 = vmatmul.f32.gmra.mxu1 %v1536_v34 }
 0x1a0   : > { %1363 = vrot.lane.b32.xlu2 %v4456_v16, %s2545_s12 }
 0x1a1   : > { %2413 = vmatmul.msk.f32.gmra.mxu2 %vm391_vm0, %v1567_v54 }
 0x1a2   : > { %v1104_v0 = vpop.permute.xlu2 %1103  ;;  %948 = vrot.lane.b32.xlu1 %v3577_v21, %s2545_s12 }
 0x1a3   : > { %v935_v18 = vpop.permute.xlu1 %934  ;;  %1190 = vst.msk [vmem:[#allocation2 + $0xf8] sm:$0xff] %vm714_vm4, %v1104_v0  ;;  %v3860_v27 = vpop.f32.mrf.mxu2 }
 0x1a4   : > { %v1229_v41 = vpop.permute.xlu0 %1228  ;;  %1024 = vst.msk [vmem:[#allocation2 + $0xc0] sm:$0xfe] %vm1014_vm9, %v935_v18  ;;  %1242 = vrot.lane.b32.xlu0 %v4457_v53, %s2544_s11 }
 0x1a5   : > { %1311 = vst.msk [vmem:[#allocation2 + $0xc8] sm:$0xfe] %vm1302_vm10, %v1229_v41  ;;  %v1595_v7 = vld [vmem:[#allocation2 + $0x288] sm:$0xff] }
 0x1a6   : > { %1431 = vst.msk [vmem:[#allocation2 + $0xc8] sm:$0xff] %vm1016_vm11, %v1350_v58  ;;  %1839 = vmatmul.f32.gmra.mxu3 %v1595_v7 }
 0x1a8   : > { %1387 = vrot.lane.b32.xlu2 %v4449_v14, %s2545_s12  ;;  %v4459_v14 = vld [vmem:[#allocation26_spill] sm:$0xff] }
 0x1a9   : > { %2414 = vmatmul.msk.f32.gmra.mxu2 %vm391_vm0, %v1570_v10 }
 0x1aa   : > { %v1354_v36 = vpop.permute.xlu2 %1353  ;;  %1266 = vrot.lane.b32.xlu1 %v3620_v26, %s2544_s11 }
 0x1ab   : > { %v975_v38 = vpop.permute.xlu1 %974  ;;  %v1538_v2 = vld [vmem:[#allocation2 + $0xc0] sm:$0xff] }
 0x1ac   : > { %v844_v25 = vpop.permute.xlu0 %843  ;;  %1782 = vmatmul.f32.gmra.mxu0 %v1538_v2  ;;  %1137 = vrot.lane.b32.xlu0 %v3546_v3, %s2542_s10  ;;  %v3872_v50 = vpop.f32.mrf.mxu2  ;;  %v4458_v3 = vld [vmem:[#allocation35_spill] sm:$0xff] }
 0x1ad   : > { %909 = vst.msk [vmem:[#allocation2 + $0x2a0] sm:$0xff] %vm881_vm6, %v844_v25  ;;  %v1539_v39 = vld [vmem:[#allocation2 + $0xc8] sm:$0xff] }
 0x1ae   : > { %1044 = vst.msk [vmem:[#allocation2 + $0x2a0] sm:$0xfe] %vm1014_vm9, %v975_v38  ;;  %1895 = vmatmul.f32.gmra.mxu1 %v1539_v39 }
 0x1b0   : > { %950 = vrot.lane.b32.xlu2 %v3328_v32, %s2545_s12 }
 0x1b1   : > { %2415 = vmatmul.msk.f32.gmra.mxu2 %vm391_vm0, %v1573_v37 }
 0x1b2   : > { %v1106_v21 = vpop.permute.xlu2 %1105  ;;  %1244 = vrot.lane.b32.xlu1 %v4458_v3, %s2544_s11 }
 0x1b3   : > { %v937_v1 = vpop.permute.xlu1 %936  ;;  %1191 = vst.msk [vmem:[#allocation2 + $0x110] sm:$0x7f] %vm1180_vm8, %v1106_v21  ;;  %v1588_v21 = vld [vmem:[#allocation2 + $0x250] sm:$0xff] }
 0x1b4   : > { %v1231_v61 = vpop.permute.xlu0 %1230  ;;  %1025 = vst.msk [vmem:[#allocation2 + $0xd8] sm:$0xff] %vm1016_vm11, %v937_v1  ;;  %1115 = vrot.lane.b32.xlu0 %v4459_v14, %s2542_s10  ;;  %v3886_v44 = vpop.f32.mrf.mxu2 }
 0x1b5   : > { %1312 = vst.msk [vmem:[#allocation2 + $0xe0] sm:$0xff] %vm881_vm6, %v1231_v61  ;;  %v1598_v35 = vld [vmem:[#allocation2 + $0x2a0] sm:$0xff] }
 0x1b6   : > { %1432 = vst.msk [vmem:[#allocation2 + $0xe0] sm:$0xff] %vm1016_vm11, %v1352_v45  ;;  %1842 = vmatmul.f32.gmra.mxu3 %v1598_v35 }
 0x1b8   : > { %1268 = vrot.lane.b32.xlu2 %v3737_v4, %s2544_s11 }
 0x1b9   : > { %2416 = vmatmul.msk.f32.gmra.mxu2 %vm391_vm0, %v1576_v62  ;;  %v4465_v62 = vld [vmem:[#allocation10_spill] sm:$0xff] }
 0x1ba   : > { %v3884_v26 = vpop.permute.xlu2 %1355  ;;  %1139 = vrot.lane.b32.xlu1 %v3680_v28, %s2542_s10 }
 0x1bb   : > { %v977_v15 = vpop.permute.xlu1 %976  ;;  %v1541_v32 = vld [vmem:[#allocation2 + $0xd8] sm:$0xff] }
 0x1bc   : > { %v846_v20 = vpop.permute.xlu0 %845  ;;  %1785 = vmatmul.f32.gmra.mxu0 %v1541_v32  ;;  %1365 = vrot.lane.b32.xlu0 %v4460_v5, %s2545_s12  ;;  %v3905_v58 = vpop.f32.mrf.mxu2 }
 0x1bd   : > { %910 = vst.msk [vmem:[#allocation2 + $0x2b8] sm:$0x7f] %vm883_vm7, %v846_v20  ;;  %v1542_v52 = vld [vmem:[#allocation2 + $0xe0] sm:$0xff] }
 0x1be   : > { %1045 = vst.msk [vmem:[#allocation2 + $0x2b8] sm:$0xff] %vm1016_vm11, %v977_v15  ;;  %1898 = vmatmul.f32.gmra.mxu1 %v1542_v52  ;;  %v4466_v52 = vld [vmem:[#allocation32_spill] sm:$0xff] }
 0x1c0   : > { %1246 = vrot.lane.b32.xlu2 %v4461_v55, %s2544_s11 }
 0x1c1   : > { %v1872_v63 = vpop.f32.mrf.mxu1  ;;  %2417 = vmatmul.msk.f32.gmra.mxu2 %vm391_vm0, %v1579_v43 }
 0x1c2   : > { %v1759_v56 = vpop.f32.mrf.mxu0  ;;  %v1108_v17 = vpop.permute.xlu2 %1107  ;;  %1117 = vrot.lane.b32.xlu1 %v4462_v46, %s2542_s10  ;;  %v4467_v46 = vld [vmem:[#allocation38_spill] sm:$0xff] }
 0x1c3   : > { %v1873_v9 = vadd.f32 %v1872_v63, %v1759_v56  ;;  %v939_v30 = vpop.permute.xlu1 %938  ;;  %1192 = vst.msk [vmem:[#allocation2 + $0x128] sm:$0xff] %vm714_vm4, %v1108_v17 }
 0x1c4   : > { %v1233_v4 = vpop.permute.xlu0 %1232  ;;  %1026 = vst.msk [vmem:[#allocation2 + $0xf0] sm:$0xfe] %vm1014_vm9, %v939_v30  ;;  %1389 = vrot.lane.b32.xlu0 %v3688_v60, %s2545_s12  ;;  %v3929_v45 = vpop.f32.mrf.mxu2  ;;  %v3935_v60 = vsel %vm745_vm1, %v1080_v48, %v3922_v11  ;;  %v4468_v48 = vld [vmem:[#allocation28_spill] sm:$0xff] }
 0x1c5   : > { %v1986_v28 = vadd.f32 %v3841_v40, %v1873_v9  ;;  %1313 = vst.msk [vmem:[#allocation2 + $0xf8] sm:$0xfe] %vm1302_vm10, %v1233_v4  ;;  %v1601_v42 = vld [vmem:[#allocation2 + $0x2b8] sm:$0xff] }
 0x1c6   : > { %1433 = vst.msk [vmem:[#allocation2 + $0xf8] sm:$0xff] %vm1016_vm11, %v1354_v36  ;;  %1845 = vmatmul.f32.gmra.mxu3 %v1601_v42 }
 0x1c7   : > { %2081 = vst.msk [vmem:[%s3902_s20] sm:$0xff] %vm391_vm0, %v1986_v28  ;;  %v2182_v8 = vmul.f32 %v1986_v28, %v1986_v28  ;;  %v2113_v34 = vsel %vm391_vm0, %v1986_v28, 0.0 }
 0x1c8   : > { %1512 = vst.msk [vmem:[#allocation2 + $0x2b0] sm:$0xff] %vm391_vm0, %v3935_v60  ;;  %1141 = vrot.lane.b32.xlu2 %v3661_v59, %s2542_s10 }
 0x1c9   : > { %2418 = vmatmul.msk.f32.gmra.mxu2 %vm391_vm0, %v1582_v6  ;;  %v2214_v18 = vsel %vm391_vm0, %v2182_v8, 0.0 }
 0x1ca   : > { %v3924_v29 = vpop.permute.xlu2 %1357  ;;  %v1762_v31 = vpop.f32.mrf.mxu0  ;;  %1367 = vrot.lane.b32.xlu1 %v4463_v24, %s2545_s12 }
 0x1cb   : > { %v1875_v33 = vpop.f32.mrf.mxu1  ;;  %v979_v49 = vpop.permute.xlu1 %978  ;;  %v1544_v23 = vld [vmem:[#allocation2 + $0xf0] sm:$0xff] }
 0x1cc   : > { %v848_v19 = vpop.permute.xlu0 %847  ;;  %v1876_v12 = vadd.f32 %v1875_v33, %v1762_v31  ;;  %1788 = vmatmul.f32.gmra.mxu0 %v1544_v23  ;;  %952 = vrot.lane.b32.xlu0 %v4457_v53, %s2545_s12  ;;  %v3955_v38 = vpop.f32.mrf.mxu2  ;;  %v4464_v53 = vld [vmem:[#allocation30_spill] sm:$0xff] }
 0x1cd   : > { %911 = vst.msk [vmem:[#allocation2 + $0x2d0] sm:$0xff] %vm881_vm6, %v848_v19  ;;  %v1545_v13 = vld [vmem:[#allocation2 + $0xf8] sm:$0xff] }
 0x1ce   : > { %1046 = vst.msk [vmem:[#allocation2 + $0x2d0] sm:$0xfe] %vm1014_vm9, %v979_v49  ;;  %1901 = vmatmul.f32.gmra.mxu1 %v1545_v13  ;;  %v1989_v51 = vadd.f32 %v3860_v27, %v1876_v12  ;;  %v1585_v27 = vld [vmem:[#allocation2 + $0x238] sm:$0xff] }
 0x1d0   : > { %2082 = vst.msk [vmem:[%s3902_s20 + $0x8] sm:$0xff] %vm391_vm0, %v1989_v51  ;;  %v2114_v22 = vsel %vm391_vm0, %v1989_v51, 0.0  ;;  %v2183_v40 = vmul.f32 %v1989_v51, %v1989_v51  ;;  %1119 = vrot.lane.b32.xlu2 %v4464_v53, %s2542_s10 }
 0x1d1   : > { %v2115_v0 = vadd.f32 %v2114_v22, %v2113_v34  ;;  %2419 = vmatmul.msk.f32.gmra.mxu2 %vm391_vm0, %v1585_v27  ;;  %v4469_v22 = vld [vmem:[#allocation15_spill] sm:$0xff]  ;;  %v4471_v27 = vld [vmem:[#allocation29_spill] sm:$0xff] }
 0x1d2   : > { %v2215_v54 = vsel %vm391_vm0, %v2183_v40, 0.0  ;;  %v3952_v41 = vpop.permute.xlu2 %1381  ;;  %1391 = vrot.lane.b32.xlu1 %v3722_v57, %s2545_s12  ;;  %v1765_v10 = vpop.f32.mrf.mxu0 }
 0x1d3   : > { %v2216_v7 = vadd.f32 %v2215_v54, %v2214_v18  ;;  %v941_v36 = vpop.permute.xlu1 %940  ;;  %v1591_v54 = vld [vmem:[#allocation2 + $0x268] sm:$0xff] }
 0x1d4   : > { %v1235_v16 = vpop.permute.xlu0 %1234  ;;  %1027 = vst.msk [vmem:[#allocation2 + $0x108] sm:$0xff] %vm1016_vm11, %v941_v36  ;;  %1270 = vrot.lane.b32.xlu0 %v3764_v47, %s2544_s11  ;;  %v3970_v14 = vpop.f32.mrf.mxu2 }
 0x1d5   : > { %1314 = vst.msk [vmem:[#allocation2 + $0x110] sm:$0xff] %vm881_vm6, %v1235_v16  ;;  %v1604_v59 = vld [vmem:[#allocation2 + $0x2d0] sm:$0xff] }
 0x1d6   : > { %1434 = vst.msk [vmem:[#allocation2 + $0x110] sm:$0xff] %vm1016_vm11, %v3884_v26  ;;  %1848 = vmatmul.f32.gmra.mxu3 %v1604_v59 }
 0x1d8   : > { %1369 = vrot.lane.b32.xlu2 %v4465_v62, %s2545_s12 }
 0x1d9   : > { %2420 = vmatmul.msk.f32.gmra.mxu2 %vm391_vm0, %v1588_v21 }
 0x1da   : > { %v1878_v25 = vpop.f32.mrf.mxu1  ;;  %v945_v2 = vpop.permute.xlu2 %944  ;;  %954 = vrot.lane.b32.xlu1 %v4458_v3, %s2545_s12 }
 0x1db   : > { %v1879_v39 = vadd.f32 %v1878_v25, %v1765_v10  ;;  %1029 = vst.msk [vmem:[#allocation2 + $0x138] sm:$0xff] %vm1016_vm11, %v945_v2  ;;  %v981_v37 = vpop.permute.xlu1 %980  ;;  %v1547_v57 = vld [vmem:[#allocation2 + $0x108] sm:$0xff] }
 0x1dc   : > { %v850_v1 = vpop.permute.xlu0 %849  ;;  %1791 = vmatmul.f32.gmra.mxu0 %v1547_v57  ;;  %1248 = vrot.lane.b32.xlu0 %v4466_v52, %s2544_s11  ;;  %v3988_v4 = vpop.f32.mrf.mxu2 }
 0x1dd   : > { %v1992_v61 = vadd.f32 %v3872_v50, %v1879_v39  ;;  %912 = vst.msk [vmem:[#allocation2 + $0x2e8] sm:$0x7f] %vm883_vm7, %v850_v1  ;;  %v1548_v35 = vld [vmem:[#allocation2 + $0x110] sm:$0xff] }
 0x1de   : > { %1047 = vst.msk [vmem:[#allocation2 + $0x2e8] sm:$0xff] %vm1016_vm11, %v981_v37  ;;  %1904 = vmatmul.f32.gmra.mxu1 %v1548_v35  ;;  %v4472_v37 = vld [vmem:[#allocation27_spill] sm:$0xff]  ;;  %v4473_v35 = vld [vmem:[#allocation34_spill] sm:$0xff] }
 0x1df   : > { %2083 = vst.msk [vmem:[%s3902_s20 + $0x10] sm:$0xff] %vm391_vm0, %v1992_v61  ;;  %v2116_v47 = vsel %vm391_vm0, %v1992_v61, 0.0  ;;  %v2184_v26 = vmul.f32 %v1992_v61, %v1992_v61 }
 0x1e0   : > { %v2117_v15 = vadd.f32 %v2116_v47, %v2115_v0  ;;  %1250 = vrot.lane.b32.xlu2 %v4467_v46, %s2544_s11  ;;  %v4474_v47 = vld [vmem:[#allocation14_spill] sm:$0xff] }
 0x1e1   : > { %v2217_v50 = vsel %vm391_vm0, %v2184_v26, 0.0  ;;  %2421 = vmatmul.msk.f32.gmra.mxu2 %vm391_vm0, %v1591_v54 }
 0x1e2   : > { %v2218_v20 = vadd.f32 %v2217_v50, %v2216_v7  ;;  %v1768_v32 = vpop.f32.mrf.mxu0  ;;  %v1881_v63 = vpop.f32.mrf.mxu1  ;;  %1121 = vrot.lane.b32.xlu1 %v4468_v48, %s2542_s10  ;;  %v1553_v7 = vld [vmem:[#allocation2 + $0x138] sm:$0xff] }
 0x1e3   : > { %v1882_v5 = vadd.f32 %v1881_v63, %v1768_v32  ;;  %v3984_v56 = vpop.permute.xlu2 %1262  ;;  %v943_v30 = vpop.permute.xlu1 %942  ;;  %v4475_v63 = vld [vmem:[#allocation13_spill] sm:$0xff] }
 0x1e4   : > { %v1237_v9 = vpop.permute.xlu0 %1236  ;;  %1028 = vst.msk [vmem:[#allocation2 + $0x120] sm:$0xfe] %vm1014_vm9, %v943_v30  ;;  %1143 = vrot.lane.b32.xlu0 %v3935_v60, %s2542_s10  ;;  %v4006_v8 = vpop.f32.mrf.mxu2 }
 0x1e5   : > { %v1995_v17 = vadd.f32 %v3886_v44, %v1882_v5  ;;  %1315 = vst.msk [vmem:[#allocation2 + $0x128] sm:$0xfe] %vm1302_vm10, %v1237_v9  ;;  %v1607_v43 = vld [vmem:[#allocation2 + $0x2e8] sm:$0xff]  ;;  %v4476_v5 = vld [vmem:[#allocation40_spill] sm:$0xff] }
 0x1e6   : > { %1435 = vst.msk [vmem:[#allocation2 + $0x128] sm:$0xff] %vm1016_vm11, %v3924_v29  ;;  %1851 = vmatmul.f32.gmra.mxu3 %v1607_v43 }
 0x1e7   : > { %2084 = vst.msk [vmem:[%s3902_s20 + $0x18] sm:$0xff] %vm391_vm0, %v1995_v17  ;;  %v2118_v3 = vsel %vm391_vm0, %v1995_v17, 0.0  ;;  %v2185_v28 = vmul.f32 %v1995_v17, %v1995_v17 }
 0x1e8   : > { %v2119_v42 = vadd.f32 %v2118_v3, %v2117_v15  ;;  %1145 = vrot.lane.b32.xlu2 %v3922_v11, %s2542_s10 }
 0x1e9   : > { %v2219_v44 = vsel %vm391_vm0, %v2185_v28, 0.0 }
 0x1ea   : > { %v2220_v33 = vadd.f32 %v2219_v44, %v2218_v20  ;;  %v1771_v31 = vpop.f32.mrf.mxu0  ;;  %1371 = vrot.lane.b32.xlu1 %v4469_v22, %s2545_s12  ;;  %v1594_v20 = vld [vmem:[#allocation2 + $0x280] sm:$0xff] }
 0x1eb   : > { %v1884_v29 = vpop.f32.mrf.mxu1  ;;  %v4003_v6 = vpop.permute.xlu2 %1240  ;;  %v1550_v60 = vld [vmem:[#allocation2 + $0x120] sm:$0xff]  ;;  %2422 = vmatmul.msk.f32.gmra.mxu2 %vm391_vm0, %v1594_v20 }
 0x1ec   : > { %v1132_v19 = vpop.permute.xlu0 %1131  ;;  %v1885_v12 = vadd.f32 %v1884_v29, %v1771_v31  ;;  %v1261_v49 = vpop.permute.xlu1 %1260  ;;  %1794 = vmatmul.f32.gmra.mxu0 %v1550_v60  ;;  %956 = vrot.lane.b32.xlu0 %v4461_v55, %s2545_s12  ;;  %v4470_v55 = vld [vmem:[#allocation33_spill] sm:$0xff] }
 0x1ed   : > { %1204 = vst.msk [vmem:[#allocation2 + $0x248] sm:$0xff] %vm714_vm4, %v1132_v19  ;;  %v1551_v13 = vld [vmem:[#allocation2 + $0x128] sm:$0xff]  ;;  %v4024_v11 = vpop.f32.mrf.mxu2 }
 0x1ee   : > { %1327 = vst.msk [vmem:[#allocation2 + $0x248] sm:$0xfe] %vm1302_vm10, %v1261_v49  ;;  %1907 = vmatmul.f32.gmra.mxu1 %v1551_v13  ;;  %v1998_v51 = vadd.f32 %v3905_v58, %v1885_v12 }
 0x1ef   : > { %1447 = vst.msk [vmem:[#allocation2 + $0x248] sm:$0xff] %vm1016_vm11, %v3952_v41 }
 0x1f0   : > { %2085 = vst.msk [vmem:[%s3902_s20 + $0x20] sm:$0xff] %vm391_vm0, %v1998_v51  ;;  %v2120_v23 = vsel %vm391_vm0, %v1998_v51, 0.0  ;;  %v2186_v34 = vmul.f32 %v1998_v51, %v1998_v51  ;;  %958 = vrot.lane.b32.xlu2 %v4466_v52, %s2545_s12 }
 0x1f1   : > { %v2121_v40 = vadd.f32 %v2120_v23, %v2119_v42  ;;  %v4479_v23 = vld [vmem:[#allocation41_spill] sm:$0xff] }
 0x1f2   : > { %v2221_v58 = vsel %vm391_vm0, %v2186_v34, 0.0  ;;  %1252 = vrot.lane.b32.xlu1 %v4470_v55, %s2544_s11  ;;  %v4480_v34 = vld [vmem:[#allocation37_spill] sm:$0xff] }
 0x1f3   : > { %v1136_v24 = vpop.permute.xlu2 %1135  ;;  %v2222_v0 = vadd.f32 %v2221_v58, %v2220_v33  ;;  %v4477_v33 = vld [vmem:[#allocation17_spill] sm:$0xff] }
 0x1f4   : > { %1206 = vst.msk [vmem:[#allocation2 + $0x278] sm:$0xff] %vm714_vm4, %v1136_v24  ;;  %v1110_v18 = vpop.permute.xlu0 %1109  ;;  %v1239_v41 = vpop.permute.xlu1 %1238  ;;  %1797 = vmatmul.f32.gmra.mxu0 %v1553_v7  ;;  %1123 = vrot.lane.b32.xlu0 %v4471_v27, %s2542_s10 }
 0x1f5   : > { %1193 = vst.msk [vmem:[#allocation2 + $0x140] sm:$0x7f] %vm1180_vm8, %v1110_v18  ;;  %v4036_v2 = vpop.f32.mrf.mxu2 }
 0x1f6   : > { %1316 = vst.msk [vmem:[#allocation2 + $0x140] sm:$0xff] %vm881_vm6, %v1239_v41  ;;  %v1587_v16 = vld [vmem:[#allocation2 + $0x248] sm:$0xff] }
 0x1f7   : > { %1943 = vmatmul.f32.vlgmr.msrb.gmra.mxu3 %v1587_v16 }
 0x1f8   : > { %1254 = vrot.lane.b32.xlu2 %v4473_v35, %s2544_s11 }
 0x1f9   : > { %v1774_v53 = vpop.f32.mrf.mxu0 }
 0x1fa   : > { %1125 = vrot.lane.b32.xlu1 %v4472_v37, %s2542_s10 }
 0x1fb   : > { %v1887_v36 = vpop.f32.mrf.mxu1  ;;  %v1114_v59 = vpop.permute.xlu2 %1113 }
 0x1fc   : > { %1195 = vst.msk [vmem:[#allocation2 + $0x170] sm:$0x7f] %vm1180_vm8, %v1114_v59  ;;  %v1360_v10 = vpop.permute.xlu0 %1359  ;;  %v1888_v25 = vadd.f32 %v1887_v36, %v1774_v53  ;;  %v1134_v39 = vpop.permute.xlu1 %1133  ;;  %1373 = vrot.lane.b32.xlu0 %v4474_v47, %s2545_s12  ;;  %v4481_v36 = vld [vmem:[#allocation16_spill] sm:$0xff] }
 0x1fd   : > { %1436 = vst.msk [vmem:[#allocation2 + $0x140] sm:$0xff] %vm1016_vm11, %v1360_v10  ;;  %v4053_v32 = vpop.f32.mrf.mxu2 }
 0x1fe   : > { %1205 = vst.msk [vmem:[#allocation2 + $0x260] sm:$0x7f] %vm1180_vm8, %v1134_v39  ;;  %v2001_v21 = vadd.f32 %v3929_v45, %v1888_v25 }
 0x1ff   : > { %1328 = vst.msk [vmem:[#allocation2 + $0x260] sm:$0xff] %vm881_vm6, %v3984_v56 }
 0x200   : > { %2086 = vst.msk [vmem:[%s3902_s20 + $0x28] sm:$0xff] %vm391_vm0, %v2001_v21  ;;  %v2122_v1 = vsel %vm391_vm0, %v2001_v21, 0.0  ;;  %v2187_v61 = vmul.f32 %v2001_v21, %v2001_v21  ;;  %1127 = vrot.lane.b32.xlu2 %v4476_v5, %s2542_s10 }
 0x201   : > { %v2123_v57 = vadd.f32 %v2122_v1, %v2121_v40 }
 0x202   : > { %v2223_v45 = vsel %vm391_vm0, %v2187_v61, 0.0  ;;  %1375 = vrot.lane.b32.xlu1 %v4475_v63, %s2545_s12 }
 0x203   : > { %v1364_v26 = vpop.permute.xlu2 %1363  ;;  %v2224_v15 = vadd.f32 %v2223_v45, %v2222_v0 }
 0x204   : > { %v1384_v50 = vpop.permute.xlu0 %1383  ;;  %v1554_v62 = vld [vmem:[#allocation2 + $0x140] sm:$0xff]  ;;  %v1112_v52 = vpop.permute.xlu1 %1111  ;;  %960 = vrot.lane.b32.xlu0 %v4467_v46, %s2545_s12 }
 0x205   : > { %1448 = vst.msk [vmem:[#allocation2 + $0x260] sm:$0xff] %vm1016_vm11, %v1384_v50  ;;  %1910 = vmatmul.f32.gmra.mxu1 %v1554_v62  ;;  %v4068_v42 = vpop.f32.mrf.mxu2 }
 0x206   : > { %1194 = vst.msk [vmem:[#allocation2 + $0x158] sm:$0xff] %vm714_vm4, %v1112_v52 }
 0x207   : > { %1317 = vst.msk [vmem:[#allocation2 + $0x158] sm:$0xfe] %vm1302_vm10, %v4003_v6  ;;  %v4478_v6 = vld [vmem:[#allocation39_spill] sm:$0xff] }
 0x208   : > { %1377 = vrot.lane.b32.xlu2 %v4477_v33, %s2545_s12 }
 0x209   : > { %v1777_v17 = vpop.f32.mrf.mxu0 }
 0x20a   : > { %962 = vrot.lane.b32.xlu1 %v4470_v55, %s2545_s12 }
 0x20b   : > { %v1890_v56 = vpop.f32.mrf.mxu1  ;;  %v4065_v9 = vpop.permute.xlu2 %1387 }
 0x20c   : > { %v947_v30 = vpop.permute.xlu0 %946  ;;  %v1590_v43 = vld [vmem:[#allocation2 + $0x260] sm:$0xff]  ;;  %v1891_v3 = vadd.f32 %v1890_v56, %v1777_v17  ;;  %v1362_v28 = vpop.permute.xlu1 %1361  ;;  %1256 = vrot.lane.b32.xlu0 %v4478_v6, %s2544_s11 }
 0x20d   : > { %1030 = vst.msk [vmem:[#allocation2 + $0x150] sm:$0xfe] %vm1014_vm9, %v947_v30  ;;  %1946 = vmatmul.f32.gmra.mxu3 %v1590_v43  ;;  %v4084_v60 = vpop.f32.mrf.mxu2  ;;  %v4125_v30 = vpop.f32.mrf.mxu3 }
 0x20e   : > { %1437 = vst.msk [vmem:[#allocation2 + $0x158] sm:$0xff] %vm1016_vm11, %v1362_v28  ;;  %v2004_v44 = vadd.f32 %v3955_v38, %v1891_v3 }
 0x210   : > { %2087 = vst.msk [vmem:[%s3902_s20 + $0x30] sm:$0xff] %vm391_vm0, %v2004_v44  ;;  %v2124_v46 = vsel %vm391_vm0, %v2004_v44, 0.0  ;;  %v2188_v48 = vmul.f32 %v2004_v44, %v2004_v44  ;;  %964 = vrot.lane.b32.xlu2 %v4473_v35, %s2545_s12 }
 0x211   : > { %v2125_v29 = vadd.f32 %v2124_v46, %v2123_v57 }
 0x212   : > { %v2225_v31 = vsel %vm391_vm0, %v2188_v48, 0.0  ;;  %1258 = vrot.lane.b32.xlu1 %v4479_v23, %s2544_s11 }
 0x213   : > { %v951_v19 = vpop.permute.xlu2 %950  ;;  %v2226_v12 = vadd.f32 %v2225_v31, %v2224_v15 }
 0x214   : > { %1032 = vst.msk [vmem:[#allocation2 + $0x180] sm:$0xfe] %vm1014_vm9, %v951_v19  ;;  %v1265_v38 = vpop.permute.xlu0 %1264  ;;  %v1556_v49 = vld [vmem:[#allocation2 + $0x150] sm:$0xff]  ;;  %v1386_v13 = vpop.permute.xlu1 %1385  ;;  %1129 = vrot.lane.b32.xlu0 %v4480_v34, %s2542_s10 }
 0x215   : > { %1329 = vst.msk [vmem:[#allocation2 + $0x278] sm:$0xfe] %vm1302_vm10, %v1265_v38  ;;  %1800 = vmatmul.f32.gmra.mxu0 %v1556_v49  ;;  %v1557_v51 = vld [vmem:[#allocation2 + $0x158] sm:$0xff]  ;;  %v4094_v41 = vpop.f32.mrf.mxu2 }
 0x216   : > { %1449 = vst.msk [vmem:[#allocation2 + $0x278] sm:$0xff] %vm1016_vm11, %v1386_v13  ;;  %1913 = vmatmul.f32.gmra.mxu1 %v1557_v51 }
 0x219   : > { %v1780_v58 = vpop.f32.mrf.mxu0 }
 0x21b   : > { %v1893_v22 = vpop.f32.mrf.mxu1  ;;  %v1269_v40 = vpop.permute.xlu2 %1268 }
 0x21c   : > { %v1243_v24 = vpop.permute.xlu0 %1242  ;;  %v1894_v0 = vadd.f32 %v1893_v22, %v1780_v58  ;;  %v949_v18 = vpop.permute.xlu1 %948  ;;  %1379 = vrot.lane.b32.xlu0 %v4481_v36, %s2545_s12 }
 0x21d   : > { %1318 = vst.msk [vmem:[#allocation2 + $0x170] sm:$0xff] %vm881_vm6, %v1243_v24  ;;  %v1593_v54 = vld [vmem:[#allocation2 + $0x278] sm:$0xff]  ;;  %v4107_v1 = vpop.f32.mrf.mxu2 }
 0x21e   : > { %1438 = vst.msk [vmem:[#allocation2 + $0x170] sm:$0xff] %vm1016_vm11, %v1364_v26  ;;  %1949 = vmatmul.f32.gmra.mxu3 %v1593_v54  ;;  %v2007_v7 = vadd.f32 %v3970_v14, %v1894_v0  ;;  %v1562_v26 = vld [vmem:[#allocation2 + $0x180] sm:$0xff] }
 0x21f   : > { %1031 = vst.msk [vmem:[#allocation2 + $0x168] sm:$0xff] %vm1016_vm11, %v949_v18 }
 0x220   : > { %2088 = vst.msk [vmem:[%s3902_s20 + $0x38] sm:$0xff] %vm391_vm0, %v2007_v7  ;;  %v2126_v16 = vsel %vm391_vm0, %v2007_v7, 0.0  ;;  %v2189_v55 = vmul.f32 %v2007_v7, %v2007_v7 }
 0x221   : > { %v2127_v27 = vadd.f32 %v2126_v16, %v2125_v29 }
 0x222   : > { %v2227_v59 = vsel %vm391_vm0, %v2189_v55, 0.0 }
 0x223   : > { %v1247_v53 = vpop.permute.xlu2 %1246  ;;  %v2228_v10 = vadd.f32 %v2227_v59, %v2226_v12  ;;  %v4136_v12 = vpop.f32.mrf.mxu3 }
 0x224   : > { %v1138_v25 = vpop.permute.xlu0 %1137  ;;  %v1267_v39 = vpop.permute.xlu1 %1266 }
 0x225   : > { %1207 = vst.msk [vmem:[#allocation2 + $0x290] sm:$0x7f] %vm1180_vm8, %v1138_v25  ;;  %v1560_v14 = vld [vmem:[#allocation2 + $0x170] sm:$0xff]  ;;  %v4115_v62 = vpop.f32.mrf.mxu2 }
 0x226   : > { %1330 = vst.msk [vmem:[#allocation2 + $0x290] sm:$0xff] %vm881_vm6, %v1267_v39  ;;  %v1559_v21 = vld [vmem:[#allocation2 + $0x168] sm:$0xff]  ;;  %1916 = vmatmul.f32.gmra.mxu1 %v1560_v14 }
 0x227   : > { %1450 = vst.msk [vmem:[#allocation2 + $0x290] sm:$0xff] %vm1016_vm11, %v4065_v9  ;;  %1803 = vmatmul.f32.gmra.mxu0 %v1559_v21 }
 0x229   : > { %v1783_v35 = vpop.f32.mrf.mxu0 }
 0x22b   : > { %v1896_v61 = vpop.f32.mrf.mxu1  ;;  %v1142_v37 = vpop.permute.xlu2 %1141 }
 0x22c   : > { %1209 = vst.msk [vmem:[#allocation2 + $0x2c0] sm:$0x7f] %vm1180_vm8, %v1142_v37  ;;  %v1116_v57 = vpop.permute.xlu0 %1115  ;;  %v1897_v47 = vadd.f32 %v1896_v61, %v1783_v35  ;;  %v1245_v45 = vpop.permute.xlu1 %1244 }
 0x22d   : > { %1196 = vst.msk [vmem:[#allocation2 + $0x188] sm:$0xff] %vm714_vm4, %v1116_v57  ;;  %v4127_v43 = vpop.f32.mrf.mxu2 }
 0x22e   : > { %1319 = vst.msk [vmem:[#allocation2 + $0x188] sm:$0xfe] %vm1302_vm10, %v1245_v45  ;;  %v1596_v15 = vld [vmem:[#allocation2 + $0x290] sm:$0xff]  ;;  %v2010_v50 = vadd.f32 %v3988_v4, %v1897_v47 }
 0x22f   : > { %1806 = vmatmul.f32.gmra.mxu0 %v1562_v26  ;;  %1952 = vmatmul.f32.gmra.mxu3 %v1596_v15 }
 0x230   : > { %2089 = vst.msk [vmem:[%s3902_s20 + $0x40] sm:$0xff] %vm391_vm0, %v2010_v50  ;;  %v2128_v20 = vsel %vm391_vm0, %v2010_v50, 0.0  ;;  %v2190_v52 = vmul.f32 %v2010_v50, %v2010_v50 }
 0x231   : > { %v2129_v63 = vadd.f32 %v2128_v20, %v2127_v27 }
 0x232   : > { %v2229_v5 = vsel %vm391_vm0, %v2190_v52, 0.0 }
 0x233   : > { %v1120_v56 = vpop.permute.xlu2 %1119  ;;  %v2230_v9 = vadd.f32 %v2229_v5, %v2228_v10 }
 0x234   : > { %1198 = vst.msk [vmem:[#allocation2 + $0x1b8] sm:$0xff] %vm714_vm4, %v1120_v56  ;;  %v1366_v17 = vpop.permute.xlu0 %1365  ;;  %v1140_v4 = vpop.permute.xlu1 %1139 }
 0x235   : > { %1439 = vst.msk [vmem:[#allocation2 + $0x188] sm:$0xff] %vm1016_vm11, %v1366_v17 }
 0x236   : > { %1208 = vst.msk [vmem:[#allocation2 + $0x2a8] sm:$0xff] %vm714_vm4, %v1140_v4 }
 0x237   : > { %1331 = vst.msk [vmem:[#allocation2 + $0x2a8] sm:$0xfe] %vm1302_vm10, %v1269_v40  ;;  %v4143_v40 = vpop.f32.mrf.mxu3 }
 0x239   : > { %v1786_v44 = vpop.f32.mrf.mxu0 }
 0x23b   : > { %v1899_v3 = vpop.f32.mrf.mxu1  ;;  %v1370_v28 = vpop.permute.xlu2 %1369 }
 0x23c   : > { %v1390_v46 = vpop.permute.xlu0 %1389  ;;  %v1563_v48 = vld [vmem:[#allocation2 + $0x188] sm:$0xff]  ;;  %v1900_v33 = vadd.f32 %v1899_v3, %v1786_v44  ;;  %v1118_v29 = vpop.permute.xlu1 %1117 }
 0x23d   : > { %1451 = vst.msk [vmem:[#allocation2 + $0x2a8] sm:$0xff] %vm1016_vm11, %v1390_v46  ;;  %1919 = vmatmul.f32.gmra.mxu1 %v1563_v48 }
 0x23e   : > { %1197 = vst.msk [vmem:[#allocation2 + $0x1a0] sm:$0x7f] %vm1180_vm8, %v1118_v29  ;;  %v2013_v6 = vadd.f32 %v4006_v8, %v1900_v33  ;;  %v4141_v8 = vpop.f32.mrf.mxu2 }
 0x23f   : > { %1320 = vst.msk [vmem:[#allocation2 + $0x1a0] sm:$0xff] %vm881_vm6, %v1247_v53  ;;  %v4151_v59 = vpop.f32.mrf.mxu3 }
 0x240   : > { %2090 = vst.msk [vmem:[%s3902_s20 + $0x48] sm:$0xff] %vm391_vm0, %v2013_v6  ;;  %v2130_v31 = vsel %vm391_vm0, %v2013_v6, 0.0  ;;  %v2191_v19 = vmul.f32 %v2013_v6, %v2013_v6 }
 0x241   : > { %v2131_v38 = vadd.f32 %v2130_v31, %v2129_v63 }
 0x242   : > { %v2231_v49 = vsel %vm391_vm0, %v2191_v19, 0.0 }
 0x243   : > { %v1251_v13 = vpop.permute.xlu2 %1250  ;;  %v2232_v51 = vadd.f32 %v2231_v49, %v2230_v9 }
 0x244   : > { %v953_v23 = vpop.permute.xlu0 %952  ;;  %v1599_v34 = vld [vmem:[#allocation2 + $0x2a8] sm:$0xff]  ;;  %v1368_v22 = vpop.permute.xlu1 %1367 }
 0x245   : > { %1033 = vst.msk [vmem:[#allocation2 + $0x198] sm:$0xff] %vm1016_vm11, %v953_v23  ;;  %1955 = vmatmul.f32.gmra.mxu3 %v1599_v34 }
 0x246   : > { %1440 = vst.msk [vmem:[#allocation2 + $0x1a0] sm:$0xff] %vm1016_vm11, %v1368_v22  ;;  %v4149_v36 = vpop.f32.mrf.mxu2 }
 0x247   : > { %v4161_v35 = vpop.f32.mrf.mxu3 }
 0x249   : > { %v1789_v54 = vpop.f32.mrf.mxu0 }
 0x24b   : > { %v1902_v58 = vpop.f32.mrf.mxu1  ;;  %v1146_v24 = vpop.permute.xlu2 %1145 }
 0x24c   : > { %1211 = vst.msk [vmem:[#allocation2 + $0x2f0] sm:$0x7f] %vm1180_vm8, %v1146_v24  ;;  %v1271_v0 = vpop.permute.xlu0 %1270  ;;  %v1565_v18 = vld [vmem:[#allocation2 + $0x198] sm:$0xff]  ;;  %v1392_v7 = vpop.permute.xlu1 %1391  ;;  %v1903_v55 = vadd.f32 %v1902_v58, %v1789_v54 }
 0x24d   : > { %1332 = vst.msk [vmem:[#allocation2 + $0x2c0] sm:$0xff] %vm881_vm6, %v1271_v0  ;;  %1809 = vmatmul.f32.gmra.mxu0 %v1565_v18  ;;  %v1566_v16 = vld [vmem:[#allocation2 + $0x1a0] sm:$0xff]  ;;  %v1597_v18 = vld [vmem:[#allocation2 + $0x298] sm:$0xff] }
 0x24e   : > { %1452 = vst.msk [vmem:[#allocation2 + $0x2c0] sm:$0xff] %vm1016_vm11, %v1392_v7  ;;  %1922 = vmatmul.f32.gmra.mxu1 %v1566_v16  ;;  %v2016_v27 = vadd.f32 %v4024_v11, %v1903_v55  ;;  %v4163_v57 = vpop.f32.mrf.mxu2 }
 0x24f   : > { %v4172_v17 = vpop.f32.mrf.mxu3 }
 0x250   : > { %2091 = vst.msk [vmem:[%s3902_s20 + $0x50] sm:$0xff] %vm391_vm0, %v2016_v27  ;;  %v2132_v53 = vsel %vm391_vm0, %v2016_v27, 0.0  ;;  %v2192_v10 = vmul.f32 %v2016_v27, %v2016_v27 }
 0x251   : > { %v2133_v25 = vadd.f32 %v2132_v53, %v2131_v38 }
 0x252   : > { %v2233_v14 = vsel %vm391_vm0, %v2192_v10, 0.0 }
 0x253   : > { %v959_v39 = vpop.permute.xlu2 %958  ;;  %v2234_v61 = vadd.f32 %v2233_v14, %v2232_v51  ;;  %v1608_v6 = vld [vmem:[#allocation2 + $0x2f0] sm:$0xff] }
 0x254   : > { %1036 = vst.msk [vmem:[#allocation2 + $0x1e0] sm:$0xfe] %vm1014_vm9, %v959_v39  ;;  %v1249_v21 = vpop.permute.xlu0 %1248  ;;  %v955_v11 = vpop.permute.xlu1 %954  ;;  %v1600_v39 = vld [vmem:[#allocation2 + $0x2b0] sm:$0xff] }
 0x255   : > { %1321 = vst.msk [vmem:[#allocation2 + $0x1b8] sm:$0xfe] %vm1302_vm10, %v1249_v21  ;;  %v1602_v37 = vld [vmem:[#allocation2 + $0x2c0] sm:$0xff] }
 0x256   : > { %1441 = vst.msk [vmem:[#allocation2 + $0x1b8] sm:$0xff] %vm1016_vm11, %v1370_v28  ;;  %1958 = vmatmul.f32.gmra.mxu3 %v1602_v37  ;;  %v4178_v33 = vpop.f32.mrf.mxu2 }
 0x257   : > { %1034 = vst.msk [vmem:[#allocation2 + $0x1b0] sm:$0xfe] %vm1014_vm9, %v955_v11 }
 0x259   : > { %v1792_v26 = vpop.f32.mrf.mxu0  ;;  %v4180_v29 = vpop.f32.mrf.mxu3 }
 0x25b   : > { %v1905_v47 = vpop.f32.mrf.mxu1  ;;  %v1255_v45 = vpop.permute.xlu2 %1254  ;;  %v1574_v27 = vld [vmem:[#allocation2 + $0x1e0] sm:$0xff] }
 0x25c   : > { %v1144_v15 = vpop.permute.xlu0 %1143  ;;  %v1906_v50 = vadd.f32 %v1905_v47, %v1792_v26  ;;  %v1122_v20 = vpop.permute.xlu1 %1121  ;;  %v1603_v26 = vld [vmem:[#allocation2 + $0x2c8] sm:$0xff] }
 0x25d   : > { %1210 = vst.msk [vmem:[#allocation2 + $0x2d8] sm:$0xff] %vm714_vm4, %v1144_v15  ;;  %v1569_v52 = vld [vmem:[#allocation2 + $0x1b8] sm:$0xff] }
 0x25e   : > { %1199 = vst.msk [vmem:[#allocation2 + $0x1d0] sm:$0x7f] %vm1180_vm8, %v1122_v20  ;;  %v1568_v63 = vld [vmem:[#allocation2 + $0x1b0] sm:$0xff]  ;;  %1925 = vmatmul.f32.gmra.mxu1 %v1569_v52  ;;  %v2019_v5 = vadd.f32 %v4036_v2, %v1906_v50  ;;  %v4185_v22 = vpop.f32.mrf.mxu2 }
 0x25f   : > { %1322 = vst.msk [vmem:[#allocation2 + $0x1d0] sm:$0xff] %vm881_vm6, %v1251_v13  ;;  %1812 = vmatmul.f32.gmra.mxu0 %v1568_v63 }
 0x260   : > { %2092 = vst.msk [vmem:[%s3902_s20 + $0x58] sm:$0xff] %vm391_vm0, %v2019_v5  ;;  %v2134_v56 = vsel %vm391_vm0, %v2019_v5, 0.0  ;;  %v2193_v9 = vmul.f32 %v2019_v5, %v2019_v5 }
 0x261   : > { %v2135_v4 = vadd.f32 %v2134_v56, %v2133_v25 }
 0x262   : > { %v2235_v3 = vsel %vm391_vm0, %v2193_v9, 0.0 }
 0x263   : > { %v1128_v28 = vpop.permute.xlu2 %1127  ;;  %v2236_v44 = vadd.f32 %v2235_v3, %v2234_v61 }
 0x264   : > { %v957_v46 = vpop.permute.xlu0 %956  ;;  %v1605_v48 = vld [vmem:[#allocation2 + $0x2d8] sm:$0xff]  ;;  %1202 = vst.msk [vmem:[#allocation2 + $0x218] sm:$0xff] %vm714_vm4, %v1128_v28  ;;  %v1372_v2 = vpop.permute.xlu1 %1371  ;;  %v1606_v28 = vld [vmem:[#allocation2 + $0x2e0] sm:$0xff] }
 0x265   : > { %1035 = vst.msk [vmem:[#allocation2 + $0x1c8] sm:$0xff] %vm1016_vm11, %v957_v46  ;;  %1961 = vmatmul.f32.gmra.mxu3 %v1605_v48 }
 0x266   : > { %1442 = vst.msk [vmem:[#allocation2 + $0x1d0] sm:$0xff] %vm1016_vm11, %v1372_v2  ;;  %v2057_v25 = vpop.f32.mrf.mxu2 }
 0x269   : > { %v1795_v49 = vpop.f32.mrf.mxu0  ;;  %v4190_v0 = vpop.f32.mrf.mxu3 }
 0x26b   : > { %v1908_v31 = vpop.f32.mrf.mxu1  ;;  %v1378_v7 = vpop.permute.xlu2 %1377 }
 0x26c   : > { %v1124_v19 = vpop.permute.xlu0 %1123  ;;  %v1571_v38 = vld [vmem:[#allocation2 + $0x1c8] sm:$0xff]  ;;  %v1253_v13 = vpop.permute.xlu1 %1252  ;;  %v1909_v23 = vadd.f32 %v1908_v31, %v1795_v49  ;;  %v1609_v49 = vld [vmem:[#allocation2 + $0x2f8] sm:$0xff] }
 0x26d   : > { %1200 = vst.msk [vmem:[#allocation2 + $0x1e8] sm:$0xff] %vm714_vm4, %v1124_v19  ;;  %1815 = vmatmul.f32.gmra.mxu0 %v1571_v38  ;;  %v1572_v51 = vld [vmem:[#allocation2 + $0x1d0] sm:$0xff]  ;;  %1964 = vmatmul.f32.gmra.mxu3 %v1608_v6 }
 0x26e   : > { %1323 = vst.msk [vmem:[#allocation2 + $0x1e8] sm:$0xfe] %vm1302_vm10, %v1253_v13  ;;  %1928 = vmatmul.f32.gmra.mxu1 %v1572_v51  ;;  %v2022_v34 = vadd.f32 %v4053_v32, %v1909_v23  ;;  %v2060_v31 = vpop.f32.mrf.mxu2 }
 0x270   : > { %2093 = vst.msk [vmem:[%s3902_s20 + $0x60] sm:$0xff] %vm391_vm0, %v2022_v34  ;;  %v2136_v58 = vsel %vm391_vm0, %v2022_v34, 0.0  ;;  %v2194_v24 = vmul.f32 %v2022_v34, %v2022_v34 }
 0x271   : > { %v2137_v54 = vadd.f32 %v2136_v58, %v2135_v4 }
 0x272   : > { %v2237_v16 = vsel %vm391_vm0, %v2194_v24, 0.0 }
 0x273   : > { %v2238_v53 = vadd.f32 %v2237_v16, %v2236_v44  ;;  %v965_v21 = vpop.permute.xlu2 %964 }
 0x274   : > { %v1374_v55 = vpop.permute.xlu0 %1373  ;;  %v1126_v32 = vpop.permute.xlu1 %1125  ;;  %1039 = vst.msk [vmem:[#allocation2 + $0x228] sm:$0xff] %vm1016_vm11, %v965_v21 }
 0x275   : > { %1443 = vst.msk [vmem:[#allocation2 + $0x1e8] sm:$0xff] %vm1016_vm11, %v1374_v55  ;;  %1818 = vmatmul.f32.gmra.mxu0 %v1574_v27  ;;  %2423 = vmatmul.msk.f32.vlgmr.msra.gmra.mxu3 %vm391_vm0, %v1597_v18 }
 0x276   : > { %1201 = vst.msk [vmem:[#allocation2 + $0x200] sm:$0x7f] %vm1180_vm8, %v1126_v32 }
 0x277   : > { %1324 = vst.msk [vmem:[#allocation2 + $0x200] sm:$0xff] %vm881_vm6, %v1255_v45 }
 0x27a   : > { %v1944_v10 = vpop.f32.mrf.mxu3 }
 0x27b   : > { %v1945_v14 = vadd.f32 %v1944_v10, %v4125_v30  ;;  %v1798_v30 = vpop.f32.mrf.mxu0  ;;  %v1583_v23 = vld [vmem:[#allocation2 + $0x228] sm:$0xff] }
 0x27c   : > { %v961_v61 = vpop.permute.xlu0 %960  ;;  %v1575_v11 = vld [vmem:[#allocation2 + $0x1e8] sm:$0xff]  ;;  %v1376_v47 = vpop.permute.xlu1 %1375 }
 0x27d   : > { %v4199_v37 = vadd.f32 %v2057_v25, %v1945_v14  ;;  %1037 = vst.msk [vmem:[#allocation2 + $0x1f8] sm:$0xff] %vm1016_vm11, %v961_v61  ;;  %1931 = vmatmul.f32.gmra.mxu1 %v1575_v11  ;;  %2424 = vmatmul.msk.f32.gmra.mxu3 %vm391_vm0, %v1600_v39 }
 0x27e   : > { %1444 = vst.msk [vmem:[#allocation2 + $0x200] sm:$0xff] %vm1016_vm11, %v1376_v47 }
 0x27f   : > { %2105 = vst.msk [vmem:[%s3902_s20 + $0xc0] sm:$0xff] %vm391_vm0, %v4199_v37 }
 0x282   : > { %v1911_v45 = vpop.f32.mrf.mxu1 }
 0x283   : > { %v1912_v15 = vadd.f32 %v1911_v45, %v1798_v30 }
 0x284   : > { %v1257_v50 = vpop.permute.xlu0 %1256  ;;  %v1577_v20 = vld [vmem:[#allocation2 + $0x1f8] sm:$0xff]  ;;  %v963_v63 = vpop.permute.xlu1 %962 }
 0x285   : > { %v2025_v52 = vadd.f32 %v4068_v42, %v1912_v15  ;;  %1325 = vst.msk [vmem:[#allocation2 + $0x218] sm:$0xfe] %vm1302_vm10, %v1257_v50  ;;  %1821 = vmatmul.f32.gmra.mxu0 %v1577_v20  ;;  %v1578_v5 = vld [vmem:[#allocation2 + $0x200] sm:$0xff]  ;;  %2425 = vmatmul.msk.f32.gmra.mxu3 %vm391_vm0, %v1603_v26 }
 0x286   : > { %1038 = vst.msk [vmem:[#allocation2 + $0x210] sm:$0xfe] %vm1014_vm9, %v963_v63  ;;  %1934 = vmatmul.f32.gmra.mxu1 %v1578_v5 }
 0x287   : > { %2094 = vst.msk [vmem:[%s3902_s20 + $0x68] sm:$0xff] %vm391_vm0, %v2025_v52  ;;  %v2138_v56 = vsel %vm391_vm0, %v2025_v52, 0.0  ;;  %v2195_v9 = vmul.f32 %v2025_v52, %v2025_v52 }
 0x288   : > { %v2139_v4 = vadd.f32 %v2138_v56, %v2137_v54  ;;  %1445 = vst.msk [vmem:[#allocation2 + $0x218] sm:$0xff] %vm1016_vm11, %v1378_v7 }
 0x289   : > { %v2239_v42 = vsel %vm391_vm0, %v2195_v9, 0.0 }
 0x28a   : > { %v2240_v3 = vadd.f32 %v2239_v42, %v2238_v53  ;;  %v2063_v53 = vpop.f32.mrf.mxu2 }
 0x28c   : > { %v1130_v44 = vpop.permute.xlu0 %1129  ;;  %v1259_v48 = vpop.permute.xlu1 %1258 }
 0x28d   : > { %1203 = vst.msk [vmem:[#allocation2 + $0x230] sm:$0x7f] %vm1180_vm8, %v1130_v44  ;;  %v1580_v46 = vld [vmem:[#allocation2 + $0x210] sm:$0xff]  ;;  %2426 = vmatmul.msk.f32.gmra.mxu3 %vm391_vm0, %v1606_v28 }
 0x28e   : > { %1824 = vmatmul.f32.gmra.mxu0 %v1580_v46  ;;  %1326 = vst.msk [vmem:[#allocation2 + $0x230] sm:$0xff] %vm881_vm6, %v1259_v48 }
 0x28f   : > { %v1581_v2 = vld [vmem:[#allocation2 + $0x218] sm:$0xff] }
 0x290   : > { %1937 = vmatmul.f32.gmra.mxu1 %v1581_v2  ;;  %v1947_v6 = vpop.f32.mrf.mxu3 }
 0x291   : > { %v1948_v19 = vadd.f32 %v1947_v6, %v4136_v12 }
 0x292   : > { %v1801_v38 = vpop.f32.mrf.mxu0 }
 0x293   : > { %v1914_v13 = vpop.f32.mrf.mxu1  ;;  %v4220_v51 = vadd.f32 %v2060_v31, %v1948_v19 }
 0x294   : > { %v1915_v34 = vadd.f32 %v1914_v13, %v1801_v38  ;;  %v1380_v58 = vpop.permute.xlu0 %1379 }
 0x295   : > { %2106 = vst.msk [vmem:[%s3902_s20 + $0xc8] sm:$0xff] %vm391_vm0, %v4220_v51  ;;  %2427 = vmatmul.msk.f32.gmra.mxu3 %vm391_vm0, %v1609_v49 }
 0x296   : > { %v2028_v24 = vadd.f32 %v4084_v60, %v1915_v34  ;;  %1446 = vst.msk [vmem:[#allocation2 + $0x230] sm:$0xff] %vm1016_vm11, %v1380_v58  ;;  %1827 = vmatmul.f32.gmra.mxu0 %v1583_v23 }
 0x298   : > { %2095 = vst.msk [vmem:[%s3902_s20 + $0x70] sm:$0xff] %vm391_vm0, %v2028_v24  ;;  %v2140_v12 = vsel %vm391_vm0, %v2028_v24, 0.0  ;;  %v2196_v18 = vmul.f32 %v2028_v24, %v2028_v24 }
 0x299   : > { %v2141_v54 = vadd.f32 %v2140_v12, %v2139_v4 }
 0x29a   : > { %v2241_v7 = vsel %vm391_vm0, %v2196_v18, 0.0 }
 0x29b   : > { %v2242_v16 = vadd.f32 %v2241_v7, %v2240_v3 }
 0x29d   : > { %v1584_v55 = vld [vmem:[#allocation2 + $0x230] sm:$0xff] }
 0x29e   : > { %1940 = vmatmul.f32.gmra.mxu1 %v1584_v55 }
 0x2a1   : > { %v1950_v27 = vpop.f32.mrf.mxu3 }
 0x2a2   : > { %v1951_v60 = vadd.f32 %v1950_v27, %v4143_v40 }
 0x2a3   : > { %v1917_v32 = vpop.f32.mrf.mxu1 }
 0x2a4   : > { %v1804_v10 = vpop.f32.mrf.mxu0  ;;  %v4233_v25 = vadd.f32 %v2063_v53, %v1951_v60 }
 0x2a5   : > { %v1918_v39 = vadd.f32 %v1917_v32, %v1804_v10 }
 0x2a6   : > { %2107 = vst.msk [vmem:[%s3902_s20 + $0xd0] sm:$0xff] %vm391_vm0, %v4233_v25 }
 0x2a7   : > { %v2031_v14 = vadd.f32 %v4094_v41, %v1918_v39 }
 0x2a9   : > { %2096 = vst.msk [vmem:[%s3902_s20 + $0x78] sm:$0xff] %vm391_vm0, %v2031_v14  ;;  %v2142_v21 = vsel %vm391_vm0, %v2031_v14, 0.0  ;;  %v2197_v61 = vmul.f32 %v2031_v14, %v2031_v14 }
 0x2aa   : > { %v2143_v11 = vadd.f32 %v2142_v21, %v2141_v54 }
 0x2ab   : > { %v2243_v47 = vsel %vm391_vm0, %v2197_v61, 0.0 }
 0x2ac   : > { %v2244_v40 = vadd.f32 %v2243_v47, %v2242_v16  ;;  %v1807_v30 = vpop.f32.mrf.mxu0 }
 0x2b2   : > { %v1953_v42 = vpop.f32.mrf.mxu3 }
 0x2b3   : > { %v1954_v24 = vadd.f32 %v1953_v42, %v4151_v59 }
 0x2ba   : > { %v1920_v45 = vpop.f32.mrf.mxu1 }
 0x2bb   : > { %v1921_v26 = vadd.f32 %v1920_v45, %v1807_v30 }
 0x2bd   : > { %v2034_v15 = vadd.f32 %v4107_v1, %v1921_v26 }
 0x2bf   : > { %2097 = vst.msk [vmem:[%s3902_s20 + $0x80] sm:$0xff] %vm391_vm0, %v2034_v15  ;;  %v2144_v50 = vsel %vm391_vm0, %v2034_v15, 0.0  ;;  %v2198_v41 = vmul.f32 %v2034_v15, %v2034_v15 }
 0x2c0   : > { %v2145_v20 = vadd.f32 %v2144_v50, %v2143_v11 }
 0x2c1   : > { %v2245_v52 = vsel %vm391_vm0, %v2198_v41, 0.0 }
 0x2c2   : > { %v2246_v63 = vadd.f32 %v2245_v52, %v2244_v40 }
 0x2c8   : > { %v1956_v48 = vpop.f32.mrf.mxu3 }
 0x2ca   : > { %v1810_v5 = vpop.f32.mrf.mxu0 }
 0x2cb   : > { %v1923_v56 = vpop.f32.mrf.mxu1 }
 0x2cc   : > { %v1924_v9 = vadd.f32 %v1923_v56, %v1810_v5 }
 0x2ce   : > { %v2037_v4 = vadd.f32 %v4115_v62, %v1924_v9 }
 0x2d0   : > { %2098 = vst.msk [vmem:[%s3902_s20 + $0x88] sm:$0xff] %vm391_vm0, %v2037_v4  ;;  %v2146_v1 = vsel %vm391_vm0, %v2037_v4, 0.0  ;;  %v2199_v3 = vmul.f32 %v2037_v4, %v2037_v4 }
 0x2d1   : > { %v2147_v28 = vadd.f32 %v2146_v1, %v2145_v20 }
 0x2d2   : > { %v2247_v44 = vsel %vm391_vm0, %v2199_v3, 0.0 }
 0x2d3   : > { %v2248_v46 = vadd.f32 %v2247_v44, %v2246_v63 }
 0x2d9   : > { %v1959_v38 = vpop.f32.mrf.mxu3 }
 0x2da   : > { %v1960_v10 = vadd.f32 %v1959_v38, %v4172_v17 }
 0x2db   : > { %v1926_v2 = vpop.f32.mrf.mxu1 }
 0x2dc   : > { %v1813_v6 = vpop.f32.mrf.mxu0 }
 0x2dd   : > { %v1927_v31 = vadd.f32 %v1926_v2, %v1813_v6 }
 0x2df   : > { %v2040_v19 = vadd.f32 %v4127_v43, %v1927_v31 }
 0x2e1   : > { %2099 = vst.msk [vmem:[%s3902_s20 + $0x90] sm:$0xff] %vm391_vm0, %v2040_v19  ;;  %v2148_v17 = vsel %vm391_vm0, %v2040_v19, 0.0 }
 0x2e8   : > { %v1962_v62 = vpop.f32.mrf.mxu3 }
 0x2e9   : > { %v1963_v61 = vadd.f32 %v1962_v62, %v4180_v29  ;;  %v2149_v29 = vadd.f32 %v2148_v17, %v2147_v28 }
 0x2ea   : > { %v1816_v49 = vpop.f32.mrf.mxu0 }
 0x2eb   : > { %v1929_v13 = vpop.f32.mrf.mxu1 }
 0x2ec   : > { %v1930_v23 = vadd.f32 %v1929_v13, %v1816_v49  ;;  %v2206_v49 = vmul.f32 %v4199_v37, %v4199_v37 }
 0x2ee   : > { %v2043_v34 = vadd.f32 %v4141_v8, %v1930_v23  ;;  %v1957_v8 = vadd.f32 %v1956_v48, %v4161_v35 }
 0x2f0   : > { %2100 = vst.msk [vmem:[%s3902_s20 + $0x98] sm:$0xff] %vm391_vm0, %v2043_v34  ;;  %v1965_v58 = vpop.f32.mrf.mxu3  ;;  %v2201_v30 = vmul.f32 %v2043_v34, %v2043_v34  ;;  %v2150_v26 = vsel %vm391_vm0, %v2043_v34, 0.0 }
 0x2f1   : > { %v2151_v5 = vadd.f32 %v2150_v26, %v2149_v29 }
 0x2f2   : > { %v1819_v43 = vpop.f32.mrf.mxu0  ;;  %v2251_v50 = vsel %vm391_vm0, %v2201_v30, 0.0 }
 0x2f8   : > { %v2066_v12 = vpop.f32.mrf.mxu3 }
 0x2f9   : > { %v4260_v18 = vadd.f32 %v2066_v12, %v1954_v24  ;;  %v2160_v24 = vsel %vm391_vm0, %v4199_v37, 0.0  ;;  %v2207_v12 = vmul.f32 %v4220_v51, %v4220_v51  ;;  %v2164_v37 = vsel %vm391_vm0, %v4233_v25, 0.0 }
 0x2fa   : > { %v1932_v54 = vpop.f32.mrf.mxu1 }
 0x2fb   : > { %2108 = vst.msk [vmem:[%s3902_s20 + $0xd8] sm:$0xff] %vm391_vm0, %v4260_v18  ;;  %v1933_v7 = vadd.f32 %v1932_v54, %v1819_v43 }
 0x2fd   : > { %v2046_v16 = vadd.f32 %v4149_v36, %v1933_v7  ;;  %v2261_v7 = vsel %vm391_vm0, %v2206_v49, 0.0 }
 0x2ff   : > { %2101 = vst.msk [vmem:[%s3902_s20 + $0xa0] sm:$0xff] %vm391_vm0, %v2046_v16  ;;  %v2202_v15 = vmul.f32 %v2046_v16, %v2046_v16  ;;  %v2152_v41 = vsel %vm391_vm0, %v2046_v16, 0.0  ;;  %v2162_v16 = vsel %vm391_vm0, %v4220_v51, 0.0  ;;  %v2166_v51 = vsel %vm391_vm0, %v4260_v18, 0.0 }
 0x300   : > { %v2069_v55 = vpop.f32.mrf.mxu3  ;;  %v2153_v28 = vadd.f32 %v2152_v41, %v2151_v5 }
 0x301   : > { %v4269_v27 = vadd.f32 %v2069_v55, %v1957_v8  ;;  %v2253_v4 = vsel %vm391_vm0, %v2202_v15, 0.0  ;;  %v2208_v8 = vmul.f32 %v4233_v25, %v4233_v25 }
 0x302   : > { %v1822_v59 = vpop.f32.mrf.mxu0 }
 0x303   : > { %2109 = vst.msk [vmem:[%s3902_s20 + $0xe0] sm:$0xff] %vm391_vm0, %v4269_v27  ;;  %v1935_v53 = vpop.f32.mrf.mxu1  ;;  %v2168_v25 = vsel %vm391_vm0, %v4269_v27, 0.0 }
 0x304   : > { %v1936_v60 = vadd.f32 %v1935_v53, %v1822_v59  ;;  %v2263_v53 = vsel %vm391_vm0, %v2207_v12, 0.0 }
 0x306   : > { %v2049_v32 = vadd.f32 %v4163_v57, %v1936_v60  ;;  %v2200_v57 = vmul.f32 %v2040_v19, %v2040_v19  ;;  %v2209_v60 = vmul.f32 %v4260_v18, %v4260_v18 }
 0x308   : > { %2102 = vst.msk [vmem:[%s3902_s20 + $0xa8] sm:$0xff] %vm391_vm0, %v2049_v32  ;;  %v2072_v36 = vpop.f32.mrf.mxu3  ;;  %v2249_v45 = vsel %vm391_vm0, %v2200_v57, 0.0  ;;  %v2203_v20 = vmul.f32 %v2049_v32, %v2049_v32  ;;  %v2154_v42 = vsel %vm391_vm0, %v2049_v32, 0.0 }
 0x309   : > { %v4278_v35 = vadd.f32 %v2072_v36, %v1960_v10  ;;  %v2250_v63 = vadd.f32 %v2249_v45, %v2248_v46  ;;  %v2155_v6 = vadd.f32 %v2154_v42, %v2153_v28  ;;  %v2265_v36 = vsel %vm391_vm0, %v2208_v8, 0.0 }
 0x30a   : > { %v2255_v44 = vsel %vm391_vm0, %v2203_v20, 0.0 }
 0x30b   : > { %2110 = vst.msk [vmem:[%s3902_s20 + $0xe8] sm:$0xff] %vm391_vm0, %v4278_v35  ;;  %v1825_v39 = vpop.f32.mrf.mxu0  ;;  %v2252_v3 = vadd.f32 %v2251_v50, %v2250_v63  ;;  %v2170_v18 = vsel %vm391_vm0, %v4278_v35, 0.0 }
 0x30d   : > { %v1938_v14 = vpop.f32.mrf.mxu1  ;;  %v2254_v46 = vadd.f32 %v2253_v4, %v2252_v3 }
 0x30e   : > { %v1939_v21 = vadd.f32 %v1938_v14, %v1825_v39  ;;  %v2210_v39 = vmul.f32 %v4269_v27, %v4269_v27 }
 0x30f   : > { %v2256_v38 = vadd.f32 %v2255_v44, %v2254_v46 }
 0x310   : > { %v2052_v11 = vadd.f32 %v4178_v33, %v1939_v21  ;;  %v2075_v47 = vpop.f32.mrf.mxu3  ;;  %v1966_v33 = vadd.f32 %v1965_v58, %v4190_v0  ;;  %v2269_v17 = vsel %vm391_vm0, %v2210_v39, 0.0 }
 0x311   : > { %v4285_v40 = vadd.f32 %v2075_v47, %v1963_v61  ;;  %v2267_v61 = vsel %vm391_vm0, %v2209_v60, 0.0 }
 0x312   : > { %2103 = vst.msk [vmem:[%s3902_s20 + $0xb0] sm:$0xff] %vm391_vm0, %v2052_v11  ;;  %v2204_v1 = vmul.f32 %v2052_v11, %v2052_v11  ;;  %v2156_v48 = vsel %vm391_vm0, %v2052_v11, 0.0  ;;  %v2211_v11 = vmul.f32 %v4278_v35, %v4278_v35 }
 0x313   : > { %2111 = vst.msk [vmem:[%s3902_s20 + $0xf0] sm:$0xff] %vm391_vm0, %v4285_v40  ;;  %v1828_v9 = vpop.f32.mrf.mxu0  ;;  %v2157_v62 = vadd.f32 %v2156_v48, %v2155_v6  ;;  %v2212_v30 = vmul.f32 %v4285_v40, %v4285_v40  ;;  %v2172_v27 = vsel %vm391_vm0, %v4285_v40, 0.0 }
 0x314   : > { %v2257_v31 = vsel %vm391_vm0, %v2204_v1, 0.0  ;;  %v2271_v15 = vsel %vm391_vm0, %v2211_v11, 0.0 }
 0x315   : > { %v2258_v34 = vadd.f32 %v2257_v31, %v2256_v38  ;;  %v2273_v41 = vsel %vm391_vm0, %v2212_v30, 0.0 }
 0x318   : > { %v2078_v52 = vpop.f32.mrf.mxu3 }
 0x319   : > { %v2079_v56 = vadd.f32 %v2078_v52, %v1966_v33 }
 0x31b   : > { %2112 = vst.msk [vmem:[%s3902_s20 + $0xf8] sm:$0xff] %vm391_vm0, %v2079_v56  ;;  %v1941_v0 = vpop.f32.mrf.mxu1  ;;  %v2213_v29 = vmul.f32 %v2079_v56, %v2079_v56  ;;  %v2174_v20 = vsel %vm391_vm0, %v2079_v56, 0.0 }
 0x31c   : > { %v1942_v2 = vadd.f32 %v1941_v0, %v1828_v9 }
 0x31d   : > { %v2275_v63 = vsel %vm391_vm0, %v2213_v29, 0.0 }
 0x31e   : > { %v2055_v19 = vadd.f32 %v4185_v22, %v1942_v2 }
 0x320   : > { %2104 = vst.msk [vmem:[%s3902_s20 + $0xb8] sm:$0xff] %vm391_vm0, %v2055_v19  ;;  %v2158_v13 = vsel %vm391_vm0, %v2055_v19, 0.0  ;;  %v2205_v23 = vmul.f32 %v2055_v19, %v2055_v19 }
 0x321   : > { %v2159_v58 = vadd.f32 %v2158_v13, %v2157_v62 }
 0x322   : > { %v2259_v22 = vsel %vm391_vm0, %v2205_v23, 0.0 }
 0x323   : > { %v2161_v43 = vadd.f32 %v2160_v24, %v2159_v58  ;;  %v2260_v54 = vadd.f32 %v2259_v22, %v2258_v34 }
 0x325   : > { %v2163_v55 = vadd.f32 %v2162_v16, %v2161_v43  ;;  %v2262_v59 = vadd.f32 %v2261_v7, %v2260_v54 }
 0x327   : > { %v2165_v32 = vadd.f32 %v2164_v37, %v2163_v55  ;;  %v2264_v10 = vadd.f32 %v2263_v53, %v2262_v59 }
 0x329   : > { %v2167_v14 = vadd.f32 %v2166_v51, %v2165_v32  ;;  %v2266_v21 = vadd.f32 %v2265_v36, %v2264_v10 }
 0x32b   : > { %v2169_v47 = vadd.f32 %v2168_v25, %v2167_v14  ;;  %v2268_v57 = vadd.f32 %v2267_v61, %v2266_v21 }
 0x32d   : > { %v2171_v45 = vadd.f32 %v2170_v18, %v2169_v47  ;;  %v2270_v26 = vadd.f32 %v2269_v17, %v2268_v57 }
 0x32f   : > { %v2173_v33 = vadd.f32 %v2172_v27, %v2171_v45  ;;  %v2272_v50 = vadd.f32 %v2271_v15, %v2270_v26 }
 0x331   : > { %v2175_v52 = vadd.f32 %v2174_v20, %v2173_v33  ;;  %v2274_v35 = vadd.f32 %v2273_v41, %v2272_v50 }
 0x333   : > { %v2176_v5 = vrot.slane %v2175_v52, 4  ;;  %v2276_v9 = vadd.f32 %v2275_v63, %v2274_v35 }
 0x335   : > { %v2177_v4 = vadd.f32 %v2176_v5, %v2175_v52  ;;  %v2277_v42 = vrot.slane %v2276_v9, 4 }
 0x337   : > { %v2178_v1 = vrot.slane %v2177_v4, 2  ;;  %v2278_v3 = vadd.f32 %v2277_v42, %v2276_v9 }
 0x339   : > { %v2179_v28 = vadd.f32 %v2178_v1, %v2177_v4  ;;  %v2279_v40 = vrot.slane %v2278_v3, 2 }
 0x33b   : > { %v2180_v0 = vrot.slane %v2179_v28, 1  ;;  %v2280_v44 = vadd.f32 %v2279_v40, %v2278_v3 }
 0x33d   : > { %v2281_v48 = vrot.slane %v2280_v44, 1  ;;  %v2181_v56 = vadd.f32 %v2180_v0, %v2179_v28 }
 0x33f   : > { %v2282_v2 = vadd.f32 %v2281_v48, %v2280_v44 }
 0x341   : > { %v2283_v46 = vsel %vm516_vm5, %v2181_v56, %v2282_v2 }
 0x342   : > { %2285 = vst.msk [vmem:[%s252_s25] sm:$0x3] %vm2284_vm12, %v2283_v46 }
 0x343 PF: > { %s17_s18 = sadd.s32 1, %s2537_s18  }
 0x344   : > { %p14_p7 = scmp.ge.s32.totalorder %s17_s18, 4  }
 0x346   :  { %16 = sbr.rel (!%p14_p7) target bundleno = 1 (0x1), region = 84 }
 0x34b   :  { %2321 = vsyncpa [#allocation4], 1 }
 0x34c   :  { %2323 = vsyncpa [#allocation4 + $0x1], 1 }

// kernel: basic_block.3
= control target key start
LH: loop header
LB: loop body
LE: loop exit
PB: predicated region body
PF: predicated region fallthrough
CT: control target
= control target key end

     0   :  { %11 = vsyncpa [#allocation4], 0  ;;  %s4369_s0 = inlined_call_operand.hbm [shape: f32[2,16,16,32], index: 0, kind: input, shape index: {}]   ;;  %s4370_s1 = inlined_call_operand.vmem [shape: f32[1,1,32], index: 1, kind: input, shape index: {}]   ;;  %s4371_s2 = inlined_call_operand.vmem [shape: f32[1,1,32], index: 2, kind: input, shape index: {}]   ;;  %s4372_s3 = inlined_call_operand.hbm [shape: f32[288,32], index: 3, kind: input, shape index: {}]   ;;  %s4373_s4 = inlined_call_operand.vmem [shape: f32[2,16,16,32], index: 4, kind: output, shape index: {0}]   ;;  %s4374_s5 = inlined_call_operand.vmem [shape: f32[2,2,32], index: 5, kind: output, shape index: {1}]  }
   0x1   :  { %13 = vsyncpa [#allocation4 + $0x1], 0 }
   0x2   :  { %14 = vsyncpa [#allocation6], 0  ;;  %s2590_s18 = smov 0   ;;  %s2592_s19 = smov 0  }
   0x3   :  { %s2594_s1 = smov 0   ;;  %s2596_s20 = smov 0  }
   0x4 LB: > { %s2609_s2 = sadd.s32 4294967295, %s2551_s20   ;;  %p40_p0 = scmp.ne.s32.totalorder %s2543_s19, %s2539_s18  ;;  %s2551_s20 = sphi %s2596_s20, %s4504_s20   ;;  %s2547_s1 = sphi %s2594_s1, %s4503_s1   ;;  %s2543_s19 = sphi %s2592_s19, %s4502_s19   ;;  %s2539_s18 = sphi %s2590_s18, %s4501_s18  }
   0x5   : > { %p41_p1 = scmp.eq.s32.totalorder %s2609_s2, 0  ;;  %p2313_p2 = scmp.ge.s32.totalorder %s2551_s20, 1 }
   0x6   : > { %p166_p3 = scmp.lt.s32.totalorder %s2551_s20, 3  ;;  %s183_s24 = sshll.u32 %s4372_s3, 4  ;;  %s184_s24 = int_to_ptr.hbm [resolvable:$true] %s183_s24 }
   0x7   : > { %p2617_p4 = por %p41_p1, %p40_p0  ;;  %s2553_s26 = smov [#allocation5]  }
   0x8   : > { %p2624_p5 = pnand %p2313_p2, %p166_p3  ;;  %s185_s27 = sshll.u32 %s2553_s26, 4  ;;  %s186_s27 = int_to_ptr.vmem [resolvable:$true] %s185_s27 }
   0x9   : > { %s2633_s28 = sadd.s32 1, %s2551_s20   ;;  %s2554_s29 = smov 128  }
   0xa   : > { %p2403_p6 = pneg %p2624_p5  ;;  %s2555_s30 = smov 8  }
   0xb   : > { %s24_s6 = ssub.s32 %s2551_s20, %s2633_s28  ;;  %s27_s7 = sadd.s32 1, %s2547_s1 }
   0xc   : > { %p2404_p7 = pnand %p2403_p6, %p41_p1  ;;  %p25_p8 = scmp.eq.s32.totalorder %s24_s6, 0 }
   0xd   : > { %p34_p9 = scmp.ne.s32.totalorder %s2547_s1, %s2543_s19  ;;  %p35_p10 = scmp.eq.s32.totalorder %s2551_s20, 0 }
   0xe   : > { %2406 = dma.hbm_to_vmem [thread:$0]  (!%p2404_p7), %s184_s24, 4608, %s186_s27, [#allocation6], %s2554_s29, %s2554_s29, %s2555_s30  }
   0xf   : > { %p2412_p11 = scmp.lt.s32.totalorder %s2551_s20, 2  ;;  %p36_p12 = por %p35_p10, %p34_p9 }
  0x10   : > { %s2646_s8 = scalar_select %p25_p8, %s2547_s1, %s27_s7  }
  0x11   : > { %s199_s9 = sand.u32 1, %s2547_s1   ;;  %s2359_s11 = sshll.u32 %s2551_s20, 8 }
  0x12   : > { %s2316_s10 = sshll.u32 %s199_s9, 8  ;;  %s208_s14 = scalar_lea.hbm %s4369_s0, %s2359_s11 }
  0x13   : > { %s203_s15 = scalar_lea.vmem [#allocation3], %s2316_s10  ;;  %s209_s17 = sshll.u32 %s208_s14, 4  ;;  %s210_s17 = int_to_ptr.hbm [resolvable:$true] %s209_s17 }
  0x14   : > { %s211_s16 = sshll.u32 %s203_s15, 4  ;;  %p2653_p13 = pnand %p2412_p11, %p36_p12  ;;  %s212_s16 = int_to_ptr.vmem [resolvable:$true] %s211_s16 }
  0x15   : > { %s200_s22 = scalar_lea.sflag [#allocation4], %s199_s9  ;;  %s2483_s23 = sshra.s32 %s210_s17, 4  ;;  %s2484_s23 = int_to_ptr.hbm [resolvable:$true] %s2483_s23 }
  0x16   : > { %s2485_s24 = scalar_lea.hbm %s2484_s23, 256  ;;  %p2487_p2 = pneg %p2653_p13 }
  0x17   : > { %p2486_p0 = scmp.ne.s32.totalorder %s2484_s23, %s2485_s24  ;;  %s2490_s27 = scalar_lea.hbm %s4369_s0, 512 }
  0x18   : > { %p2491_p7 = scmp.lt.s32.totalorder %s2484_s23, %s4369_s0  ;;  %p2492_p8 = scmp.lt.s32.totalorder %s2490_s27, %s2485_s24 }
  0x19   : > { %p2488_p3 = pnand %p2487_p2, %p2486_p0 }
  0x1a   : > { %p2493_p9 = por %p2492_p8, %p2491_p7 }
  0x1b   : > { %p2489_p6 = pneg %p2488_p3 }
  0x1d   : > { %p2494_p10 = pnand %p2493_p9, %p2489_p6 }
  0x1f   : > { %2497 = shalt.err (!%p2494_p10)
}
  0x20   : > { %2410 = dma.hbm_to_vmem [thread:$0]  (!%p2653_p13), %s210_s17, 4096, %s212_s16, %s200_s22, %s2554_s29, %s2554_s29, %s2555_s30  }
  0x21   : > { %223 = sbr.rel (%p2624_p5) target bundleno = 861 (0x35d), region = 36 }
  0x26   : > { %s225_s9 = sand.u32 1, %s2543_s19  }
  0x27   : > { %s2320_s10 = sshll.u32 %s225_s9, 8  ;;  %s226_s11 = scalar_lea.sflag [#allocation4], %s225_s9 }
  0x28   : > { %s2673_s12 = scalar_lea.vmem [#allocation3], %s2320_s10 }
  0x29   : > { %2530 = dma.done.wait (%p2617_p4), %s226_s11, 4096  }
  0x2a   : > { %2532 = vsyncadd (%p2617_p4), %s226_s11, 4294963200 }
  0x2b   : > { %2534 = dma.done.wait (%p41_p1), [#allocation6], 4608  }
  0x2c   : > { %2536 = vsyncadd (%p41_p1), [#allocation6], 4294962688  ;;  %v2684_v0 = vld [vmem:[%s2673_s12 + $0x20] sm:$0xff]  ;;  %v2687_v1 = vld [vmem:[%s2673_s12 + $0x10] sm:$0xff]  ;;  %s2556_s21 = smov 32   ;;  %vm309_vm0 = vcmask 261120  }
  0x2d   : > { %v2690_v2 = vld [vmem:[%s2673_s12] sm:$0xff]  ;;  %550 = vrot.lane.b32.xlu2 %v2684_v0, %s2556_s21  ;;  %546 = vrot.lane.b32.xlu1 %v2687_v1, %s2556_s21  ;;  %v2699_v3 = vld [vmem:[%s2673_s12 + $0x28] sm:$0xff]  ;;  %vm663_vm1 = vcmask 1046528   ;;  %v2557_v18 = vmov 0.0   ;;  %v667_v19 = vrot.slane %v2687_v1, 1  ;;  %vm1402_vm2 = vcmask 260096  }
  0x2e   : > { %542 = vrot.lane.b32.xlu0 %v2690_v2, %s2556_s21  ;;  %v2702_v4 = vld [vmem:[%s2673_s12 + $0x18] sm:$0xff]  ;;  %v2705_v5 = vld [vmem:[%s2673_s12 + $0x8] sm:$0xff]  ;;  %v2714_v6 = vld [vmem:[%s2673_s12 + $0x40] sm:$0xff]  ;;  %310 = vst.msk [vmem:[#allocation2 + $0x10] sm:$0xff] %vm309_vm0, %v2557_v18  ;;  %v664_v35 = vrot.slane %v2690_v2, 1  ;;  %s2558_s25 = smov 64  }
  0x2f   : > { %4425 = vst [vmem:[#allocation9_spill] sm:$0xff] %v2714_v6  ;;  %v2717_v7 = vld [vmem:[%s2673_s12 + $0x38] sm:$0xff]  ;;  %v2720_v8 = vld [vmem:[%s2673_s12 + $0x30] sm:$0xff]  ;;  %v2735_v11 = vld [vmem:[%s2673_s12 + $0x48] sm:$0xff]  ;;  %v2777_v20 = vrot.slane %v2702_v4, 1  ;;  %v2887_v34 = vrot.slane %v2705_v5, 1 }
  0x30   : > { %v2729_v9 = vld [vmem:[%s2673_s12 + $0x58] sm:$0xff]  ;;  %v2732_v10 = vld [vmem:[%s2673_s12 + $0x50] sm:$0xff]  ;;  %v2747_v13 = vld [vmem:[%s2673_s12 + $0x68] sm:$0xff]  ;;  %313 = vst.msk [vmem:[#allocation2 + $0x28] sm:$0xff] %vm309_vm0, %v2557_v18  ;;  %v2910_v37 = vrot.slane %v2699_v3, 1  ;;  %v670_v38 = vrot.slane %v2684_v0, 1 }
  0x31   : > { %4426 = vst [vmem:[#allocation10_spill] sm:$0xff] %v2732_v10  ;;  %v2744_v12 = vld [vmem:[%s2673_s12 + $0x70] sm:$0xff]  ;;  %v2750_v14 = vld [vmem:[%s2673_s12 + $0x60] sm:$0xff]  ;;  %v2759_v15 = vld [vmem:[%s2673_s12 + $0x88] sm:$0xff]  ;;  %v2783_v21 = vsel %vm663_vm1, %v667_v19, %v2777_v20  ;;  %v2897_v36 = vsel %vm663_vm1, %v664_v35, %v2887_v34  ;;  %v676_v40 = vrot.slane %v2714_v6, 1  ;;  %v2969_v41 = vrot.slane %v2735_v11, 1 }
  0x32   : > { %4427 = vst [vmem:[#allocation11_spill] sm:$0xff] %v2744_v12  ;;  %v2762_v16 = vld [vmem:[%s2673_s12 + $0x80] sm:$0xff]  ;;  %v2765_v17 = vld [vmem:[%s2673_s12 + $0x78] sm:$0xff]  ;;  %v2796_v24 = vld [vmem:[%s2673_s12 + $0x90] sm:$0xff]  ;;  %v2921_v39 = vsel %vm663_vm1, %v670_v38, %v2910_v37  ;;  %v2972_v42 = vrot.slane %v2717_v7, 1  ;;  %v673_v43 = vrot.slane %v2720_v8, 1 }
  0x33   : > { %4428 = vst [vmem:[#allocation12_spill] sm:$0xff] %v2750_v14  ;;  %v2788_v22 = vld [vmem:[%s2673_s12 + $0xa0] sm:$0xff]  ;;  %v2791_v23 = vld [vmem:[%s2673_s12 + $0x98] sm:$0xff]  ;;  %v2816_v26 = vld [vmem:[%s2673_s12 + $0xb0] sm:$0xff]  ;;  %v2980_v44 = vsel %vm663_vm1, %v676_v40, %v2969_v41  ;;  %v3001_v46 = vrot.slane %v2729_v9, 1  ;;  %v679_v47 = vrot.slane %v2732_v10, 1 }
  0x34   : > { %4429 = vst [vmem:[#allocation13_spill] sm:$0xff] %v2759_v15  ;;  %v2813_v25 = vld [vmem:[%s2673_s12 + $0xb8] sm:$0xff]  ;;  %v2820_v27 = vld [vmem:[%s2673_s12 + $0xa8] sm:$0xff]  ;;  %v2838_v28 = vld [vmem:[%s2673_s12 + $0xd0] sm:$0xff]  ;;  %v2986_v45 = vsel %vm663_vm1, %v673_v43, %v2972_v42  ;;  %v685_v50 = vrot.slane %v2744_v12, 1  ;;  %v3030_v51 = vrot.slane %v2765_v17, 1 }
  0x35   : > { %552 = vrot.lane.b32.xlu2 %v2699_v3, %s2556_s21  ;;  %548 = vrot.lane.b32.xlu1 %v2702_v4, %s2556_s21  ;;  %4430 = vst [vmem:[#allocation14_spill] sm:$0xff] %v2762_v16  ;;  %v2841_v29 = vld [vmem:[%s2673_s12 + $0xc8] sm:$0xff]  ;;  %v2846_v30 = vld [vmem:[%s2673_s12 + $0xc0] sm:$0xff]  ;;  %v3009_v48 = vsel %vm663_vm1, %v679_v47, %v3001_v46  ;;  %v3033_v52 = vrot.slane %v2747_v13, 1  ;;  %v682_v53 = vrot.slane %v2750_v14, 1  ;;  %v3118_v61 = vrot.slane %v2759_v15, 1 }
  0x36   : > { %544 = vrot.lane.b32.xlu0 %v2705_v5, %s2556_s21  ;;  %4431 = vst [vmem:[#allocation15_spill] sm:$0xff] %v2765_v17  ;;  %v2864_v31 = vld [vmem:[%s2673_s12 + $0xe8] sm:$0xff]  ;;  %v2867_v32 = vld [vmem:[%s2673_s12 + $0xe0] sm:$0xff]  ;;  %v2871_v33 = vld [vmem:[%s2673_s12 + $0xd8] sm:$0xff]  ;;  %v3041_v54 = vsel %vm663_vm1, %v685_v50, %v3030_v51  ;;  %v688_v62 = vrot.slane %v2762_v16, 1  ;;  %v3148_v38 = vrot.slane %v2684_v0, 7 }
  0x37   : > { %1403 = vst.msk [vmem:[#allocation2 + $0x28] sm:$0x7f] %vm1402_vm2, %v2777_v20  ;;  %v3047_v55 = vsel %vm663_vm1, %v682_v53, %v3033_v52  ;;  %v694_v40 = vrot.slane %v2788_v22, 1  ;;  %v3156_v43 = vrot.slane %v2820_v27, 1  ;;  %v3159_v47 = vrot.slane %v2791_v23, 1  ;;  %s2559_s29 = smov 96  }
  0x38   : > { %4432 = vst [vmem:[#allocation16_spill] sm:$0xff] %v2788_v22  ;;  %v3129_v63 = vsel %vm663_vm1, %v688_v62, %v3118_v61  ;;  %v691_v50 = vrot.slane %v2796_v24, 1  ;;  %v3163_v53 = vrot.slane %v2687_v1, 7  ;;  %v3168_v62 = vrot.slane %v2720_v8, 7  ;;  %p266_p1 = scmp.lt.s32.totalorder %s2609_s2, 1 }
  0x39   : > { %4433 = vst [vmem:[#allocation17_spill] sm:$0xff] %v2791_v23  ;;  %vm511_vm3 = vcmask 261121   ;;  %vm632_vm4 = vcmask 523520   ;;  %vm434_vm5 = vcmask 1040384   ;;  %vm799_vm6 = vcmask 785920  }
  0x3a   : > { %1401 = vst.msk [vmem:[#allocation2 + $0x10] sm:$0xff] %vm309_vm0, %v2783_v21  ;;  %vm801_vm7 = vcmask 784896   ;;  %vm1098_vm8 = vcmask 522496   ;;  %vm932_vm9 = vcmask 1048321   ;;  %vm1220_vm10 = vcmask 785921   ;;  %s4506_s2 = smov (!%p266_p1, %s2609_s2), 1 }
  0x3b   : > { %4434 = vst [vmem:[#allocation18_spill] sm:$0xff] %v2796_v24  ;;  %vm934_vm11 = vcmask 1048320   ;;  %s2360_s30 = sshll.u32 %s4506_s2, 8  ;;  %s2324_s16 = sshll.u32 %s4506_s2, 1  ;;  %vm2202_vm12 = vcmask 254976  }
  0x3c   : > { %307 = vst [vmem:[#allocation2] sm:$0xff] %v2557_v18  ;;  %s3906_s15 = scalar_lea.vmem %s4373_s4, %s2360_s30  ;;  %s274_s22 = scalar_lea.vmem %s4374_s5, %s2324_s16 }
  0x3d   : > { %558 = vrot.lane.b32.xlu2 %v2714_v6, %s2556_s21  ;;  %556 = vrot.lane.b32.xlu1 %v2717_v7, %s2556_s21  ;;  %308 = vst [vmem:[#allocation2 + $0x8] sm:$0xff] %v2557_v18 }
  0x3e   : > { %554 = vrot.lane.b32.xlu0 %v2720_v8, %s2556_s21  ;;  %311 = vst [vmem:[#allocation2 + $0x18] sm:$0xff] %v2557_v18 }
  0x3f   : > { %312 = vst [vmem:[#allocation2 + $0x20] sm:$0xff] %v2557_v18 }
  0x40   : > { %314 = vst [vmem:[#allocation2 + $0x30] sm:$0xff] %v2557_v18 }
  0x41   : > { %315 = vst [vmem:[#allocation2 + $0x38] sm:$0xff] %v2557_v18 }
  0x42   : > { %316 = vst.msk [vmem:[#allocation2 + $0x40] sm:$0xff] %vm309_vm0, %v2557_v18 }
  0x43   : > { %4435 = vst [vmem:[#allocation19_spill] sm:$0xff] %v2813_v25 }
  0x44   : > { %4436 = vst [vmem:[#allocation20_spill] sm:$0xff] %v2816_v26 }
  0x45   : > { %564 = vrot.lane.b32.xlu2 %v2729_v9, %s2556_s21  ;;  %562 = vrot.lane.b32.xlu1 %v2732_v10, %s2556_s21  ;;  %317 = vst [vmem:[#allocation2 + $0x48] sm:$0xff] %v2557_v18 }
  0x46   : > { %560 = vrot.lane.b32.xlu0 %v2735_v11, %s2556_s21  ;;  %4437 = vst [vmem:[#allocation21_spill] sm:$0xff] %v2820_v27 }
  0x47   : > { %318 = vst [vmem:[#allocation2 + $0x50] sm:$0xff] %v2557_v18 }
  0x48   : > { %319 = vst.msk [vmem:[#allocation2 + $0x58] sm:$0xff] %vm309_vm0, %v2557_v18 }
  0x49   : > { %320 = vst [vmem:[#allocation2 + $0x60] sm:$0xff] %v2557_v18 }
  0x4a   : > { %321 = vst [vmem:[#allocation2 + $0x68] sm:$0xff] %v2557_v18 }
  0x4b   : > { %322 = vst.msk [vmem:[#allocation2 + $0x70] sm:$0xff] %vm309_vm0, %v2557_v18 }
  0x4c   : > { %323 = vst [vmem:[#allocation2 + $0x78] sm:$0xff] %v2557_v18 }
  0x4d   : > { %570 = vrot.lane.b32.xlu2 %v2744_v12, %s2556_s21  ;;  %568 = vrot.lane.b32.xlu1 %v2747_v13, %s2556_s21  ;;  %324 = vst [vmem:[#allocation2 + $0x80] sm:$0xff] %v2557_v18 }
  0x4e   : > { %566 = vrot.lane.b32.xlu0 %v2750_v14, %s2556_s21  ;;  %4438 = vst [vmem:[#allocation22_spill] sm:$0xff] %v2841_v29 }
  0x4f   : > { %325 = vst.msk [vmem:[#allocation2 + $0x88] sm:$0xff] %vm309_vm0, %v2557_v18 }
  0x50   : > { %4439 = vst [vmem:[#allocation23_spill] sm:$0xff] %v2846_v30 }
  0x51   : > { %326 = vst [vmem:[#allocation2 + $0x90] sm:$0xff] %v2557_v18 }
  0x52   : > { %327 = vst [vmem:[#allocation2 + $0x98] sm:$0xff] %v2557_v18 }
  0x53   : > { %328 = vst.msk [vmem:[#allocation2 + $0xa0] sm:$0xff] %vm309_vm0, %v2557_v18 }
  0x54   : > { %329 = vst [vmem:[#allocation2 + $0xa8] sm:$0xff] %v2557_v18 }
  0x55   : > { %576 = vrot.lane.b32.xlu2 %v2759_v15, %s2556_s21  ;;  %574 = vrot.lane.b32.xlu1 %v2762_v16, %s2556_s21  ;;  %330 = vst [vmem:[#allocation2 + $0xb0] sm:$0xff] %v2557_v18 }
  0x56   : > { %572 = vrot.lane.b32.xlu0 %v2765_v17, %s2556_s21  ;;  %331 = vst.msk [vmem:[#allocation2 + $0xb8] sm:$0xff] %vm309_vm0, %v2557_v18 }
  0x57   : > { %332 = vst [vmem:[#allocation2 + $0xc0] sm:$0xff] %v2557_v18 }
  0x58   : > { %4440 = vst [vmem:[#allocation24_spill] sm:$0xff] %v2864_v31 }
  0x59   : > { %4441 = vst [vmem:[#allocation25_spill] sm:$0xff] %v2867_v32 }
  0x5a   : > { %333 = vst [vmem:[#allocation2 + $0xc8] sm:$0xff] %v2557_v18 }
  0x5b   : > { %4442 = vst [vmem:[#allocation26_spill] sm:$0xff] %v2871_v33 }
  0x5c   : > { %334 = vst.msk [vmem:[#allocation2 + $0xd0] sm:$0xff] %vm309_vm0, %v2557_v18 }
  0x5d   : > { %582 = vrot.lane.b32.xlu2 %v2788_v22, %s2556_s21  ;;  %580 = vrot.lane.b32.xlu1 %v2791_v23, %s2556_s21  ;;  %335 = vst [vmem:[#allocation2 + $0xd8] sm:$0xff] %v2557_v18 }
  0x5e   : > { %578 = vrot.lane.b32.xlu0 %v2796_v24, %s2556_s21  ;;  %336 = vst [vmem:[#allocation2 + $0xe0] sm:$0xff] %v2557_v18 }
  0x5f   : > { %337 = vst.msk [vmem:[#allocation2 + $0xe8] sm:$0xff] %vm309_vm0, %v2557_v18 }
  0x60   : > { %338 = vst [vmem:[#allocation2 + $0xf0] sm:$0xff] %v2557_v18 }
  0x61   : > { %339 = vst [vmem:[#allocation2 + $0xf8] sm:$0xff] %v2557_v18 }
  0x62   : > { %340 = vst.msk [vmem:[#allocation2 + $0x100] sm:$0xff] %vm309_vm0, %v2557_v18 }
  0x63   : > { %341 = vst [vmem:[#allocation2 + $0x108] sm:$0xff] %v2557_v18 }
  0x64   : > { %342 = vst [vmem:[#allocation2 + $0x110] sm:$0xff] %v2557_v18 }
  0x65   : > { %588 = vrot.lane.b32.xlu2 %v2813_v25, %s2556_s21  ;;  %586 = vrot.lane.b32.xlu1 %v2816_v26, %s2556_s21  ;;  %343 = vst.msk [vmem:[#allocation2 + $0x118] sm:$0xff] %vm309_vm0, %v2557_v18 }
  0x66   : > { %584 = vrot.lane.b32.xlu0 %v2820_v27, %s2556_s21  ;;  %344 = vst [vmem:[#allocation2 + $0x120] sm:$0xff] %v2557_v18 }
  0x67   : > { %345 = vst [vmem:[#allocation2 + $0x128] sm:$0xff] %v2557_v18 }
  0x68   : > { %346 = vst.msk [vmem:[#allocation2 + $0x130] sm:$0xff] %vm309_vm0, %v2557_v18 }
  0x69   : > { %347 = vst [vmem:[#allocation2 + $0x138] sm:$0xff] %v2557_v18 }
  0x6a   : > { %348 = vst [vmem:[#allocation2 + $0x140] sm:$0xff] %v2557_v18 }
  0x6b   : > { %349 = vst.msk [vmem:[#allocation2 + $0x148] sm:$0xff] %vm309_vm0, %v2557_v18 }
  0x6c   : > { %350 = vst [vmem:[#allocation2 + $0x150] sm:$0xff] %v2557_v18 }
  0x6d   : > { %594 = vrot.lane.b32.xlu2 %v2838_v28, %s2556_s21  ;;  %592 = vrot.lane.b32.xlu1 %v2841_v29, %s2556_s21  ;;  %351 = vst [vmem:[#allocation2 + $0x158] sm:$0xff] %v2557_v18 }
  0x6e   : > { %590 = vrot.lane.b32.xlu0 %v2846_v30, %s2556_s21  ;;  %352 = vst.msk [vmem:[#allocation2 + $0x160] sm:$0xff] %vm309_vm0, %v2557_v18 }
  0x6f   : > { %353 = vst [vmem:[#allocation2 + $0x168] sm:$0xff] %v2557_v18 }
  0x70   : > { %354 = vst [vmem:[#allocation2 + $0x170] sm:$0xff] %v2557_v18 }
  0x71   : > { %355 = vst.msk [vmem:[#allocation2 + $0x178] sm:$0xff] %vm309_vm0, %v2557_v18 }
  0x72   : > { %356 = vst [vmem:[#allocation2 + $0x180] sm:$0xff] %v2557_v18 }
  0x73   : > { %357 = vst [vmem:[#allocation2 + $0x188] sm:$0xff] %v2557_v18 }
  0x74   : > { %358 = vst.msk [vmem:[#allocation2 + $0x190] sm:$0xff] %vm309_vm0, %v2557_v18 }
  0x75   : > { %600 = vrot.lane.b32.xlu2 %v2864_v31, %s2556_s21  ;;  %598 = vrot.lane.b32.xlu1 %v2867_v32, %s2556_s21  ;;  %359 = vst [vmem:[#allocation2 + $0x198] sm:$0xff] %v2557_v18 }
  0x76   : > { %596 = vrot.lane.b32.xlu0 %v2871_v33, %s2556_s21  ;;  %360 = vst [vmem:[#allocation2 + $0x1a0] sm:$0xff] %v2557_v18 }
  0x77   : > { %361 = vst.msk [vmem:[#allocation2 + $0x1a8] sm:$0xff] %vm309_vm0, %v2557_v18 }
  0x78   : > { %362 = vst [vmem:[#allocation2 + $0x1b0] sm:$0xff] %v2557_v18 }
  0x79   : > { %363 = vst [vmem:[#allocation2 + $0x1b8] sm:$0xff] %v2557_v18 }
  0x7a   : > { %364 = vst.msk [vmem:[#allocation2 + $0x1c0] sm:$0xff] %vm309_vm0, %v2557_v18 }
  0x7b   : > { %365 = vst [vmem:[#allocation2 + $0x1c8] sm:$0xff] %v2557_v18 }
  0x7c   : > { %366 = vst [vmem:[#allocation2 + $0x1d0] sm:$0xff] %v2557_v18 }
  0x7d   : > { %713 = vrot.lane.b32.xlu2 %v2783_v21, %s2558_s25  ;;  %711 = vrot.lane.b32.xlu1 %v2887_v34, %s2558_s25  ;;  %367 = vst.msk [vmem:[#allocation2 + $0x1d8] sm:$0xff] %vm309_vm0, %v2557_v18 }
  0x7e   : > { %709 = vrot.lane.b32.xlu0 %v2897_v36, %s2558_s25  ;;  %368 = vst [vmem:[#allocation2 + $0x1e0] sm:$0xff] %v2557_v18 }
  0x7f   : > { %369 = vst [vmem:[#allocation2 + $0x1e8] sm:$0xff] %v2557_v18 }
  0x80   : > { %370 = vst.msk [vmem:[#allocation2 + $0x1f0] sm:$0xff] %vm309_vm0, %v2557_v18 }
  0x81   : > { %371 = vst [vmem:[#allocation2 + $0x1f8] sm:$0xff] %v2557_v18 }
  0x82   : > { %372 = vst [vmem:[#allocation2 + $0x200] sm:$0xff] %v2557_v18 }
  0x83   : > { %373 = vst.msk [vmem:[#allocation2 + $0x208] sm:$0xff] %vm309_vm0, %v2557_v18 }
  0x84   : > { %374 = vst [vmem:[#allocation2 + $0x210] sm:$0xff] %v2557_v18 }
  0x85   : > { %719 = vrot.lane.b32.xlu2 %v2910_v37, %s2558_s25  ;;  %717 = vrot.lane.b32.xlu1 %v2921_v39, %s2558_s25  ;;  %375 = vst [vmem:[#allocation2 + $0x218] sm:$0xff] %v2557_v18 }
  0x86   : > { %715 = vrot.lane.b32.xlu0 %v2777_v20, %s2558_s25  ;;  %376 = vst.msk [vmem:[#allocation2 + $0x220] sm:$0xff] %vm309_vm0, %v2557_v18 }
  0x87   : > { %377 = vst [vmem:[#allocation2 + $0x228] sm:$0xff] %v2557_v18  ;;  %v3017_v49 = vpop.permute.xlu2 %550 }
  0x88   : > { %378 = vst [vmem:[#allocation2 + $0x230] sm:$0xff] %v2557_v18 }
  0x89   : > { %4443 = vst [vmem:[#allocation27_spill] sm:$0xff] %v2969_v41 }
  0x8a   : > { %379 = vst.msk [vmem:[#allocation2 + $0x238] sm:$0xff] %vm309_vm0, %v2557_v18 }
  0x8b   : > { %380 = vst [vmem:[#allocation2 + $0x240] sm:$0xff] %v2557_v18 }
  0x8c   : > { %4444 = vst [vmem:[#allocation28_spill] sm:$0xff] %v2980_v44 }
  0x8d   : > { %723 = vrot.lane.b32.xlu1 %v2972_v42, %s2558_s25  ;;  %381 = vst [vmem:[#allocation2 + $0x248] sm:$0xff] %v2557_v18  ;;  %725 = vrot.lane.b32.xlu2 %v2980_v44, %s2558_s25 }
  0x8e   : > { %721 = vrot.lane.b32.xlu0 %v2986_v45, %s2558_s25  ;;  %382 = vst.msk [vmem:[#allocation2 + $0x250] sm:$0xff] %vm309_vm0, %v2557_v18 }
  0x8f   : > { %383 = vst [vmem:[#allocation2 + $0x258] sm:$0xff] %v2557_v18  ;;  %v3057_v56 = vpop.permute.xlu2 %552 }
  0x90   : > { %384 = vst [vmem:[#allocation2 + $0x260] sm:$0xff] %v2557_v18 }
  0x91   : > { %385 = vst.msk [vmem:[#allocation2 + $0x268] sm:$0xff] %vm309_vm0, %v2557_v18 }
  0x92   : > { %386 = vst [vmem:[#allocation2 + $0x270] sm:$0xff] %v2557_v18 }
  0x93   : > { %4445 = vst [vmem:[#allocation29_spill] sm:$0xff] %v3001_v46 }
  0x94   : > { %387 = vst [vmem:[#allocation2 + $0x278] sm:$0xff] %v2557_v18 }
  0x95   : > { %388 = vst.msk [vmem:[#allocation2 + $0x280] sm:$0xff] %vm309_vm0, %v2557_v18  ;;  %731 = vrot.lane.b32.xlu2 %v3001_v46, %s2558_s25  ;;  %729 = vrot.lane.b32.xlu1 %v3009_v48, %s2558_s25 }
  0x96   : > { %389 = vst [vmem:[#allocation2 + $0x288] sm:$0xff] %v2557_v18  ;;  %727 = vrot.lane.b32.xlu0 %v2969_v41, %s2558_s25 }
  0x97   : > { %390 = vst [vmem:[#allocation2 + $0x290] sm:$0xff] %v2557_v18  ;;  %v3079_v57 = vpop.permute.xlu2 %558 }
  0x98   : > { %391 = vst.msk [vmem:[#allocation2 + $0x298] sm:$0xff] %vm309_vm0, %v2557_v18 }
  0x99   : > { %392 = vst [vmem:[#allocation2 + $0x2a0] sm:$0xff] %v2557_v18 }
  0x9a   : > { %393 = vst [vmem:[#allocation2 + $0x2a8] sm:$0xff] %v2557_v18 }
  0x9b   : > { %394 = vst.msk [vmem:[#allocation2 + $0x2b0] sm:$0xff] %vm309_vm0, %v2557_v18 }
  0x9c   : > { %395 = vst [vmem:[#allocation2 + $0x2b8] sm:$0xff] %v2557_v18 }
  0x9d   : > { %4446 = vst [vmem:[#allocation30_spill] sm:$0xff] %v3030_v51  ;;  %735 = vrot.lane.b32.xlu1 %v3033_v52, %s2558_s25  ;;  %737 = vrot.lane.b32.xlu2 %v3041_v54, %s2558_s25 }
  0x9e   : > { %396 = vst [vmem:[#allocation2 + $0x2c0] sm:$0xff] %v2557_v18  ;;  %733 = vrot.lane.b32.xlu0 %v3047_v55, %s2558_s25 }
  0x9f   : > { %397 = vst.msk [vmem:[#allocation2 + $0x2c8] sm:$0xff] %vm309_vm0, %v2557_v18  ;;  %v3101_v58 = vpop.permute.xlu2 %564  ;;  %v3103_v59 = vpop.permute.xlu1 %546 }
  0xa0   : > { %398 = vst [vmem:[#allocation2 + $0x2d0] sm:$0xff] %v2557_v18  ;;  %v3109_v60 = vpop.permute.xlu0 %542 }
  0xa1   : > { %399 = vst [vmem:[#allocation2 + $0x2d8] sm:$0xff] %v2557_v18 }
  0xa2   : > { %400 = vst.msk [vmem:[#allocation2 + $0x2e0] sm:$0xff] %vm309_vm0, %v2557_v18 }
  0xa3   : > { %401 = vst [vmem:[#allocation2 + $0x2e8] sm:$0xff] %v2557_v18 }
  0xa4   : > { %402 = vst [vmem:[#allocation2 + $0x2f0] sm:$0xff] %v2557_v18 }
  0xa5   : > { %403 = vst.msk [vmem:[#allocation2 + $0x2f8] sm:$0xff] %vm309_vm0, %v2557_v18  ;;  %743 = vrot.lane.b32.xlu2 %v3118_v61, %s2558_s25  ;;  %741 = vrot.lane.b32.xlu1 %v3129_v63, %s2558_s25 }
  0xa6   : > { %966 = vst.msk [vmem:[#allocation2 + $0x8] sm:$0xff] %vm309_vm0, %v2690_v2  ;;  %739 = vrot.lane.b32.xlu0 %v3030_v51, %s2558_s25 }
  0xa7   : > { %967 = vst.msk [vmem:[#allocation2 + $0x20] sm:$0xff] %vm309_vm0, %v2705_v5  ;;  %v3139_v18 = vpop.permute.xlu2 %570  ;;  %v3141_v19 = vpop.permute.xlu1 %548 }
  0xa8   : > { %968 = vst.msk [vmem:[#allocation2 + $0x38] sm:$0xff] %vm309_vm0, %v2687_v1  ;;  %v3145_v35 = vpop.permute.xlu0 %544 }
  0xa9   : > { %969 = vst.msk [vmem:[#allocation2 + $0x50] sm:$0xff] %vm309_vm0, %v2702_v4 }
  0xaa   : > { %970 = vst.msk [vmem:[#allocation2 + $0x68] sm:$0xff] %vm309_vm0, %v2684_v0 }
  0xab   : > { %971 = vst.msk [vmem:[#allocation2 + $0x80] sm:$0xff] %vm309_vm0, %v2699_v3 }
  0xac   : > { %972 = vst.msk [vmem:[#allocation2 + $0x98] sm:$0xff] %vm309_vm0, %v2720_v8 }
  0xad   : > { %973 = vst.msk [vmem:[#allocation2 + $0xb0] sm:$0xff] %vm309_vm0, %v2717_v7  ;;  %747 = vrot.lane.b32.xlu1 %v3159_v47, %s2558_s25 }
  0xae   : > { %974 = vst.msk [vmem:[#allocation2 + $0xc8] sm:$0xff] %vm309_vm0, %v2714_v6 }
  0xaf   : > { %975 = vst.msk [vmem:[#allocation2 + $0xe0] sm:$0xff] %vm309_vm0, %v2735_v11 }
  0xb0   : > { %976 = vst.msk [vmem:[#allocation2 + $0xf8] sm:$0xff] %vm309_vm0, %v2732_v10 }
  0xb1   : > { %977 = vst.msk [vmem:[#allocation2 + $0x110] sm:$0xff] %vm309_vm0, %v2729_v9 }
  0xb2   : > { %978 = vst.msk [vmem:[#allocation2 + $0x128] sm:$0xff] %vm309_vm0, %v2750_v14 }
  0xb3   : > { %979 = vst.msk [vmem:[#allocation2 + $0x140] sm:$0xff] %vm309_vm0, %v2747_v13 }
  0xb4   : > { %980 = vst.msk [vmem:[#allocation2 + $0x158] sm:$0xff] %vm309_vm0, %v2744_v12 }
  0xb5   : > { %981 = vst.msk [vmem:[#allocation2 + $0x170] sm:$0xff] %vm309_vm0, %v2765_v17  ;;  %v3203_v17 = vpop.permute.xlu1 %556  ;;  %1001 = vrot.lane.b32.xlu1 %v2897_v36, %s2556_s21 }
  0xb6   : > { %982 = vst.msk [vmem:[#allocation2 + $0x188] sm:$0xff] %vm309_vm0, %v2762_v16 }
  0xb7   : > { %4447 = vst [vmem:[#allocation31_spill] sm:$0xff] %v3101_v58  ;;  %v3206_v58 = vrot.slane %v2744_v12, 7  ;;  %v3223_v12 = vrot.slane %v2788_v22, 7 }
  0xb8   : > { %983 = vst.msk [vmem:[#allocation2 + $0x1a0] sm:$0xff] %vm309_vm0, %v2759_v15  ;;  %v3181_v15 = vrot.slane %v2714_v6, 7  ;;  %v3201_v6 = vpop.permute.xlu2 %576 }
  0xb9   : > { %984 = vst.msk [vmem:[#allocation2 + $0x1b8] sm:$0xff] %vm309_vm0, %v2796_v24 }
  0xba   : > { %985 = vst.msk [vmem:[#allocation2 + $0x1d0] sm:$0xff] %vm309_vm0, %v2791_v23 }
  0xbb   : > { %986 = vst.msk [vmem:[#allocation2 + $0x1e8] sm:$0xff] %vm309_vm0, %v2788_v22  ;;  %v3242_v22 = vrot.slane %v2838_v28, 7 }
  0xbc   : > { %987 = vst.msk [vmem:[#allocation2 + $0x200] sm:$0xff] %vm309_vm0, %v2820_v27 }
  0xbd   : > { %988 = vst.msk [vmem:[#allocation2 + $0x218] sm:$0xff] %vm309_vm0, %v2816_v26  ;;  %1251 = vrot.lane.b32.xlu1 %v2687_v1, %s2559_s29  ;;  %v439_v1 = vrot.slane %v2702_v4, 7 }
  0xbe   : > { %989 = vst.msk [vmem:[#allocation2 + $0x230] sm:$0xff] %vm309_vm0, %v2813_v25 }
  0xbf   : > { %990 = vst.msk [vmem:[#allocation2 + $0x248] sm:$0xff] %vm309_vm0, %v2846_v30 }
  0xc0   : > { %991 = vst.msk [vmem:[#allocation2 + $0x260] sm:$0xff] %vm309_vm0, %v2841_v29 }
  0xc1   : > { %992 = vst.msk [vmem:[#allocation2 + $0x278] sm:$0xff] %vm309_vm0, %v2838_v28 }
  0xc2   : > { %993 = vst.msk [vmem:[#allocation2 + $0x290] sm:$0xff] %vm309_vm0, %v2871_v33  ;;  %v3178_v33 = vsel %vm663_vm1, %v691_v50, %v3159_v47  ;;  %v3197_v50 = vrot.slane %v2750_v14, 7  ;;  %v3218_v14 = vrot.slane %v2796_v24, 7  ;;  %v3249_v24 = vrot.slane %v2867_v32, 7 }
  0xc3   : > { %994 = vst.msk [vmem:[#allocation2 + $0x2a8] sm:$0xff] %vm309_vm0, %v2867_v32  ;;  %745 = vrot.lane.b32.xlu0 %v3178_v33, %s2558_s25  ;;  %v435_v32 = vrot.slane %v2690_v2, 7 }
  0xc4   : > { %995 = vst.msk [vmem:[#allocation2 + $0x2c0] sm:$0xff] %vm309_vm0, %v2864_v31  ;;  %v3174_v31 = vsel %vm663_vm1, %v694_v40, %v3156_v43  ;;  %v3190_v40 = vrot.slane %v2732_v10, 7  ;;  %v3213_v10 = vrot.slane %v2762_v16, 7  ;;  %v3233_v16 = vrot.slane %v2846_v30, 7 }
  0xc5   : > { %4448 = vst [vmem:[#allocation32_spill] sm:$0xff] %v3156_v43  ;;  %749 = vrot.lane.b32.xlu2 %v3174_v31, %s2558_s25 }
  0xc6   : > { %4449 = vst [vmem:[#allocation33_spill] sm:$0xff] %v3159_v47 }
  0xc7   : > { %1405 = vst.msk [vmem:[#allocation2 + $0x58] sm:$0x7f] %vm1402_vm2, %v2910_v37 }
  0xc8   : > { %1404 = vst.msk [vmem:[#allocation2 + $0x40] sm:$0xff] %vm309_vm0, %v2921_v39 }
  0xc9   : > { %4450 = vst [vmem:[#allocation34_spill] sm:$0xff] %v3174_v31 }
  0xca   : > { %4451 = vst [vmem:[#allocation35_spill] sm:$0xff] %v3178_v33 }
  0xcb   : > { %516 = vst.msk [vmem:[#allocation2 + $0x90] sm:$0xfe] %vm511_vm3, %v3148_v38  ;;  %751 = vrot.lane.b32.xlu0 %v3156_v43, %s2558_s25 }
  0xcc   : > { %637 = vst.msk [vmem:[#allocation2 + $0x90] sm:$0xff] %vm632_vm4, %v3017_v49  ;;  %v3210_v49 = vpop.permute.xlu0 %554 }
  0xcd   : > { %514 = vst.msk [vmem:[#allocation2 + $0x60] sm:$0xfe] %vm511_vm3, %v3163_v53  ;;  %1130 = vrot.lane.b32.xlu2 %v3163_v53, %s2558_s25 }
  0xce   : > { %4452 = vst [vmem:[#allocation36_spill] sm:$0xff] %v3201_v6  ;;  %v3228_v6 = vrot.slane %v2816_v26, 7 }
  0xcf   : > { %4453 = vst [vmem:[#allocation37_spill] sm:$0xff] %v3206_v58 }
  0xd0   : > { %518 = vst.msk [vmem:[#allocation2 + $0xc0] sm:$0xfe] %vm511_vm3, %v3168_v62 }
  0xd1   : > { %4454 = vst [vmem:[#allocation38_spill] sm:$0xff] %v3213_v10 }
  0xd2   : > { %520 = vst.msk [vmem:[#allocation2 + $0xf0] sm:$0xfe] %vm511_vm3, %v3181_v15 }
  0xd3   : > { %522 = vst.msk [vmem:[#allocation2 + $0x120] sm:$0xfe] %vm511_vm3, %v3190_v40  ;;  %836 = vrot.lane.b32.xlu0 %v435_v32, %s2559_s29 }
  0xd4   : > { %4455 = vst [vmem:[#allocation39_spill] sm:$0xff] %v3223_v12  ;;  %v3255_v36 = vpop.permute.xlu0 %560 }
  0xd5   : > { %524 = vst.msk [vmem:[#allocation2 + $0x150] sm:$0xfe] %vm511_vm3, %v3197_v50  ;;  %1003 = vrot.lane.b32.xlu2 %v2887_v34, %s2556_s21  ;;  %v436_v34 = vrot.slane %v2705_v5, 7  ;;  %v440_v5 = vsel %vm434_vm5, %v3163_v53, %v439_v1 }
  0xd6   : > { %4456 = vst [vmem:[#allocation40_spill] sm:$0xff] %v3228_v6 }
  0xd7   : > { %526 = vst.msk [vmem:[#allocation2 + $0x180] sm:$0xfe] %vm511_vm3, %v3206_v58  ;;  %v563_v58 = vpop.permute.xlu1 %562 }
  0xd8   : > { %4457 = vst [vmem:[#allocation41_spill] sm:$0xff] %v3233_v16 }
  0xd9   : > { %528 = vst.msk [vmem:[#allocation2 + $0x1b0] sm:$0xfe] %vm511_vm3, %v3213_v10  ;;  %v583_v10 = vpop.permute.xlu2 %582 }
  0xda   : > { %530 = vst.msk [vmem:[#allocation2 + $0x1e0] sm:$0xfe] %vm511_vm3, %v3218_v14 }
  0xdb   : > { %532 = vst.msk [vmem:[#allocation2 + $0x210] sm:$0xfe] %vm511_vm3, %v3223_v12  ;;  %1132 = vrot.lane.b32.xlu0 %v440_v5, %s2558_s25 }
  0xdc   : > { %534 = vst.msk [vmem:[#allocation2 + $0x240] sm:$0xfe] %vm511_vm3, %v3228_v6 }
  0xdd   : > { %536 = vst.msk [vmem:[#allocation2 + $0x270] sm:$0xfe] %vm511_vm3, %v3233_v16  ;;  %1253 = vrot.lane.b32.xlu2 %v2702_v4, %s2559_s29  ;;  %v469_v4 = vrot.slane %v2813_v25, 7 }
  0xde   : > { %538 = vst.msk [vmem:[#allocation2 + $0x2a0] sm:$0xfe] %vm511_vm3, %v3242_v22 }
  0xdf   : > { %540 = vst.msk [vmem:[#allocation2 + $0x2d0] sm:$0xfe] %vm511_vm3, %v3249_v24  ;;  %v3277_v2 = vpop.permute.xlu1 %568 }
  0xe0   : > { %1408 = vst.msk [vmem:[#allocation2 + $0xa0] sm:$0xff] %vm309_vm0, %v2980_v44 }
  0xe1   : > { %1409 = vst.msk [vmem:[#allocation2 + $0xb8] sm:$0x7f] %vm1402_vm2, %v2969_v41  ;;  %v589_v44 = vpop.permute.xlu2 %588  ;;  %v567_v41 = vpop.permute.xlu0 %566 }
  0xe2   : > { %1407 = vst.msk [vmem:[#allocation2 + $0x88] sm:$0x7f] %vm1402_vm2, %v2972_v42 }
  0xe3   : > { %1406 = vst.msk [vmem:[#allocation2 + $0x70] sm:$0xff] %vm309_vm0, %v2986_v45  ;;  %1005 = vrot.lane.b32.xlu0 %v2783_v21, %s2556_s21  ;;  %v463_v21 = vrot.slane %v2791_v23, 7  ;;  %v1528_v23 = vld [vmem:[#allocation5] sm:$0xff] }
  0xe4   : > { %1411 = vst.msk [vmem:[#allocation2 + $0xe8] sm:$0x7f] %vm1402_vm2, %v3001_v46  ;;  %v437_v46 = vsel %vm434_vm5, %v435_v32, %v436_v34 }
  0xe5   : > { %1410 = vst.msk [vmem:[#allocation2 + $0xd0] sm:$0xff] %vm309_vm0, %v3009_v48  ;;  %838 = vrot.lane.b32.xlu1 %v437_v46, %s2559_s29  ;;  %840 = vrot.lane.b32.xlu2 %v3163_v53, %s2559_s29  ;;  %v442_v53 = vrot.slane %v2699_v3, 7 }
  0xe6   : > { %641 = vst.msk [vmem:[#allocation2 + $0xf0] sm:$0xff] %vm632_vm4, %v3079_v57 }
  0xe7   : > { %1414 = vst.msk [vmem:[#allocation2 + $0x130] sm:$0xff] %vm309_vm0, %v3041_v54  ;;  %v575_v34 = vpop.permute.xlu1 %574 }
  0xe8   : > { %1415 = vst.msk [vmem:[#allocation2 + $0x148] sm:$0x7f] %vm1402_vm2, %v3030_v51 }
  0xe9   : > { %1413 = vst.msk [vmem:[#allocation2 + $0x118] sm:$0x7f] %vm1402_vm2, %v3033_v52  ;;  %v595_v57 = vpop.permute.xlu2 %594  ;;  %v3306_v51 = vpop.permute.xlu0 %572 }
  0xea   : > { %1412 = vst.msk [vmem:[#allocation2 + $0x100] sm:$0xff] %vm309_vm0, %v3047_v55 }
  0xeb   : > { %635 = vst.msk [vmem:[#allocation2 + $0x60] sm:$0xff] %vm632_vm4, %v3103_v59  ;;  %1255 = vrot.lane.b32.xlu0 %v2684_v0, %s2559_s29  ;;  %v466_v0 = vrot.slane %v2820_v27, 7  ;;  %v3596_v27 = vld [vmem:[#allocation5 + $0xa8] sm:$0xff] }
  0xec   : > { %1417 = vst.msk [vmem:[#allocation2 + $0x178] sm:$0x7f] %vm1402_vm2, %v3118_v61 }
  0xed   : > { %1416 = vst.msk [vmem:[#allocation2 + $0x160] sm:$0xff] %vm309_vm0, %v3129_v63  ;;  %1134 = vrot.lane.b32.xlu1 %v3148_v38, %s2558_s25 }
  0xee   : > { %647 = vst.msk [vmem:[#allocation2 + $0x180] sm:$0xff] %vm632_vm4, %v3139_v18 }
  0xef   : > { %1420 = vst.msk [vmem:[#allocation2 + $0x1c0] sm:$0xff] %vm309_vm0, %v3174_v31  ;;  %v581_v18 = vpop.permute.xlu1 %580 }
  0xf0   : > { %1421 = vst.msk [vmem:[#allocation2 + $0x1d8] sm:$0x7f] %vm1402_vm2, %v3156_v43  ;;  %v3336_v43 = vsel %vm434_vm5, %v3228_v6, %v469_v4  ;;  %v700_v4 = vrot.slane %v2846_v30, 1  ;;  %v3556_v30 = vld [vmem:[#allocation5 + $0xc0] sm:$0xff] }
  0xf1   : > { %1419 = vst.msk [vmem:[#allocation2 + $0x1a8] sm:$0x7f] %vm1402_vm2, %v3159_v47  ;;  %v3329_v59 = vpop.permute.xlu2 %600  ;;  %v579_v1 = vpop.permute.xlu0 %578 }
  0xf2   : > { %1418 = vst.msk [vmem:[#allocation2 + $0x190] sm:$0xff] %vm309_vm0, %v3178_v33  ;;  %v3614_v33 = vld [vmem:[#allocation5 + $0x98] sm:$0xff] }
  0xf3   : > { %639 = vst.msk [vmem:[#allocation2 + $0xc0] sm:$0xff] %vm632_vm4, %v3210_v49  ;;  %842 = vrot.lane.b32.xlu0 %v440_v5, %s2559_s29 }
  0xf4   : > { %653 = vst.msk [vmem:[#allocation2 + $0x210] sm:$0xff] %vm632_vm4, %v583_v10  ;;  %v3345_v10 = vsel %vm434_vm5, %v3148_v38, %v442_v53 }
  0xf5   : > { %643 = vst.msk [vmem:[#allocation2 + $0x120] sm:$0xff] %vm632_vm4, %v563_v58  ;;  %1136 = vrot.lane.b32.xlu2 %v3345_v10, %s2558_s25  ;;  %1007 = vrot.lane.b32.xlu1 %v2777_v20, %s2556_s21  ;;  %v3364_v20 = vsel %vm434_vm5, %v3218_v14, %v463_v21  ;;  %v451_v21 = vrot.slane %v2729_v9, 7 }
  0xf6   : > { %4458 = vst [vmem:[#allocation42_spill] sm:$0xff] %v3336_v43 }
  0xf7   : > { %512 = vst.msk [vmem:[#allocation2 + $0x30] sm:$0xfe] %vm511_vm3, %v435_v32  ;;  %v587_v32 = vpop.permute.xlu1 %586 }
  0xf8   : > { %633 = vst.msk [vmem:[#allocation2 + $0x30] sm:$0xff] %vm632_vm4, %v3109_v60 }
  0xf9   : > { %535 = vst.msk [vmem:[#allocation2 + $0x258] sm:$0xff] %vm309_vm0, %v3336_v43  ;;  %v714_v58 = vpop.permute.xlu2 %713  ;;  %v1434_v43 = vld [vmem:[#allocation2 + $0x10] sm:$0xff] }
  0xfa   : > { %656 = vst.msk [vmem:[#allocation2 + $0x258] sm:$0xff] %vm632_vm4, %v589_v44  ;;  %v585_v44 = vpop.permute.xlu0 %584 }
  0xfb   : > { %645 = vst.msk [vmem:[#allocation2 + $0x150] sm:$0xff] %vm632_vm4, %v567_v41  ;;  %1138 = vrot.lane.b32.xlu0 %v3168_v62, %s2558_s25 }
  0xfc   : > { %515 = vst.msk [vmem:[#allocation2 + $0x78] sm:$0xff] %vm309_vm0, %v440_v5 }
  0xfd   : > { %636 = vst.msk [vmem:[#allocation2 + $0x78] sm:$0xff] %vm632_vm4, %v3141_v19  ;;  %1009 = vrot.lane.b32.xlu2 %v2921_v39, %s2556_s21  ;;  %1257 = vrot.lane.b32.xlu1 %v2699_v3, %s2559_s29  ;;  %v3384_v39 = vsel %vm434_vm5, %v3223_v12, %v466_v0  ;;  %v697_v3 = vrot.slane %v2816_v26, 1  ;;  %v445_v19 = vrot.slane %v2717_v7, 7  ;;  %v454_v0 = vrot.slane %v2747_v13, 7  ;;  %v3567_v26 = vld [vmem:[#allocation5 + $0x108] sm:$0xff]  ;;  %v3609_v12 = vld [vmem:[#allocation5 + $0xa0] sm:$0xff] }
  0xfe   : > { %513 = vst.msk [vmem:[#allocation2 + $0x48] sm:$0xff] %vm309_vm0, %v437_v46 }
  0xff   : > { %634 = vst.msk [vmem:[#allocation2 + $0x48] sm:$0xff] %vm632_vm4, %v3145_v35  ;;  %v593_v41 = vpop.permute.xlu1 %592 }
 0x100   : > { %659 = vst.msk [vmem:[#allocation2 + $0x2a0] sm:$0xff] %vm632_vm4, %v595_v57  ;;  %v3415_v57 = vsel %vm434_vm5, %v3168_v62, %v445_v19  ;;  %v3480_v19 = vld [vmem:[#allocation5 + $0xf8] sm:$0xff] }
 0x101   : > { %649 = vst.msk [vmem:[#allocation2 + $0x1b0] sm:$0xff] %vm632_vm4, %v575_v34  ;;  %v720_v46 = vpop.permute.xlu2 %719  ;;  %1773 = vmatpush.msra.mxu1 %v3480_v19 }
 0x102   : > { %531 = vst.msk [vmem:[#allocation2 + $0x1f8] sm:$0xff] %vm309_vm0, %v3364_v20  ;;  %v591_v60 = vpop.permute.xlu0 %590 }
 0x103   : > { %652 = vst.msk [vmem:[#allocation2 + $0x1f8] sm:$0xff] %vm632_vm4, %v581_v18  ;;  %v3435_v18 = vrot.slane %v2841_v29, 1 }
 0x104   : > { %651 = vst.msk [vmem:[#allocation2 + $0x1e0] sm:$0xff] %vm632_vm4, %v579_v1  ;;  %v448_v1 = vrot.slane %v2735_v11, 7 }
 0x105   : > { %517 = vst.msk [vmem:[#allocation2 + $0xa8] sm:$0xff] %vm309_vm0, %v3345_v10  ;;  %1259 = vrot.lane.b32.xlu2 %v2720_v8, %s2559_s29  ;;  %844 = vrot.lane.b32.xlu1 %v3148_v38, %s2559_s29  ;;  %v472_v8 = vrot.slane %v2841_v29, 7  ;;  %v3524_v29 = vld [vmem:[#allocation5 + $0xd8] sm:$0xff] }
 0x106   : > { %638 = vst.msk [vmem:[#allocation2 + $0xa8] sm:$0xff] %vm632_vm4, %v3057_v56  ;;  %v3397_v56 = vrot.slane %v2813_v25, 1  ;;  %v3565_v25 = vld [vmem:[#allocation5 + $0xb8] sm:$0xff] }
 0x107   : > { %4459 = vst [vmem:[#allocation43_spill] sm:$0xff] %v3384_v39  ;;  %v599_v35 = vpop.permute.xlu1 %598  ;;  %v3423_v34 = vsel %vm434_vm5, %v3233_v16, %v472_v8  ;;  %v3488_v8 = vld [vmem:[#allocation5 + $0xf0] sm:$0xff] }
 0x108   : > { %655 = vst.msk [vmem:[#allocation2 + $0x240] sm:$0xff] %vm632_vm4, %v587_v32  ;;  %v3411_v5 = vsel %vm663_vm1, %v697_v3, %v3397_v56  ;;  %v3448_v32 = vsel %vm663_vm1, %v700_v4, %v3435_v18  ;;  %v1541_v4 = vld [vmem:[#allocation5 + $0x68] sm:$0xff]  ;;  %1774 = vmatpush.msra.mxu1 %v3488_v8 }
 0x109   : > { %803 = vst.msk [vmem:[#allocation2 + $0x60] sm:$0xff] %vm799_vm6, %v714_v58  ;;  %v726_v49 = vpop.permute.xlu2 %725  ;;  %753 = vrot.lane.b32.xlu0 %v3411_v5, %s2558_s25  ;;  %v3452_v58 = vsel %vm434_vm5, %v3181_v15, %v448_v1  ;;  %v4465_v1 = vld [vmem:[#allocation37_spill] sm:$0xff] }
 0x10a   : > { %533 = vst.msk [vmem:[#allocation2 + $0x228] sm:$0xff] %vm309_vm0, %v3384_v39  ;;  %v3406_v38 = vpop.permute.xlu0 %596  ;;  %v1532_v39 = vld [vmem:[#allocation5 + $0x20] sm:$0xff] }
 0x10b   : > { %654 = vst.msk [vmem:[#allocation2 + $0x228] sm:$0xff] %vm632_vm4, %v585_v44  ;;  %v3460_v44 = vsel %vm434_vm5, %v3190_v40, %v451_v21  ;;  %v3496_v21 = vld [vmem:[#allocation5 + $0xe8] sm:$0xff] }
 0x10c   : > { %4460 = vst [vmem:[#allocation44_spill] sm:$0xff] %v3397_v56  ;;  %1775 = vmatpush.msra.mxu1 %v3496_v21 }
 0x10d   : > { %806 = vst.msk [vmem:[#allocation2 + $0xa8] sm:$0x7f] %vm801_vm7, %v720_v46  ;;  %1011 = vrot.lane.b32.xlu2 %v2910_v37, %s2556_s21  ;;  %884 = vrot.lane.b32.xlu1 %v3233_v16, %s2559_s29 }
 0x10e   : > { %657 = vst.msk [vmem:[#allocation2 + $0x270] sm:$0xff] %vm632_vm4, %v591_v60  ;;  %v4463_v60 = vld [vmem:[#allocation31_spill] sm:$0xff] }
 0x10f   : > { %661 = vst.msk [vmem:[#allocation2 + $0x2d0] sm:$0xff] %vm632_vm4, %v599_v35  ;;  %v712_v53 = vpop.permute.xlu1 %711  ;;  %v1542_v35 = vld [vmem:[#allocation5 + $0x70] sm:$0xff] }
 0x110   : > { %809 = vst.msk [vmem:[#allocation2 + $0xf0] sm:$0xff] %vm799_vm6, %v726_v49  ;;  %v3484_v49 = vsel %vm434_vm5, %v3197_v50, %v454_v0  ;;  %v4467_v0 = vld [vmem:[#allocation26_spill] sm:$0xff] }
 0x111   : > { %4461 = vst [vmem:[#allocation45_spill] sm:$0xff] %v3411_v5  ;;  %v732_v37 = vpop.permute.xlu2 %731  ;;  %1140 = vrot.lane.b32.xlu0 %v3415_v57, %s2558_s25 }
 0x112   : > { %1422 = vst.msk [vmem:[#allocation2 + $0x1f0] sm:$0xff] %vm309_vm0, %v3411_v5 }
 0x113   : > { %1423 = vst.msk [vmem:[#allocation2 + $0x208] sm:$0x7f] %vm1402_vm2, %v3397_v56 }
 0x114   : > { %4462 = vst [vmem:[#allocation46_spill] sm:$0xff] %v3423_v34 }
 0x115   : > { %519 = vst.msk [vmem:[#allocation2 + $0xd8] sm:$0xff] %vm309_vm0, %v3415_v57  ;;  %1261 = vrot.lane.b32.xlu2 %v2717_v7, %s2559_s29  ;;  %846 = vrot.lane.b32.xlu1 %v3345_v10, %s2559_s29  ;;  %v4464_v7 = vld [vmem:[#allocation15_spill] sm:$0xff] }
 0x116   : > { %640 = vst.msk [vmem:[#allocation2 + $0xd8] sm:$0xff] %vm632_vm4, %v3203_v17  ;;  %v710_v17 = vpop.permute.xlu0 %709  ;;  %v457_v3 = vrot.slane %v4464_v7, 7 }
 0x117   : > { %537 = vst.msk [vmem:[#allocation2 + $0x288] sm:$0xff] %vm309_vm0, %v3423_v34  ;;  %v718_v46 = vpop.permute.xlu1 %717 }
 0x118   : > { %658 = vst.msk [vmem:[#allocation2 + $0x288] sm:$0xff] %vm632_vm4, %v593_v41 }
 0x119   : > { %802 = vst.msk [vmem:[#allocation2 + $0x48] sm:$0x7f] %vm801_vm7, %v712_v53  ;;  %v738_v41 = vpop.permute.xlu2 %737  ;;  %v3493_v53 = vsel %vm434_vm5, %v4465_v1, %v457_v3  ;;  %755 = vrot.lane.b32.xlu0 %v3397_v56, %s2558_s25  ;;  %v1538_v56 = vld [vmem:[#allocation5 + $0x50] sm:$0xff] }
 0x11a   : > { %800 = vst.msk [vmem:[#allocation2 + $0x30] sm:$0xff] %vm799_vm6, %v710_v17 }
 0x11b   : > { %1424 = vst.msk [vmem:[#allocation2 + $0x220] sm:$0xff] %vm309_vm0, %v3448_v32 }
 0x11c   : > { %1425 = vst.msk [vmem:[#allocation2 + $0x238] sm:$0x7f] %vm1402_vm2, %v3435_v18 }
 0x11d   : > { %521 = vst.msk [vmem:[#allocation2 + $0x108] sm:$0xff] %vm309_vm0, %v3452_v58  ;;  %1013 = vrot.lane.b32.xlu2 %v2986_v45, %s2556_s21  ;;  %886 = vrot.lane.b32.xlu1 %v3423_v34, %s2559_s29  ;;  %v3553_v34 = vld [vmem:[#allocation5 + $0x110] sm:$0xff] }
 0x11e   : > { %642 = vst.msk [vmem:[#allocation2 + $0x108] sm:$0xff] %vm632_vm4, %v3255_v36  ;;  %v716_v10 = vpop.permute.xlu0 %715  ;;  %v1543_v36 = vld [vmem:[#allocation5 + $0x78] sm:$0xff] }
 0x11f   : > { %523 = vst.msk [vmem:[#allocation2 + $0x138] sm:$0xff] %vm309_vm0, %v3460_v44  ;;  %1660 = vmatpush.msra.mxu0 %v1543_v36  ;;  %2361 = vmatpush.msra.mxu3 %v1543_v36  ;;  %v724_v3 = vpop.permute.xlu1 %723  ;;  %v1539_v36 = vld [vmem:[#allocation5 + $0x58] sm:$0xff] }
 0x120   : > { %644 = vst.msk [vmem:[#allocation2 + $0x138] sm:$0xff] %vm632_vm4, %v4463_v60  ;;  %v3510_v60 = vld [vmem:[#allocation5 + $0xe0] sm:$0xff] }
 0x121   : > { %815 = vst.msk [vmem:[#allocation2 + $0x180] sm:$0xff] %vm799_vm6, %v738_v41  ;;  %1661 = vmatpush.msra.mxu0 %v1542_v35  ;;  %v475_v41 = vrot.slane %v4467_v0, 7  ;;  %v744_v45 = vpop.permute.xlu2 %743  ;;  %2362 = vmatpush.msra.mxu3 %v1542_v35  ;;  %v4468_v35 = vld [vmem:[#allocation38_spill] sm:$0xff] }
 0x122   : > { %805 = vst.msk [vmem:[#allocation2 + $0x90] sm:$0xff] %vm799_vm6, %v718_v46  ;;  %v1540_v46 = vld [vmem:[#allocation5 + $0x60] sm:$0xff]  ;;  %1776 = vmatpush.msra.mxu1 %v3510_v60  ;;  %1142 = vrot.lane.b32.xlu0 %v3181_v15, %s2558_s25 }
 0x123   : > { %804 = vst.msk [vmem:[#allocation2 + $0x78] sm:$0x7f] %vm801_vm7, %v716_v10  ;;  %1662 = vmatpush.msra.mxu0 %v1541_v4  ;;  %v3520_v10 = vsel %vm434_vm5, %v3242_v22, %v475_v41  ;;  %2363 = vmatpush.msra.mxu3 %v1541_v4  ;;  %v3535_v41 = vld [vmem:[#allocation5 + $0xd0] sm:$0xff]  ;;  %v1537_v4 = vld [vmem:[#allocation5 + $0x48] sm:$0xff] }
 0x124   : > { %812 = vst.msk [vmem:[#allocation2 + $0x138] sm:$0x7f] %vm801_vm7, %v732_v37  ;;  %v4466_v37 = vld [vmem:[#allocation13_spill] sm:$0xff]  ;;  %1777 = vmatpush.msra.mxu1 %v3524_v29 }
 0x125   : > { %525 = vst.msk [vmem:[#allocation2 + $0x168] sm:$0xff] %vm309_vm0, %v3484_v49  ;;  %v460_v17 = vrot.slane %v4466_v37, 7  ;;  %1663 = vmatpush.msra.mxu0 %v1540_v46  ;;  %2364 = vmatpush.msra.mxu3 %v1540_v46  ;;  %v1536_v46 = vld [vmem:[#allocation5 + $0x40] sm:$0xff] }
 0x126   : > { %646 = vst.msk [vmem:[#allocation2 + $0x168] sm:$0xff] %vm632_vm4, %v3277_v2  ;;  %v722_v2 = vpop.permute.xlu0 %721  ;;  %848 = vrot.lane.b32.xlu1 %v3168_v62, %s2559_s29  ;;  %1778 = vmatpush.msra.mxu1 %v3535_v41 }
 0x127   : > { %527 = vst.msk [vmem:[#allocation2 + $0x198] sm:$0xff] %vm309_vm0, %v3493_v53  ;;  %1664 = vmatpush.msra.mxu0 %v1539_v36  ;;  %2365 = vmatpush.msra.mxu3 %v1539_v36  ;;  %v1534_v36 = vld [vmem:[#allocation5 + $0x30] sm:$0xff] }
 0x128   : > { %648 = vst.msk [vmem:[#allocation2 + $0x198] sm:$0xff] %vm632_vm4, %v3306_v51  ;;  %v3528_v51 = vsel %vm434_vm5, %v4468_v35, %v460_v17  ;;  %v4469_v17 = vld [vmem:[#allocation9_spill] sm:$0xff] }
 0x129   : > { %808 = vst.msk [vmem:[#allocation2 + $0xd8] sm:$0x7f] %vm801_vm7, %v724_v3  ;;  %v3537_v3 = vld [vmem:[#allocation5 + $0x118] sm:$0xff]  ;;  %1665 = vmatpush.msra.mxu0 %v1538_v56  ;;  %1263 = vrot.lane.b32.xlu2 %v4469_v17, %s2559_s29  ;;  %v750_v16 = vpop.permute.xlu2 %749  ;;  %v730_v17 = vpop.permute.xlu1 %729 }
 0x12a   : > { %807 = vst.msk [vmem:[#allocation2 + $0xc0] sm:$0xff] %vm799_vm6, %v722_v2  ;;  %1898 = vmatpush.msra.mxu2 %v3537_v3  ;;  %v4470_v2 = vld [vmem:[#allocation36_spill] sm:$0xff]  ;;  %2366 = vmatpush.msra.mxu3 %v1538_v56  ;;  %v3582_v56 = vld [vmem:[#allocation5 + $0x100] sm:$0xff] }
 0x12b   : > { %539 = vst.msk [vmem:[#allocation2 + $0x2b8] sm:$0xff] %vm309_vm0, %v3520_v10  ;;  %1666 = vmatpush.msra.mxu0 %v1537_v4  ;;  %757 = vrot.lane.b32.xlu0 %v3448_v32, %s2558_s25 }
 0x12c   : > { %660 = vst.msk [vmem:[#allocation2 + $0x2b8] sm:$0xff] %vm632_vm4, %v3406_v38  ;;  %v3546_v38 = vld [vmem:[#allocation5 + $0xc8] sm:$0xff]  ;;  %1899 = vmatpush.msra.mxu2 %v3553_v34  ;;  %2367 = vmatpush.msra.mxu3 %v1537_v4 }
 0x12d   : > { %529 = vst.msk [vmem:[#allocation2 + $0x1c8] sm:$0xff] %vm309_vm0, %v3528_v51  ;;  %1779 = vmatpush.msra.mxu1 %v3546_v38  ;;  %1667 = vmatpush.msra.mxu0 %v1536_v46  ;;  %v1437_v4 = vld [vmem:[#allocation2 + $0x28] sm:$0xff] }
 0x12e   : > { %650 = vst.msk [vmem:[#allocation2 + $0x1c8] sm:$0xff] %vm632_vm4, %v4470_v2  ;;  %v728_v62 = vpop.permute.xlu0 %727  ;;  %v4471_v2 = vld [vmem:[#allocation24_spill] sm:$0xff]  ;;  %888 = vrot.lane.b32.xlu1 %v3242_v22, %s2559_s29  ;;  %1900 = vmatpush.msra.mxu2 %v3567_v26 }
 0x12f   : > { %818 = vst.msk [vmem:[#allocation2 + $0x1c8] sm:$0x7f] %vm801_vm7, %v744_v45  ;;  %v478_v5 = vrot.slane %v4471_v2, 7  ;;  %1780 = vmatpush.msra.mxu1 %v3556_v30  ;;  %v1535_v45 = vld [vmem:[#allocation5 + $0x38] sm:$0xff]  ;;  %2368 = vmatpush.msra.mxu3 %v1536_v46 }
 0x130   : > { %821 = vst.msk [vmem:[#allocation2 + $0x210] sm:$0xff] %vm799_vm6, %v750_v16  ;;  %1668 = vmatpush.msra.mxu0 %v1535_v45  ;;  %1901 = vmatpush.msra.mxu2 %v3582_v56 }
 0x131   : > { %811 = vst.msk [vmem:[#allocation2 + $0x120] sm:$0xff] %vm799_vm6, %v730_v17  ;;  %v3571_v16 = vsel %vm434_vm5, %v3249_v24, %v478_v5  ;;  %1781 = vmatpush.msra.mxu1 %v3565_v25  ;;  %v3574_v17 = vld [vmem:[#allocation5 + $0xb0] sm:$0xff]  ;;  %1015 = vrot.lane.b32.xlu2 %v2972_v42, %s2556_s21  ;;  %v703_v5 = vrot.slane %v2838_v28, 1  ;;  %v1533_v42 = vld [vmem:[#allocation5 + $0x28] sm:$0xff]  ;;  %v3593_v31 = vpop.permute.xlu2 %1130  ;;  %v736_v6 = vpop.permute.xlu1 %735 }
 0x132   : > { %810 = vst.msk [vmem:[#allocation2 + $0x108] sm:$0x7f] %vm801_vm7, %v728_v62  ;;  %v3586_v62 = vrot.slane %v4467_v0, 1  ;;  %1669 = vmatpush.msra.mxu0 %v1534_v36  ;;  %2325 = vmatmul.msk.f32.vlgmr.msra.gmra.mxu2 %vm309_vm0, %v1434_v43  ;;  %v1530_v43 = vld [vmem:[#allocation5 + $0x10] sm:$0xff] }
 0x133   : > { %541 = vst.msk [vmem:[#allocation2 + $0x2e8] sm:$0xff] %vm309_vm0, %v3571_v16  ;;  %1782 = vmatpush.msra.mxu1 %v3574_v17  ;;  %2369 = vmatpush.msra.mxu3 %v1535_v45  ;;  %v1529_v45 = vld [vmem:[#allocation5 + $0x8] sm:$0xff] }
 0x134   : > { %662 = vst.msk [vmem:[#allocation2 + $0x2e8] sm:$0xff] %vm632_vm4, %v3329_v59  ;;  %v3600_v47 = vsel %vm663_vm1, %v703_v5, %v3586_v62  ;;  %1670 = vmatpush.msra.mxu0 %v1533_v42  ;;  %v1531_v5 = vld [vmem:[#allocation5 + $0x18] sm:$0xff]  ;;  %1144 = vrot.lane.b32.xlu0 %v3452_v58, %s2558_s25 }
 0x135   : > { %1427 = vst.msk [vmem:[#allocation2 + $0x268] sm:$0x7f] %vm1402_vm2, %v3586_v62  ;;  %1783 = vmatpush.msra.mxu1 %v3596_v27  ;;  %2370 = vmatpush.msra.mxu3 %v1534_v36  ;;  %v3633_v36 = vld [vmem:[#allocation5 + $0x80] sm:$0xff] }
 0x136   : > { %v734_v59 = vpop.permute.xlu0 %733  ;;  %1426 = vst.msk [vmem:[#allocation2 + $0x250] sm:$0xff] %vm309_vm0, %v3600_v47  ;;  %1671 = vmatpush.msra.mxu0 %v1532_v39  ;;  %850 = vrot.lane.b32.xlu1 %v3415_v57, %s2559_s29  ;;  %v3626_v57 = vld [vmem:[#allocation5 + $0x88] sm:$0xff] }
 0x137   : > { %813 = vst.msk [vmem:[#allocation2 + $0x150] sm:$0xff] %vm799_vm6, %v734_v59  ;;  %1784 = vmatpush.msra.mxu1 %v3609_v12  ;;  %2371 = vmatpush.msra.mxu3 %v1533_v42  ;;  %v1440_v42 = vld [vmem:[#allocation2 + $0x40] sm:$0xff] }
 0x138   : > { %814 = vst.msk [vmem:[#allocation2 + $0x168] sm:$0x7f] %vm801_vm7, %v736_v6  ;;  %1672 = vmatpush.msra.mxu0 %v1531_v5  ;;  %v3622_v6 = vld [vmem:[#allocation5 + $0x90] sm:$0xff] }
 0x139   : > { %1265 = vrot.lane.b32.xlu2 %v2735_v11, %s2559_s29  ;;  %v1004_v46 = vpop.permute.xlu2 %1003  ;;  %v742_v59 = vpop.permute.xlu1 %741  ;;  %1785 = vmatpush.msra.mxu1 %v3614_v33 }
 0x13a   : > { %1099 = vst.msk [vmem:[#allocation2 + $0x20] sm:$0x7f] %vm1098_vm8, %v1004_v46  ;;  %1673 = vmatpush.msra.mxu0 %v1530_v43  ;;  %2326 = vmatmul.msk.f32.gmra.mxu2 %vm309_vm0, %v1437_v4  ;;  %v4472_v46 = vld [vmem:[#allocation28_spill] sm:$0xff] }
 0x13b   : > { %817 = vst.msk [vmem:[#allocation2 + $0x1b0] sm:$0xff] %vm799_vm6, %v742_v59  ;;  %1786 = vmatpush.msra.mxu1 %v3622_v6  ;;  %2372 = vmatpush.msra.mxu3 %v1532_v39  ;;  %v4473_v39 = vld [vmem:[#allocation10_spill] sm:$0xff] }
 0x13c   : > { %1674 = vmatpush.msra.mxu0 %v1529_v45  ;;  %759 = vrot.lane.b32.xlu0 %v3435_v18, %s2558_s25 }
 0x13d   : > { %1787 = vmatpush.msra.mxu1 %v3626_v57  ;;  %2373 = vmatpush.msra.mxu3 %v1531_v5  ;;  %v1443_v5 = vld [vmem:[#allocation2 + $0x58] sm:$0xff] }
 0x13e   : > { %v740_v11 = vpop.permute.xlu0 %739  ;;  %1675 = vmatpush.msra.mxu0 %v1528_v23  ;;  %890 = vrot.lane.b32.xlu1 %v3520_v10, %s2559_s29 }
 0x13f   : > { %816 = vst.msk [vmem:[#allocation2 + $0x198] sm:$0x7f] %vm801_vm7, %v740_v11  ;;  %1788 = vmatpush.msra.mxu1 %v3633_v36  ;;  %2374 = vmatpush.msra.mxu3 %v1530_v43 }
 0x141   : > { %1017 = vrot.lane.b32.xlu2 %v4472_v46, %s2556_s21  ;;  %v3642_v4 = vpop.permute.xlu2 %1253  ;;  %v748_v59 = vpop.permute.xlu1 %747  ;;  %2375 = vmatpush.msra.mxu3 %v1529_v45  ;;  %v3668_v45 = vrot.slane %v4471_v2, 1 }
 0x142   : > { %820 = vst.msk [vmem:[#allocation2 + $0x1f8] sm:$0x7f] %vm801_vm7, %v748_v59  ;;  %2327 = vmatmul.msk.f32.gmra.mxu2 %vm309_vm0, %v1440_v42 }
 0x143   : > { %2376 = vmatpush.msra.mxu3 %v1528_v23  ;;  %v4475_v23 = vld [vmem:[#allocation25_spill] sm:$0xff]  ;;  %1429 = vst.msk [vmem:[#allocation2 + $0x298] sm:$0x7f] %vm1402_vm2, %v3668_v45 }
 0x144   : > { %1146 = vrot.lane.b32.xlu0 %v3190_v40, %s2558_s25 }
 0x145   : > { %2377 = vmatpush.msrb.mxu3 %v3480_v19  ;;  %v706_v19 = vrot.slane %v4475_v23, 1 }
 0x146   : > { %v746_v11 = vpop.permute.xlu0 %745  ;;  %852 = vrot.lane.b32.xlu1 %v3181_v15, %s2559_s29  ;;  %v4474_v15 = vld [vmem:[#allocation27_spill] sm:$0xff] }
 0x147   : > { %819 = vst.msk [vmem:[#allocation2 + $0x1e0] sm:$0xff] %vm799_vm6, %v746_v11  ;;  %2378 = vmatpush.msrb.mxu3 %v3488_v8  ;;  %v3683_v11 = vsel %vm663_vm1, %v706_v19, %v3668_v45 }
 0x148   : > { %1428 = vst.msk [vmem:[#allocation2 + $0x280] sm:$0xff] %vm309_vm0, %v3683_v11 }
 0x149   : > { %1267 = vrot.lane.b32.xlu2 %v4473_v39, %s2559_s29  ;;  %v841_v46 = vpop.permute.xlu2 %840  ;;  %v1002_v59 = vpop.permute.xlu1 %1001  ;;  %2379 = vmatpush.msrb.mxu3 %v3496_v21 }
 0x14a   : > { %936 = vst.msk [vmem:[#allocation2 + $0x30] sm:$0xfe] %vm932_vm9, %v841_v46  ;;  %2328 = vmatmul.msk.f32.gmra.mxu2 %vm309_vm0, %v1443_v5 }
 0x14b   : > { %1097 = vst.msk [vmem:[#allocation2 + $0x8] sm:$0xff] %vm632_vm4, %v1002_v59  ;;  %2380 = vmatpush.msrb.mxu3 %v3510_v60  ;;  %v3688_v60 = vld [vmem:[%s2673_s12 + $0xf0] sm:$0xff] }
 0x14c   : > { %1221 = vst.msk [vmem:[#allocation2 + $0x8] sm:$0xfe] %vm1220_vm10, %v3593_v31  ;;  %761 = vrot.lane.b32.xlu0 %v3600_v47, %s2558_s25  ;;  %v1446_v31 = vld [vmem:[#allocation2 + $0x70] sm:$0xff] }
 0x14d   : > { %2381 = vmatpush.msrb.mxu3 %v3524_v29  ;;  %996 = vst.msk [vmem:[#allocation2 + $0x2d8] sm:$0xff] %vm309_vm0, %v3688_v60  ;;  %v1449_v29 = vld [vmem:[#allocation2 + $0x88] sm:$0xff] }
 0x14e   : > { %v752_v43 = vpop.permute.xlu0 %751  ;;  %892 = vrot.lane.b32.xlu1 %v3249_v24, %s2559_s29 }
 0x14f   : > { %822 = vst.msk [vmem:[#allocation2 + $0x228] sm:$0x7f] %vm801_vm7, %v752_v43  ;;  %2382 = vmatpush.msrb.mxu3 %v3535_v41  ;;  %v1458_v43 = vld [vmem:[#allocation2 + $0xd0] sm:$0xff] }
 0x151   : > { %1019 = vrot.lane.b32.xlu2 %v4474_v15, %s2556_s21  ;;  %v3673_v8 = vpop.permute.xlu2 %1136  ;;  %v1252_v21 = vpop.permute.xlu1 %1251  ;;  %2383 = vmatpush.msrb.mxu3 %v3546_v38 }
 0x152   : > { %1341 = vst.msk [vmem:[#allocation2 + $0x8] sm:$0xff] %vm934_vm11, %v1252_v21  ;;  %2329 = vmatmul.msk.f32.gmra.mxu2 %vm309_vm0, %v1446_v31 }
 0x153   : > { %2384 = vmatpush.msrb.mxu3 %v3556_v30 }
 0x154   : > { %1148 = vrot.lane.b32.xlu0 %v3460_v44, %s2558_s25 }
 0x155   : > { %2385 = vmatpush.msrb.mxu3 %v3565_v25  ;;  %v3717_v25 = vld [vmem:[%s2673_s12 + $0xf8] sm:$0xff] }
 0x156   : > { %v837_v42 = vpop.permute.xlu0 %836  ;;  %854 = vrot.lane.b32.xlu1 %v3452_v58, %s2559_s29  ;;  %997 = vst.msk [vmem:[#allocation2 + $0x2f0] sm:$0xff] %vm309_vm0, %v3717_v25 }
 0x157   : > { %933 = vst.msk [vmem:[#allocation2] sm:$0xfe] %vm932_vm9, %v837_v42  ;;  %2386 = vmatpush.msrb.mxu3 %v3574_v17 }
 0x159   : > { %1269 = vrot.lane.b32.xlu2 %v2729_v9, %s2559_s29  ;;  %v1010_v39 = vpop.permute.xlu2 %1009  ;;  %v839_v5 = vpop.permute.xlu1 %838  ;;  %v1433_v41 = vld [vmem:[#allocation2 + $0x8] sm:$0xff]  ;;  %2387 = vmatpush.msrb.mxu3 %v3596_v27  ;;  %v1452_v9 = vld [vmem:[#allocation2 + $0xa0] sm:$0xff] }
 0x15a   : > { %1102 = vst.msk [vmem:[#allocation2 + $0x68] sm:$0xff] %vm632_vm4, %v1010_v39  ;;  %1789 = vmatmul.f32.vlgmr.msra.gmra.mxu1 %v1433_v41  ;;  %2330 = vmatmul.msk.f32.gmra.mxu2 %vm309_vm0, %v1449_v29 }
 0x15b   : > { %935 = vst.msk [vmem:[#allocation2 + $0x18] sm:$0xff] %vm934_vm11, %v839_v5  ;;  %2388 = vmatpush.msrb.mxu3 %v3609_v12  ;;  %v4476_v12 = vld [vmem:[#allocation12_spill] sm:$0xff]  ;;  %v1461_v5 = vld [vmem:[#allocation2 + $0xe8] sm:$0xff] }
 0x15c   : > { %763 = vrot.lane.b32.xlu0 %v3586_v62, %s2558_s25 }
 0x15d   : > { %2389 = vmatpush.msrb.mxu3 %v3614_v33  ;;  %v1455_v33 = vld [vmem:[#allocation2 + $0xb8] sm:$0xff] }
 0x15e   : > { %v1133_v46 = vpop.permute.xlu0 %1132  ;;  %v1432_v38 = vld [vmem:[#allocation2] sm:$0xff]  ;;  %894 = vrot.lane.b32.xlu1 %v3571_v16, %s2559_s29 }
 0x15f   : > { %1222 = vst.msk [vmem:[#allocation2 + $0x20] sm:$0xff] %vm799_vm6, %v1133_v46  ;;  %1676 = vmatmul.f32.vlgmr.msra.gmra.mxu0 %v1432_v38  ;;  %2390 = vmatpush.msrb.mxu3 %v3622_v6 }
 0x160   : > { %1342 = vst.msk [vmem:[#allocation2 + $0x20] sm:$0xff] %vm934_vm11, %v3642_v4 }
 0x161   : > { %1021 = vrot.lane.b32.xlu2 %v3009_v48, %s2556_s21  ;;  %v1260_v30 = vpop.permute.xlu2 %1259  ;;  %v1135_v58 = vpop.permute.xlu1 %1134  ;;  %2391 = vmatpush.msrb.mxu3 %v3626_v57  ;;  %v3738_v57 = vrot.slane %v3688_v60, 7 }
 0x162   : > { %2331 = vmatmul.msk.f32.gmra.mxu2 %vm309_vm0, %v1452_v9  ;;  %v1435_v17 = vld [vmem:[#allocation2 + $0x18] sm:$0xff]  ;;  %v1464_v9 = vld [vmem:[#allocation2 + $0x100] sm:$0xff] }
 0x163   : > { %2392 = vmatpush.msrb.mxu3 %v3633_v36  ;;  %v4477_v36 = vld [vmem:[#allocation29_spill] sm:$0xff] }
 0x164   : > { %1150 = vrot.lane.b32.xlu0 %v3197_v50, %s2558_s25 }
 0x166   : > { %v1006_v27 = vpop.permute.xlu0 %1005  ;;  %856 = vrot.lane.b32.xlu1 %v3190_v40, %s2559_s29  ;;  %v1438_v40 = vld [vmem:[#allocation2 + $0x30] sm:$0xff] }
 0x167   : > { %1100 = vst.msk [vmem:[#allocation2 + $0x38] sm:$0xff] %vm632_vm4, %v1006_v27  ;;  %v1436_v48 = vld [vmem:[#allocation2 + $0x20] sm:$0xff]  ;;  %1679 = vmatmul.f32.gmra.mxu0 %v1435_v17 }
 0x168   : > { %1223 = vst.msk [vmem:[#allocation2 + $0x38] sm:$0xfe] %vm1220_vm10, %v1135_v58  ;;  %1792 = vmatmul.f32.gmra.mxu1 %v1436_v48 }
 0x169   : > { %1271 = vrot.lane.b32.xlu2 %v4476_v12, %s2559_s29  ;;  %v1012_v4 = vpop.permute.xlu2 %1011  ;;  %v1008_v59 = vpop.permute.xlu1 %1007  ;;  %v1467_v12 = vld [vmem:[#allocation2 + $0x118] sm:$0xff] }
 0x16a   : > { %1103 = vst.msk [vmem:[#allocation2 + $0x80] sm:$0x7f] %vm1098_vm8, %v1012_v4  ;;  %2332 = vmatmul.msk.f32.gmra.mxu2 %vm309_vm0, %v1455_v33 }
 0x16b   : > { %1101 = vst.msk [vmem:[#allocation2 + $0x50] sm:$0x7f] %vm1098_vm8, %v1008_v59 }
 0x16c   : > { %1224 = vst.msk [vmem:[#allocation2 + $0x50] sm:$0xff] %vm799_vm6, %v3673_v8  ;;  %765 = vrot.lane.b32.xlu0 %v3683_v11, %s2558_s25  ;;  %v834_v8 = vrot.slane %v3717_v25, 7 }
 0x16e   : > { %v1256_v6 = vpop.permute.xlu0 %1255  ;;  %896 = vrot.lane.b32.xlu1 %v3738_v57, %s2559_s29 }
 0x16f   : > { %1343 = vst.msk [vmem:[#allocation2 + $0x38] sm:$0xff] %vm934_vm11, %v1256_v6  ;;  %1682 = vmatmul.f32.gmra.mxu0 %v1438_v40  ;;  %v1470_v6 = vld [vmem:[#allocation2 + $0x130] sm:$0xff] }
 0x171   : > { %1023 = vrot.lane.b32.xlu2 %v4477_v36, %s2556_s21  ;;  %v1262_v15 = vpop.permute.xlu2 %1261  ;;  %v1258_v19 = vpop.permute.xlu1 %1257 }
 0x172   : > { %1344 = vst.msk [vmem:[#allocation2 + $0x50] sm:$0xff] %vm934_vm11, %v1258_v19  ;;  %2333 = vmatmul.msk.f32.gmra.mxu2 %vm309_vm0, %v1458_v43 }
 0x174   : > { %1152 = vrot.lane.b32.xlu0 %v3484_v49, %s2558_s25 }
 0x176   : > { %v843_v31 = vpop.permute.xlu0 %842  ;;  %v1439_v21 = vld [vmem:[#allocation2 + $0x38] sm:$0xff]  ;;  %858 = vrot.lane.b32.xlu1 %v3460_v44, %s2559_s29 }
 0x177   : > { %937 = vst.msk [vmem:[#allocation2 + $0x48] sm:$0xff] %vm934_vm11, %v843_v31  ;;  %1795 = vmatmul.f32.gmra.mxu1 %v1439_v21 }
 0x179   : > { %1273 = vrot.lane.b32.xlu2 %v2747_v13, %s2559_s29  ;;  %v1014_v42 = vpop.permute.xlu2 %1013  ;;  %v845_v29 = vpop.permute.xlu1 %844  ;;  %v1442_v39 = vld [vmem:[#allocation2 + $0x50] sm:$0xff]  ;;  %v3765_v13 = vsel %vm434_vm5, %v3738_v57, %v834_v8 }
 0x17a   : > { %1104 = vst.msk [vmem:[#allocation2 + $0x98] sm:$0xff] %vm632_vm4, %v1014_v42  ;;  %2334 = vmatmul.msk.f32.gmra.mxu2 %vm309_vm0, %v1461_v5  ;;  %v1482_v42 = vld [vmem:[#allocation2 + $0x190] sm:$0xff] }
 0x17b   : > { %938 = vst.msk [vmem:[#allocation2 + $0x60] sm:$0xfe] %vm932_vm9, %v845_v29 }
 0x17c   : > { %767 = vrot.lane.b32.xlu0 %v3668_v45, %s2558_s25 }
 0x17e   : > { %v1139_v41 = vpop.permute.xlu0 %1138  ;;  %v1441_v46 = vld [vmem:[#allocation2 + $0x48] sm:$0xff]  ;;  %898 = vrot.lane.b32.xlu1 %v3765_v13, %s2559_s29 }
 0x17f   : > { %1225 = vst.msk [vmem:[#allocation2 + $0x68] sm:$0xfe] %vm1220_vm10, %v1139_v41  ;;  %1685 = vmatmul.f32.gmra.mxu0 %v1441_v46  ;;  %1798 = vmatmul.f32.gmra.mxu1 %v1442_v39  ;;  %v4480_v41 = vld [vmem:[#allocation30_spill] sm:$0xff] }
 0x180   : > { %1345 = vst.msk [vmem:[#allocation2 + $0x68] sm:$0xff] %vm934_vm11, %v1260_v30 }
 0x181   : > { %1025 = vrot.lane.b32.xlu2 %v3047_v55, %s2556_s21  ;;  %v885_v38 = vpop.permute.xlu1 %884  ;;  %v4478_v55 = vld [vmem:[#allocation11_spill] sm:$0xff] }
 0x182   : > { %v1444_v27 = vld [vmem:[#allocation2 + $0x60] sm:$0xff]  ;;  %2335 = vmatmul.msk.f32.gmra.mxu2 %vm309_vm0, %v1464_v9 }
 0x183   : > { %v1264_v44 = vpop.permute.xlu2 %1263 }
 0x184   : > { %1154 = vrot.lane.b32.xlu0 %v4465_v1, %s2558_s25 }
 0x186   : > { %v754_v30 = vpop.permute.xlu0 %753  ;;  %860 = vrot.lane.b32.xlu1 %v3197_v50, %s2559_s29 }
 0x187   : > { %823 = vst.msk [vmem:[#allocation2 + $0x240] sm:$0xff] %vm799_vm6, %v754_v30  ;;  %v1445_v58 = vld [vmem:[#allocation2 + $0x68] sm:$0xff]  ;;  %1688 = vmatmul.f32.gmra.mxu0 %v1444_v27 }
 0x188   : > { %958 = vst.msk [vmem:[#allocation2 + $0x240] sm:$0xfe] %vm932_vm9, %v885_v38  ;;  %1801 = vmatmul.f32.gmra.mxu1 %v1445_v58  ;;  %v1488_v58 = vld [vmem:[#allocation2 + $0x1c0] sm:$0xff] }
 0x189   : > { %1275 = vrot.lane.b32.xlu2 %v4478_v55, %s2559_s29  ;;  %v847_v17 = vpop.permute.xlu1 %846 }
 0x18a   : > { %2336 = vmatmul.msk.f32.gmra.mxu2 %vm309_vm0, %v1467_v12  ;;  %939 = vst.msk [vmem:[#allocation2 + $0x78] sm:$0xff] %vm934_vm11, %v847_v17 }
 0x18b   : > { %v1016_v48 = vpop.permute.xlu2 %1015 }
 0x18c   : > { %1105 = vst.msk [vmem:[#allocation2 + $0xb0] sm:$0x7f] %vm1098_vm8, %v1016_v48  ;;  %1049 = vrot.lane.b32.xlu0 %v3448_v32, %s2556_s21 }
 0x18e   : > { %v1141_v33 = vpop.permute.xlu0 %1140  ;;  %1178 = vrot.lane.b32.xlu1 %v3242_v22, %s2558_s25 }
 0x18f   : > { %1226 = vst.msk [vmem:[#allocation2 + $0x80] sm:$0xff] %vm799_vm6, %v1141_v33  ;;  %v1504_v4 = vld [vmem:[#allocation2 + $0x240] sm:$0xff]  ;;  %v1491_v33 = vld [vmem:[#allocation2 + $0x1d8] sm:$0xff] }
 0x190   : > { %1346 = vst.msk [vmem:[#allocation2 + $0x80] sm:$0xff] %vm934_vm11, %v1262_v15  ;;  %1748 = vmatmul.f32.vlgmr.msra.gmra.mxu3 %v1504_v4 }
 0x191   : > { %2393 = vmatpush.msra.mxu3 %v3537_v3  ;;  %1299 = vrot.lane.b32.xlu2 %v2838_v28, %s2559_s29  ;;  %v887_v59 = vpop.permute.xlu1 %886  ;;  %v1447_v28 = vld [vmem:[#allocation2 + $0x78] sm:$0xff] }
 0x192   : > { %2337 = vmatmul.msk.f32.gmra.mxu2 %vm309_vm0, %v1470_v6  ;;  %1691 = vmatmul.f32.gmra.mxu0 %v1447_v28 }
 0x193   : > { %2394 = vmatpush.msra.mxu3 %v3553_v34  ;;  %v1266_v50 = vpop.permute.xlu2 %1265  ;;  %v1473_v34 = vld [vmem:[#allocation2 + $0x148] sm:$0xff] }
 0x194   : > { %1027 = vrot.lane.b32.xlu0 %v3033_v52, %s2556_s21 }
 0x195   : > { %2395 = vmatpush.msra.mxu3 %v3567_v26 }
 0x196   : > { %v756_v40 = vpop.permute.xlu0 %755  ;;  %1156 = vrot.lane.b32.xlu1 %v3493_v53, %s2558_s25 }
 0x197   : > { %824 = vst.msk [vmem:[#allocation2 + $0x258] sm:$0x7f] %vm801_vm7, %v756_v40  ;;  %v1448_v3 = vld [vmem:[#allocation2 + $0x80] sm:$0xff]  ;;  %2396 = vmatpush.msra.mxu3 %v3582_v56  ;;  %v4481_v40 = vld [vmem:[#allocation18_spill] sm:$0xff] }
 0x198   : > { %959 = vst.msk [vmem:[#allocation2 + $0x258] sm:$0xff] %vm934_vm11, %v887_v59  ;;  %1804 = vmatmul.f32.gmra.mxu1 %v1448_v3  ;;  %v1476_v56 = vld [vmem:[#allocation2 + $0x160] sm:$0xff] }
 0x199   : > { %862 = vrot.lane.b32.xlu2 %v3484_v49, %s2559_s29  ;;  %v849_v26 = vpop.permute.xlu1 %848 }
 0x19a   : > { %2338 = vmatmul.msk.f32.gmra.mxu2 %vm309_vm0, %v1473_v34  ;;  %940 = vst.msk [vmem:[#allocation2 + $0x90] sm:$0xfe] %vm932_vm9, %v849_v26  ;;  %v1497_v34 = vld [vmem:[#allocation2 + $0x208] sm:$0xff] }
 0x19b   : > { %v1018_v22 = vpop.permute.xlu2 %1017 }
 0x19c   : > { %1106 = vst.msk [vmem:[#allocation2 + $0xc8] sm:$0xff] %vm632_vm4, %v1018_v22  ;;  %1277 = vrot.lane.b32.xlu0 %v4464_v7, %s2559_s29 }
 0x19e   : > { %v1143_v32 = vpop.permute.xlu0 %1142  ;;  %1051 = vrot.lane.b32.xlu1 %v3435_v18, %s2556_s21 }
 0x19f   : > { %1227 = vst.msk [vmem:[#allocation2 + $0x98] sm:$0xfe] %vm1220_vm10, %v1143_v32  ;;  %v1507_v36 = vld [vmem:[#allocation2 + $0x258] sm:$0xff] }
 0x1a0   : > { %1347 = vst.msk [vmem:[#allocation2 + $0x98] sm:$0xff] %vm934_vm11, %v1264_v44  ;;  %1751 = vmatmul.f32.gmra.mxu3 %v1507_v36  ;;  %v1485_v44 = vld [vmem:[#allocation2 + $0x1a8] sm:$0xff] }
 0x1a1   : > { %1180 = vrot.lane.b32.xlu2 %v3520_v10, %s2558_s25  ;;  %v889_v49 = vpop.permute.xlu1 %888  ;;  %v1450_v19 = vld [vmem:[#allocation2 + $0x90] sm:$0xff]  ;;  %v1479_v10 = vld [vmem:[#allocation2 + $0x178] sm:$0xff] }
 0x1a2   : > { %2339 = vmatmul.msk.f32.gmra.mxu2 %vm309_vm0, %v1476_v56  ;;  %1694 = vmatmul.f32.gmra.mxu0 %v1450_v19 }
 0x1a3   : > { %v1268_v52 = vpop.permute.xlu2 %1267 }
 0x1a4   : > { %1301 = vrot.lane.b32.xlu0 %v4467_v0, %s2559_s29 }
 0x1a6   : > { %v758_v43 = vpop.permute.xlu0 %757  ;;  %1029 = vrot.lane.b32.xlu1 %v3041_v54, %s2556_s21  ;;  %v4479_v54 = vld [vmem:[#allocation14_spill] sm:$0xff] }
 0x1a7   : > { %825 = vst.msk [vmem:[#allocation2 + $0x270] sm:$0xff] %vm799_vm6, %v758_v43  ;;  %v1451_v15 = vld [vmem:[#allocation2 + $0x98] sm:$0xff] }
 0x1a8   : > { %960 = vst.msk [vmem:[#allocation2 + $0x270] sm:$0xfe] %vm932_vm9, %v889_v49  ;;  %1807 = vmatmul.f32.gmra.mxu1 %v1451_v15  ;;  %v3926_v49 = vrot.slane %v3717_v25, 1  ;;  %v1500_v15 = vld [vmem:[#allocation2 + $0x220] sm:$0xff] }
 0x1a9   : > { %1158 = vrot.lane.b32.xlu2 %v4468_v35, %s2558_s25  ;;  %v851_v7 = vpop.permute.xlu1 %850 }
 0x1aa   : > { %2340 = vmatmul.msk.f32.gmra.mxu2 %vm309_vm0, %v1479_v10  ;;  %941 = vst.msk [vmem:[#allocation2 + $0xa8] sm:$0xff] %vm934_vm11, %v851_v7 }
 0x1ab   : > { %v1020_v18 = vpop.permute.xlu2 %1019  ;;  %1431 = vst.msk [vmem:[#allocation2 + $0x2c8] sm:$0x7f] %vm1402_vm2, %v3926_v49 }
 0x1ac   : > { %1107 = vst.msk [vmem:[#allocation2 + $0xe0] sm:$0x7f] %vm1098_vm8, %v1020_v18  ;;  %864 = vrot.lane.b32.xlu0 %v4465_v1, %s2559_s29 }
 0x1ae   : > { %v1145_v31 = vpop.permute.xlu0 %1144  ;;  %1279 = vrot.lane.b32.xlu1 %v4479_v54, %s2559_s29 }
 0x1af   : > { %1228 = vst.msk [vmem:[#allocation2 + $0xb0] sm:$0xff] %vm799_vm6, %v1145_v31  ;;  %v1510_v21 = vld [vmem:[#allocation2 + $0x270] sm:$0xff] }
 0x1b0   : > { %1348 = vst.msk [vmem:[#allocation2 + $0xb0] sm:$0xff] %vm934_vm11, %v1266_v50  ;;  %1754 = vmatmul.f32.gmra.mxu3 %v1510_v21 }
 0x1b1   : > { %1053 = vrot.lane.b32.xlu2 %v3600_v47, %s2556_s21  ;;  %v891_v8 = vpop.permute.xlu1 %890  ;;  %v1453_v5 = vld [vmem:[#allocation2 + $0xa8] sm:$0xff] }
 0x1b2   : > { %2341 = vmatmul.msk.f32.gmra.mxu2 %vm309_vm0, %v1482_v42  ;;  %1697 = vmatmul.f32.gmra.mxu0 %v1453_v5 }
 0x1b3   : > { %v1270_v0 = vpop.permute.xlu2 %1269 }
 0x1b4   : > { %1182 = vrot.lane.b32.xlu0 %v3249_v24, %s2558_s25 }
 0x1b5   : > { %v3842_v47 = vpop.f32.mrf.mxu2 }
 0x1b6   : > { %v760_v29 = vpop.permute.xlu0 %759  ;;  %1303 = vrot.lane.b32.xlu1 %v4475_v23, %s2559_s29 }
 0x1b7   : > { %826 = vst.msk [vmem:[#allocation2 + $0x288] sm:$0x7f] %vm801_vm7, %v760_v29  ;;  %v1454_v39 = vld [vmem:[#allocation2 + $0xb0] sm:$0xff] }
 0x1b8   : > { %961 = vst.msk [vmem:[#allocation2 + $0x288] sm:$0xff] %vm934_vm11, %v891_v8  ;;  %1810 = vmatmul.f32.gmra.mxu1 %v1454_v39  ;;  %v4482_v39 = vld [vmem:[#allocation17_spill] sm:$0xff] }
 0x1b9   : > { %1031 = vrot.lane.b32.xlu2 %v4480_v41, %s2556_s21  ;;  %v853_v46 = vpop.permute.xlu1 %852 }
 0x1ba   : > { %2342 = vmatmul.msk.f32.gmra.mxu2 %vm309_vm0, %v1485_v44  ;;  %942 = vst.msk [vmem:[#allocation2 + $0xc0] sm:$0xfe] %vm932_vm9, %v853_v46 }
 0x1bb   : > { %v1022_v1 = vpop.permute.xlu2 %1021 }
 0x1bc   : > { %1108 = vst.msk [vmem:[#allocation2 + $0xf8] sm:$0xff] %vm632_vm4, %v1022_v1  ;;  %1160 = vrot.lane.b32.xlu0 %v3528_v51, %s2558_s25 }
 0x1bd   : > { %v3861_v24 = vpop.f32.mrf.mxu2 }
 0x1be   : > { %v1147_v38 = vpop.permute.xlu0 %1146  ;;  %866 = vrot.lane.b32.xlu1 %v3493_v53, %s2559_s29 }
 0x1bf   : > { %1229 = vst.msk [vmem:[#allocation2 + $0xc8] sm:$0xfe] %vm1220_vm10, %v1147_v38  ;;  %v1513_v9 = vld [vmem:[#allocation2 + $0x288] sm:$0xff]  ;;  %v1503_v38 = vld [vmem:[#allocation2 + $0x238] sm:$0xff] }
 0x1c0   : > { %1349 = vst.msk [vmem:[#allocation2 + $0xc8] sm:$0xff] %vm934_vm11, %v1268_v52  ;;  %1757 = vmatmul.f32.gmra.mxu3 %v1513_v9  ;;  %v998_v52 = vrot.slane %v3688_v60, 1 }
 0x1c1   : > { %1281 = vrot.lane.b32.xlu2 %v4466_v37, %s2559_s29  ;;  %v893_v30 = vpop.permute.xlu1 %892  ;;  %v1456_v48 = vld [vmem:[#allocation2 + $0xc0] sm:$0xff] }
 0x1c2   : > { %2343 = vmatmul.msk.f32.gmra.mxu2 %vm309_vm0, %v1488_v58  ;;  %1700 = vmatmul.f32.gmra.mxu0 %v1456_v48 }
 0x1c3   : > { %v1272_v23 = vpop.permute.xlu2 %1271 }
 0x1c4   : > { %1055 = vrot.lane.b32.xlu0 %v3586_v62, %s2556_s21  ;;  %v1494_v62 = vld [vmem:[#allocation2 + $0x1f0] sm:$0xff] }
 0x1c5   : > { %v3873_v12 = vpop.f32.mrf.mxu2 }
 0x1c6   : > { %v762_v27 = vpop.permute.xlu0 %761  ;;  %1184 = vrot.lane.b32.xlu1 %v3571_v16, %s2558_s25 }
 0x1c7   : > { %827 = vst.msk [vmem:[#allocation2 + $0x2a0] sm:$0xff] %vm799_vm6, %v762_v27  ;;  %v1457_v55 = vld [vmem:[#allocation2 + $0xc8] sm:$0xff] }
 0x1c8   : > { %962 = vst.msk [vmem:[#allocation2 + $0x2a0] sm:$0xfe] %vm932_vm9, %v893_v30  ;;  %1813 = vmatmul.f32.gmra.mxu1 %v1457_v55  ;;  %v1506_v55 = vld [vmem:[#allocation2 + $0x250] sm:$0xff] }
 0x1c9   : > { %1305 = vrot.lane.b32.xlu2 %v4471_v2, %s2559_s29  ;;  %v855_v37 = vpop.permute.xlu1 %854 }
 0x1ca   : > { %2344 = vmatmul.msk.f32.gmra.mxu2 %vm309_vm0, %v1491_v33  ;;  %943 = vst.msk [vmem:[#allocation2 + $0xd8] sm:$0xff] %vm934_vm11, %v855_v37 }
 0x1cb   : > { %v1024_v53 = vpop.permute.xlu2 %1023 }
 0x1cc   : > { %1109 = vst.msk [vmem:[#allocation2 + $0x110] sm:$0x7f] %vm1098_vm8, %v1024_v53  ;;  %1033 = vrot.lane.b32.xlu0 %v3129_v63, %s2556_s21 }
 0x1cd   : > { %v3888_v59 = vpop.f32.mrf.mxu2 }
 0x1ce   : > { %v1149_v17 = vpop.permute.xlu0 %1148  ;;  %1162 = vrot.lane.b32.xlu1 %v3218_v14, %s2558_s25 }
 0x1cf   : > { %1230 = vst.msk [vmem:[#allocation2 + $0xe0] sm:$0xff] %vm799_vm6, %v1149_v17  ;;  %v1516_v4 = vld [vmem:[#allocation2 + $0x2a0] sm:$0xff] }
 0x1d0   : > { %1350 = vst.msk [vmem:[#allocation2 + $0xe0] sm:$0xff] %vm934_vm11, %v1270_v0  ;;  %1760 = vmatmul.f32.gmra.mxu3 %v1516_v4 }
 0x1d1   : > { %868 = vrot.lane.b32.xlu2 %v4468_v35, %s2559_s29  ;;  %v895_v16 = vpop.permute.xlu1 %894  ;;  %v1459_v35 = vld [vmem:[#allocation2 + $0xd8] sm:$0xff] }
 0x1d2   : > { %2345 = vmatmul.msk.f32.gmra.mxu2 %vm309_vm0, %v1494_v62  ;;  %1703 = vmatmul.f32.gmra.mxu0 %v1459_v35 }
 0x1d3   : > { %v3886_v2 = vpop.permute.xlu2 %1273 }
 0x1d4   : > { %1283 = vrot.lane.b32.xlu0 %v4481_v40, %s2559_s29 }
 0x1d5   : > { %v3909_v32 = vpop.f32.mrf.mxu2 }
 0x1d6   : > { %v764_v50 = vpop.permute.xlu0 %763  ;;  %1057 = vrot.lane.b32.xlu1 %v3683_v11, %s2556_s21 }
 0x1d7   : > { %828 = vst.msk [vmem:[#allocation2 + $0x2b8] sm:$0x7f] %vm801_vm7, %v764_v50  ;;  %v1460_v6 = vld [vmem:[#allocation2 + $0xe0] sm:$0xff]  ;;  %v1790_v63 = vpop.f32.mrf.mxu1  ;;  %v4485_v50 = vld [vmem:[#allocation39_spill] sm:$0xff] }
 0x1d8   : > { %963 = vst.msk [vmem:[#allocation2 + $0x2b8] sm:$0xff] %vm934_vm11, %v895_v16  ;;  %1816 = vmatmul.f32.gmra.mxu1 %v1460_v6  ;;  %v4484_v16 = vld [vmem:[#allocation16_spill] sm:$0xff] }
 0x1d9   : > { %1186 = vrot.lane.b32.xlu2 %v3738_v57, %s2558_s25  ;;  %v857_v26 = vpop.permute.xlu1 %856 }
 0x1da   : > { %2346 = vmatmul.msk.f32.gmra.mxu2 %vm309_vm0, %v1497_v34  ;;  %944 = vst.msk [vmem:[#allocation2 + $0xf0] sm:$0xfe] %vm932_vm9, %v857_v26 }
 0x1db   : > { %v1026_v22 = vpop.permute.xlu2 %1025 }
 0x1dc   : > { %v1677_v3 = vpop.f32.mrf.mxu0  ;;  %1110 = vst.msk [vmem:[#allocation2 + $0x128] sm:$0xff] %vm632_vm4, %v1026_v22  ;;  %1307 = vrot.lane.b32.xlu0 %v3688_v60, %s2559_s29  ;;  %v3939_v60 = vsel %vm663_vm1, %v998_v52, %v3926_v49  ;;  %v4487_v52 = vld [vmem:[#allocation33_spill] sm:$0xff] }
 0x1dd   : > { %v1791_v28 = vadd.f32 %v1790_v63, %v1677_v3  ;;  %v3933_v31 = vpop.f32.mrf.mxu2  ;;  %1430 = vst.msk [vmem:[#allocation2 + $0x2b0] sm:$0xff] %vm309_vm0, %v3939_v60 }
 0x1de   : > { %v1151_v57 = vpop.permute.xlu0 %1150  ;;  %1035 = vrot.lane.b32.xlu1 %v3118_v61, %s2556_s21 }
 0x1df   : > { %v1904_v11 = vadd.f32 %v3842_v47, %v1791_v28  ;;  %1231 = vst.msk [vmem:[#allocation2 + $0xf8] sm:$0xfe] %vm1220_vm10, %v1151_v57  ;;  %v1519_v36 = vld [vmem:[#allocation2 + $0x2b8] sm:$0xff] }
 0x1e0   : > { %1351 = vst.msk [vmem:[#allocation2 + $0xf8] sm:$0xff] %vm934_vm11, %v1272_v23  ;;  %1763 = vmatmul.f32.gmra.mxu3 %v1519_v36  ;;  %v4486_v36 = vld [vmem:[#allocation43_spill] sm:$0xff] }
 0x1e1   : > { %1999 = vst.msk [vmem:[%s3906_s15] sm:$0xff] %vm309_vm0, %v1904_v11  ;;  %1164 = vrot.lane.b32.xlu2 %v3364_v20, %s2558_s25  ;;  %v897_v61 = vpop.permute.xlu1 %896  ;;  %v2100_v21 = vmul.f32 %v1904_v11, %v1904_v11  ;;  %v1462_v0 = vld [vmem:[#allocation2 + $0xf0] sm:$0xff]  ;;  %v2031_v8 = vsel %vm309_vm0, %v1904_v11, 0.0 }
 0x1e2   : > { %2347 = vmatmul.msk.f32.gmra.mxu2 %vm309_vm0, %v1500_v15  ;;  %1706 = vmatmul.f32.gmra.mxu0 %v1462_v0 }
 0x1e3   : > { %v3928_v43 = vpop.permute.xlu2 %1275  ;;  %v2132_v47 = vsel %vm309_vm0, %v2100_v21, 0.0 }
 0x1e4   : > { %v1680_v19 = vpop.f32.mrf.mxu0  ;;  %870 = vrot.lane.b32.xlu0 %v3528_v51, %s2559_s29  ;;  %v4483_v51 = vld [vmem:[#allocation35_spill] sm:$0xff] }
 0x1e5   : > { %v1793_v56 = vpop.f32.mrf.mxu1 }
 0x1e6   : > { %v766_v18 = vpop.permute.xlu0 %765  ;;  %v1794_v7 = vadd.f32 %v1793_v56, %v1680_v19  ;;  %1285 = vrot.lane.b32.xlu1 %v4482_v39, %s2559_s29 }
 0x1e7   : > { %829 = vst.msk [vmem:[#allocation2 + $0x2d0] sm:$0xff] %vm799_vm6, %v766_v18  ;;  %v1463_v10 = vld [vmem:[#allocation2 + $0xf8] sm:$0xff] }
 0x1e8   : > { %964 = vst.msk [vmem:[#allocation2 + $0x2d0] sm:$0xfe] %vm932_vm9, %v897_v61  ;;  %1819 = vmatmul.f32.gmra.mxu1 %v1463_v10  ;;  %v1907_v54 = vadd.f32 %v3861_v24, %v1794_v7  ;;  %v3959_v24 = vpop.f32.mrf.mxu2 }
 0x1e9   : > { %1059 = vrot.lane.b32.xlu2 %v3668_v45, %s2556_s21  ;;  %v859_v9 = vpop.permute.xlu1 %858 }
 0x1ea   : > { %2000 = vst.msk [vmem:[%s3906_s15 + $0x8] sm:$0xff] %vm309_vm0, %v1907_v54  ;;  %v2032_v42 = vsel %vm309_vm0, %v1907_v54, 0.0  ;;  %v2101_v29 = vmul.f32 %v1907_v54, %v1907_v54  ;;  %2348 = vmatmul.msk.f32.gmra.mxu2 %vm309_vm0, %v1503_v38  ;;  %v4490_v38 = vld [vmem:[#allocation34_spill] sm:$0xff] }
 0x1eb   : > { %v2033_v5 = vadd.f32 %v2032_v42, %v2031_v8  ;;  %v3956_v1 = vpop.permute.xlu2 %1299  ;;  %945 = vst.msk [vmem:[#allocation2 + $0x108] sm:$0xff] %vm934_vm11, %v859_v9  ;;  %v4488_v42 = vld [vmem:[#allocation21_spill] sm:$0xff] }
 0x1ec   : > { %v2133_v41 = vsel %vm309_vm0, %v2101_v29, 0.0  ;;  %v1683_v23 = vpop.f32.mrf.mxu0  ;;  %1188 = vrot.lane.b32.xlu0 %v3765_v13, %s2558_s25 }
 0x1ed   : > { %v2134_v46 = vadd.f32 %v2133_v41, %v2132_v47  ;;  %v1509_v41 = vld [vmem:[#allocation2 + $0x268] sm:$0xff] }
 0x1ee   : > { %v1153_v44 = vpop.permute.xlu0 %1152  ;;  %1309 = vrot.lane.b32.xlu1 %v3717_v25, %s2559_s29 }
 0x1ef   : > { %1232 = vst.msk [vmem:[#allocation2 + $0x110] sm:$0xff] %vm799_vm6, %v1153_v44  ;;  %v1522_v45 = vld [vmem:[#allocation2 + $0x2d0] sm:$0xff] }
 0x1f0   : > { %1352 = vst.msk [vmem:[#allocation2 + $0x110] sm:$0xff] %vm934_vm11, %v3886_v2  ;;  %1766 = vmatmul.f32.gmra.mxu3 %v1522_v45  ;;  %v3974_v33 = vpop.f32.mrf.mxu2 }
 0x1f1   : > { %1037 = vrot.lane.b32.xlu2 %v4483_v51, %s2556_s21  ;;  %v899_v37 = vpop.permute.xlu1 %898 }
 0x1f2   : > { %v1465_v25 = vld [vmem:[#allocation2 + $0x108] sm:$0xff]  ;;  %2349 = vmatmul.msk.f32.gmra.mxu2 %vm309_vm0, %v1506_v55 }
 0x1f3   : > { %v863_v27 = vpop.permute.xlu2 %862  ;;  %1709 = vmatmul.f32.gmra.mxu0 %v1465_v25 }
 0x1f4   : > { %v1796_v30 = vpop.f32.mrf.mxu1  ;;  %947 = vst.msk [vmem:[#allocation2 + $0x138] sm:$0xff] %vm934_vm11, %v863_v27  ;;  %1166 = vrot.lane.b32.xlu0 %v4485_v50, %s2558_s25 }
 0x1f5   : > { %v1797_v58 = vadd.f32 %v1796_v30, %v1683_v23 }
 0x1f6   : > { %v768_v48 = vpop.permute.xlu0 %767  ;;  %872 = vrot.lane.b32.xlu1 %v3218_v14, %s2559_s29 }
 0x1f7   : > { %v1910_v53 = vadd.f32 %v3873_v12, %v1797_v58  ;;  %830 = vst.msk [vmem:[#allocation2 + $0x2e8] sm:$0x7f] %vm801_vm7, %v768_v48  ;;  %v1466_v17 = vld [vmem:[#allocation2 + $0x110] sm:$0xff] }
 0x1f8   : > { %965 = vst.msk [vmem:[#allocation2 + $0x2e8] sm:$0xff] %vm934_vm11, %v899_v37  ;;  %1822 = vmatmul.f32.gmra.mxu1 %v1466_v17  ;;  %v3992_v34 = vpop.f32.mrf.mxu2  ;;  %v4491_v37 = vld [vmem:[#allocation32_spill] sm:$0xff]  ;;  %v4492_v17 = vld [vmem:[#allocation42_spill] sm:$0xff] }
 0x1f9   : > { %2001 = vst.msk [vmem:[%s3906_s15 + $0x10] sm:$0xff] %vm309_vm0, %v1910_v53  ;;  %v2034_v13 = vsel %vm309_vm0, %v1910_v53, 0.0  ;;  %v2102_v4 = vmul.f32 %v1910_v53, %v1910_v53  ;;  %1287 = vrot.lane.b32.xlu2 %v4484_v16, %s2559_s29  ;;  %v861_v22 = vpop.permute.xlu1 %860 }
 0x1fa   : > { %v2035_v2 = vadd.f32 %v2034_v13, %v2033_v5  ;;  %946 = vst.msk [vmem:[#allocation2 + $0x120] sm:$0xfe] %vm932_vm9, %v861_v22  ;;  %2350 = vmatmul.msk.f32.gmra.mxu2 %vm309_vm0, %v1509_v41  ;;  %v4493_v13 = vld [vmem:[#allocation20_spill] sm:$0xff] }
 0x1fb   : > { %v2135_v12 = vsel %vm309_vm0, %v2102_v4, 0.0  ;;  %v3988_v40 = vpop.permute.xlu2 %1180 }
 0x1fc   : > { %v2136_v62 = vadd.f32 %v2135_v12, %v2134_v46  ;;  %v1686_v6 = vpop.f32.mrf.mxu0  ;;  %v1799_v35 = vpop.f32.mrf.mxu1  ;;  %1061 = vrot.lane.b32.xlu0 %v3939_v60, %s2556_s21  ;;  %v1471_v46 = vld [vmem:[#allocation2 + $0x138] sm:$0xff] }
 0x1fd   : > { %v1800_v63 = vadd.f32 %v1799_v35, %v1686_v6  ;;  %v4494_v35 = vld [vmem:[#allocation19_spill] sm:$0xff] }
 0x1fe   : > { %v1155_v3 = vpop.permute.xlu0 %1154  ;;  %1039 = vrot.lane.b32.xlu1 %v4487_v52, %s2556_s21 }
 0x1ff   : > { %v1913_v28 = vadd.f32 %v3888_v59, %v1800_v63  ;;  %1233 = vst.msk [vmem:[#allocation2 + $0x128] sm:$0xfe] %vm1220_vm10, %v1155_v3  ;;  %v1525_v26 = vld [vmem:[#allocation2 + $0x2e8] sm:$0xff]  ;;  %v4495_v63 = vld [vmem:[#allocation45_spill] sm:$0xff] }
 0x200   : > { %1353 = vst.msk [vmem:[#allocation2 + $0x128] sm:$0xff] %vm934_vm11, %v3928_v43  ;;  %1769 = vmatmul.f32.gmra.mxu3 %v1525_v26  ;;  %v4010_v21 = vpop.f32.mrf.mxu2 }
 0x201   : > { %2002 = vst.msk [vmem:[%s3906_s15 + $0x18] sm:$0xff] %vm309_vm0, %v1913_v28  ;;  %v2036_v14 = vsel %vm309_vm0, %v1913_v28, 0.0  ;;  %v2103_v57 = vmul.f32 %v1913_v28, %v1913_v28  ;;  %1168 = vrot.lane.b32.xlu2 %v4486_v36, %s2558_s25  ;;  %v1179_v61 = vpop.permute.xlu1 %1178  ;;  %v1468_v60 = vld [vmem:[#allocation2 + $0x120] sm:$0xff] }
 0x202   : > { %v2037_v11 = vadd.f32 %v2036_v14, %v2035_v2  ;;  %1712 = vmatmul.f32.gmra.mxu0 %v1468_v60 }
 0x203   : > { %v2137_v59 = vsel %vm309_vm0, %v2103_v57, 0.0  ;;  %v4007_v15 = vpop.permute.xlu2 %1158 }
 0x204   : > { %v2138_v56 = vadd.f32 %v2137_v59, %v2136_v62  ;;  %v1689_v19 = vpop.f32.mrf.mxu0  ;;  %874 = vrot.lane.b32.xlu0 %v3364_v20, %s2559_s29  ;;  %v4489_v20 = vld [vmem:[#allocation40_spill] sm:$0xff]  ;;  %v1512_v62 = vld [vmem:[#allocation2 + $0x280] sm:$0xff] }
 0x205   : > { %v1802_v43 = vpop.f32.mrf.mxu1  ;;  %2351 = vmatmul.msk.f32.gmra.mxu2 %vm309_vm0, %v1512_v62 }
 0x206   : > { %v1050_v18 = vpop.permute.xlu0 %1049  ;;  %v1803_v7 = vadd.f32 %v1802_v43, %v1689_v19  ;;  %1289 = vrot.lane.b32.xlu1 %v4488_v42, %s2559_s29 }
 0x207   : > { %1122 = vst.msk [vmem:[#allocation2 + $0x248] sm:$0xff] %vm632_vm4, %v1050_v18  ;;  %v1469_v10 = vld [vmem:[#allocation2 + $0x128] sm:$0xff] }
 0x208   : > { %1245 = vst.msk [vmem:[#allocation2 + $0x248] sm:$0xfe] %vm1220_vm10, %v1179_v61  ;;  %1825 = vmatmul.f32.gmra.mxu1 %v1469_v10  ;;  %v1916_v54 = vadd.f32 %v3909_v32, %v1803_v7 }
 0x209   : > { %1365 = vst.msk [vmem:[#allocation2 + $0x248] sm:$0xff] %vm934_vm11, %v3956_v1  ;;  %1063 = vrot.lane.b32.xlu2 %v3926_v49, %s2556_s21  ;;  %v1157_v1 = vpop.permute.xlu1 %1156  ;;  %v4028_v49 = vpop.f32.mrf.mxu2 }
 0x20a   : > { %2003 = vst.msk [vmem:[%s3906_s15 + $0x20] sm:$0xff] %vm309_vm0, %v1916_v54  ;;  %v2038_v0 = vsel %vm309_vm0, %v1916_v54, 0.0  ;;  %v2104_v8 = vmul.f32 %v1916_v54, %v1916_v54  ;;  %1715 = vmatmul.f32.gmra.mxu0 %v1471_v46 }
 0x20b   : > { %v2039_v29 = vadd.f32 %v2038_v0, %v2037_v11  ;;  %v1054_v39 = vpop.permute.xlu2 %1053  ;;  %v4498_v0 = vld [vmem:[#allocation46_spill] sm:$0xff] }
 0x20c   : > { %v2139_v32 = vsel %vm309_vm0, %v2104_v8, 0.0  ;;  %1124 = vst.msk [vmem:[#allocation2 + $0x278] sm:$0xff] %vm632_vm4, %v1054_v39  ;;  %1041 = vrot.lane.b32.xlu0 %v4490_v38, %s2556_s21  ;;  %v4499_v8 = vld [vmem:[#allocation44_spill] sm:$0xff] }
 0x20d   : > { %v2140_v5 = vadd.f32 %v2139_v32, %v2138_v56  ;;  %v4496_v56 = vld [vmem:[#allocation23_spill] sm:$0xff] }
 0x20e   : > { %v1028_v47 = vpop.permute.xlu0 %1027  ;;  %1170 = vrot.lane.b32.xlu1 %v4489_v20, %s2558_s25 }
 0x20f   : > { %1111 = vst.msk [vmem:[#allocation2 + $0x140] sm:$0x7f] %vm1098_vm8, %v1028_v47  ;;  %v1692_v51 = vpop.f32.mrf.mxu0 }
 0x210   : > { %1234 = vst.msk [vmem:[#allocation2 + $0x140] sm:$0xff] %vm799_vm6, %v1157_v1  ;;  %v1505_v44 = vld [vmem:[#allocation2 + $0x248] sm:$0xff] }
 0x211   : > { %1861 = vmatmul.f32.vlgmr.msrb.gmra.mxu3 %v1505_v44  ;;  %876 = vrot.lane.b32.xlu2 %v4485_v50, %s2559_s29  ;;  %v1052_v58 = vpop.permute.xlu1 %1051  ;;  %v4040_v27 = vpop.f32.mrf.mxu2 }
 0x212   : > { %1123 = vst.msk [vmem:[#allocation2 + $0x260] sm:$0x7f] %vm1098_vm8, %v1052_v58 }
 0x213   : > { %v1032_v45 = vpop.permute.xlu2 %1031  ;;  %1246 = vst.msk [vmem:[#allocation2 + $0x260] sm:$0xff] %vm799_vm6, %v3988_v40 }
 0x214   : > { %1113 = vst.msk [vmem:[#allocation2 + $0x170] sm:$0x7f] %vm1098_vm8, %v1032_v45  ;;  %1291 = vrot.lane.b32.xlu0 %v4493_v13, %s2559_s29 }
 0x215   : > { %v1805_v9 = vpop.f32.mrf.mxu1 }
 0x216   : > { %v1278_v23 = vpop.permute.xlu0 %1277  ;;  %v1806_v30 = vadd.f32 %v1805_v9, %v1692_v51  ;;  %1043 = vrot.lane.b32.xlu1 %v4491_v37, %s2556_s21  ;;  %v4500_v9 = vld [vmem:[#allocation22_spill] sm:$0xff] }
 0x217   : > { %1354 = vst.msk [vmem:[#allocation2 + $0x140] sm:$0xff] %vm934_vm11, %v1278_v23 }
 0x218   : > { %v1919_v55 = vadd.f32 %v3933_v31, %v1806_v30 }
 0x219   : > { %1172 = vrot.lane.b32.xlu2 %v4492_v17, %s2558_s25  ;;  %v1030_v50 = vpop.permute.xlu1 %1029  ;;  %v4057_v6 = vpop.f32.mrf.mxu2 }
 0x21a   : > { %2004 = vst.msk [vmem:[%s3906_s15 + $0x28] sm:$0xff] %vm309_vm0, %v1919_v55  ;;  %v2040_v48 = vsel %vm309_vm0, %v1919_v55, 0.0  ;;  %v2105_v53 = vmul.f32 %v1919_v55, %v1919_v55 }
 0x21b   : > { %v2041_v25 = vadd.f32 %v2040_v48, %v2039_v29  ;;  %v1282_v4 = vpop.permute.xlu2 %1281  ;;  %1112 = vst.msk [vmem:[#allocation2 + $0x158] sm:$0xff] %vm632_vm4, %v1030_v50 }
 0x21c   : > { %v2141_v31 = vsel %vm309_vm0, %v2105_v53, 0.0  ;;  %1235 = vst.msk [vmem:[#allocation2 + $0x158] sm:$0xfe] %vm1220_vm10, %v4007_v15  ;;  %878 = vrot.lane.b32.xlu0 %v4486_v36, %s2559_s29  ;;  %v4497_v15 = vld [vmem:[#allocation41_spill] sm:$0xff] }
 0x21d   : > { %v2142_v2 = vadd.f32 %v2141_v31, %v2140_v5 }
 0x21e   : > { %v1302_v12 = vpop.permute.xlu0 %1301  ;;  %v1472_v16 = vld [vmem:[#allocation2 + $0x140] sm:$0xff]  ;;  %1293 = vrot.lane.b32.xlu1 %v4494_v35, %s2559_s29 }
 0x21f   : > { %1366 = vst.msk [vmem:[#allocation2 + $0x260] sm:$0xff] %vm934_vm11, %v1302_v12  ;;  %1828 = vmatmul.f32.gmra.mxu1 %v1472_v16  ;;  %v1695_v28 = vpop.f32.mrf.mxu0 }
 0x221   : > { %1045 = vrot.lane.b32.xlu2 %v4495_v63, %s2556_s21  ;;  %v1280_v57 = vpop.permute.xlu1 %1279  ;;  %v4072_v11 = vpop.f32.mrf.mxu2 }
 0x222   : > { %1355 = vst.msk [vmem:[#allocation2 + $0x158] sm:$0xff] %vm934_vm11, %v1280_v57 }
 0x223   : > { %v4069_v3 = vpop.permute.xlu2 %1305 }
 0x224   : > { %1174 = vrot.lane.b32.xlu0 %v4497_v15, %s2558_s25 }
 0x225   : > { %v1808_v40 = vpop.f32.mrf.mxu1 }
 0x226   : > { %v865_v22 = vpop.permute.xlu0 %864  ;;  %v1508_v26 = vld [vmem:[#allocation2 + $0x260] sm:$0xff]  ;;  %v1809_v14 = vadd.f32 %v1808_v40, %v1695_v28  ;;  %880 = vrot.lane.b32.xlu1 %v4489_v20, %s2559_s29 }
 0x227   : > { %948 = vst.msk [vmem:[#allocation2 + $0x150] sm:$0xfe] %vm932_vm9, %v865_v22  ;;  %1864 = vmatmul.f32.gmra.mxu3 %v1508_v26  ;;  %v4129_v22 = vpop.f32.mrf.mxu3 }
 0x228   : > { %v1922_v59 = vadd.f32 %v3959_v24, %v1809_v14 }
 0x229   : > { %1295 = vrot.lane.b32.xlu2 %v4496_v56, %s2559_s29  ;;  %v1304_v10 = vpop.permute.xlu1 %1303  ;;  %v1475_v54 = vld [vmem:[#allocation2 + $0x158] sm:$0xff]  ;;  %v4088_v60 = vpop.f32.mrf.mxu2 }
 0x22a   : > { %2005 = vst.msk [vmem:[%s3906_s15 + $0x30] sm:$0xff] %vm309_vm0, %v1922_v59  ;;  %v2042_v36 = vsel %vm309_vm0, %v1922_v59, 0.0  ;;  %v2106_v52 = vmul.f32 %v1922_v59, %v1922_v59  ;;  %1831 = vmatmul.f32.gmra.mxu1 %v1475_v54 }
 0x22b   : > { %v2043_v43 = vadd.f32 %v2042_v36, %v2041_v25  ;;  %v869_v18 = vpop.permute.xlu2 %868 }
 0x22c   : > { %v2143_v19 = vsel %vm309_vm0, %v2106_v52, 0.0  ;;  %950 = vst.msk [vmem:[#allocation2 + $0x180] sm:$0xfe] %vm932_vm9, %v869_v18  ;;  %1047 = vrot.lane.b32.xlu0 %v4499_v8, %s2556_s21 }
 0x22d   : > { %v2144_v7 = vadd.f32 %v2143_v19, %v2142_v2 }
 0x22e   : > { %v1183_v24 = vpop.permute.xlu0 %1182  ;;  %v1474_v61 = vld [vmem:[#allocation2 + $0x150] sm:$0xff]  ;;  %1176 = vrot.lane.b32.xlu1 %v4498_v0, %s2558_s25 }
 0x22f   : > { %1247 = vst.msk [vmem:[#allocation2 + $0x278] sm:$0xfe] %vm1220_vm10, %v1183_v24  ;;  %1718 = vmatmul.f32.gmra.mxu0 %v1474_v61  ;;  %v1698_v32 = vpop.f32.mrf.mxu0 }
 0x230   : > { %1367 = vst.msk [vmem:[#allocation2 + $0x278] sm:$0xff] %vm934_vm11, %v1304_v10 }
 0x231   : > { %882 = vrot.lane.b32.xlu2 %v4492_v17, %s2559_s29  ;;  %v867_v47 = vpop.permute.xlu1 %866  ;;  %v4098_v1 = vpop.f32.mrf.mxu2 }
 0x232   : > { %949 = vst.msk [vmem:[#allocation2 + $0x168] sm:$0xff] %vm934_vm11, %v867_v47 }
 0x233   : > { %v1187_v29 = vpop.permute.xlu2 %1186 }
 0x234   : > { %1297 = vrot.lane.b32.xlu0 %v4500_v9, %s2559_s29 }
 0x235   : > { %v1811_v42 = vpop.f32.mrf.mxu1 }
 0x236   : > { %v1161_v39 = vpop.permute.xlu0 %1160  ;;  %v1812_v5 = vadd.f32 %v1811_v42, %v1698_v32 }
 0x237   : > { %1236 = vst.msk [vmem:[#allocation2 + $0x170] sm:$0xff] %vm799_vm6, %v1161_v39  ;;  %v1511_v41 = vld [vmem:[#allocation2 + $0x278] sm:$0xff] }
 0x238   : > { %1356 = vst.msk [vmem:[#allocation2 + $0x170] sm:$0xff] %vm934_vm11, %v1282_v4  ;;  %1867 = vmatmul.f32.gmra.mxu3 %v1511_v41  ;;  %v1925_v46 = vadd.f32 %v3974_v33, %v1812_v5  ;;  %v1480_v4 = vld [vmem:[#allocation2 + $0x180] sm:$0xff] }
 0x239   : > { %v1185_v58 = vpop.permute.xlu1 %1184  ;;  %v1477_v55 = vld [vmem:[#allocation2 + $0x168] sm:$0xff]  ;;  %v4111_v48 = vpop.f32.mrf.mxu2 }
 0x23a   : > { %2006 = vst.msk [vmem:[%s3906_s15 + $0x38] sm:$0xff] %vm309_vm0, %v1925_v46  ;;  %v2044_v44 = vsel %vm309_vm0, %v1925_v46, 0.0  ;;  %v2107_v20 = vmul.f32 %v1925_v46, %v1925_v46  ;;  %1721 = vmatmul.f32.gmra.mxu0 %v1477_v55 }
 0x23b   : > { %v2045_v38 = vadd.f32 %v2044_v44, %v2043_v43  ;;  %v1165_v51 = vpop.permute.xlu2 %1164 }
 0x23c   : > { %v2145_v45 = vsel %vm309_vm0, %v2107_v20, 0.0 }
 0x23d   : > { %v2146_v23 = vadd.f32 %v2145_v45, %v2144_v7  ;;  %v4140_v7 = vpop.f32.mrf.mxu3 }
 0x23e   : > { %v1056_v30 = vpop.permute.xlu0 %1055 }
 0x23f   : > { %1125 = vst.msk [vmem:[#allocation2 + $0x290] sm:$0x7f] %vm1098_vm8, %v1056_v30  ;;  %v1478_v33 = vld [vmem:[#allocation2 + $0x170] sm:$0xff]  ;;  %v1701_v17 = vpop.f32.mrf.mxu0 }
 0x240   : > { %1248 = vst.msk [vmem:[#allocation2 + $0x290] sm:$0xff] %vm799_vm6, %v1185_v58  ;;  %1834 = vmatmul.f32.gmra.mxu1 %v1478_v33 }
 0x241   : > { %1368 = vst.msk [vmem:[#allocation2 + $0x290] sm:$0xff] %vm934_vm11, %v4069_v3  ;;  %v1163_v31 = vpop.permute.xlu1 %1162  ;;  %v4119_v16 = vpop.f32.mrf.mxu2 }
 0x242   : > { %1724 = vmatmul.f32.gmra.mxu0 %v1480_v4 }
 0x243   : > { %v1060_v37 = vpop.permute.xlu2 %1059 }
 0x244   : > { %1127 = vst.msk [vmem:[#allocation2 + $0x2c0] sm:$0x7f] %vm1098_vm8, %v1060_v37 }
 0x245   : > { %v1814_v53 = vpop.f32.mrf.mxu1 }
 0x246   : > { %v1034_v25 = vpop.permute.xlu0 %1033  ;;  %v1815_v13 = vadd.f32 %v1814_v53, %v1701_v17 }
 0x247   : > { %1114 = vst.msk [vmem:[#allocation2 + $0x188] sm:$0xff] %vm632_vm4, %v1034_v25 }
 0x248   : > { %1237 = vst.msk [vmem:[#allocation2 + $0x188] sm:$0xfe] %vm1220_vm10, %v1163_v31  ;;  %v1514_v2 = vld [vmem:[#allocation2 + $0x290] sm:$0xff]  ;;  %v1928_v12 = vadd.f32 %v3992_v34, %v1815_v13 }
 0x249   : > { %1870 = vmatmul.f32.gmra.mxu3 %v1514_v2  ;;  %v1058_v34 = vpop.permute.xlu1 %1057  ;;  %v4131_v26 = vpop.f32.mrf.mxu2 }
 0x24a   : > { %2007 = vst.msk [vmem:[%s3906_s15 + $0x40] sm:$0xff] %vm309_vm0, %v1928_v12  ;;  %v2046_v62 = vsel %vm309_vm0, %v1928_v12, 0.0  ;;  %v2108_v50 = vmul.f32 %v1928_v12, %v1928_v12 }
 0x24b   : > { %v2047_v35 = vadd.f32 %v2046_v62, %v2045_v38  ;;  %v1038_v40 = vpop.permute.xlu2 %1037  ;;  %1126 = vst.msk [vmem:[#allocation2 + $0x2a8] sm:$0xff] %vm632_vm4, %v1058_v34 }
 0x24c   : > { %v2147_v63 = vsel %vm309_vm0, %v2108_v50, 0.0  ;;  %1116 = vst.msk [vmem:[#allocation2 + $0x1b8] sm:$0xff] %vm632_vm4, %v1038_v40 }
 0x24d   : > { %v2148_v3 = vadd.f32 %v2147_v63, %v2146_v23  ;;  %1249 = vst.msk [vmem:[#allocation2 + $0x2a8] sm:$0xfe] %vm1220_vm10, %v1187_v29  ;;  %v4147_v29 = vpop.f32.mrf.mxu3 }
 0x24e   : > { %v1284_v28 = vpop.permute.xlu0 %1283 }
 0x24f   : > { %1357 = vst.msk [vmem:[#allocation2 + $0x188] sm:$0xff] %vm934_vm11, %v1284_v28  ;;  %v1704_v59 = vpop.f32.mrf.mxu0 }
 0x251   : > { %v1036_v43 = vpop.permute.xlu1 %1035 }
 0x252   : > { %1115 = vst.msk [vmem:[#allocation2 + $0x1a0] sm:$0x7f] %vm1098_vm8, %v1036_v43 }
 0x253   : > { %v1288_v57 = vpop.permute.xlu2 %1287  ;;  %1238 = vst.msk [vmem:[#allocation2 + $0x1a0] sm:$0xff] %vm799_vm6, %v1165_v51 }
 0x255   : > { %v1817_v14 = vpop.f32.mrf.mxu1  ;;  %v4155_v45 = vpop.f32.mrf.mxu3 }
 0x256   : > { %v1308_v36 = vpop.permute.xlu0 %1307  ;;  %v1481_v52 = vld [vmem:[#allocation2 + $0x188] sm:$0xff]  ;;  %v1818_v56 = vadd.f32 %v1817_v14, %v1704_v59 }
 0x257   : > { %1369 = vst.msk [vmem:[#allocation2 + $0x2a8] sm:$0xff] %vm934_vm11, %v1308_v36  ;;  %1837 = vmatmul.f32.gmra.mxu1 %v1481_v52 }
 0x258   : > { %v1931_v15 = vadd.f32 %v4010_v21, %v1818_v56  ;;  %v4145_v21 = vpop.f32.mrf.mxu2 }
 0x259   : > { %v1286_v42 = vpop.permute.xlu1 %1285 }
 0x25a   : > { %2008 = vst.msk [vmem:[%s3906_s15 + $0x48] sm:$0xff] %vm309_vm0, %v1931_v15  ;;  %v2048_v19 = vsel %vm309_vm0, %v1931_v15, 0.0  ;;  %v2109_v18 = vmul.f32 %v1931_v15, %v1931_v15 }
 0x25b   : > { %v2049_v24 = vadd.f32 %v2048_v19, %v2047_v35  ;;  %v1169_v10 = vpop.permute.xlu2 %1168  ;;  %1358 = vst.msk [vmem:[#allocation2 + $0x1a0] sm:$0xff] %vm934_vm11, %v1286_v42 }
 0x25c   : > { %v2149_v61 = vsel %vm309_vm0, %v2109_v18, 0.0 }
 0x25d   : > { %v2150_v54 = vadd.f32 %v2149_v61, %v2148_v3  ;;  %v4165_v17 = vpop.f32.mrf.mxu3 }
 0x25e   : > { %v871_v0 = vpop.permute.xlu0 %870  ;;  %v1517_v8 = vld [vmem:[#allocation2 + $0x2a8] sm:$0xff] }
 0x25f   : > { %951 = vst.msk [vmem:[#allocation2 + $0x198] sm:$0xff] %vm934_vm11, %v871_v0  ;;  %1873 = vmatmul.f32.gmra.mxu3 %v1517_v8  ;;  %v1707_v41 = vpop.f32.mrf.mxu0 }
 0x260   : > { %v4153_v9 = vpop.f32.mrf.mxu2 }
 0x261   : > { %v1310_v46 = vpop.permute.xlu1 %1309 }
 0x262   : > { %v1484_v44 = vld [vmem:[#allocation2 + $0x1a0] sm:$0xff] }
 0x263   : > { %v1064_v39 = vpop.permute.xlu2 %1063  ;;  %1840 = vmatmul.f32.gmra.mxu1 %v1484_v44 }
 0x264   : > { %1129 = vst.msk [vmem:[#allocation2 + $0x2f0] sm:$0x7f] %vm1098_vm8, %v1064_v39 }
 0x265   : > { %v1820_v32 = vpop.f32.mrf.mxu1  ;;  %v4176_v28 = vpop.f32.mrf.mxu3 }
 0x266   : > { %v1189_v5 = vpop.permute.xlu0 %1188  ;;  %v1483_v47 = vld [vmem:[#allocation2 + $0x198] sm:$0xff]  ;;  %v1821_v20 = vadd.f32 %v1820_v32, %v1707_v41 }
 0x267   : > { %1250 = vst.msk [vmem:[#allocation2 + $0x2c0] sm:$0xff] %vm799_vm6, %v1189_v5  ;;  %1727 = vmatmul.f32.gmra.mxu0 %v1483_v47  ;;  %v1515_v47 = vld [vmem:[#allocation2 + $0x298] sm:$0xff] }
 0x268   : > { %1370 = vst.msk [vmem:[#allocation2 + $0x2c0] sm:$0xff] %vm934_vm11, %v1310_v46  ;;  %v1934_v38 = vadd.f32 %v4028_v49, %v1821_v20  ;;  %v4167_v25 = vpop.f32.mrf.mxu2 }
 0x269   : > { %v873_v49 = vpop.permute.xlu1 %872 }
 0x26a   : > { %2009 = vst.msk [vmem:[%s3906_s15 + $0x50] sm:$0xff] %vm309_vm0, %v1934_v38  ;;  %v2050_v51 = vsel %vm309_vm0, %v1934_v38, 0.0  ;;  %v2110_v23 = vmul.f32 %v1934_v38, %v1934_v38 }
 0x26b   : > { %v2051_v30 = vadd.f32 %v2050_v51, %v2049_v24  ;;  %v877_v58 = vpop.permute.xlu2 %876  ;;  %952 = vst.msk [vmem:[#allocation2 + $0x1b0] sm:$0xfe] %vm932_vm9, %v873_v49  ;;  %v1526_v15 = vld [vmem:[#allocation2 + $0x2f0] sm:$0xff] }
 0x26c   : > { %v2151_v33 = vsel %vm309_vm0, %v2110_v23, 0.0  ;;  %954 = vst.msk [vmem:[#allocation2 + $0x1e0] sm:$0xfe] %vm932_vm9, %v877_v58  ;;  %v1518_v58 = vld [vmem:[#allocation2 + $0x2b0] sm:$0xff] }
 0x26d   : > { %v2152_v53 = vadd.f32 %v2151_v33, %v2150_v54 }
 0x26e   : > { %v1167_v55 = vpop.permute.xlu0 %1166 }
 0x26f   : > { %1239 = vst.msk [vmem:[#allocation2 + $0x1b8] sm:$0xfe] %vm1220_vm10, %v1167_v55  ;;  %v1520_v37 = vld [vmem:[#allocation2 + $0x2c0] sm:$0xff] }
 0x270   : > { %1359 = vst.msk [vmem:[#allocation2 + $0x1b8] sm:$0xff] %vm934_vm11, %v1288_v57  ;;  %1876 = vmatmul.f32.gmra.mxu3 %v1520_v37  ;;  %v1710_v4 = vpop.f32.mrf.mxu0  ;;  %v4182_v56 = vpop.f32.mrf.mxu2 }
 0x271   : > { %v1040_v62 = vpop.permute.xlu1 %1039 }
 0x272   : > { %1117 = vst.msk [vmem:[#allocation2 + $0x1d0] sm:$0x7f] %vm1098_vm8, %v1040_v62  ;;  %v1486_v35 = vld [vmem:[#allocation2 + $0x1b0] sm:$0xff] }
 0x273   : > { %v1173_v31 = vpop.permute.xlu2 %1172  ;;  %1240 = vst.msk [vmem:[#allocation2 + $0x1d0] sm:$0xff] %vm799_vm6, %v1169_v10  ;;  %1730 = vmatmul.f32.gmra.mxu0 %v1486_v35  ;;  %v4184_v43 = vpop.f32.mrf.mxu3  ;;  %v1492_v38 = vld [vmem:[#allocation2 + $0x1e0] sm:$0xff] }
 0x275   : > { %v1823_v13 = vpop.f32.mrf.mxu1 }
 0x276   : > { %v1062_v2 = vpop.permute.xlu0 %1061  ;;  %v1824_v12 = vadd.f32 %v1823_v13, %v1710_v4  ;;  %v1521_v4 = vld [vmem:[#allocation2 + $0x2c8] sm:$0xff] }
 0x277   : > { %1128 = vst.msk [vmem:[#allocation2 + $0x2d8] sm:$0xff] %vm632_vm4, %v1062_v2  ;;  %v1487_v50 = vld [vmem:[#allocation2 + $0x1b8] sm:$0xff] }
 0x278   : > { %1843 = vmatmul.f32.gmra.mxu1 %v1487_v50  ;;  %v1937_v63 = vadd.f32 %v4040_v27, %v1824_v12  ;;  %v4189_v42 = vpop.f32.mrf.mxu2 }
 0x279   : > { %v1290_v27 = vpop.permute.xlu1 %1289 }
 0x27a   : > { %2010 = vst.msk [vmem:[%s3906_s15 + $0x58] sm:$0xff] %vm309_vm0, %v1937_v63  ;;  %v2052_v40 = vsel %vm309_vm0, %v1937_v63, 0.0  ;;  %v2111_v3 = vmul.f32 %v1937_v63, %v1937_v63 }
 0x27b   : > { %v2053_v34 = vadd.f32 %v2052_v40, %v2051_v30  ;;  %v1046_v57 = vpop.permute.xlu2 %1045  ;;  %1360 = vst.msk [vmem:[#allocation2 + $0x1d0] sm:$0xff] %vm934_vm11, %v1290_v27 }
 0x27c   : > { %v2153_v14 = vsel %vm309_vm0, %v2111_v3, 0.0  ;;  %1120 = vst.msk [vmem:[#allocation2 + $0x218] sm:$0xff] %vm632_vm4, %v1046_v57  ;;  %v1524_v57 = vld [vmem:[#allocation2 + $0x2e0] sm:$0xff] }
 0x27d   : > { %v2154_v59 = vadd.f32 %v2153_v14, %v2152_v53 }
 0x27e   : > { %v875_v36 = vpop.permute.xlu0 %874  ;;  %v1523_v52 = vld [vmem:[#allocation2 + $0x2d8] sm:$0xff] }
 0x27f   : > { %953 = vst.msk [vmem:[#allocation2 + $0x1c8] sm:$0xff] %vm934_vm11, %v875_v36  ;;  %1879 = vmatmul.f32.gmra.mxu3 %v1523_v52  ;;  %v1713_v61 = vpop.f32.mrf.mxu0 }
 0x280   : > { %v1975_v30 = vpop.f32.mrf.mxu2 }
 0x281   : > { %v1171_v10 = vpop.permute.xlu1 %1170 }
 0x282   : > { %v1490_v54 = vld [vmem:[#allocation2 + $0x1d0] sm:$0xff] }
 0x283   : > { %1846 = vmatmul.f32.gmra.mxu1 %v1490_v54  ;;  %v4194_v5 = vpop.f32.mrf.mxu3  ;;  %v1296_v46 = vpop.permute.xlu2 %1295 }
 0x285   : > { %v1826_v19 = vpop.f32.mrf.mxu1 }
 0x286   : > { %v1042_v18 = vpop.permute.xlu0 %1041  ;;  %v1489_v24 = vld [vmem:[#allocation2 + $0x1c8] sm:$0xff]  ;;  %v1827_v0 = vadd.f32 %v1826_v19, %v1713_v61  ;;  %v1527_v61 = vld [vmem:[#allocation2 + $0x2f8] sm:$0xff] }
 0x287   : > { %1118 = vst.msk [vmem:[#allocation2 + $0x1e8] sm:$0xff] %vm632_vm4, %v1042_v18  ;;  %1733 = vmatmul.f32.gmra.mxu0 %v1489_v24  ;;  %1882 = vmatmul.f32.gmra.mxu3 %v1526_v15 }
 0x288   : > { %1241 = vst.msk [vmem:[#allocation2 + $0x1e8] sm:$0xfe] %vm1220_vm10, %v1171_v10  ;;  %v1940_v8 = vadd.f32 %v4057_v6, %v1827_v0  ;;  %v1978_v19 = vpop.f32.mrf.mxu2 }
 0x289   : > { %v1044_v6 = vpop.permute.xlu1 %1043 }
 0x28a   : > { %2011 = vst.msk [vmem:[%s3906_s15 + $0x60] sm:$0xff] %vm309_vm0, %v1940_v8  ;;  %v2054_v32 = vsel %vm309_vm0, %v1940_v8, 0.0  ;;  %v2112_v39 = vmul.f32 %v1940_v8, %v1940_v8 }
 0x28b   : > { %v2055_v41 = vadd.f32 %v2054_v32, %v2053_v34  ;;  %1119 = vst.msk [vmem:[#allocation2 + $0x200] sm:$0x7f] %vm1098_vm8, %v1044_v6  ;;  %v883_v55 = vpop.permute.xlu2 %882 }
 0x28c   : > { %v2155_v44 = vsel %vm309_vm0, %v2112_v39, 0.0  ;;  %1242 = vst.msk [vmem:[#allocation2 + $0x200] sm:$0xff] %vm799_vm6, %v1173_v31 }
 0x28d   : > { %v2156_v51 = vadd.f32 %v2155_v44, %v2154_v59  ;;  %957 = vst.msk [vmem:[#allocation2 + $0x228] sm:$0xff] %vm934_vm11, %v883_v55 }
 0x28e   : > { %v1292_v20 = vpop.permute.xlu0 %1291 }
 0x28f   : > { %1361 = vst.msk [vmem:[#allocation2 + $0x1e8] sm:$0xff] %vm934_vm11, %v1292_v20  ;;  %1736 = vmatmul.f32.gmra.mxu0 %v1492_v38  ;;  %2352 = vmatmul.msk.f32.vlgmr.msra.gmra.mxu3 %vm309_vm0, %v1515_v47 }
 0x291   : > { %v1294_v13 = vpop.permute.xlu1 %1293 }
 0x292   : > { %1362 = vst.msk [vmem:[#allocation2 + $0x200] sm:$0xff] %vm934_vm11, %v1294_v13 }
 0x294   : > { %v1862_v23 = vpop.f32.mrf.mxu3  ;;  %v1501_v0 = vld [vmem:[#allocation2 + $0x228] sm:$0xff] }
 0x295   : > { %v1863_v33 = vadd.f32 %v1862_v23, %v4129_v22  ;;  %v1716_v22 = vpop.f32.mrf.mxu0 }
 0x296   : > { %v879_v53 = vpop.permute.xlu0 %878  ;;  %v1493_v49 = vld [vmem:[#allocation2 + $0x1e8] sm:$0xff] }
 0x297   : > { %v4203_v37 = vadd.f32 %v1975_v30, %v1863_v33  ;;  %955 = vst.msk [vmem:[#allocation2 + $0x1f8] sm:$0xff] %vm934_vm11, %v879_v53  ;;  %1849 = vmatmul.f32.gmra.mxu1 %v1493_v49  ;;  %2353 = vmatmul.msk.f32.gmra.mxu3 %vm309_vm0, %v1518_v58 }
 0x299   : > { %2023 = vst.msk [vmem:[%s3906_s15 + $0xc0] sm:$0xff] %vm309_vm0, %v4203_v37  ;;  %v881_v35 = vpop.permute.xlu1 %880  ;;  %v1496_v63 = vld [vmem:[#allocation2 + $0x200] sm:$0xff] }
 0x29a   : > { %956 = vst.msk [vmem:[#allocation2 + $0x210] sm:$0xfe] %vm932_vm9, %v881_v35 }
 0x29c   : > { %v1829_v31 = vpop.f32.mrf.mxu1 }
 0x29d   : > { %v1830_v2 = vadd.f32 %v1829_v31, %v1716_v22 }
 0x29e   : > { %v1175_v12 = vpop.permute.xlu0 %1174  ;;  %v1495_v62 = vld [vmem:[#allocation2 + $0x1f8] sm:$0xff] }
 0x29f   : > { %v1943_v50 = vadd.f32 %v4072_v11, %v1830_v2  ;;  %1243 = vst.msk [vmem:[#allocation2 + $0x218] sm:$0xfe] %vm1220_vm10, %v1175_v12  ;;  %1739 = vmatmul.f32.gmra.mxu0 %v1495_v62  ;;  %2354 = vmatmul.msk.f32.gmra.mxu3 %vm309_vm0, %v1521_v4 }
 0x2a0   : > { %1852 = vmatmul.f32.gmra.mxu1 %v1496_v63  ;;  %1363 = vst.msk [vmem:[#allocation2 + $0x218] sm:$0xff] %vm934_vm11, %v1296_v46 }
 0x2a1   : > { %2012 = vst.msk [vmem:[%s3906_s15 + $0x68] sm:$0xff] %vm309_vm0, %v1943_v50  ;;  %v2056_v40 = vsel %vm309_vm0, %v1943_v50, 0.0  ;;  %v2113_v3 = vmul.f32 %v1943_v50, %v1943_v50  ;;  %v1498_v36 = vld [vmem:[#allocation2 + $0x210] sm:$0xff]  ;;  %v1177_v52 = vpop.permute.xlu1 %1176 }
 0x2a2   : > { %v2057_v34 = vadd.f32 %v2056_v40, %v2055_v41 }
 0x2a3   : > { %v2157_v11 = vsel %vm309_vm0, %v2113_v3, 0.0 }
 0x2a4   : > { %v2158_v14 = vadd.f32 %v2157_v11, %v2156_v51  ;;  %v1981_v51 = vpop.f32.mrf.mxu2 }
 0x2a6   : > { %v1048_v59 = vpop.permute.xlu0 %1047 }
 0x2a7   : > { %1121 = vst.msk [vmem:[#allocation2 + $0x230] sm:$0x7f] %vm1098_vm8, %v1048_v59  ;;  %2355 = vmatmul.msk.f32.gmra.mxu3 %vm309_vm0, %v1524_v57  ;;  %1742 = vmatmul.f32.gmra.mxu0 %v1498_v36  ;;  %v1499_v27 = vld [vmem:[#allocation2 + $0x218] sm:$0xff]  ;;  %v1832_v10 = vpop.f32.mrf.mxu1 }
 0x2a8   : > { %1244 = vst.msk [vmem:[#allocation2 + $0x230] sm:$0xff] %vm799_vm6, %v1177_v52  ;;  %1855 = vmatmul.f32.gmra.mxu1 %v1499_v27 }
 0x2aa   : > { %v1865_v15 = vpop.f32.mrf.mxu3 }
 0x2ab   : > { %v1866_v18 = vadd.f32 %v1865_v15, %v4140_v7 }
 0x2ac   : > { %v1719_v24 = vpop.f32.mrf.mxu0 }
 0x2ad   : > { %v4224_v54 = vadd.f32 %v1978_v19, %v1866_v18  ;;  %v1833_v8 = vadd.f32 %v1832_v10, %v1719_v24 }
 0x2ae   : > { %v1298_v32 = vpop.permute.xlu0 %1297 }
 0x2af   : > { %2024 = vst.msk [vmem:[%s3906_s15 + $0xc8] sm:$0xff] %vm309_vm0, %v4224_v54  ;;  %2356 = vmatmul.msk.f32.gmra.mxu3 %vm309_vm0, %v1527_v61  ;;  %v1946_v39 = vadd.f32 %v4088_v60, %v1833_v8  ;;  %1745 = vmatmul.f32.gmra.mxu0 %v1501_v0 }
 0x2b0   : > { %1364 = vst.msk [vmem:[#allocation2 + $0x230] sm:$0xff] %vm934_vm11, %v1298_v32 }
 0x2b1   : > { %2013 = vst.msk [vmem:[%s3906_s15 + $0x70] sm:$0xff] %vm309_vm0, %v1946_v39  ;;  %v2058_v7 = vsel %vm309_vm0, %v1946_v39, 0.0  ;;  %v2114_v47 = vmul.f32 %v1946_v39, %v1946_v39 }
 0x2b2   : > { %v2059_v41 = vadd.f32 %v2058_v7, %v2057_v34 }
 0x2b3   : > { %v2159_v46 = vsel %vm309_vm0, %v2114_v47, 0.0 }
 0x2b4   : > { %v2160_v44 = vadd.f32 %v2159_v46, %v2158_v14 }
 0x2b7   : > { %v1502_v20 = vld [vmem:[#allocation2 + $0x230] sm:$0xff]  ;;  %v1722_v23 = vpop.f32.mrf.mxu0 }
 0x2b8   : > { %1858 = vmatmul.f32.gmra.mxu1 %v1502_v20 }
 0x2bb   : > { %v1868_v38 = vpop.f32.mrf.mxu3 }
 0x2bc   : > { %v1869_v60 = vadd.f32 %v1868_v38, %v4147_v29 }
 0x2bd   : > { %v1835_v6 = vpop.f32.mrf.mxu1 }
 0x2be   : > { %v4237_v30 = vadd.f32 %v1981_v51, %v1869_v60  ;;  %v1836_v58 = vadd.f32 %v1835_v6, %v1722_v23 }
 0x2bf   : > { %v1725_v22 = vpop.f32.mrf.mxu0 }
 0x2c0   : > { %2025 = vst.msk [vmem:[%s3906_s15 + $0xd0] sm:$0xff] %vm309_vm0, %v4237_v30  ;;  %v1949_v33 = vadd.f32 %v4098_v1, %v1836_v58 }
 0x2c2   : > { %2014 = vst.msk [vmem:[%s3906_s15 + $0x78] sm:$0xff] %vm309_vm0, %v1949_v33  ;;  %v2060_v55 = vsel %vm309_vm0, %v1949_v33, 0.0  ;;  %v2115_v53 = vmul.f32 %v1949_v33, %v1949_v33 }
 0x2c3   : > { %v2061_v49 = vadd.f32 %v2060_v55, %v2059_v41 }
 0x2c4   : > { %v2161_v13 = vsel %vm309_vm0, %v2115_v53, 0.0 }
 0x2c5   : > { %v2162_v29 = vadd.f32 %v2161_v13, %v2160_v44 }
 0x2cc   : > { %v1871_v11 = vpop.f32.mrf.mxu3 }
 0x2cd   : > { %v1872_v39 = vadd.f32 %v1871_v11, %v4155_v45 }
 0x2d4   : > { %v1838_v31 = vpop.f32.mrf.mxu1 }
 0x2d5   : > { %v1839_v4 = vadd.f32 %v1838_v31, %v1725_v22 }
 0x2d7   : > { %v1952_v2 = vadd.f32 %v4111_v48, %v1839_v4 }
 0x2d9   : > { %2015 = vst.msk [vmem:[%s3906_s15 + $0x80] sm:$0xff] %vm309_vm0, %v1952_v2  ;;  %v2062_v12 = vsel %vm309_vm0, %v1952_v2, 0.0  ;;  %v2116_v1 = vmul.f32 %v1952_v2, %v1952_v2 }
 0x2da   : > { %v2063_v62 = vadd.f32 %v2062_v12, %v2061_v49 }
 0x2db   : > { %v2163_v50 = vsel %vm309_vm0, %v2116_v1, 0.0 }
 0x2dc   : > { %v2164_v35 = vadd.f32 %v2163_v50, %v2162_v29 }
 0x2e0   : > { %v1841_v40 = vpop.f32.mrf.mxu1 }
 0x2e2   : > { %v1874_v52 = vpop.f32.mrf.mxu3 }
 0x2e4   : > { %v1728_v63 = vpop.f32.mrf.mxu0 }
 0x2e5   : > { %v1842_v3 = vadd.f32 %v1841_v40, %v1728_v63 }
 0x2e7   : > { %v1955_v34 = vadd.f32 %v4119_v16, %v1842_v3 }
 0x2e9   : > { %2016 = vst.msk [vmem:[%s3906_s15 + $0x88] sm:$0xff] %vm309_vm0, %v1955_v34  ;;  %v2064_v48 = vsel %vm309_vm0, %v1955_v34, 0.0  ;;  %v2117_v14 = vmul.f32 %v1955_v34, %v1955_v34 }
 0x2ea   : > { %v2065_v57 = vadd.f32 %v2064_v48, %v2063_v62 }
 0x2eb   : > { %v2165_v59 = vsel %vm309_vm0, %v2117_v14, 0.0 }
 0x2ec   : > { %v2166_v36 = vadd.f32 %v2165_v59, %v2164_v35 }
 0x2f0   : > { %v1731_v15 = vpop.f32.mrf.mxu0 }
 0x2f3   : > { %v1877_v24 = vpop.f32.mrf.mxu3 }
 0x2f4   : > { %v1878_v23 = vadd.f32 %v1877_v24, %v4176_v28 }
 0x2f5   : > { %v1844_v27 = vpop.f32.mrf.mxu1 }
 0x2f6   : > { %v1845_v19 = vadd.f32 %v1844_v27, %v1731_v15 }
 0x2f8   : > { %v1958_v18 = vadd.f32 %v4131_v26, %v1845_v19 }
 0x2fa   : > { %2017 = vst.msk [vmem:[%s3906_s15 + $0x90] sm:$0xff] %vm309_vm0, %v1958_v18  ;;  %v2066_v28 = vsel %vm309_vm0, %v1958_v18, 0.0 }
 0x300   : > { %v1847_v10 = vpop.f32.mrf.mxu1 }
 0x302   : > { %v1880_v16 = vpop.f32.mrf.mxu3 }
 0x303   : > { %v1881_v53 = vadd.f32 %v1880_v16, %v4184_v43  ;;  %v2067_v43 = vadd.f32 %v2066_v28, %v2065_v57 }
 0x304   : > { %v1734_v61 = vpop.f32.mrf.mxu0 }
 0x305   : > { %v1848_v0 = vadd.f32 %v1847_v10, %v1734_v61  ;;  %v2124_v61 = vmul.f32 %v4203_v37, %v4203_v37 }
 0x307   : > { %v1961_v8 = vadd.f32 %v4145_v21, %v1848_v0  ;;  %v1875_v21 = vadd.f32 %v1874_v52, %v4165_v17 }
 0x309   : > { %2018 = vst.msk [vmem:[%s3906_s15 + $0x98] sm:$0xff] %vm309_vm0, %v1961_v8  ;;  %v2119_v22 = vmul.f32 %v1961_v8, %v1961_v8  ;;  %v2068_v4 = vsel %vm309_vm0, %v1961_v8, 0.0 }
 0x30a   : > { %v1883_v32 = vpop.f32.mrf.mxu3  ;;  %v2069_v63 = vadd.f32 %v2068_v4, %v2067_v43 }
 0x30b   : > { %v2169_v12 = vsel %vm309_vm0, %v2119_v22, 0.0 }
 0x30c   : > { %v1737_v26 = vpop.f32.mrf.mxu0 }
 0x312   : > { %v1984_v7 = vpop.f32.mrf.mxu3 }
 0x313   : > { %v4264_v47 = vadd.f32 %v1984_v7, %v1872_v39  ;;  %v2078_v39 = vsel %vm309_vm0, %v4203_v37, 0.0  ;;  %v2125_v7 = vmul.f32 %v4224_v54, %v4224_v54  ;;  %v2082_v37 = vsel %vm309_vm0, %v4237_v30, 0.0 }
 0x314   : > { %v1850_v41 = vpop.f32.mrf.mxu1 }
 0x315   : > { %2026 = vst.msk [vmem:[%s3906_s15 + $0xd8] sm:$0xff] %vm309_vm0, %v4264_v47  ;;  %v1851_v46 = vadd.f32 %v1850_v41, %v1737_v26 }
 0x317   : > { %v1964_v44 = vadd.f32 %v4153_v9, %v1851_v46  ;;  %v2179_v46 = vsel %vm309_vm0, %v2124_v61, 0.0 }
 0x319   : > { %2019 = vst.msk [vmem:[%s3906_s15 + $0xa0] sm:$0xff] %vm309_vm0, %v1964_v44  ;;  %v2120_v2 = vmul.f32 %v1964_v44, %v1964_v44  ;;  %v2070_v1 = vsel %vm309_vm0, %v1964_v44, 0.0  ;;  %v2080_v44 = vsel %vm309_vm0, %v4224_v54, 0.0  ;;  %v2084_v54 = vsel %vm309_vm0, %v4264_v47, 0.0 }
 0x31a   : > { %v1987_v20 = vpop.f32.mrf.mxu3  ;;  %v2071_v57 = vadd.f32 %v2070_v1, %v2069_v63 }
 0x31b   : > { %v4273_v38 = vadd.f32 %v1987_v20, %v1875_v21  ;;  %v2171_v34 = vsel %vm309_vm0, %v2120_v2, 0.0  ;;  %v2126_v21 = vmul.f32 %v4237_v30, %v4237_v30 }
 0x31c   : > { %v1740_v45 = vpop.f32.mrf.mxu0 }
 0x31d   : > { %2027 = vst.msk [vmem:[%s3906_s15 + $0xe0] sm:$0xff] %vm309_vm0, %v4273_v38  ;;  %v1853_v51 = vpop.f32.mrf.mxu1  ;;  %v2086_v30 = vsel %vm309_vm0, %v4273_v38, 0.0 }
 0x31e   : > { %v1854_v60 = vadd.f32 %v1853_v51, %v1740_v45  ;;  %v2181_v51 = vsel %vm309_vm0, %v2125_v7, 0.0 }
 0x320   : > { %v1967_v6 = vadd.f32 %v4167_v25, %v1854_v60  ;;  %v2118_v25 = vmul.f32 %v1958_v18, %v1958_v18  ;;  %v2127_v60 = vmul.f32 %v4264_v47, %v4264_v47 }
 0x322   : > { %2020 = vst.msk [vmem:[%s3906_s15 + $0xa8] sm:$0xff] %vm309_vm0, %v1967_v6  ;;  %v1990_v9 = vpop.f32.mrf.mxu3  ;;  %v2167_v31 = vsel %vm309_vm0, %v2118_v25, 0.0  ;;  %v2121_v62 = vmul.f32 %v1967_v6, %v1967_v6  ;;  %v2072_v11 = vsel %vm309_vm0, %v1967_v6, 0.0 }
 0x323   : > { %v4282_v17 = vadd.f32 %v1990_v9, %v1878_v23  ;;  %v2168_v35 = vadd.f32 %v2167_v31, %v2166_v36  ;;  %v2073_v15 = vadd.f32 %v2072_v11, %v2071_v57  ;;  %v2183_v9 = vsel %vm309_vm0, %v2126_v21, 0.0 }
 0x324   : > { %v1743_v58 = vpop.f32.mrf.mxu0  ;;  %v2173_v59 = vsel %vm309_vm0, %v2121_v62, 0.0 }
 0x325   : > { %2028 = vst.msk [vmem:[%s3906_s15 + $0xe8] sm:$0xff] %vm309_vm0, %v4282_v17  ;;  %v1856_v33 = vpop.f32.mrf.mxu1  ;;  %v2170_v14 = vadd.f32 %v2169_v12, %v2168_v35  ;;  %v2088_v47 = vsel %vm309_vm0, %v4282_v17, 0.0 }
 0x326   : > { %v1857_v55 = vadd.f32 %v1856_v33, %v1743_v58  ;;  %v2128_v58 = vmul.f32 %v4273_v38, %v4273_v38 }
 0x327   : > { %v2172_v36 = vadd.f32 %v2171_v34, %v2170_v14 }
 0x328   : > { %v1970_v49 = vadd.f32 %v4182_v56, %v1857_v55  ;;  %v1884_v56 = vadd.f32 %v1883_v32, %v4194_v5  ;;  %v2187_v28 = vsel %vm309_vm0, %v2128_v58, 0.0 }
 0x329   : > { %v2174_v24 = vadd.f32 %v2173_v59, %v2172_v36 }
 0x32a   : > { %v1993_v13 = vpop.f32.mrf.mxu3  ;;  %2021 = vst.msk [vmem:[%s3906_s15 + $0xb0] sm:$0xff] %vm309_vm0, %v1970_v49  ;;  %v2122_v48 = vmul.f32 %v1970_v49, %v1970_v49  ;;  %v2074_v52 = vsel %vm309_vm0, %v1970_v49, 0.0  ;;  %v2129_v49 = vmul.f32 %v4282_v17, %v4282_v17 }
 0x32b   : > { %v4289_v29 = vadd.f32 %v1993_v13, %v1881_v53  ;;  %v2075_v16 = vadd.f32 %v2074_v52, %v2073_v15  ;;  %v2185_v53 = vsel %vm309_vm0, %v2127_v60, 0.0 }
 0x32c   : > { %v1746_v3 = vpop.f32.mrf.mxu0  ;;  %v2175_v19 = vsel %vm309_vm0, %v2122_v48, 0.0  ;;  %v2189_v2 = vsel %vm309_vm0, %v2129_v49, 0.0 }
 0x32d   : > { %2029 = vst.msk [vmem:[%s3906_s15 + $0xf0] sm:$0xff] %vm309_vm0, %v4289_v29  ;;  %v2176_v8 = vadd.f32 %v2175_v19, %v2174_v24  ;;  %v2130_v22 = vmul.f32 %v4289_v29, %v4289_v29  ;;  %v2090_v38 = vsel %vm309_vm0, %v4289_v29, 0.0 }
 0x32f   : > { %v2191_v1 = vsel %vm309_vm0, %v2130_v22, 0.0 }
 0x332   : > { %v1996_v50 = vpop.f32.mrf.mxu3 }
 0x333   : > { %v1997_v40 = vadd.f32 %v1996_v50, %v1884_v56 }
 0x335   : > { %2030 = vst.msk [vmem:[%s3906_s15 + $0xf8] sm:$0xff] %vm309_vm0, %v1997_v40  ;;  %v1859_v5 = vpop.f32.mrf.mxu1  ;;  %v2131_v43 = vmul.f32 %v1997_v40, %v1997_v40  ;;  %v2092_v62 = vsel %vm309_vm0, %v1997_v40, 0.0 }
 0x336   : > { %v1860_v27 = vadd.f32 %v1859_v5, %v1746_v3 }
 0x337   : > { %v2193_v35 = vsel %vm309_vm0, %v2131_v43, 0.0 }
 0x338   : > { %v1973_v18 = vadd.f32 %v4189_v42, %v1860_v27 }
 0x33a   : > { %2022 = vst.msk [vmem:[%s3906_s15 + $0xb8] sm:$0xff] %vm309_vm0, %v1973_v18  ;;  %v2076_v10 = vsel %vm309_vm0, %v1973_v18, 0.0  ;;  %v2123_v0 = vmul.f32 %v1973_v18, %v1973_v18 }
 0x33b   : > { %v2077_v32 = vadd.f32 %v2076_v10, %v2075_v16 }
 0x33c   : > { %v2177_v42 = vsel %vm309_vm0, %v2123_v0, 0.0 }
 0x33d   : > { %v2079_v26 = vadd.f32 %v2078_v39, %v2077_v32  ;;  %v2178_v41 = vadd.f32 %v2177_v42, %v2176_v8 }
 0x33f   : > { %v2081_v20 = vadd.f32 %v2080_v44, %v2079_v26  ;;  %v2180_v45 = vadd.f32 %v2179_v46, %v2178_v41 }
 0x341   : > { %v2083_v6 = vadd.f32 %v2082_v37, %v2081_v20  ;;  %v2182_v23 = vadd.f32 %v2181_v51, %v2180_v45 }
 0x343   : > { %v2085_v33 = vadd.f32 %v2084_v54, %v2083_v6  ;;  %v2184_v55 = vadd.f32 %v2183_v9, %v2182_v23 }
 0x345   : > { %v2087_v13 = vadd.f32 %v2086_v30, %v2085_v33  ;;  %v2186_v25 = vadd.f32 %v2185_v53, %v2184_v55 }
 0x347   : > { %v2089_v31 = vadd.f32 %v2088_v47, %v2087_v13  ;;  %v2188_v4 = vadd.f32 %v2187_v28, %v2186_v25 }
 0x349   : > { %v2091_v56 = vadd.f32 %v2090_v38, %v2089_v31  ;;  %v2190_v12 = vadd.f32 %v2189_v2, %v2188_v4 }
 0x34b   : > { %v2093_v50 = vadd.f32 %v2092_v62, %v2091_v56  ;;  %v2192_v17 = vadd.f32 %v2191_v1, %v2190_v12 }
 0x34d   : > { %v2094_v63 = vrot.slane %v2093_v50, 4  ;;  %v2194_v3 = vadd.f32 %v2193_v35, %v2192_v17 }
 0x34f   : > { %v2095_v34 = vadd.f32 %v2094_v63, %v2093_v50  ;;  %v2195_v11 = vrot.slane %v2194_v3, 4 }
 0x351   : > { %v2096_v48 = vrot.slane %v2095_v34, 2  ;;  %v2196_v14 = vadd.f32 %v2195_v11, %v2194_v3 }
 0x353   : > { %v2097_v57 = vadd.f32 %v2096_v48, %v2095_v34  ;;  %v2197_v29 = vrot.slane %v2196_v14, 2 }
 0x355   : > { %v2098_v5 = vrot.slane %v2097_v57, 1  ;;  %v2198_v59 = vadd.f32 %v2197_v29, %v2196_v14 }
 0x357   : > { %v2199_v52 = vrot.slane %v2198_v59, 1  ;;  %v2099_v40 = vadd.f32 %v2098_v5, %v2097_v57 }
 0x359   : > { %v2200_v27 = vadd.f32 %v2199_v52, %v2198_v59 }
 0x35b   : > { %v2201_v36 = vsel %vm434_vm5, %v2099_v40, %v2200_v27 }
 0x35c   : > { %2203 = vst.msk [vmem:[%s274_s22] sm:$0x3] %vm2202_vm12, %v2201_v36 }
 0x35d PF: > { %p17_p4 = scmp.ge.s32.totalorder %s2633_s28, 4   ;;  %s4501_s18 = smov %s2543_s19 }
 0x35e   : > { %s4502_s19 = smov %s2547_s1  ;;  %s4503_s1 = smov %s2646_s8 }
 0x35f   : > { %s4504_s20 = smov %s2633_s28  ;;  %19 = sbr.rel (!%p17_p4) target bundleno = 4 (0x4), region = 93 }
 0x364   :  { %2239 = vsyncpa [#allocation4], 1 }
 0x365   :  { %2241 = vsyncpa [#allocation4 + $0x1], 1 }
 0x366   :  { %2242 = vsyncpa [#allocation6], 1 }

</bundles_post_ra>
